<compile_context>
chip_gen: v7x
topology: tpu7x:2x2x1
jax: 0.10.0
libtpu: 0.0.40
codegen_flags: <defaults>
</compile_context>

<pallas_src>
import functools

import numpy as np

import jax
import jax.numpy as jnp
from jax.experimental import pallas as pl
from jax.experimental.pallas import tpu as pltpu


NB = 8          # batch rows per block (sublane granule)
N_HEADS = 3


def _round_up(v, m):
    return ((v + m - 1) // m) * m


# ---------------------------------------------------------------------------
# Fused kernel: 3x3 conv (9 shifted matmuls) + ReLU + masked global-avg-pool (MXU)
# + 3 fused MLP heads + per-head L2 normalize.
# ---------------------------------------------------------------------------

def _fused_kernel(x_ref, sel_ref, cw_ref, cb_ref, w1_ref, b1_ref, w2_ref, b2_ref,
                  out_ref, pool_acc, *, n_heads):
    """Grid = (batch_blocks [parallel], spatial_row_blocks [arbitrary]).

    x_ref:   (1, NB, tile_h+2, W+2, C)            bf16  overlapping row window (halo)
    sel_ref: (1, 1, NB, rows)                     f32   pool selection = mask * 1/(H*W)
    cw_ref:  (9, C, CF_pad)                       bf16  conv weight, tap-major (kh,kw)
    cb_ref:  (1, CF_pad)                          f32
    w1_ref:  (CF_pad, n_heads*HID_pad)            bf16  heads' first GEMM, stacked
    b1_ref:  (1, n_heads*HID_pad)                 f32
    w2_ref:  (n_heads*HID_pad, n_heads*PROJ_pad)  bf16  block-diagonal second GEMM
    b2_ref:  (1, n_heads*PROJ_pad)                f32
    out_ref: (NB, n_heads*PROJ_pad)               f32
    pool_acc:(NB, CF_pad)                         f32   scratch (pooled feature acc)
    """
    s = pl.program_id(1)

    @pl.when(s == 0)
    def _():
        pool_acc[...] = jnp.zeros_like(pool_acc)

    # ---- 3x3 conv on this row window: 9 shifted matmuls, f32 accumulation ----
    slab = x_ref[0].astype(jnp.float32)               # (NB, tile_h+2, W+2, C)
    nb, thp2, wp2, c = slab.shape
    th, wo = thp2 - 2, wp2 - 2
    rows = nb * th * wo

    y = None
    for kh in range(3):
        for kw in range(3):
            piece = slab[:, kh:kh + th, kw:kw + wo, :]           # shifted tap window
            piece = piece.reshape(rows, c).astype(jnp.bfloat16)
            d = jnp.dot(piece, cw_ref[kh * 3 + kw],
                        preferred_element_type=jnp.float32)
            y = d if y is None else y + d
    y = jnp.maximum(y + cb_ref[...], 0.0)             # (rows, CF_pad) f32
    # TODO(synk): chunk this f32 epilogue over sub-slices of tile_h (fori_loop) to keep
    # live f32 temporaries within ~32 vregs at very large tiles; bounded here by tile_h.

    # ---- masked global-average-pool on the MXU (sel carries mask and 1/(H*W)) ----
    pool_acc[...] += jnp.dot(sel_ref[0, 0], y, preferred_element_type=jnp.float32)

    # ---- last spatial block: 3 projection heads (fused GEMMs) + L2 normalize ----
    @pl.when(s == pl.num_programs(1) - 1)
    def _():
        feats = pool_acc[...].astype(jnp.bfloat16)                       # (NB, CF_pad)
        h_all = jnp.dot(feats, w1_ref[...], preferred_element_type=jnp.float32)
        h_all = jnp.maximum(h_all + b1_ref[...], 0.0)
        p_all = jnp.dot(h_all.astype(jnp.bfloat16), w2_ref[...],
                        preferred_element_type=jnp.float32) + b2_ref[...]
        proj_pad = p_all.shape[1] // n_heads
        for k in range(n_heads):                                         # static loop
            pk = p_all[:, k * proj_pad:(k + 1) * proj_pad]
            ssq = jnp.sum(pk * pk, axis=1, keepdims=True)
            # F.normalize(p=2, dim=1): p / max(||p||, 1e-12)
            out_ref[:, k * proj_pad:(k + 1) * proj_pad] = (
                pk * jax.lax.rsqrt(jnp.maximum(ssq, 1e-24)))


# ---------------------------------------------------------------------------
# Wrapper
# ---------------------------------------------------------------------------

def three_mlp_forward(x, params, *, n_heads=N_HEADS):
    """x: (N, C_in, H, W) float32 (NCHW). Returns tuple of 3 arrays (N, 1, PROJ)."""
    n, c_in, h, w = x.shape

    conv_w, conv_b = params["conv_w"], params["conv_b"]    # (CF, C, 3, 3), (CF,)
    w1, b1 = params["w1"], params["b1"]                    # (3, CF, HID), (3, HID)
    w2, b2 = params["w2"], params["b2"]                    # (3, HID, PROJ), (3, PROJ)
    c_feat, hid, proj = conv_w.shape[0], w1.shape[-1], w2.shape[-1]

    cf_pad = _round_up(c_feat, 128)
    hid_pad = _round_up(hid, 128)
    proj_pad = _round_up(proj, 128)

    # ---- tiling: bounded spatial blocks (pipelined reduction axis) ----
    n_bblk = pl.cdiv(n, NB)
    n_pad = n_bblk * NB
    tile_h = max(1, min(h, 512 // max(w, 1)))        # ~512 output positions per step
    if h >= 2:
        tile_h = min(tile_h, pl.cdiv(h, 2))          # >=2 spatial steps -> pipelining
    n_sblk = pl.cdiv(h, tile_h)
    rows = NB * tile_h * w

    # ---- overlapping row windows of the zero-padded NHWC input (conv halo) ----
    # ~(tile_h+2)/tile_h x the raw input bytes; replaces the 9x im2col tensor in HBM.
    x_nhwc = jnp.transpose(x, (0, 2, 3, 1))
    hp = n_sblk * tile_h + 2
    xp = jnp.pad(x_nhwc, ((0, n_pad - n), (1, hp - h - 1), (1, 1), (0, 0)))
    x_win = jnp.stack([xp[:, i * tile_h:i * tile_h + tile_h + 2]
                       for i in range(n_sblk)], axis=0).astype(jnp.bfloat16)
    # x_win: (n_sblk, n_pad, tile_h+2, W+2, C)

    # ---- pool selection matrix (static): row mask * 1/(H*W); zero for padded spatial
    #      rows and padded batch rows, so relu(conv_b) never leaks into the pool ----
    inv_p = 1.0 / float(h * w)
    sel_np = np.zeros((n_bblk, n_sblk, NB, rows), np.float32)
    for b in range(n_bblk):
        for s in range(n_sblk):
            h_rem = min(tile_h, h - s * tile_h)
            for m in range(NB):
                if b * NB + m >= n:
                    continue
                base = m * tile_h * w
                sel_np[b, s, m, base:base + h_rem * w] = inv_p
    sel_all = jnp.asarray(sel_np)

    # ---- pack / pad weights: bf16 matmul operands, f32 biases ----
    cw = jnp.transpose(conv_w, (2, 3, 1, 0)).reshape(9, c_in, c_feat)    # tap-major
    cw = jnp.pad(cw, ((0, 0), (0, 0), (0, cf_pad - c_feat))).astype(jnp.bfloat16)
    cb = jnp.pad(conv_b.reshape(1, -1),
                 ((0, 0), (0, cf_pad - c_feat))).astype(jnp.float32)

    w1p = jnp.pad(w1, ((0, 0), (0, cf_pad - c_feat), (0, hid_pad - hid)))
    w1_cat = jnp.concatenate([w1p[k] for k in range(n_heads)],
                             axis=1).astype(jnp.bfloat16)                # (CFp, 3*HIDp)
    b1_cat = jnp.pad(b1, ((0, 0), (0, hid_pad - hid))).reshape(
        1, n_heads * hid_pad).astype(jnp.float32)

    w2p = jnp.pad(w2, ((0, 0), (0, hid_pad - hid), (0, proj_pad - proj)))
    w2_bd = jnp.zeros((n_heads * hid_pad, n_heads * proj_pad), jnp.float32)
    for k in range(n_heads):                                             # block-diagonal
        w2_bd = w2_bd.at[k * hid_pad:(k + 1) * hid_pad,
                         k * proj_pad:(k + 1) * proj_pad].set(w2p[k])
    w2_bd = w2_bd.astype(jnp.bfloat16)
    b2_cat = jnp.pad(b2, ((0, 0), (0, proj_pad - proj))).reshape(
        1, n_heads * proj_pad).astype(jnp.float32)

    # ---- VMEM budget sized off the actual chip (v5e/v6e 128 MiB, v7x 64 MiB) ----
    try:
        vmem_cap = int(pltpu.get_tpu_info().vmem_capacity_bytes)
    except Exception:
        vmem_cap = 64 * 1024 * 1024
    vmem_limit = int(min(max(vmem_cap // 2, 32 * 1024 * 1024), 100 * 1024 * 1024))
    # TODO(synk): mark the constant-index weight inputs pl.Buffered(1) to reclaim a bit
    # more VMEM headroom on v7x once tiles grow (trivial at these weight sizes).

    kernel = functools.partial(_fused_kernel, n_heads=n_heads)

    conv_flops = 2 * n_bblk * n_sblk * rows * (9 * c_in) * cf_pad
    pool_flops = 2 * n_bblk * n_sblk * NB * rows * cf_pad
    head_flops = n_bblk * (2 * NB * cf_pad * n_heads * hid_pad
                           + 2 * NB * n_heads * hid_pad * n_heads * proj_pad)
    bytes_accessed = (x_win.size * 2 + sel_all.size * 4 + cw.size * 2 + cb.size * 4
                      + w1_cat.size * 2 + b1_cat.size * 4 + w2_bd.size * 2
                      + b2_cat.size * 4 + n_pad * n_heads * proj_pad * 4)

    out = pl.pallas_call(
        kernel,
        out_shape=jax.ShapeDtypeStruct((n_pad, n_heads * proj_pad), jnp.float32),
        grid=(n_bblk, n_sblk),
        in_specs=[
            pl.BlockSpec((1, NB, tile_h + 2, w + 2, c_in),
                         lambda b, s: (s, b, 0, 0, 0)),
            pl.BlockSpec((1, 1, NB, rows), lambda b, s: (b, s, 0, 0)),
            pl.BlockSpec((9, c_in, cf_pad), lambda b, s: (0, 0, 0)),
            pl.BlockSpec((1, cf_pad), lambda b, s: (0, 0)),
            pl.BlockSpec((cf_pad, n_heads * hid_pad), lambda b, s: (0, 0)),
            pl.BlockSpec((1, n_heads * hid_pad), lambda b, s: (0, 0)),
            pl.BlockSpec((n_heads * hid_pad, n_heads * proj_pad), lambda b, s: (0, 0)),
            pl.BlockSpec((1, n_heads * proj_pad), lambda b, s: (0, 0)),
        ],
        out_specs=pl.BlockSpec((NB, n_heads * proj_pad), lambda b, s: (b, 0)),
        scratch_shapes=[pltpu.VMEM((NB, cf_pad), jnp.float32)],
        compiler_params=pltpu.CompilerParams(
            dimension_semantics=("parallel", "arbitrary"),
            vmem_limit_bytes=vmem_limit,
        ),
        cost_estimate=pl.CostEstimate(
            flops=conv_flops + pool_flops + head_flops,
            transcendentals=n_heads * n_pad,
            bytes_accessed=bytes_accessed),
    )(x_win, sel_all, cw, cb, w1_cat, b1_cat, w2_bd, b2_cat)

    # slice the packed lane-dense output back into 3 heads + unsqueeze(1)
    return tuple(out[:n, k * proj_pad:k * proj_pad + proj][:, None, :]
                 for k in range(n_heads))


# ---------------------------------------------------------------------------
# Params + pure-JAX reference
# ---------------------------------------------------------------------------

def init_params(key, c_in, c_feat, hid, proj, n_heads=N_HEADS):
    ks = jax.random.split(key, 6)
    return {
        "conv_w": jax.random.normal(ks[0], (c_feat, c_in, 3, 3), jnp.float32) * 0.1,
        "conv_b": jax.random.normal(ks[1], (c_feat,), jnp.float32) * 0.01,
        "w1": jax.random.normal(ks[2], (n_heads, c_feat, hid), jnp.float32) * 0.1,
        "b1": jax.random.normal(ks[3], (n_heads, hid), jnp.float32) * 0.01,
        "w2": jax.random.normal(ks[4], (n_heads, hid, proj), jnp.float32) * 0.1,
        "b2": jax.random.normal(ks[5], (n_heads, proj), jnp.float32) * 0.01,
    }


def reference_forward(x, params, n_heads=N_HEADS):
    """Pure-JAX f32 reference with identical semantics (torch Conv2d cross-correlation)."""
    y = jax.lax.conv_general_dilated(
        x, params["conv_w"], window_strides=(1, 1), padding=((1, 1), (1, 1)),
        dimension_numbers=("NCHW", "OIHW", "NCHW"))
    y = jnp.maximum(y + params["conv_b"][None, :, None, None], 0.0)
    feats = jnp.mean(y, axis=(2, 3))
    outs = []
    for k in range(n_heads):
        hh = jnp.maximum(feats @ params["w1"][k] + params["b1"][k][None, :], 0.0)
        pp = hh @ params["w2"][k] + params["b2"][k][None, :]
        nrm = jnp.maximum(jnp.linalg.norm(pp, axis=1, keepdims=True), 1e-12)
        outs.append((pp / nrm)[:, None, :])
    return tuple(outs)


if __name__ == "__main__":
    # small shapes consistent with an NCHW CNN backbone + MLP heads
    N, C_IN, H, W = 2, 4, 16, 16
    C_FEAT, HID, PROJ = 32, 32, 32

    key = jax.random.PRNGKey(0)
    kx, kp = jax.random.split(key)
    x = jax.random.normal(kx, (N, C_IN, H, W), jnp.float32)
    params = init_params(kp, C_IN, C_FEAT, HID, PROJ)

    fwd = jax.jit(functools.partial(three_mlp_forward, params=params))
    out1, out2, out3 = fwd(x)
    jax.block_until_ready((out1, out2, out3))

    assert out1.shape == (N, 1, PROJ)
    assert out2.shape == (N, 1, PROJ)
    assert out3.shape == (N, 1, PROJ)

    # each projection is L2-normalized along the feature dim
    for o in (out1, out2, out3):
        assert jnp.allclose(jnp.linalg.norm(o[:, 0, :], axis=1), 1.0, atol=1e-3)

    # matches the pure-f32 reference within bf16-matmul tolerance
    r1, r2, r3 = reference_forward(x, params)
    for o, r in ((out1, r1), (out2, r2), (out3, r3)):
        err = float(jnp.max(jnp.abs(o - r)))
        assert err < 5e-2, err

    print("KERNEL_OK")
</pallas_src>

<mosaic_0001>
module attributes {stable_mosaic.version = 11 : i64} {
  func.func @_fused_kernel(%arg0: i32, %arg1: i32, %arg2: memref<1x8x10x18x4xbf16, #tpu.memory_space<vmem>>, %arg3: memref<1x1x8x1024xf32, #tpu.memory_space<vmem>>, %arg4: memref<9x4x128xbf16, #tpu.memory_space<vmem>>, %arg5: memref<1x128xf32, #tpu.memory_space<vmem>>, %arg6: memref<128x384xbf16, #tpu.memory_space<vmem>>, %arg7: memref<1x384xf32, #tpu.memory_space<vmem>>, %arg8: memref<384x384xbf16, #tpu.memory_space<vmem>>, %arg9: memref<1x384xf32, #tpu.memory_space<vmem>>, %arg10: memref<8x384xf32, #tpu.memory_space<vmem>>, %arg11: memref<8x128xf32, #tpu.memory_space<vmem>>) attributes {dimension_semantics = [#tpu.dimension_semantics<parallel>, #tpu.dimension_semantics<arbitrary>], iteration_bounds = array<i64: 1, 2>, scalar_prefetch = 0 : i64, scratch_operands = 1 : i64, tpu.core_type = #tpu.core_type<tc>, window_params = [{transform_indices = @transform_0, window_bounds = array<i64: 1, 8, 10, 18, 4>}, {transform_indices = @transform_1, window_bounds = array<i64: 1, 1, 8, 1024>}, {pipeline_mode = #tpu.pipeline_mode<synchronous>, transform_indices = @transform_2, window_bounds = array<i64: 9, 4, 128>}, {pipeline_mode = #tpu.pipeline_mode<synchronous>, transform_indices = @transform_3, window_bounds = array<i64: 1, 128>}, {pipeline_mode = #tpu.pipeline_mode<synchronous>, transform_indices = @transform_4, window_bounds = array<i64: 128, 384>}, {pipeline_mode = #tpu.pipeline_mode<synchronous>, transform_indices = @transform_5, window_bounds = array<i64: 1, 384>}, {pipeline_mode = #tpu.pipeline_mode<synchronous>, transform_indices = @transform_6, window_bounds = array<i64: 384, 384>}, {pipeline_mode = #tpu.pipeline_mode<synchronous>, transform_indices = @transform_7, window_bounds = array<i64: 1, 384>}, {transform_indices = @transform_8, window_bounds = array<i64: 8, 384>}]} {
    %c0_i32 = arith.constant 0 : i32
    %0 = arith.cmpi eq, %arg1, %c0_i32 : i32
    %1 = arith.extui %0 : i1 to i32
    %c0_i32_0 = arith.constant 0 : i32
    %2 = arith.cmpi ne, %1, %c0_i32_0 : i32
    scf.if %2 {
      %cst_45 = arith.constant 0.000000e+00 : f32
      %82 = vector.broadcast %cst_45 : f32 to vector<8x128xf32>
      %c0_46 = arith.constant 0 : index
      %c0_47 = arith.constant 0 : index
      %83 = vector.load %arg11[%c0_46, %c0_47] : memref<8x128xf32, #tpu.memory_space<vmem>>, vector<8x128xf32>
      tpu.vector_store %arg11[%c0_46, %c0_47], %82 {strides = array<i32>} : memref<8x128xf32, #tpu.memory_space<vmem>>, vector<8x128xf32>,
    } else {
    }
    %c0 = arith.constant 0 : index
    %c0_1 = arith.constant 0 : index
    %c0_2 = arith.constant 0 : index
    %c0_3 = arith.constant 0 : index
    %c0_4 = arith.constant 0 : index
    %3 = vector.load %arg2[%c0, %c0_1, %c0_2, %c0_3, %c0_4] : memref<1x8x10x18x4xbf16, #tpu.memory_space<vmem>>, vector<1x8x10x18x4xbf16>
    %4 = vector.shape_cast %3 : vector<1x8x10x18x4xbf16> to vector<8x10x18x4xbf16>
    %5 = arith.extf %4 : vector<8x10x18x4xbf16> to vector<8x10x18x4xf32>
    %6 = vector.extract_strided_slice %5 {offsets = [0, 0, 0, 0], sizes = [8, 8, 16, 4], strides = [1, 1, 1, 1]} : vector<8x10x18x4xf32> to vector<8x8x16x4xf32>
    %7 = vector.shape_cast %6 : vector<8x8x16x4xf32> to vector<1024x4xf32>
    %8 = arith.truncf %7 : vector<1024x4xf32> to vector<1024x4xbf16>
    %c0_5 = arith.constant 0 : index
    %c0_6 = arith.constant 0 : index
    %c0_7 = arith.constant 0 : index
    %9 = vector.load %arg4[%c0_5, %c0_6, %c0_7] : memref<9x4x128xbf16, #tpu.memory_space<vmem>>, vector<1x4x128xbf16>
    %10 = vector.shape_cast %9 : vector<1x4x128xbf16> to vector<4x128xbf16>
    %cst = arith.constant dense<0.000000e+00> : vector<1024x128xf32>
    %11 = tpu.matmul %8, %10, %cst {dimension_numbers = #tpu.dot_dimension_numbers<[1], [0], [0], [1], [0, 0, 1, 1], [], []>} : vector<1024x4xbf16>, vector<4x128xbf16>, vector<1024x128xf32> -> vector<1024x128xf32>
    %12 = vector.extract_strided_slice %5 {offsets = [0, 0, 1, 0], sizes = [8, 8, 16, 4], strides = [1, 1, 1, 1]} : vector<8x10x18x4xf32> to vector<8x8x16x4xf32>
    %13 = vector.shape_cast %12 : vector<8x8x16x4xf32> to vector<1024x4xf32>
    %14 = arith.truncf %13 : vector<1024x4xf32> to vector<1024x4xbf16>
    %c1 = arith.constant 1 : index
    %c0_8 = arith.constant 0 : index
    %c0_9 = arith.constant 0 : index
    %15 = vector.load %arg4[%c1, %c0_8, %c0_9] : memref<9x4x128xbf16, #tpu.memory_space<vmem>>, vector<1x4x128xbf16>
    %16 = vector.shape_cast %15 : vector<1x4x128xbf16> to vector<4x128xbf16>
    %cst_10 = arith.constant dense<0.000000e+00> : vector<1024x128xf32>
    %17 = tpu.matmul %14, %16, %cst_10 {dimension_numbers = #tpu.dot_dimension_numbers<[1], [0], [0], [1], [0, 0, 1, 1], [], []>} : vector<1024x4xbf16>, vector<4x128xbf16>, vector<1024x128xf32> -> vector<1024x128xf32>
    %18 = arith.addf %11, %17 : vector<1024x128xf32>
    %19 = vector.extract_strided_slice %5 {offsets = [0, 0, 2, 0], sizes = [8, 8, 16, 4], strides = [1, 1, 1, 1]} : vector<8x10x18x4xf32> to vector<8x8x16x4xf32>
    %20 = vector.shape_cast %19 : vector<8x8x16x4xf32> to vector<1024x4xf32>
    %21 = arith.truncf %20 : vector<1024x4xf32> to vector<1024x4xbf16>
    %c2 = arith.constant 2 : index
    %c0_11 = arith.constant 0 : index
    %c0_12 = arith.constant 0 : index
    %22 = vector.load %arg4[%c2, %c0_11, %c0_12] : memref<9x4x128xbf16, #tpu.memory_space<vmem>>, vector<1x4x128xbf16>
    %23 = vector.shape_cast %22 : vector<1x4x128xbf16> to vector<4x128xbf16>
    %cst_13 = arith.constant dense<0.000000e+00> : vector<1024x128xf32>
    %24 = tpu.matmul %21, %23, %cst_13 {dimension_numbers = #tpu.dot_dimension_numbers<[1], [0], [0], [1], [0, 0, 1, 1], [], []>} : vector<1024x4xbf16>, vector<4x128xbf16>, vector<1024x128xf32> -> vector<1024x128xf32>
    %25 = arith.addf %18, %24 : vector<1024x128xf32>
    %26 = vector.extract_strided_slice %5 {offsets = [0, 1, 0, 0], sizes = [8, 8, 16, 4], strides = [1, 1, 1, 1]} : vector<8x10x18x4xf32> to vector<8x8x16x4xf32>
    %27 = vector.shape_cast %26 : vector<8x8x16x4xf32> to vector<1024x4xf32>
    %28 = arith.truncf %27 : vector<1024x4xf32> to vector<1024x4xbf16>
    %c3 = arith.constant 3 : index
    %c0_14 = arith.constant 0 : index
    %c0_15 = arith.constant 0 : index
    %29 = vector.load %arg4[%c3, %c0_14, %c0_15] : memref<9x4x128xbf16, #tpu.memory_space<vmem>>, vector<1x4x128xbf16>
    %30 = vector.shape_cast %29 : vector<1x4x128xbf16> to vector<4x128xbf16>
    %cst_16 = arith.constant dense<0.000000e+00> : vector<1024x128xf32>
    %31 = tpu.matmul %28, %30, %cst_16 {dimension_numbers = #tpu.dot_dimension_numbers<[1], [0], [0], [1], [0, 0, 1, 1], [], []>} : vector<1024x4xbf16>, vector<4x128xbf16>, vector<1024x128xf32> -> vector<1024x128xf32>
    %32 = arith.addf %25, %31 : vector<1024x128xf32>
    %33 = vector.extract_strided_slice %5 {offsets = [0, 1, 1, 0], sizes = [8, 8, 16, 4], strides = [1, 1, 1, 1]} : vector<8x10x18x4xf32> to vector<8x8x16x4xf32>
    %34 = vector.shape_cast %33 : vector<8x8x16x4xf32> to vector<1024x4xf32>
    %35 = arith.truncf %34 : vector<1024x4xf32> to vector<1024x4xbf16>
    %c4 = arith.constant 4 : index
    %c0_17 = arith.constant 0 : index
    %c0_18 = arith.constant 0 : index
    %36 = vector.load %arg4[%c4, %c0_17, %c0_18] : memref<9x4x128xbf16, #tpu.memory_space<vmem>>, vector<1x4x128xbf16>
    %37 = vector.shape_cast %36 : vector<1x4x128xbf16> to vector<4x128xbf16>
    %cst_19 = arith.constant dense<0.000000e+00> : vector<1024x128xf32>
    %38 = tpu.matmul %35, %37, %cst_19 {dimension_numbers = #tpu.dot_dimension_numbers<[1], [0], [0], [1], [0, 0, 1, 1], [], []>} : vector<1024x4xbf16>, vector<4x128xbf16>, vector<1024x128xf32> -> vector<1024x128xf32>
    %39 = arith.addf %32, %38 : vector<1024x128xf32>
    %40 = vector.extract_strided_slice %5 {offsets = [0, 1, 2, 0], sizes = [8, 8, 16, 4], strides = [1, 1, 1, 1]} : vector<8x10x18x4xf32> to vector<8x8x16x4xf32>
    %41 = vector.shape_cast %40 : vector<8x8x16x4xf32> to vector<1024x4xf32>
    %42 = arith.truncf %41 : vector<1024x4xf32> to vector<1024x4xbf16>
    %c5 = arith.constant 5 : index
    %c0_20 = arith.constant 0 : index
    %c0_21 = arith.constant 0 : index
    %43 = vector.load %arg4[%c5, %c0_20, %c0_21] : memref<9x4x128xbf16, #tpu.memory_space<vmem>>, vector<1x4x128xbf16>
    %44 = vector.shape_cast %43 : vector<1x4x128xbf16> to vector<4x128xbf16>
    %cst_22 = arith.constant dense<0.000000e+00> : vector<1024x128xf32>
    %45 = tpu.matmul %42, %44, %cst_22 {dimension_numbers = #tpu.dot_dimension_numbers<[1], [0], [0], [1], [0, 0, 1, 1], [], []>} : vector<1024x4xbf16>, vector<4x128xbf16>, vector<1024x128xf32> -> vector<1024x128xf32>
    %46 = arith.addf %39, %45 : vector<1024x128xf32>
    %47 = vector.extract_strided_slice %5 {offsets = [0, 2, 0, 0], sizes = [8, 8, 16, 4], strides = [1, 1, 1, 1]} : vector<8x10x18x4xf32> to vector<8x8x16x4xf32>
    %48 = vector.shape_cast %47 : vector<8x8x16x4xf32> to vector<1024x4xf32>
    %49 = arith.truncf %48 : vector<1024x4xf32> to vector<1024x4xbf16>
    %c6 = arith.constant 6 : index
    %c0_23 = arith.constant 0 : index
    %c0_24 = arith.constant 0 : index
    %50 = vector.load %arg4[%c6, %c0_23, %c0_24] : memref<9x4x128xbf16, #tpu.memory_space<vmem>>, vector<1x4x128xbf16>
    %51 = vector.shape_cast %50 : vector<1x4x128xbf16> to vector<4x128xbf16>
    %cst_25 = arith.constant dense<0.000000e+00> : vector<1024x128xf32>
    %52 = tpu.matmul %49, %51, %cst_25 {dimension_numbers = #tpu.dot_dimension_numbers<[1], [0], [0], [1], [0, 0, 1, 1], [], []>} : vector<1024x4xbf16>, vector<4x128xbf16>, vector<1024x128xf32> -> vector<1024x128xf32>
    %53 = arith.addf %46, %52 : vector<1024x128xf32>
    %54 = vector.extract_strided_slice %5 {offsets = [0, 2, 1, 0], sizes = [8, 8, 16, 4], strides = [1, 1, 1, 1]} : vector<8x10x18x4xf32> to vector<8x8x16x4xf32>
    %55 = vector.shape_cast %54 : vector<8x8x16x4xf32> to vector<1024x4xf32>
    %56 = arith.truncf %55 : vector<1024x4xf32> to vector<1024x4xbf16>
    %c7 = arith.constant 7 : index
    %c0_26 = arith.constant 0 : index
    %c0_27 = arith.constant 0 : index
    %57 = vector.load %arg4[%c7, %c0_26, %c0_27] : memref<9x4x128xbf16, #tpu.memory_space<vmem>>, vector<1x4x128xbf16>
    %58 = vector.shape_cast %57 : vector<1x4x128xbf16> to vector<4x128xbf16>
    %cst_28 = arith.constant dense<0.000000e+00> : vector<1024x128xf32>
    %59 = tpu.matmul %56, %58, %cst_28 {dimension_numbers = #tpu.dot_dimension_numbers<[1], [0], [0], [1], [0, 0, 1, 1], [], []>} : vector<1024x4xbf16>, vector<4x128xbf16>, vector<1024x128xf32> -> vector<1024x128xf32>
    %60 = arith.addf %53, %59 : vector<1024x128xf32>
    %61 = vector.extract_strided_slice %5 {offsets = [0, 2, 2, 0], sizes = [8, 8, 16, 4], strides = [1, 1, 1, 1]} : vector<8x10x18x4xf32> to vector<8x8x16x4xf32>
    %62 = vector.shape_cast %61 : vector<8x8x16x4xf32> to vector<1024x4xf32>
    %63 = arith.truncf %62 : vector<1024x4xf32> to vector<1024x4xbf16>
    %c8 = arith.constant 8 : index
    %c0_29 = arith.constant 0 : index
    %c0_30 = arith.constant 0 : index
    %64 = vector.load %arg4[%c8, %c0_29, %c0_30] : memref<9x4x128xbf16, #tpu.memory_space<vmem>>, vector<1x4x128xbf16>
    %65 = vector.shape_cast %64 : vector<1x4x128xbf16> to vector<4x128xbf16>
    %cst_31 = arith.constant dense<0.000000e+00> : vector<1024x128xf32>
    %66 = tpu.matmul %63, %65, %cst_31 {dimension_numbers = #tpu.dot_dimension_numbers<[1], [0], [0], [1], [0, 0, 1, 1], [], []>} : vector<1024x4xbf16>, vector<4x128xbf16>, vector<1024x128xf32> -> vector<1024x128xf32>
    %67 = arith.addf %60, %66 : vector<1024x128xf32>
    %c0_32 = arith.constant 0 : index
    %c0_33 = arith.constant 0 : index
    %68 = vector.load %arg5[%c0_32, %c0_33] : memref<1x128xf32, #tpu.memory_space<vmem>>, vector<1x128xf32>
    %69 = vector.broadcast %68 : vector<1x128xf32> to vector<1024x128xf32>
    %70 = arith.addf %67, %69 : vector<1024x128xf32>
    %cst_34 = arith.constant 0.000000e+00 : f32
    %71 = vector.broadcast %cst_34 : f32 to vector<1024x128xf32>
    %72 = arith.maximumf %70, %71 : vector<1024x128xf32>
    %c0_35 = arith.constant 0 : index
    %c0_36 = arith.constant 0 : index
    %73 = vector.load %arg11[%c0_35, %c0_36] : memref<8x128xf32, #tpu.memory_space<vmem>>, vector<8x128xf32>
    %c0_37 = arith.constant 0 : index
    %c0_38 = arith.constant 0 : index
    %c0_39 = arith.constant 0 : index
    %c0_40 = arith.constant 0 : index
    %74 = vector.load %arg3[%c0_37, %c0_38, %c0_39, %c0_40] : memref<1x1x8x1024xf32, #tpu.memory_space<vmem>>, vector<1x1x8x1024xf32>
    %75 = vector.shape_cast %74 : vector<1x1x8x1024xf32> to vector<8x1024xf32>
    %cst_41 = arith.constant dense<0.000000e+00> : vector<8x128xf32>
    %76 = tpu.matmul %75, %72, %cst_41 {dimension_numbers = #tpu.dot_dimension_numbers<[1], [0], [0], [1], [0, 0, 1, 1], [], []>} : vector<8x1024xf32>, vector<1024x128xf32>, vector<8x128xf32> -> vector<8x128xf32>
    %77 = arith.addf %73, %76 : vector<8x128xf32>
    %c0_42 = arith.constant 0 : index
    %c0_43 = arith.constant 0 : index
    %78 = vector.load %arg11[%c0_42, %c0_43] : memref<8x128xf32, #tpu.memory_space<vmem>>, vector<8x128xf32>
    tpu.vector_store %arg11[%c0_42, %c0_43], %77 {strides = array<i32>} : memref<8x128xf32, #tpu.memory_space<vmem>>, vector<8x128xf32>,
    %c1_i32 = arith.constant 1 : i32
    %79 = arith.cmpi eq, %arg1, %c1_i32 : i32
    %80 = arith.extui %79 : i1 to i32
    %c0_i32_44 = arith.constant 0 : i32
    %81 = arith.cmpi ne, %80, %c0_i32_44 : i32
    scf.if %81 {
      %c0_45 = arith.constant 0 : index
      %c0_46 = arith.constant 0 : index
      %82 = vector.load %arg11[%c0_45, %c0_46] : memref<8x128xf32, #tpu.memory_space<vmem>>, vector<8x128xf32>
      %83 = arith.truncf %82 : vector<8x128xf32> to vector<8x128xbf16>
      %c0_47 = arith.constant 0 : index
      %c0_48 = arith.constant 0 : index
      %84 = vector.load %arg6[%c0_47, %c0_48] : memref<128x384xbf16, #tpu.memory_space<vmem>>, vector<128x384xbf16>
      %cst_49 = arith.constant dense<0.000000e+00> : vector<8x384xf32>
      %85 = tpu.matmul %83, %84, %cst_49 {dimension_numbers = #tpu.dot_dimension_numbers<[1], [0], [0], [1], [0, 0, 1, 1], [], []>} : vector<8x128xbf16>, vector<128x384xbf16>, vector<8x384xf32> -> vector<8x384xf32>
      %c0_50 = arith.constant 0 : index
      %c0_51 = arith.constant 0 : index
      %86 = vector.load %arg7[%c0_50, %c0_51] : memref<1x384xf32, #tpu.memory_space<vmem>>, vector<1x384xf32>
      %87 = vector.broadcast %86 : vector<1x384xf32> to vector<8x384xf32>
      %88 = arith.addf %85, %87 : vector<8x384xf32>
      %cst_52 = arith.constant 0.000000e+00 : f32
      %89 = vector.broadcast %cst_52 : f32 to vector<8x384xf32>
      %90 = arith.maximumf %88, %89 : vector<8x384xf32>
      %91 = arith.truncf %90 : vector<8x384xf32> to vector<8x384xbf16>
      %c0_53 = arith.constant 0 : index
      %c0_54 = arith.constant 0 : index
      %92 = vector.load %arg8[%c0_53, %c0_54] : memref<384x384xbf16, #tpu.memory_space<vmem>>, vector<384x384xbf16>
      %cst_55 = arith.constant dense<0.000000e+00> : vector<8x384xf32>
      %93 = tpu.matmul %91, %92, %cst_55 {dimension_numbers = #tpu.dot_dimension_numbers<[1], [0], [0], [1], [0, 0, 1, 1], [], []>} : vector<8x384xbf16>, vector<384x384xbf16>, vector<8x384xf32> -> vector<8x384xf32>
      %c0_56 = arith.constant 0 : index
      %c0_57 = arith.constant 0 : index
      %94 = vector.load %arg9[%c0_56, %c0_57] : memref<1x384xf32, #tpu.memory_space<vmem>>, vector<1x384xf32>
      %95 = vector.broadcast %94 : vector<1x384xf32> to vector<8x384xf32>
      %96 = arith.addf %93, %95 : vector<8x384xf32>
      %97 = vector.extract_strided_slice %96 {offsets = [0, 0], sizes = [8, 128], strides = [1, 1]} : vector<8x384xf32> to vector<8x128xf32>
      %98 = arith.mulf %97, %97 : vector<8x128xf32>
      %cst_58 = arith.constant dense<0.000000e+00> : vector<8xf32>
      %99 = vector.multi_reduction <add>, %98, %cst_58 [1] : vector<8x128xf32> to vector<8xf32>
      %100 = vector.shape_cast %99 : vector<8xf32> to vector<8x1xf32>
      %cst_59 = arith.constant 1.000000e-24 : f32
      %101 = vector.broadcast %cst_59 : f32 to vector<8x1xf32>
      %102 = arith.maximumf %100, %101 : vector<8x1xf32>
      %103 = math.rsqrt %102 : vector<8x1xf32>
      %104 = vector.broadcast %103 : vector<8x1xf32> to vector<8x128xf32>
      %105 = arith.mulf %97, %104 : vector<8x128xf32>
      %c0_60 = arith.constant 0 : index
      %c0_61 = arith.constant 0 : index
      %106 = vector.load %arg10[%c0_60, %c0_61] : memref<8x384xf32, #tpu.memory_space<vmem>>, vector<8x128xf32>
      tpu.vector_store %arg10[%c0_60, %c0_61], %105 {strides = array<i32>} : memref<8x384xf32, #tpu.memory_space<vmem>>, vector<8x128xf32>,
      %107 = vector.extract_strided_slice %96 {offsets = [0, 128], sizes = [8, 128], strides = [1, 1]} : vector<8x384xf32> to vector<8x128xf32>
      %108 = arith.mulf %107, %107 : vector<8x128xf32>
      %cst_62 = arith.constant dense<0.000000e+00> : vector<8xf32>
      %109 = vector.multi_reduction <add>, %108, %cst_62 [1] : vector<8x128xf32> to vector<8xf32>
      %110 = vector.shape_cast %109 : vector<8xf32> to vector<8x1xf32>
      %cst_63 = arith.constant 1.000000e-24 : f32
      %111 = vector.broadcast %cst_63 : f32 to vector<8x1xf32>
      %112 = arith.maximumf %110, %111 : vector<8x1xf32>
      %113 = math.rsqrt %112 : vector<8x1xf32>
      %114 = vector.broadcast %113 : vector<8x1xf32> to vector<8x128xf32>
      %115 = arith.mulf %107, %114 : vector<8x128xf32>
      %c0_64 = arith.constant 0 : index
      %c128 = arith.constant 128 : index
      %116 = vector.load %arg10[%c0_64, %c128] : memref<8x384xf32, #tpu.memory_space<vmem>>, vector<8x128xf32>
      tpu.vector_store %arg10[%c0_64, %c128], %115 {strides = array<i32>} : memref<8x384xf32, #tpu.memory_space<vmem>>, vector<8x128xf32>,
      %117 = vector.extract_strided_slice %96 {offsets = [0, 256], sizes = [8, 128], strides = [1, 1]} : vector<8x384xf32> to vector<8x128xf32>
      %118 = arith.mulf %117, %117 : vector<8x128xf32>
      %cst_65 = arith.constant dense<0.000000e+00> : vector<8xf32>
      %119 = vector.multi_reduction <add>, %118, %cst_65 [1] : vector<8x128xf32> to vector<8xf32>
      %120 = vector.shape_cast %119 : vector<8xf32> to vector<8x1xf32>
      %cst_66 = arith.constant 1.000000e-24 : f32
      %121 = vector.broadcast %cst_66 : f32 to vector<8x1xf32>
      %122 = arith.maximumf %120, %121 : vector<8x1xf32>
      %123 = math.rsqrt %122 : vector<8x1xf32>
      %124 = vector.broadcast %123 : vector<8x1xf32> to vector<8x128xf32>
      %125 = arith.mulf %117, %124 : vector<8x128xf32>
      %c0_67 = arith.constant 0 : index
      %c256 = arith.constant 256 : index
      %126 = vector.load %arg10[%c0_67, %c256] : memref<8x384xf32, #tpu.memory_space<vmem>>, vector<8x128xf32>
      tpu.vector_store %arg10[%c0_67, %c256], %125 {strides = array<i32>} : memref<8x384xf32, #tpu.memory_space<vmem>>, vector<8x128xf32>,
    } else {
    }
    return
  }
  func.func @transform_0(%arg0: i32, %arg1: i32) -> (i32, i32, i32, i32, i32) {
    %c0_i32 = arith.constant 0 : i32
    %c0_i32_0 = arith.constant 0 : i32
    %c0_i32_1 = arith.constant 0 : i32
    %c0_i32_2 = arith.constant 0 : i32
    return %arg1, %arg0, %c0_i32, %c0_i32_0, %c0_i32_1 : i32, i32, i32, i32, i32
  }
  func.func @transform_1(%arg0: i32, %arg1: i32) -> (i32, i32, i32, i32) {
    %c0_i32 = arith.constant 0 : i32
    %c0_i32_0 = arith.constant 0 : i32
    %c0_i32_1 = arith.constant 0 : i32
    return %arg0, %arg1, %c0_i32, %c0_i32_0 : i32, i32, i32, i32
  }
  func.func @transform_2(%arg0: i32, %arg1: i32) -> (i32, i32, i32) {
    %c0_i32 = arith.constant 0 : i32
    %c0_i32_0 = arith.constant 0 : i32
    %c0_i32_1 = arith.constant 0 : i32
    %c0_i32_2 = arith.constant 0 : i32
    return %c0_i32, %c0_i32_0, %c0_i32_1 : i32, i32, i32
  }
  func.func @transform_3(%arg0: i32, %arg1: i32) -> (i32, i32) {
    %c0_i32 = arith.constant 0 : i32
    %c0_i32_0 = arith.constant 0 : i32
    %c0_i32_1 = arith.constant 0 : i32
    return %c0_i32, %c0_i32_0 : i32, i32
  }
  func.func @transform_4(%arg0: i32, %arg1: i32) -> (i32, i32) {
    %c0_i32 = arith.constant 0 : i32
    %c0_i32_0 = arith.constant 0 : i32
    %c0_i32_1 = arith.constant 0 : i32
    return %c0_i32, %c0_i32_0 : i32, i32
  }
  func.func @transform_5(%arg0: i32, %arg1: i32) -> (i32, i32) {
    %c0_i32 = arith.constant 0 : i32
    %c0_i32_0 = arith.constant 0 : i32
    %c0_i32_1 = arith.constant 0 : i32
    return %c0_i32, %c0_i32_0 : i32, i32
  }
  func.func @transform_6(%arg0: i32, %arg1: i32) -> (i32, i32) {
    %c0_i32 = arith.constant 0 : i32
    %c0_i32_0 = arith.constant 0 : i32
    %c0_i32_1 = arith.constant 0 : i32
    return %c0_i32, %c0_i32_0 : i32, i32
  }
  func.func @transform_7(%arg0: i32, %arg1: i32) -> (i32, i32) {
    %c0_i32 = arith.constant 0 : i32
    %c0_i32_0 = arith.constant 0 : i32
    %c0_i32_1 = arith.constant 0 : i32
    return %c0_i32, %c0_i32_0 : i32, i32
  }
  func.func @transform_8(%arg0: i32, %arg1: i32) -> (i32, i32) {
    %c0_i32 = arith.constant 0 : i32
    %c0_i32_0 = arith.constant 0 : i32
    return %arg0, %c0_i32 : i32, i32
  }
}

</mosaic_0001>

<bundles_post_ra>
// kernel: three_mlp_forward.1
= control target key start
LH: loop header
LB: loop body
LE: loop exit
PB: predicated region body
PF: predicated region fallthrough
CT: control target
= control target key end

     0   :  { %s15007_s27 = smov 0   ;;  %s15009_s28 = smov 0   ;;  %s19699_s0 = inlined_call_operand.vmem [shape: bf16[2,8,10,18,4], index: 0, kind: input, shape index: {}]   ;;  %s19700_s1 = inlined_call_operand.vmem [shape: f32[1,2,8,1024], index: 1, kind: input, shape index: {}]   ;;  %s19701_s2 = inlined_call_operand.vmem [shape: bf16[9,4,128], index: 2, kind: input, shape index: {}]   ;;  %s19702_s3 = inlined_call_operand.vmem [shape: f32[1,128], index: 3, kind: input, shape index: {}]   ;;  %s19703_s4 = inlined_call_operand.vmem [shape: bf16[128,384], index: 4, kind: input, shape index: {}]   ;;  %s19704_s5 = inlined_call_operand.vmem [shape: f32[1,384], index: 5, kind: input, shape index: {}]   ;;  %s19705_s6 = inlined_call_operand.vmem [shape: bf16[384,384], index: 6, kind: input, shape index: {}]   ;;  %s19706_s7 = inlined_call_operand.vmem [shape: f32[1,384], index: 7, kind: input, shape index: {}]   ;;  %s19707_s8 = inlined_call_operand.vmem [shape: f32[8,384], index: 8, kind: output, shape index: {}]  }
   0x1   :  { %s15011_s29 = smov 0  }
   0x2 LB: > { %s27_s30 = sadd.s32 1, %s14952_s28  ;;  %p10624_p0 = scmp.ge.s32.totalorder %s14956_s29, 1  ;;  %s14956_s29 = sphi %s15011_s29, %s18_s29   ;;  %s14952_s28 = sphi %s15009_s28, %s21097_s28   ;;  %s14948_s27 = sphi %s15007_s27, %s21096_s27  }
   0x3   : > { %p28_p1 = scmp.ge.s32.totalorder %s27_s30, 2  ;;  %p298_p2 = scmp.lt.s32.totalorder %s14956_s29, 3 }
   0x5   : > { %s21099_s30 = smov (%p28_p1, %s27_s30), 0  ;;  %p299_p3 = pnand %p10624_p0, %p298_p2 }
   0x7   : > { %302 = sbr.rel (%p299_p3) target bundleno = 2327 (0x917), region = 52 }
   0xe   : > { %p347_p4 = scmp.lt.s32.totalorder %s14948_s27, 1  ;;  %p10628_p5 = scmp.ne.s32.totalorder %s14948_s27, 0 }
   0xf   : > { %v14958_v0 = vmov (!%p10628_p5), 0.0  }
  0x10   : > { %s348_s9 = scalar_select %p347_p4, %s14948_s27, 1 }
  0x11   : > { %375 = sbr.rel (%p10628_p5) target bundleno = 24 (0x18), region = 56  ;;  %376 = vst [vmem:[#allocation2] sm:$0xff] (!%p10628_p5), %v14958_v0 }
  0x12   : > { %s14540_s10 = smul.u32 960, %s348_s9  ;;  %s11394_s11 = sshll.u32 %s348_s9, 6 }
  0x13   : > { %s15032_s14 = scalar_lea.vmem %s19700_s1, %s11394_s11 }
  0x14   : > { %s15037_s17 = scalar_lea.vmem %s19699_s0, %s14540_s10 }
  0x18 PF: > { %vm1822_vm0 = vcmask 1041408   ;;  %v10960_v1 = vld [vmem:[%s19701_s2 + $0x8] sm:$0x3]  ;;  %v10693_v2 = vld [vmem:[%s19701_s2 + $0x2] sm:$0x3]  ;;  %v15061_v9 = vld [vmem:[%s15037_s17 + $0xc] sm:$0xff]  }
  0x19   : > { %v15047_v3 = vld [vmem:[%s15037_s17] sm:$0xff]   ;;  %14534 = vmatprep.subr.msk.bf16.mxu0 %vm1822_vm0, %v10960_v1  ;;  %14530 = vmatprep.subr.msk.bf16.mxu1 %vm1822_vm0, %v10693_v2  ;;  %v15052_v4 = vsel %vm1822_vm0, %v10960_v1, 0  ;;  %v1824_v5 = vsel %vm1822_vm0, %v10693_v2, 0  ;;  %v15056_v6 = vld [vmem:[%s15037_s17 + $0x8] sm:$0x1]  ;;  %vm1114_vm1 = vcmask 1046528   ;;  %v19755_v12 = vunpack.c.l.bf16 %v15061_v9 }
  0x1a   : > { %20145 = vst [vmem:[#allocation3_spill] sm:$0xff] %v15047_v3  ;;  %20146 = vst [vmem:[#allocation4_spill] sm:$0xff] %v15052_v4  ;;  %v19710_v7 = vunpack.c.l.bf16 %v15047_v3  ;;  %v19709_v8 = vunpack.c.h.bf16 %v15047_v3  ;;  %12681 = vmatpush3.bf16.msra.mxu0 %v15052_v4  ;;  %12161 = vmatpush3.bf16.msra.mxu1 %v1824_v5  ;;  %v19708_v10 = vunpack.c.l.bf16 %v15056_v6  ;;  %v15066_v11 = vld [vmem:[%s15037_s17 + $0x14] sm:$0x1]  ;;  %v11025_v13 = vld [vmem:[%s19701_s2 + $0xa] sm:$0x3]  ;;  %v19751_v17 = vunpack.c.h.bf16 %v15061_v9 }
  0x1b   : > { %20147 = vst [vmem:[#allocation5_spill] sm:$0xff] %v15056_v6  ;;  %14536 = vmatprep.subr.msk.bf16.mxu0 %vm1822_vm0, %v11025_v13  ;;  %v19750_v18 = vunpack.c.l.bf16 %v15066_v11  ;;  %v15082_v19 = vld [vmem:[%s15037_s17 + $0x18] sm:$0xff]   ;;  %v1120_v21 = vrot.slane %v19755_v12, 1  ;;  %v15088_v22 = vld [vmem:[%s15037_s17 + $0x20] sm:$0x1]  ;;  %vm1629_vm2 = vcmask 31744  }
  0x1c   : > { %v1115_v14 = vrot.slane %v19710_v7, 1  ;;  %v1116_v15 = vrot.slane %v19709_v8, 1  ;;  %v1118_v16 = vrot.slane %v19708_v10, 1  ;;  %v1121_v24 = vrot.slane %v19751_v17, 1  ;;  %v15098_v29 = vld [vmem:[%s15037_s17 + $0x24] sm:$0xff]   ;;  %v15107_v34 = vld [vmem:[%s15037_s17 + $0x30] sm:$0xff]  }
  0x1d   : > { %v1123_v25 = vrot.slane %v19750_v18, 1  ;;  %v19749_v27 = vunpack.c.l.bf16 %v15082_v19  ;;  %v19748_v28 = vunpack.c.h.bf16 %v15082_v19  ;;  %v19747_v32 = vunpack.c.l.bf16 %v15088_v22  ;;  %v15104_v33 = vld [vmem:[%s15037_s17 + $0x2c] sm:$0x1]  ;;  %v15115_v38 = vld [vmem:[%s15037_s17 + $0x38] sm:$0x1]  ;;  %v15128_v46 = vld [vmem:[%s15037_s17 + $0x3c] sm:$0xff]  }
  0x1e   : > { %v1117_v20 = vsel %vm1114_vm1, %v1115_v14, %v1116_v15  ;;  %v1119_v23 = vsel %vm1114_vm1, %v1116_v15, %v1118_v16  ;;  %v1122_v30 = vsel %vm1114_vm1, %v1120_v21, %v1121_v24  ;;  %v6085_v40 = vsel %vm1822_vm0, %v11025_v13, 0  ;;  %v15136_v51 = vld [vmem:[%s15037_s17 + $0x44] sm:$0x1]  ;;  %v15139_v52 = vld [vmem:[%s15037_s17 + $0x48] sm:$0xff]   ;;  %v15163_v0 = vld [vmem:[%s15037_s17 + $0x50] sm:$0x1] }
  0x1f   : > { %v1563_v26 = vpack.c.bf16 %v1119_v23, %v1117_v20  ;;  %v1124_v31 = vsel %vm1114_vm1, %v1121_v24, %v1123_v25  ;;  %v1125_v36 = vrot.slane %v19749_v27, 1  ;;  %v1126_v37 = vrot.slane %v19748_v28, 1  ;;  %v15167_v2 = vld [vmem:[%s15037_s17 + $0x54] sm:$0xff]   ;;  %v15176_v16 = vld [vmem:[%s15037_s17 + $0x5c] sm:$0x1]  ;;  %p11294_p6 = scmp.ne.s32.totalorder %s14948_s27, 1 }
  0x20   : > { %v1564_v35 = vpack.c.bf16 %v1124_v31, %v1122_v30  ;;  %v1128_v39 = vrot.slane %v19747_v32, 1  ;;  %v19746_v41 = vunpack.c.l.bf16 %v15098_v29  ;;  %v19742_v43 = vunpack.c.h.bf16 %v15098_v29  ;;  %v15401_v18 = vld [vmem:[%s15037_s17 + $0xf0] sm:$0xff]   ;;  %v15404_v17 = vld [vmem:[%s15037_s17 + $0xf8] sm:$0x1]  ;;  %v15434_v4 = vld [vmem:[%s15037_s17 + $0x104] sm:$0x1] }
  0x21   : > { %12162 = vmatprep.mubr.msk.bf16.mxu1 %vm1629_vm2, %v1563_v26  ;;  %v1127_v42 = vsel %vm1114_vm1, %v1125_v36, %v1126_v37  ;;  %v19738_v44 = vunpack.c.l.bf16 %v15104_v33  ;;  %v19737_v45 = vunpack.c.l.bf16 %v15107_v34  ;;  %v19736_v49 = vunpack.c.h.bf16 %v15107_v34  ;;  %20160 = vst [vmem:[#allocation18_spill] sm:$0xff] %v15401_v18  ;;  %20161 = vst [vmem:[#allocation19_spill] sm:$0xff] %v15404_v17  ;;  %v15629_v3 = vld [vmem:[%s15037_s17 + $0x158] sm:$0x1] }
  0x22   : > { %12682 = vmatprep.mubr.msk.bf16.mxu0 %vm1629_vm2, %v1564_v35  ;;  %12163 = vmatmul.mubr.msk.bf16.vlgmr.msra.gmra.mrb[0].mxu1 %vm1629_vm2, %v1564_v35  ;;  %v1129_v47 = vsel %vm1114_vm1, %v1126_v37, %v1128_v39  ;;  %v1130_v48 = vrot.slane %v19746_v41, 1  ;;  %v19729_v50 = vunpack.c.l.bf16 %v15115_v38  ;;  %v1131_v54 = vrot.slane %v19742_v43, 1  ;;  %20208 = vst [vmem:[#allocation41_spill] sm:$0xff] %v15629_v3 }
  0x23   : > { %v15141_v53 = vpack.c.bf16 %v1129_v47, %v1127_v42  ;;  %v1133_v55 = vrot.slane %v19738_v44, 1  ;;  %v1135_v56 = vrot.slane %v19737_v45, 1  ;;  %v1136_v57 = vrot.slane %v19736_v49, 1 }
  0x24   : > { %v1138_v58 = vrot.slane %v19729_v50, 1  ;;  %v19728_v59 = vunpack.c.l.bf16 %v15128_v46  ;;  %v19727_v60 = vunpack.c.h.bf16 %v15128_v46  ;;  %v1132_v61 = vsel %vm1114_vm1, %v1130_v48, %v1131_v54 }
  0x25   : > { %20148 = vst [vmem:[#allocation6_spill] sm:$0xff] %v15141_v53  ;;  %12683 = vmatmul.mubr.msk.bf16.vlgmr.msra.gmra.mrb[0].mxu0 %vm1629_vm2, %v15141_v53  ;;  %12166 = vmatprep.mubr.msk.bf16.mxu1 %vm1629_vm2, %v15141_v53  ;;  %v1134_v62 = vsel %vm1114_vm1, %v1131_v54, %v1133_v55  ;;  %v19726_v63 = vunpack.c.l.bf16 %v15136_v51  ;;  %v19723_v1 = vunpack.c.l.bf16 %v15139_v52  ;;  %v1137_v13 = vsel %vm1114_vm1, %v1135_v56, %v1136_v57  ;;  %v15213_v55 = vld [vmem:[%s15037_s17 + $0x60] sm:$0xff]  }
  0x26   : > { %12811 = vmatpush3.bf16.msra.mxu0 %v6085_v40  ;;  %v15169_v5 = vpack.c.bf16 %v1134_v62, %v1132_v61  ;;  %v1139_v14 = vsel %vm1114_vm1, %v1136_v57, %v1138_v58  ;;  %v1140_v15 = vrot.slane %v19728_v59, 1  ;;  %v1141_v21 = vrot.slane %v19727_v60, 1  ;;  %v15200_v40 = vld [vmem:[%s15037_s17 + $0x78] sm:$0xff]   ;;  %v15218_v57 = vld [vmem:[%s15037_s17 + $0x68] sm:$0x1] }
  0x27   : > { %v15178_v20 = vpack.c.bf16 %v1139_v14, %v1137_v13  ;;  %v1143_v23 = vrot.slane %v19726_v63, 1  ;;  %v19719_v24 = vunpack.c.h.bf16 %v15139_v52  ;;  %v19717_v25 = vunpack.c.l.bf16 %v15163_v0  ;;  %20151 = vst [vmem:[#allocation9_spill] sm:$0xff] %v15200_v40  ;;  %v15221_v58 = vld [vmem:[%s15037_s17 + $0x80] sm:$0x1]  ;;  %v15225_v62 = vld [vmem:[%s15037_s17 + $0x84] sm:$0xff]  }
  0x28   : > { %20149 = vst [vmem:[#allocation7_spill] sm:$0xff] %v15169_v5  ;;  %12686 = vmatprep.mubr.msk.bf16.mxu0 %vm1629_vm2, %v15169_v5  ;;  %v1145_v26 = vrot.slane %v19723_v1, 1  ;;  %v19716_v30 = vunpack.c.l.bf16 %v15167_v2  ;;  %v19712_v31 = vunpack.c.h.bf16 %v15167_v2  ;;  %v1142_v35 = vsel %vm1114_vm1, %v1140_v15, %v1141_v21  ;;  %20153 = vst [vmem:[#allocation11_spill] sm:$0xff] %v15221_v58 }
  0x29   : > { %20150 = vst [vmem:[#allocation8_spill] sm:$0xff] %v15178_v20  ;;  %v1144_v36 = vsel %vm1114_vm1, %v1141_v21, %v1143_v23  ;;  %v1146_v37 = vrot.slane %v19719_v24, 1  ;;  %v19711_v39 = vunpack.c.l.bf16 %v15176_v16  ;;  %v1148_v47 = vrot.slane %v19717_v25, 1  ;;  %v15234_v23 = vld [vmem:[%s15037_s17 + $0x8c] sm:$0x1] }
  0x2a   : > { %12167 = vmatmul.mubr.msk.bf16.gmra.mrb[4].mxu1 %vm1629_vm2, %v15169_v5  ;;  %v15204_v42 = vpack.c.bf16 %v1144_v36, %v1142_v35  ;;  %v1150_v48 = vrot.slane %v19716_v30, 1  ;;  %v1151_v54 = vrot.slane %v19712_v31, 1  ;;  %v19715_v61 = vunpack.c.l.bf16 %v15200_v40  ;;  %v15276_v30 = vld [vmem:[%s15037_s17 + $0x90] sm:$0xff]   ;;  %v15279_v25 = vld [vmem:[%s15037_s17 + $0x98] sm:$0x1] }
  0x2b   : > { %12170 = vmatprep.mubr.msk.bf16.mxu1 %vm1629_vm2, %v15178_v20  ;;  %v1153_v56 = vrot.slane %v19711_v39, 1  ;;  %v1147_v13 = vsel %vm1114_vm1, %v1145_v26, %v1146_v37  ;;  %v1149_v14 = vsel %vm1114_vm1, %v1146_v37, %v1148_v47  ;;  %v19718_v15 = vunpack.c.l.bf16 %v15213_v55  ;;  %v15489_v5 = vld [vmem:[%s15037_s17 + $0x11c] sm:$0x1] }
  0x2c   : > { %20152 = vst [vmem:[#allocation10_spill] sm:$0xff] %v15204_v42  ;;  %v19720_v21 = vunpack.c.h.bf16 %v15213_v55  ;;  %v1152_v35 = vsel %vm1114_vm1, %v1150_v48, %v1151_v54  ;;  %v19721_v36 = vunpack.c.l.bf16 %v15218_v57  ;;  %v19714_v10 = vunpack.c.h.bf16 %v15200_v40  ;;  %v15250_v48 = vld [vmem:[%s19701_s2] sm:$0x3]  ;;  %20174 = vst [vmem:[#allocation24_spill] sm:$0xff] %v15489_v5 }
  0x2d   : > { %12687 = vmatmul.mubr.msk.bf16.gmra.mrb[4].mxu0 %vm1629_vm2, %v15178_v20  ;;  %v19713_v8 = vunpack.c.l.bf16 %v15221_v58  ;;  %v1154_v26 = vsel %vm1114_vm1, %v1151_v54, %v1153_v56  ;;  %v1155_v37 = vrot.slane %v19715_v61, 1  ;;  %v19722_v47 = vunpack.c.l.bf16 %v15225_v62  ;;  %14531 = vmatprep.subr.msk.bf16.mxu1 %vm1822_vm0, %v15250_v48 }
  0x2e   : > { %12690 = vmatprep.mubr.msk.bf16.mxu0 %vm1629_vm2, %v15204_v42  ;;  %v19725_v7 = vunpack.c.h.bf16 %v15225_v62  ;;  %v15252_v39 = vpack.c.bf16 %v1149_v14, %v1147_v13  ;;  %v1156_v31 = vrot.slane %v19714_v10, 1  ;;  %v19724_v56 = vunpack.c.l.bf16 %v15234_v23 }
  0x2f   : > { %v1158_v54 = vrot.slane %v19713_v8, 1  ;;  %v5228_v13 = vrot.slane %v19718_v15, 1  ;;  %v5229_v14 = vrot.slane %v19720_v21, 1  ;;  %v15269_v8 = vpack.c.bf16 %v1154_v26, %v1152_v35  ;;  %v15288_v26 = vld [vmem:[%s15037_s17 + $0x9c] sm:$0xff]  }
  0x30   : > { %20154 = vst [vmem:[#allocation12_spill] sm:$0xff] %v15252_v39  ;;  %v5231_v10 = vrot.slane %v19721_v36, 1  ;;  %v1160_v61 = vrot.slane %v19722_v47, 1  ;;  %v1157_v15 = vsel %vm1114_vm1, %v1155_v37, %v1156_v31  ;;  %v1161_v21 = vrot.slane %v19725_v7, 1  ;;  %v15291_v36 = vld [vmem:[%s15037_s17 + $0xa4] sm:$0x1] }
  0x31   : > { %20155 = vst [vmem:[#allocation13_spill] sm:$0xff] %v15269_v8  ;;  %v1159_v24 = vsel %vm1114_vm1, %v1156_v31, %v1158_v54  ;;  %v1163_v35 = vrot.slane %v19724_v56, 1  ;;  %v5230_v47 = vsel %vm1114_vm1, %v5228_v13, %v5229_v14  ;;  %v19731_v1 = vunpack.c.l.bf16 %v15276_v30 }
  0x32   : > { %12171 = vmatmul.mubr.msk.bf16.gmra.mrb[8].mxu1 %vm1629_vm2, %v15204_v42  ;;  %v19730_v31 = vunpack.c.h.bf16 %v15276_v30  ;;  %v19732_v37 = vunpack.c.l.bf16 %v15279_v25  ;;  %v5232_v54 = vsel %vm1114_vm1, %v5229_v14, %v5231_v10  ;;  %v1571_v56 = vpack.c.bf16 %v1159_v24, %v1157_v15  ;;  %v15318_v15 = vld [vmem:[%s15037_s17 + $0xa8] sm:$0xff]  }
  0x33   : > { %12174 = vmatprep.mubr.msk.bf16.mxu1 %vm1629_vm2, %v15252_v39  ;;  %v19735_v7 = vunpack.c.l.bf16 %v15288_v26  ;;  %v19733_v63 = vunpack.c.h.bf16 %v15288_v26  ;;  %v1162_v13 = vsel %vm1114_vm1, %v1160_v61, %v1161_v21  ;;  %v1164_v60 = vsel %vm1114_vm1, %v1161_v21, %v1163_v35  ;;  %v15326_v35 = vld [vmem:[%s15037_s17 + $0xb0] sm:$0x1] }
  0x34   : > { %v19734_v59 = vunpack.c.l.bf16 %v15291_v36  ;;  %v15309_v50 = vpack.c.bf16 %v5232_v54, %v5230_v47  ;;  %v1165_v10 = vrot.slane %v19731_v1, 1  ;;  %v1166_v24 = vrot.slane %v19730_v31, 1  ;;  %v15332_v1 = vld [vmem:[%s15037_s17 + $0xb4] sm:$0xff]  }
  0x35   : > { %12691 = vmatmul.mubr.msk.bf16.gmra.mrb[8].mxu0 %vm1629_vm2, %v15252_v39  ;;  %v1168_v61 = vrot.slane %v19732_v37, 1  ;;  %v1572_v21 = vpack.c.bf16 %v1164_v60, %v1162_v13  ;;  %v1170_v14 = vrot.slane %v19735_v7, 1  ;;  %v1171_v47 = vrot.slane %v19733_v63, 1  ;;  %v15335_v37 = vld [vmem:[%s15037_s17 + $0xbc] sm:$0x1] }
  0x36   : > { %12694 = vmatprep.mubr.msk.bf16.mxu0 %vm1629_vm2, %v15269_v8  ;;  %20156 = vst [vmem:[#allocation14_spill] sm:$0xff] %v15309_v50  ;;  %v1173_v54 = vrot.slane %v19734_v59, 1  ;;  %v19740_v31 = vunpack.c.l.bf16 %v15318_v15  ;;  %v1167_v60 = vsel %vm1114_vm1, %v1165_v10, %v1166_v24  ;;  %v19739_v13 = vunpack.c.h.bf16 %v15318_v15 }
  0x37   : > { %v19741_v63 = vunpack.c.l.bf16 %v15326_v35  ;;  %v1172_v59 = vsel %vm1114_vm1, %v1170_v14, %v1171_v47  ;;  %v19744_v49 = vunpack.c.l.bf16 %v15332_v1  ;;  %v19743_v45 = vunpack.c.h.bf16 %v15332_v1 }
  0x38   : > { %v1174_v7 = vsel %vm1114_vm1, %v1171_v47, %v1173_v54  ;;  %v19745_v10 = vunpack.c.l.bf16 %v15335_v37  ;;  %v1176_v14 = vrot.slane %v19739_v13, 1  ;;  %v15359_v54 = vld [vmem:[%s15037_s17 + $0xc0] sm:$0xff]   ;;  %v20165_v12 = vunpack.c.l.bf16 %v15404_v17  ;;  %v15537_v17 = vld [vmem:[%s15037_s17 + $0x134] sm:$0x1] }
  0x39   : > { %v1178_v47 = vrot.slane %v19741_v63, 1  ;;  %v15363_v44 = vpack.c.bf16 %v1174_v7, %v1172_v59  ;;  %v15378_v63 = vld [vmem:[%s15037_s17 + $0xd4] sm:$0x1]  ;;  %v19753_v43 = vunpack.c.l.bf16 %v15359_v54  ;;  %v19752_v7 = vunpack.c.h.bf16 %v15359_v54  ;;  %20185 = vst [vmem:[#allocation29_spill] sm:$0xff] %v15537_v17 }
  0x3a   : > { %12175 = vmatmul.mubr.msk.bf16.gmra.mrb[12].mxu1 %vm1629_vm2, %v15269_v8  ;;  %v1183_v13 = vrot.slane %v19745_v10, 1  ;;  %v19758_v32 = vunpack.c.l.bf16 %v15378_v63  ;;  %v20172_v42 = vunpack.c.l.bf16 %v15434_v4  ;;  %vm3111_vm3 = vcmask 1045504  }
  0x3b   : > { %12178 = vmatprep.mubr.msk.bf16.mxu1 %vm1629_vm2, %v1571_v56  ;;  %v1169_v56 = vsel %vm1114_vm1, %v1166_v24, %v1168_v61  ;;  %v1175_v61 = vrot.slane %v19740_v31, 1  ;;  %20158 = vst [vmem:[#allocation16_spill] sm:$0xff] %v15363_v44  ;;  %v15375_v31 = vld [vmem:[%s15037_s17 + $0xcc] sm:$0xff]   ;;  %vm14961_vm4 = vmmov (!%p11294_p6), 0  }
  0x3c   : > { %v15349_v24 = vpack.c.bf16 %v1169_v56, %v1167_v60  ;;  %v15366_v60 = vld [vmem:[%s15037_s17 + $0xc8] sm:$0x1]  ;;  %v1181_v56 = vrot.slane %v19743_v45, 1  ;;  %v1179_v45 = vsel %vm1114_vm1, %v1176_v14, %v1178_v47  ;;  %v19756_v10 = vunpack.c.l.bf16 %v15375_v31 }
  0x3d   : > { %12695 = vmatmul.mubr.msk.bf16.gmra.mrb[12].mxu0 %vm1629_vm2, %v15309_v50  ;;  %v1177_v59 = vsel %vm1114_vm1, %v1175_v61, %v1176_v14  ;;  %v19759_v41 = vunpack.c.h.bf16 %v15375_v31  ;;  %v1185_v14 = vrot.slane %v19753_v43, 1  ;;  %v1186_v47 = vrot.slane %v19752_v7, 1  ;;  %v15421_v7 = vld [vmem:[%s15037_s17 + $0xd8] sm:$0xff]   ;;  %v15424_v43 = vld [vmem:[%s15037_s17 + $0xe0] sm:$0x1] }
  0x3e   : > { %12698 = vmatprep.mubr.msk.bf16.mxu0 %vm1629_vm2, %v1572_v21  ;;  %20157 = vst [vmem:[#allocation15_spill] sm:$0xff] %v15349_v24  ;;  %v1184_v27 = vsel %vm1114_vm1, %v1181_v56, %v1183_v13  ;;  %v15394_v61 = vpack.c.bf16 %v1179_v45, %v1177_v59  ;;  %v1193_v59 = vrot.slane %v19758_v32, 1  ;;  %v1203_v20 = vrot.slane %v20172_v42, 1 }
  0x40   : > { %20159 = vst [vmem:[#allocation17_spill] sm:$0xff] %v15394_v61 }
  0x42   : > { %12179 = vmatmul.mubr.msk.bf16.gmra.mrb[16].mxu1 %vm1629_vm2, %v1572_v21  ;;  %v1180_v21 = vrot.slane %v19744_v49, 1  ;;  %v19754_v49 = vunpack.c.l.bf16 %v15366_v60 }
  0x43   : > { %12182 = vmatprep.mubr.msk.bf16.mxu1 %vm1629_vm2, %v15349_v24 }
  0x44   : > { %v1182_v28 = vsel %vm1114_vm1, %v1180_v21, %v1181_v56  ;;  %v1188_v13 = vrot.slane %v19754_v49, 1  ;;  %v1190_v21 = vrot.slane %v19756_v10, 1  ;;  %v1191_v56 = vrot.slane %v19759_v41, 1 }
  0x45   : > { %12699 = vmatmul.mubr.msk.bf16.gmra.mrb[16].mxu0 %vm1629_vm2, %v15349_v24  ;;  %v15412_v45 = vpack.c.bf16 %v1184_v27, %v1182_v28  ;;  %v15430_v28 = vld [vmem:[%s15037_s17 + $0xfc] sm:$0xff]   ;;  %v1187_v10 = vsel %vm1114_vm1, %v1185_v14, %v1186_v47  ;;  %v20164_v41 = vunpack.c.h.bf16 %v15401_v18  ;;  %v1198_v24 = vrot.slane %v20165_v12, 1 }
  0x46   : > { %12702 = vmatprep.mubr.msk.bf16.mxu0 %vm1629_vm2, %v15363_v44  ;;  %v1189_v32 = vsel %vm1114_vm1, %v1186_v47, %v1188_v13  ;;  %v1192_v27 = vsel %vm1114_vm1, %v1190_v21, %v1191_v56  ;;  %v1194_v14 = vsel %vm1114_vm1, %v1191_v56, %v1193_v59  ;;  %v20163_v47 = vunpack.c.l.bf16 %v15401_v18 }
  0x47   : > { %20162 = vst [vmem:[#allocation20_spill] sm:$0xff] %v15412_v45  ;;  %v1196_v49 = vrot.slane %v20164_v41, 1  ;;  %v15455_v8 = vpack.c.bf16 %v1189_v32, %v1187_v10  ;;  %v20167_v21 = vunpack.c.l.bf16 %v15421_v7  ;;  %v20168_v59 = vunpack.c.h.bf16 %v15421_v7 }
  0x48   : > { %v1195_v13 = vrot.slane %v20163_v47, 1  ;;  %v15468_v12 = vpack.c.bf16 %v1194_v14, %v1192_v27  ;;  %v20170_v32 = vunpack.c.l.bf16 %v15424_v43  ;;  %v20171_v50 = vunpack.c.h.bf16 %v15430_v28  ;;  %v15521_v27 = vld [vmem:[%s15037_s17 + $0x120] sm:$0xff]   ;;  %v15525_v14 = vld [vmem:[%s15037_s17 + $0x128] sm:$0x1] }
  0x49   : > { %20166 = vst [vmem:[#allocation21_spill] sm:$0xff] %v15455_v8  ;;  %v5233_v56 = vrot.slane %v20167_v21, 1  ;;  %v5234_v47 = vrot.slane %v20168_v59, 1  ;;  %v15477_v21 = vld [vmem:[%s15037_s17 + $0x110] sm:$0x1]  ;;  %v1199_v39 = vsel %vm1114_vm1, %v1196_v49, %v1198_v24  ;;  %20179 = vst [vmem:[#allocation26_spill] sm:$0xff] %v15521_v27 }
  0x4a   : > { %12183 = vmatmul.mubr.msk.bf16.gmra.mrb[20].mxu1 %vm1629_vm2, %v15363_v44  ;;  %v19770_v44 = vunpack.c.l.bf16 %v15430_v28  ;;  %20169 = vst [vmem:[#allocation22_spill] sm:$0xff] %v15468_v12  ;;  %v5236_v41 = vrot.slane %v20170_v32, 1  ;;  %v1197_v59 = vsel %vm1114_vm1, %v1195_v13, %v1196_v49  ;;  %v15486_v32 = vld [vmem:[%s15037_s17 + $0x114] sm:$0xff]   ;;  %20180 = vst [vmem:[#allocation27_spill] sm:$0xff] %v15525_v14 }
  0x4b   : > { %12186 = vmatprep.mubr.msk.bf16.mxu1 %vm1629_vm2, %v15394_v61  ;;  %20173 = vst [vmem:[#allocation23_spill] sm:$0xff] %v15486_v32  ;;  %v5235_v49 = vsel %vm1114_vm1, %v5233_v56, %v5234_v47  ;;  %v1579_v24 = vpack.c.bf16 %v1199_v39, %v1197_v59  ;;  %v20183_v53 = vunpack.c.h.bf16 %v15486_v32 }
  0x4c   : > { %v1200_v10 = vrot.slane %v19770_v44, 1  ;;  %v5237_v42 = vsel %vm1114_vm1, %v5234_v47, %v5236_v41  ;;  %v15502_v44 = vld [vmem:[%s19701_s2 + $0xc] sm:$0x3] }
  0x4d   : > { %12703 = vmatmul.mubr.msk.bf16.gmra.mrb[20].mxu0 %vm1629_vm2, %v15394_v61  ;;  %v15464_v61 = vld [vmem:[%s15037_s17 + $0x108] sm:$0xff]   ;;  %14537 = vmatprep.subr.msk.bf16.mxu0 %vm1822_vm0, %v15502_v44 }
  0x4e   : > { %12706 = vmatprep.mubr.msk.bf16.mxu0 %vm1629_vm2, %v15412_v45  ;;  %v20175_v39 = vunpack.c.l.bf16 %v15464_v61  ;;  %v20176_v41 = vunpack.c.h.bf16 %v15464_v61 }
  0x50   : > { %v1205_v47 = vrot.slane %v20175_v39, 1  ;;  %v20182_v39 = vunpack.c.l.bf16 %v15486_v32  ;;  %v15850_v32 = vld [vmem:[%s15037_s17 + $0x1f4] sm:$0x1] }
  0x52   : > { %12187 = vmatmul.mubr.msk.bf16.gmra.mrb[24].mxu1 %vm1629_vm2, %v15412_v45  ;;  %v1201_v45 = vrot.slane %v20171_v50, 1 }
  0x53   : > { %12190 = vmatprep.mubr.msk.bf16.mxu1 %vm1629_vm2, %v15455_v8 }
  0x54   : > { %v1202_v13 = vsel %vm1114_vm1, %v1200_v10, %v1201_v45  ;;  %v1204_v50 = vsel %vm1114_vm1, %v1201_v45, %v1203_v20  ;;  %v1206_v10 = vrot.slane %v20176_v41, 1  ;;  %v15516_v20 = vpack.c.bf16 %v5237_v42, %v5235_v49 }
  0x55   : > { %12707 = vmatmul.mubr.msk.bf16.gmra.mrb[24].mxu0 %vm1629_vm2, %v15455_v8  ;;  %v20178_v45 = vunpack.c.l.bf16 %v15477_v21  ;;  %v1580_v56 = vpack.c.bf16 %v1204_v50, %v1202_v13  ;;  %v15528_v8 = vld [vmem:[%s15037_s17 + $0x12c] sm:$0xff]   ;;  %v1210_v41 = vrot.slane %v20182_v39, 1  ;;  %v20184_v49 = vunpack.c.l.bf16 %v15489_v5 }
  0x56   : > { %12710 = vmatprep.mubr.msk.bf16.mxu0 %vm1629_vm2, %v15468_v12  ;;  %20177 = vst [vmem:[#allocation25_spill] sm:$0xff] %v15516_v20  ;;  %20181 = vst [vmem:[#allocation28_spill] sm:$0xff] %v15528_v8 }
  0x57   : > { %v1208_v59 = vrot.slane %v20178_v45, 1  ;;  %v1213_v42 = vrot.slane %v20184_v49, 1  ;;  %v1207_v45 = vsel %vm1114_vm1, %v1205_v47, %v1206_v10  ;;  %v20189_v49 = vunpack.c.l.bf16 %v15525_v14 }
  0x58   : > { %v20190_v47 = vunpack.c.l.bf16 %v15528_v8 }
  0x59   : > { %v1209_v13 = vsel %vm1114_vm1, %v1206_v10, %v1208_v59  ;;  %v20187_v10 = vunpack.c.l.bf16 %v15521_v27  ;;  %v1218_v18 = vrot.slane %v20189_v49, 1  ;;  %v15581_v49 = vld [vmem:[%s15037_s17 + $0x14c] sm:$0x1] }
  0x5a   : > { %12191 = vmatmul.mubr.msk.bf16.gmra.mrb[28].mxu1 %vm1629_vm2, %v15468_v12  ;;  %v1211_v12 = vrot.slane %v20183_v53, 1  ;;  %v20188_v53 = vunpack.c.h.bf16 %v15521_v27  ;;  %v1220_v58 = vrot.slane %v20190_v47, 1  ;;  %20197 = vst [vmem:[#allocation35_spill] sm:$0xff] %v15581_v49  ;;  %v2564_v47 = vsel %vm1822_vm0, %v15250_v48, 0 }
  0x5b   : > { %12194 = vmatprep.mubr.msk.bf16.mxu1 %vm1629_vm2, %v1579_v24  ;;  %v1215_v59 = vrot.slane %v20187_v10, 1  ;;  %12291 = vmatpush3.bf16.msra.mxu1 %v2564_v47 }
  0x5c   : > { %v1212_v50 = vsel %vm1114_vm1, %v1210_v41, %v1211_v12  ;;  %v1214_v24 = vsel %vm1114_vm1, %v1211_v12, %v1213_v42  ;;  %v1216_v39 = vrot.slane %v20188_v53, 1  ;;  %v20191_v41 = vunpack.c.h.bf16 %v15528_v8  ;;  %v15566_v12 = vld [vmem:[%s15037_s17 + $0x138] sm:$0xff]   ;;  %v15578_v53 = vld [vmem:[%s15037_s17 + $0x144] sm:$0xff]  }
  0x5d   : > { %12711 = vmatmul.mubr.msk.bf16.gmra.mrb[28].mxu0 %vm1629_vm2, %v15516_v20  ;;  %v15552_v20 = vpack.c.bf16 %v1209_v13, %v1207_v45  ;;  %20192 = vst [vmem:[#allocation31_spill] sm:$0xff] %v15566_v12  ;;  %v15570_v42 = vpack.c.bf16 %v1214_v24, %v1212_v50  ;;  %v20194_v45 = vunpack.c.l.bf16 %v15537_v17  ;;  %20196 = vst [vmem:[#allocation34_spill] sm:$0xff] %v15578_v53  ;;  %v15639_v8 = vld [vmem:[%s15037_s17 + $0x17c] sm:$0x1] }
  0x5e   : > { %12714 = vmatprep.mubr.msk.bf16.mxu0 %vm1629_vm2, %v1580_v56  ;;  %v1221_v40 = vrot.slane %v20191_v41, 1  ;;  %v1217_v10 = vsel %vm1114_vm1, %v1215_v59, %v1216_v39  ;;  %v1219_v24 = vsel %vm1114_vm1, %v1216_v39, %v1218_v18  ;;  %v15600_v18 = vld [vmem:[%s15037_s17 + $0x168] sm:$0xff]   ;;  %v15605_v39 = vld [vmem:[%s15037_s17 + $0x170] sm:$0x1]  ;;  %20210 = vst [vmem:[#allocation43_spill] sm:$0xff] %v15639_v8 }
  0x5f   : > { %20186 = vst [vmem:[#allocation30_spill] sm:$0xff] %v15552_v20  ;;  %20193 = vst [vmem:[#allocation32_spill] sm:$0xff] %v15570_v42  ;;  %v1223_v13 = vrot.slane %v20194_v45, 1  ;;  %v19786_v45 = vunpack.c.h.bf16 %v15566_v12 }
  0x60   : > { %v1222_v50 = vsel %vm1114_vm1, %v1220_v58, %v1221_v40  ;;  %20198 = vst [vmem:[#allocation36_spill] sm:$0xff] %v15600_v18  ;;  %v15602_v58 = vpack.c.bf16 %v1219_v24, %v1217_v10  ;;  %20200 = vst [vmem:[#allocation38_spill] sm:$0xff] %v15605_v39  ;;  %v15618_v10 = vld [vmem:[%s15037_s17 + $0x150] sm:$0xff]   ;;  %v20205_v24 = vunpack.c.l.bf16 %v15578_v53 }
  0x61   : > { %v1224_v48 = vsel %vm1114_vm1, %v1221_v40, %v1223_v13  ;;  %v20202_v40 = vunpack.c.l.bf16 %v15566_v12  ;;  %v1226_v47 = vrot.slane %v19786_v45, 1  ;;  %20204 = vst [vmem:[#allocation40_spill] sm:$0xff] %v15618_v10  ;;  %v15635_v12 = vld [vmem:[%s15037_s17 + $0x174] sm:$0xff]  }
  0x62   : > { %12195 = vmatmul.mubr.msk.bf16.gmra.mrb[32].mxu1 %vm1629_vm2, %v1580_v56  ;;  %v15575_v56 = vld [vmem:[%s15037_s17 + $0x140] sm:$0x1]  ;;  %20199 = vst [vmem:[#allocation37_spill] sm:$0xff] %v15602_v58  ;;  %v15609_v6 = vpack.c.bf16 %v1224_v48, %v1222_v50  ;;  %v20206_v50 = vunpack.c.h.bf16 %v15578_v53  ;;  %20209 = vst [vmem:[#allocation42_spill] sm:$0xff] %v15635_v12 }
  0x63   : > { %12198 = vmatprep.mubr.msk.bf16.mxu1 %vm1629_vm2, %v15552_v20  ;;  %20195 = vst [vmem:[#allocation33_spill] sm:$0xff] %v15575_v56  ;;  %v1225_v13 = vrot.slane %v20202_v40, 1  ;;  %v20203_v41 = vunpack.c.l.bf16 %v15575_v56 }
  0x64   : > { %20201 = vst [vmem:[#allocation39_spill] sm:$0xff] %v15609_v6  ;;  %v1231_v48 = vrot.slane %v20206_v50, 1  ;;  %v20213_v50 = vunpack.c.l.bf16 %v15605_v39 }
  0x65   : > { %12715 = vmatmul.mubr.msk.bf16.gmra.mrb[32].mxu0 %vm1629_vm2, %v15552_v20  ;;  %v1228_v59 = vrot.slane %v20203_v41, 1  ;;  %v20207_v20 = vunpack.c.l.bf16 %v15581_v49  ;;  %v20211_v41 = vunpack.c.l.bf16 %v15600_v18  ;;  %v20218_v49 = vunpack.c.l.bf16 %v15629_v3 }
  0x66   : > { %12718 = vmatprep.mubr.msk.bf16.mxu0 %vm1629_vm2, %v15570_v42  ;;  %v1238_v45 = vrot.slane %v20213_v50, 1  ;;  %v20217_v50 = vunpack.c.h.bf16 %v15618_v10 }
  0x67   : > { %v1233_v40 = vrot.slane %v20207_v20, 1  ;;  %v1229_v20 = vsel %vm1114_vm1, %v1226_v47, %v1228_v59  ;;  %v20212_v59 = vunpack.c.h.bf16 %v15600_v18  ;;  %v20222_v18 = vunpack.c.l.bf16 %v15639_v8  ;;  %v15737_v8 = vld [vmem:[%s15037_s17 + $0x1ac] sm:$0x1] }
  0x68   : > { %20235 = vst [vmem:[#allocation54_spill] sm:$0xff] %v15737_v8 }
  0x69   : > { %v1234_v17 = vsel %vm1114_vm1, %v1231_v48, %v1233_v40 }
  0x6a   : > { %12199 = vmatmul.mubr.msk.bf16.gmra.mrb[36].mxu1 %vm1629_vm2, %v15570_v42  ;;  %v1230_v42 = vrot.slane %v20205_v24, 1  ;;  %v1227_v24 = vsel %vm1114_vm1, %v1225_v13, %v1226_v47  ;;  %v19803_v13 = vunpack.c.l.bf16 %v15635_v12  ;;  %v1236_v47 = vrot.slane %v20212_v59, 1 }
  0x6b   : > { %12202 = vmatprep.mubr.msk.bf16.mxu1 %vm1629_vm2, %v15602_v58  ;;  %v15660_v53 = vpack.c.bf16 %v1229_v20, %v1227_v24  ;;  %v5239_v59 = vrot.slane %v20217_v50, 1  ;;  %v15677_v20 = vld [vmem:[%s15037_s17 + $0x180] sm:$0xff]   ;;  %v1243_v50 = vrot.slane %v20222_v18, 1 }
  0x6c   : > { %v1232_v56 = vsel %vm1114_vm1, %v1230_v42, %v1231_v48  ;;  %v20215_v48 = vunpack.c.l.bf16 %v15618_v10  ;;  %v5241_v42 = vrot.slane %v20218_v49, 1  ;;  %v1240_v24 = vrot.slane %v19803_v13, 1  ;;  %20219 = vst [vmem:[#allocation46_spill] sm:$0xff] %v15677_v20  ;;  %v15689_v10 = vld [vmem:[%s15037_s17 + $0x18c] sm:$0xff]   ;;  %v15692_v49 = vld [vmem:[%s15037_s17 + $0x194] sm:$0x1] }
  0x6d   : > { %12719 = vmatmul.mubr.msk.bf16.gmra.mrb[36].mxu0 %vm1629_vm2, %v15602_v58  ;;  %v1235_v58 = vrot.slane %v20211_v41, 1  ;;  %20214 = vst [vmem:[#allocation44_spill] sm:$0xff] %v15660_v53  ;;  %v15668_v41 = vpack.c.bf16 %v1234_v17, %v1232_v56  ;;  %v1239_v39 = vsel %vm1114_vm1, %v1236_v47, %v1238_v45  ;;  %v20221_v17 = vunpack.c.h.bf16 %v15635_v12  ;;  %20223 = vst [vmem:[#allocation48_spill] sm:$0xff] %v15689_v10  ;;  %v15723_v45 = vld [vmem:[%s15037_s17 + $0x1a0] sm:$0x1] }
  0x6e   : > { %12722 = vmatprep.mubr.msk.bf16.mxu0 %vm1629_vm2, %v15609_v6  ;;  %v5238_v40 = vrot.slane %v20215_v48, 1  ;;  %20224 = vst [vmem:[#allocation49_spill] sm:$0xff] %v15692_v49  ;;  %v5242_v18 = vsel %vm1114_vm1, %v5239_v59, %v5241_v42  ;;  %v20226_v42 = vunpack.c.l.bf16 %v15677_v20  ;;  %20230 = vst [vmem:[#allocation52_spill] sm:$0xff] %v15723_v45  ;;  %v20231_v3 = vunpack.c.l.bf16 %v15689_v10 }
  0x6f   : > { %20216 = vst [vmem:[#allocation45_spill] sm:$0xff] %v15668_v41  ;;  %v1237_v48 = vsel %vm1114_vm1, %v1235_v58, %v1236_v47  ;;  %v1241_v56 = vrot.slane %v20221_v17, 1 }
  0x70   : > { %v5240_v58 = vsel %vm1114_vm1, %v5238_v40, %v5239_v59  ;;  %v1587_v47 = vpack.c.bf16 %v1239_v39, %v1237_v48  ;;  %v1245_v39 = vrot.slane %v20226_v42, 1  ;;  %v20227_v59 = vunpack.c.h.bf16 %v15677_v20 }
  0x71   : > { %v1244_v13 = vsel %vm1114_vm1, %v1241_v56, %v1243_v50  ;;  %v15710_v40 = vpack.c.bf16 %v5242_v18, %v5240_v58  ;;  %v1250_v58 = vrot.slane %v20231_v3, 1  ;;  %v20232_v18 = vunpack.c.h.bf16 %v15689_v10 }
  0x72   : > { %12203 = vmatmul.mubr.msk.bf16.gmra.mrb[40].mxu1 %vm1629_vm2, %v15609_v6  ;;  %v15680_v6 = vld [vmem:[%s15037_s17 + $0x188] sm:$0x1]  ;;  %v1246_v48 = vrot.slane %v20227_v59, 1  ;;  %v20233_v42 = vunpack.c.l.bf16 %v15692_v49 }
  0x73   : > { %12206 = vmatprep.mubr.msk.bf16.mxu1 %vm1629_vm2, %v15660_v53  ;;  %20220 = vst [vmem:[#allocation47_spill] sm:$0xff] %v15680_v6  ;;  %20225 = vst [vmem:[#allocation50_spill] sm:$0xff] %v15710_v40  ;;  %v15732_v59 = vld [vmem:[%s15037_s17 + $0x1a4] sm:$0xff]  }
  0x74   : > { %v1253_v20 = vrot.slane %v20233_v42, 1  ;;  %20234 = vst [vmem:[#allocation53_spill] sm:$0xff] %v15732_v59  ;;  %v1247_v3 = vsel %vm1114_vm1, %v1245_v39, %v1246_v48 }
  0x75   : > { %12723 = vmatmul.mubr.msk.bf16.gmra.mrb[40].mxu0 %vm1629_vm2, %v15660_v53  ;;  %v1242_v53 = vsel %vm1114_vm1, %v1240_v24, %v1241_v56  ;;  %v20228_v24 = vunpack.c.l.bf16 %v15680_v6  ;;  %v15719_v56 = vld [vmem:[%s15037_s17 + $0x198] sm:$0xff]   ;;  %v19818_v6 = vunpack.c.h.bf16 %v15732_v59 }
  0x76   : > { %12726 = vmatprep.mubr.msk.bf16.mxu0 %vm1629_vm2, %v15668_v41  ;;  %20229 = vst [vmem:[#allocation51_spill] sm:$0xff] %v15719_v56  ;;  %v1588_v50 = vpack.c.bf16 %v1244_v13, %v1242_v53 }
  0x77   : > { %v1248_v17 = vrot.slane %v20228_v24, 1  ;;  %v19820_v24 = vunpack.c.l.bf16 %v15737_v8 }
  0x79   : > { %v1249_v53 = vsel %vm1114_vm1, %v1246_v48, %v1248_v17  ;;  %v20237_v17 = vunpack.c.l.bf16 %v15719_v56  ;;  %v20238_v48 = vunpack.c.h.bf16 %v15719_v56 }
  0x7a   : > { %12207 = vmatmul.mubr.msk.bf16.gmra.mrb[44].mxu1 %vm1629_vm2, %v15668_v41  ;;  %v1251_v41 = vrot.slane %v20232_v18, 1 }
  0x7b   : > { %12210 = vmatprep.mubr.msk.bf16.mxu1 %vm1629_vm2, %v1587_v47  ;;  %v1255_v39 = vrot.slane %v20237_v17, 1  ;;  %v1256_v13 = vrot.slane %v20238_v48, 1  ;;  %v20239_v47 = vunpack.c.l.bf16 %v15723_v45  ;;  %v20245_v17 = vunpack.c.l.bf16 %v15732_v59 }
  0x7c   : > { %v1252_v18 = vsel %vm1114_vm1, %v1250_v58, %v1251_v41  ;;  %v1254_v42 = vsel %vm1114_vm1, %v1251_v41, %v1253_v20  ;;  %v15760_v58 = vld [vmem:[%s15037_s17 + $0x1b0] sm:$0xff]   ;;  %v15763_v41 = vld [vmem:[%s15037_s17 + $0x1b8] sm:$0x1] }
  0x7d   : > { %12727 = vmatmul.mubr.msk.bf16.gmra.mrb[44].mxu0 %vm1629_vm2, %v15710_v40  ;;  %v15750_v40 = vpack.c.bf16 %v1249_v53, %v1247_v3  ;;  %v1258_v49 = vrot.slane %v20239_v47, 1  ;;  %20240 = vst [vmem:[#allocation56_spill] sm:$0xff] %v15760_v58  ;;  %20241 = vst [vmem:[#allocation57_spill] sm:$0xff] %v15763_v41  ;;  %v15767_v20 = vpack.c.bf16 %v1254_v42, %v1252_v18  ;;  %v15770_v3 = vld [vmem:[%s15037_s17 + $0x1bc] sm:$0xff]   ;;  %v15773_v53 = vld [vmem:[%s15037_s17 + $0x1c4] sm:$0x1]  ;;  %v20250_v8 = vunpack.c.l.bf16 %v15760_v58 }
  0x7e   : > { %12730 = vmatprep.mubr.msk.bf16.mxu0 %vm1629_vm2, %v1588_v50  ;;  %20243 = vst [vmem:[#allocation59_spill] sm:$0xff] %v15770_v3  ;;  %20244 = vst [vmem:[#allocation60_spill] sm:$0xff] %v15773_v53  ;;  %v1260_v48 = vrot.slane %v20245_v17, 1  ;;  %v1263_v47 = vrot.slane %v19820_v24, 1  ;;  %v1257_v45 = vsel %vm1114_vm1, %v1255_v39, %v1256_v13  ;;  %v20246_v39 = vunpack.c.l.bf16 %v15061_v9  ;;  %v15798_v18 = vld [vmem:[%s15037_s17 + $0x1e0] sm:$0xff]  }
  0x7f   : > { %20236 = vst [vmem:[#allocation55_spill] sm:$0xff] %v15750_v40  ;;  %20242 = vst [vmem:[#allocation58_spill] sm:$0xff] %v15767_v20  ;;  %v1259_v17 = vsel %vm1114_vm1, %v1256_v13, %v1258_v49  ;;  %v15801_v49 = vld [vmem:[%s15037_s17 + $0x1e8] sm:$0x1]  ;;  %v20251_v59 = vunpack.c.h.bf16 %v15760_v58 }
  0x80   : > { %v3117_v24 = vrot.slane %v20246_v39, 2  ;;  %20247 = vst [vmem:[#allocation61_spill] sm:$0xff] %v15798_v18  ;;  %20248 = vst [vmem:[#allocation62_spill] sm:$0xff] %v15801_v49  ;;  %v15803_v13 = vpack.c.bf16 %v1259_v17, %v1257_v45  ;;  %v20252_v39 = vunpack.c.l.bf16 %v15763_v41  ;;  %v15822_v58 = vld [vmem:[%s15037_s17 + $0x1c8] sm:$0xff]   ;;  %v20260_v41 = vunpack.c.h.bf16 %v15082_v19 }
  0x82   : > { %12211 = vmatmul.mubr.msk.bf16.gmra.mrb[48].mxu1 %vm1629_vm2, %v1588_v50  ;;  %v1261_v50 = vrot.slane %v19818_v6, 1  ;;  %20249 = vst [vmem:[#allocation63_spill] sm:$0xff] %v15803_v13  ;;  %v1265_v6 = vrot.slane %v20250_v8, 1  ;;  %v1268_v10 = vrot.slane %v20252_v39, 1  ;;  %v20256_v8 = vunpack.c.l.bf16 %v15773_v53 }
  0x83   : > { %12214 = vmatprep.mubr.msk.bf16.mxu1 %vm1629_vm2, %v15750_v40  ;;  %v20259_v53 = vunpack.c.l.bf16 %v15082_v19 }
  0x84   : > { %v1262_v56 = vsel %vm1114_vm1, %v1260_v48, %v1261_v50  ;;  %v1264_v42 = vsel %vm1114_vm1, %v1261_v50, %v1263_v47  ;;  %v20253_v48 = vunpack.c.h.bf16 %v15061_v9  ;;  %v20254_v50 = vunpack.c.l.bf16 %v15770_v3 }
  0x85   : > { %12731 = vmatmul.mubr.msk.bf16.gmra.mrb[48].mxu0 %vm1629_vm2, %v15750_v40  ;;  %v1266_v40 = vrot.slane %v20251_v59, 1  ;;  %v20255_v47 = vunpack.c.h.bf16 %v15770_v3  ;;  %v1273_v14 = vrot.slane %v20256_v8, 1  ;;  %v15826_v9 = vpack.c.bf16 %v1264_v42, %v1262_v56  ;;  %v15829_v59 = vld [vmem:[%s15037_s17 + $0x1d0] sm:$0x1] }
  0x86   : > { %12734 = vmatprep.mubr.msk.bf16.mxu0 %vm1629_vm2, %v15767_v20  ;;  %v3118_v12 = vrot.slane %v20253_v48, 2  ;;  %v1270_v45 = vrot.slane %v20254_v50, 1  ;;  %v20258_v8 = vunpack.c.l.bf16 %v15066_v11  ;;  %v3122_v3 = vrot.slane %v20259_v53, 2 }
  0x87   : > { %v1271_v17 = vrot.slane %v20255_v47, 1  ;;  %20257 = vst [vmem:[#allocation64_spill] sm:$0xff] %v15826_v9  ;;  %v15835_v47 = vld [vmem:[%s15037_s17 + $0x1ec] sm:$0xff]   ;;  %v3123_v56 = vrot.slane %v20260_v41, 2  ;;  %v20261_v42 = vunpack.c.l.bf16 %v15088_v22  ;;  %v1267_v39 = vsel %vm1114_vm1, %v1265_v6, %v1266_v40 }
  0x88   : > { %v1269_v48 = vsel %vm1114_vm1, %v1266_v40, %v1268_v10  ;;  %v19839_v50 = vunpack.c.l.bf16 %v15822_v58  ;;  %v20262_v6 = vunpack.c.l.bf16 %v15798_v18  ;;  %v20263_v40 = vunpack.c.h.bf16 %v15798_v18  ;;  %v15976_v18 = vld [vmem:[%s15037_s17 + $0x228] sm:$0xff]  }
  0x89   : > { %v3125_v27 = vrot.slane %v20261_v42, 2  ;;  %v1272_v11 = vsel %vm1114_vm1, %v1270_v45, %v1271_v17  ;;  %v1274_v19 = vsel %vm1114_vm1, %v1271_v17, %v1273_v14  ;;  %v3119_v17 = vsel %vm3111_vm3, %v3117_v24, %v3118_v12  ;;  %v15883_v24 = vld [vmem:[%s15037_s17 + $0x1f8] sm:$0xff]   ;;  %20287 = vst [vmem:[#allocation79_spill] sm:$0xff] %v15976_v18 }
  0x8a   : > { %12215 = vmatmul.mubr.msk.bf16.gmra.mrb[52].mxu1 %vm1629_vm2, %v15767_v20  ;;  %v3120_v20 = vrot.slane %v20258_v8, 2  ;;  %v1275_v10 = vrot.slane %v20262_v6, 1  ;;  %v1276_v53 = vrot.slane %v20263_v40, 1  ;;  %v20264_v8 = vunpack.c.l.bf16 %v15801_v49  ;;  %20269 = vst [vmem:[#allocation67_spill] sm:$0xff] %v15883_v24  ;;  %v15903_v49 = vld [vmem:[%s15037_s17 + $0x204] sm:$0xff]  }
  0x8b   : > { %12218 = vmatprep.mubr.msk.bf16.mxu1 %vm1629_vm2, %v15803_v13  ;;  %v15870_v22 = vpack.c.bf16 %v1269_v48, %v1267_v39  ;;  %v5243_v6 = vrot.slane %v19839_v50, 1  ;;  %v20267_v40 = vunpack.c.h.bf16 %v15822_v58  ;;  %v20268_v45 = vunpack.c.l.bf16 %v15829_v59  ;;  %20275 = vst [vmem:[#allocation70_spill] sm:$0xff] %v15903_v49 }
  0x8c   : > { %v1278_v42 = vrot.slane %v20264_v8, 1  ;;  %v3121_v41 = vsel %vm3111_vm3, %v3118_v12, %v3120_v20  ;;  %v3124_v12 = vsel %vm3111_vm3, %v3122_v3, %v3123_v56  ;;  %v15888_v20 = vpack.c.bf16 %v1274_v19, %v1272_v11 }
  0x8d   : > { %12735 = vmatmul.mubr.msk.bf16.gmra.mrb[52].mxu0 %vm1629_vm2, %v15803_v13  ;;  %20265 = vst [vmem:[#allocation65_spill] sm:$0xff] %v15870_v22  ;;  %v15872_v5 = vpack.c.bf16 %v3121_v41, %v3119_v17  ;;  %v5244_v8 = vrot.slane %v20267_v40, 1  ;;  %v5246_v14 = vrot.slane %v20268_v45, 1  ;;  %v1277_v39 = vsel %vm1114_vm1, %v1275_v10, %v1276_v53  ;;  %v15894_v17 = vld [vmem:[%s15037_s17 + $0x200] sm:$0x1] }
  0x8e   : > { %12738 = vmatprep.mubr.msk.bf16.mxu0 %vm1629_vm2, %v15826_v9  ;;  %20270 = vst [vmem:[#allocation68_spill] sm:$0xff] %v15888_v20  ;;  %v20271_v48 = vunpack.c.l.bf16 %v15835_v47  ;;  %20272 = vst [vmem:[#allocation69_spill] sm:$0xff] %v15894_v17  ;;  %v3126_v40 = vsel %vm3111_vm3, %v3123_v56, %v3125_v27  ;;  %v1279_v45 = vsel %vm1114_vm1, %v1276_v53, %v1278_v42  ;;  %v20273_v50 = vunpack.c.h.bf16 %v15835_v47 }
  0x8f   : > { %20266 = vst [vmem:[#allocation66_spill] sm:$0xff] %v15872_v5  ;;  %v20274_v3 = vunpack.c.l.bf16 %v15850_v32  ;;  %v15905_v11 = vpack.c.bf16 %v3126_v40, %v3124_v12  ;;  %v19844_v19 = vunpack.c.l.bf16 %v15883_v24  ;;  %v5247_v56 = vsel %vm1114_vm1, %v5244_v8, %v5246_v14 }
  0x90   : > { %v1280_v41 = vrot.slane %v20271_v48, 1  ;;  %v15910_v48 = vld [vmem:[%s15037_s17 + $0x20c] sm:$0x1]  ;;  %v1595_v53 = vpack.c.bf16 %v1279_v45, %v1277_v39  ;;  %v19847_v42 = vunpack.c.l.bf16 %v15903_v49 }
  0x91   : > { %v1283_v13 = vrot.slane %v20274_v3, 1  ;;  %20276 = vst [vmem:[#allocation71_spill] sm:$0xff] %v15905_v11  ;;  %20277 = vst [vmem:[#allocation72_spill] sm:$0xff] %v15910_v48  ;;  %v19845_v3 = vunpack.c.h.bf16 %v15903_v49  ;;  %v19846_v27 = vunpack.c.l.bf16 %v15910_v48  ;;  %v1285_v10 = vrot.slane %v19844_v19, 1  ;;  %v15951_v19 = vld [vmem:[%s15037_s17 + $0x224] sm:$0x1] }
  0x92   : > { %12219 = vmatmul.mubr.msk.bf16.gmra.mrb[56].mxu1 %vm1629_vm2, %v15826_v9  ;;  %v1281_v9 = vrot.slane %v20273_v50, 1  ;;  %v5245_v50 = vsel %vm1114_vm1, %v5243_v6, %v5244_v8  ;;  %v20278_v6 = vunpack.c.h.bf16 %v15883_v24  ;;  %v20280_v8 = vunpack.c.l.bf16 %v15894_v17  ;;  %20284 = vst [vmem:[#allocation77_spill] sm:$0xff] %v15951_v19  ;;  %v16051_v48 = vld [vmem:[%s15037_s17 + $0x26c] sm:$0x1] }
  0x93   : > { %12222 = vmatprep.mubr.msk.bf16.mxu1 %vm1629_vm2, %v15870_v22  ;;  %v15930_v14 = vpack.c.bf16 %v5247_v56, %v5245_v50  ;;  %v1290_v45 = vrot.slane %v19847_v42, 1  ;;  %v1293_v50 = vrot.slane %v19846_v27, 1  ;;  %v15948_v56 = vld [vmem:[%s15037_s17 + $0x21c] sm:$0xff]   ;;  %20306 = vst [vmem:[#allocation91_spill] sm:$0xff] %v16051_v48 }
  0x94   : > { %v1282_v12 = vsel %vm1114_vm1, %v1280_v41, %v1281_v9  ;;  %v1284_v40 = vsel %vm1114_vm1, %v1281_v9, %v1283_v13  ;;  %v1288_v39 = vrot.slane %v20280_v8, 1  ;;  %v15936_v9 = vld [vmem:[%s15037_s17 + $0x210] sm:$0xff]   ;;  %v15939_v41 = vld [vmem:[%s15037_s17 + $0x218] sm:$0x1]  ;;  %20283 = vst [vmem:[#allocation76_spill] sm:$0xff] %v15948_v56 }
  0x95   : > { %12739 = vmatmul.mubr.msk.bf16.gmra.mrb[56].mxu0 %vm1629_vm2, %v15870_v22  ;;  %v1286_v22 = vrot.slane %v20278_v6, 1  ;;  %20279 = vst [vmem:[#allocation73_spill] sm:$0xff] %v15930_v14  ;;  %v1596_v13 = vpack.c.bf16 %v1284_v40, %v1282_v12  ;;  %20281 = vst [vmem:[#allocation74_spill] sm:$0xff] %v15936_v9  ;;  %v1291_v6 = vrot.slane %v19845_v3, 1  ;;  %v19853_v40 = vunpack.c.l.bf16 %v15936_v9 }
  0x96   : > { %12742 = vmatprep.mubr.msk.bf16.mxu0 %vm1629_vm2, %v15888_v20  ;;  %20282 = vst [vmem:[#allocation75_spill] sm:$0xff] %v15939_v41  ;;  %v19852_v8 = vunpack.c.h.bf16 %v15936_v9  ;;  %v20286_v42 = vunpack.c.l.bf16 %v15939_v41  ;;  %v16038_v9 = vld [vmem:[%s15037_s17 + $0x240] sm:$0xff]  }
  0x97   : > { %v1289_v12 = vsel %vm1114_vm1, %v1286_v22, %v1288_v39  ;;  %v1295_v3 = vrot.slane %v19853_v40, 1  ;;  %v15995_v40 = vld [vmem:[%s15037_s17 + $0x23c] sm:$0x1]  ;;  %20303 = vst [vmem:[#allocation88_spill] sm:$0xff] %v16038_v9 }
  0x98   : > { %v1296_v27 = vrot.slane %v19852_v8, 1  ;;  %v15989_v8 = vld [vmem:[%s15037_s17 + $0x230] sm:$0x1]  ;;  %20293 = vst [vmem:[#allocation83_spill] sm:$0xff] %v15995_v40 }
  0x99   : > { %20291 = vst [vmem:[#allocation81_spill] sm:$0xff] %v15989_v8 }
  0x9a   : > { %12223 = vmatmul.mubr.msk.bf16.gmra.mrb[60].mxu1 %vm1629_vm2, %v15888_v20  ;;  %v1298_v20 = vrot.slane %v20286_v42, 1  ;;  %v15992_v42 = vld [vmem:[%s15037_s17 + $0x234] sm:$0xff]  }
  0x9b   : > { %12226 = vmatprep.mubr.msk.bf16.mxu1 %vm1629_vm2, %v1595_v53  ;;  %v1287_v53 = vsel %vm1114_vm1, %v1285_v10, %v1286_v22  ;;  %v19855_v10 = vunpack.c.l.bf16 %v15951_v19  ;;  %v1294_v22 = vsel %vm1114_vm1, %v1291_v6, %v1293_v50  ;;  %20292 = vst [vmem:[#allocation82_spill] sm:$0xff] %v15992_v42 }
  0x9c   : > { %v15966_v39 = vpack.c.bf16 %v1289_v12, %v1287_v53 }
  0x9d   : > { %12743 = vmatmul.mubr.msk.bf16.gmra.mrb[60].mxu0 %vm1629_vm2, %v15930_v14  ;;  %v1292_v14 = vsel %vm1114_vm1, %v1290_v45, %v1291_v6  ;;  %v20289_v6 = vunpack.c.l.bf16 %v15948_v56  ;;  %v1303_v12 = vrot.slane %v19855_v10, 1 }
  0x9e   : > { %12746 = vmatprep.mubr.msk.bf16.mxu0 %vm1629_vm2, %v1596_v13  ;;  %20285 = vst [vmem:[#allocation78_spill] sm:$0xff] %v15966_v39  ;;  %v15980_v45 = vpack.c.bf16 %v1294_v22, %v1292_v14  ;;  %v1297_v22 = vsel %vm1114_vm1, %v1295_v3, %v1296_v27  ;;  %v19867_v14 = vunpack.c.h.bf16 %v15992_v42  ;;  %v16012_v3 = vld [vmem:[%s15037_s17 + $0x258] sm:$0xff]  }
  0x9f   : > { %v1300_v50 = vrot.slane %v20289_v6, 1  ;;  %v1299_v6 = vsel %vm1114_vm1, %v1296_v27, %v1298_v20  ;;  %20294 = vst [vmem:[#allocation84_spill] sm:$0xff] %v16012_v3  ;;  %v20296_v27 = vunpack.c.l.bf16 %v15976_v18 }
  0xa0   : > { %20288 = vst [vmem:[#allocation80_spill] sm:$0xff] %v15980_v45  ;;  %v16014_v20 = vpack.c.bf16 %v1299_v6, %v1297_v22  ;;  %v20301_v22 = vunpack.c.l.bf16 %v15992_v42 }
  0xa1   : > { %v1305_v10 = vrot.slane %v20296_v27, 1  ;;  %v20302_v27 = vunpack.c.l.bf16 %v15995_v40 }
  0xa2   : > { %12227 = vmatmul.mubr.msk.bf16.gmra.mrb[64].mxu1 %vm1629_vm2, %v1596_v13  ;;  %v20290_v13 = vunpack.c.h.bf16 %v15948_v56  ;;  %20295 = vst [vmem:[#allocation85_spill] sm:$0xff] %v16014_v20  ;;  %v1310_v6 = vrot.slane %v20301_v22, 1 }
  0xa3   : > { %12230 = vmatprep.mubr.msk.bf16.mxu1 %vm1629_vm2, %v15966_v39 }
  0xa4   : > { %v1301_v53 = vrot.slane %v20290_v13, 1  ;;  %v20297_v13 = vunpack.c.h.bf16 %v15976_v18  ;;  %v1313_v18 = vrot.slane %v20302_v27, 1 }
  0xa5   : > { %12747 = vmatmul.mubr.msk.bf16.gmra.mrb[64].mxu0 %vm1629_vm2, %v15966_v39 }
  0xa6   : > { %12750 = vmatprep.mubr.msk.bf16.mxu0 %vm1629_vm2, %v15980_v45  ;;  %v1302_v19 = vsel %vm1114_vm1, %v1300_v50, %v1301_v53  ;;  %v1304_v41 = vsel %vm1114_vm1, %v1301_v53, %v1303_v12  ;;  %v1306_v56 = vrot.slane %v20297_v13, 1  ;;  %v16021_v50 = vld [vmem:[%s15037_s17 + $0x260] sm:$0x1]  ;;  %v20300_v12 = vunpack.c.l.bf16 %v15989_v8  ;;  %v16047_v8 = vld [vmem:[%s15037_s17 + $0x264] sm:$0xff]  }
  0xa7   : > { %20298 = vst [vmem:[#allocation86_spill] sm:$0xff] %v16021_v50  ;;  %v16025_v53 = vpack.c.bf16 %v1304_v41, %v1302_v19  ;;  %v1311_v13 = vrot.slane %v19867_v14, 1  ;;  %20305 = vst [vmem:[#allocation90_spill] sm:$0xff] %v16047_v8  ;;  %v20307_v41 = vunpack.c.l.bf16 %v16012_v3  ;;  %v20309_v40 = vunpack.c.l.bf16 %v16021_v50 }
  0xa8   : > { %v1308_v39 = vrot.slane %v20300_v12, 1  ;;  %v1307_v22 = vsel %vm1114_vm1, %v1305_v10, %v1306_v56 }
  0xa9   : > { %20299 = vst [vmem:[#allocation87_spill] sm:$0xff] %v16025_v53  ;;  %v1312_v12 = vsel %vm1114_vm1, %v1310_v6, %v1311_v13  ;;  %v1314_v10 = vsel %vm1114_vm1, %v1311_v13, %v1313_v18  ;;  %v1318_v19 = vrot.slane %v20309_v40, 1  ;;  %v20311_v18 = vunpack.c.l.bf16 %v16038_v9 }
  0xaa   : > { %12231 = vmatmul.mubr.msk.bf16.gmra.mrb[68].mxu1 %vm1629_vm2, %v15980_v45  ;;  %v16041_v45 = vld [vmem:[%s15037_s17 + $0x248] sm:$0x1]  ;;  %v1309_v27 = vsel %vm1114_vm1, %v1306_v56, %v1308_v39  ;;  %v19880_v56 = vunpack.c.l.bf16 %v16047_v8  ;;  %v20308_v39 = vunpack.c.h.bf16 %v16012_v3  ;;  %v16082_v40 = vpack.c.bf16 %v1314_v10, %v1312_v12 }
  0xab   : > { %12234 = vmatprep.mubr.msk.bf16.mxu1 %vm1629_vm2, %v16014_v20  ;;  %20304 = vst [vmem:[#allocation89_spill] sm:$0xff] %v16041_v45  ;;  %v16072_v49 = vpack.c.bf16 %v1309_v27, %v1307_v22  ;;  %v5248_v13 = vrot.slane %v20311_v18, 1  ;;  %v20314_v42 = vunpack.c.l.bf16 %v16041_v45  ;;  %v16089_v27 = vld [vmem:[%s15037_s17 + $0x270] sm:$0xff]   ;;  %v20318_v12 = vunpack.c.l.bf16 %v16051_v48 }
  0xac   : > { %v1316_v14 = vrot.slane %v20308_v39, 1  ;;  %20313 = vst [vmem:[#allocation93_spill] sm:$0xff] %v16082_v40  ;;  %v1320_v22 = vrot.slane %v19880_v56, 1  ;;  %20315 = vst [vmem:[#allocation94_spill] sm:$0xff] %v16089_v27  ;;  %v16266_v48 = vld [vmem:[%s15037_s17 + $0x2f0] sm:$0x1] }
  0xad   : > { %12751 = vmatmul.mubr.msk.bf16.gmra.mrb[68].mxu0 %vm1629_vm2, %v16014_v20  ;;  %v1315_v20 = vrot.slane %v20307_v41, 1  ;;  %20310 = vst [vmem:[#allocation92_spill] sm:$0xff] %v16072_v49  ;;  %v20312_v41 = vunpack.c.h.bf16 %v16038_v9  ;;  %v5251_v6 = vrot.slane %v20314_v42, 1  ;;  %v1323_v10 = vrot.slane %v20318_v12, 1  ;;  %v16101_v9 = vld [vmem:[%s15037_s17 + $0x27c] sm:$0xff]   ;;  %v16131_v12 = vld [vmem:[%s15037_s17 + $0x288] sm:$0xff]  }
  0xae   : > { %12754 = vmatprep.mubr.msk.bf16.mxu0 %vm1629_vm2, %v16025_v53  ;;  %v1319_v50 = vsel %vm1114_vm1, %v1316_v14, %v1318_v19  ;;  %20319 = vst [vmem:[#allocation96_spill] sm:$0xff] %v16101_v9  ;;  %v16104_v42 = vld [vmem:[%s15037_s17 + $0x284] sm:$0x1]  ;;  %20325 = vst [vmem:[#allocation99_spill] sm:$0xff] %v16131_v12 }
  0xaf   : > { %v5249_v39 = vrot.slane %v20312_v41, 1  ;;  %v1317_v18 = vsel %vm1114_vm1, %v1315_v20, %v1316_v14  ;;  %v20317_v41 = vunpack.c.h.bf16 %v16047_v8  ;;  %20320 = vst [vmem:[#allocation97_spill] sm:$0xff] %v16104_v42  ;;  %v20366_v8 = vunpack.c.l.bf16 %v16266_v48 }
  0xb1   : > { %v1321_v3 = vrot.slane %v20317_v41, 1  ;;  %v5250_v56 = vsel %vm1114_vm1, %v5248_v13, %v5249_v39  ;;  %v5252_v19 = vsel %vm1114_vm1, %v5249_v39, %v5251_v6  ;;  %v1603_v41 = vpack.c.bf16 %v1319_v50, %v1317_v18 }
  0xb2   : > { %12235 = vmatmul.mubr.msk.bf16.gmra.mrb[72].mxu1 %vm1629_vm2, %v16025_v53  ;;  %v16092_v53 = vld [vmem:[%s15037_s17 + $0x278] sm:$0x1]  ;;  %v16122_v20 = vpack.c.bf16 %v5252_v19, %v5250_v56  ;;  %v20322_v50 = vunpack.c.l.bf16 %v16089_v27  ;;  %v20323_v39 = vunpack.c.h.bf16 %v16089_v27  ;;  %v20327_v56 = vunpack.c.h.bf16 %v16101_v9 }
  0xb3   : > { %12238 = vmatprep.mubr.msk.bf16.mxu1 %vm1629_vm2, %v16072_v49  ;;  %20316 = vst [vmem:[#allocation95_spill] sm:$0xff] %v16092_v53  ;;  %v1322_v13 = vsel %vm1114_vm1, %v1320_v22, %v1321_v3  ;;  %v1324_v45 = vsel %vm1114_vm1, %v1321_v3, %v1323_v10  ;;  %v20326_v10 = vunpack.c.l.bf16 %v16101_v9 }
  0xb4   : > { %20321 = vst [vmem:[#allocation98_spill] sm:$0xff] %v16122_v20  ;;  %v1325_v6 = vrot.slane %v20322_v50, 1  ;;  %v1326_v18 = vrot.slane %v20323_v39, 1  ;;  %v1604_v3 = vpack.c.bf16 %v1324_v45, %v1322_v13  ;;  %v1331_v19 = vrot.slane %v20327_v56, 1 }
  0xb5   : > { %12755 = vmatmul.mubr.msk.bf16.gmra.mrb[72].mxu0 %vm1629_vm2, %v16072_v49  ;;  %v20324_v49 = vunpack.c.l.bf16 %v16092_v53  ;;  %v1330_v14 = vrot.slane %v20326_v10, 1  ;;  %v20329_v50 = vunpack.c.l.bf16 %v16104_v42  ;;  %v16145_v53 = vld [vmem:[%s15037_s17 + $0x294] sm:$0xff]   ;;  %v19889_v13 = vunpack.c.h.bf16 %v16131_v12 }
  0xb6   : > { %12758 = vmatprep.mubr.msk.bf16.mxu0 %vm1629_vm2, %v16082_v40  ;;  %20330 = vst [vmem:[#allocation101_spill] sm:$0xff] %v16145_v53  ;;  %v1327_v45 = vsel %vm1114_vm1, %v1325_v6, %v1326_v18  ;;  %v19894_v39 = vunpack.c.l.bf16 %v16145_v53 }
  0xb7   : > { %v1328_v22 = vrot.slane %v20324_v49, 1  ;;  %v1333_v27 = vrot.slane %v20329_v50, 1  ;;  %v16148_v49 = vld [vmem:[%s15037_s17 + $0x29c] sm:$0x1]  ;;  %v1332_v56 = vsel %vm1114_vm1, %v1330_v14, %v1331_v19  ;;  %v1336_v10 = vrot.slane %v19889_v13, 1  ;;  %v16205_v13 = vld [vmem:[%s15037_s17 + $0x2d0] sm:$0xff]  }
  0xb8   : > { %20331 = vst [vmem:[#allocation102_spill] sm:$0xff] %v16148_v49  ;;  %v19895_v42 = vunpack.c.l.bf16 %v16148_v49  ;;  %20340 = vst [vmem:[#allocation109_spill] sm:$0xff] %v16205_v13 }
  0xb9   : > { %v1334_v50 = vsel %vm1114_vm1, %v1331_v19, %v1333_v27  ;;  %v16172_v19 = vld [vmem:[%s15037_s17 + $0x2a0] sm:$0xff]  }
  0xba   : > { %12239 = vmatmul.mubr.msk.bf16.gmra.mrb[76].mxu1 %vm1629_vm2, %v16082_v40  ;;  %v16139_v40 = vld [vmem:[%s15037_s17 + $0x290] sm:$0x1]  ;;  %20335 = vst [vmem:[#allocation104_spill] sm:$0xff] %v16172_v19 }
  0xbb   : > { %12242 = vmatprep.mubr.msk.bf16.mxu1 %vm1629_vm2, %v1603_v41  ;;  %20328 = vst [vmem:[#allocation100_spill] sm:$0xff] %v16139_v40  ;;  %v1329_v41 = vsel %vm1114_vm1, %v1326_v18, %v1328_v22  ;;  %v20333_v18 = vunpack.c.l.bf16 %v16131_v12  ;;  %v20334_v14 = vunpack.c.l.bf16 %v16139_v40  ;;  %v20344_v12 = vunpack.c.h.bf16 %v16172_v19 }
  0xbc   : > { %v16162_v6 = vpack.c.bf16 %v1329_v41, %v1327_v45  ;;  %v16176_v45 = vpack.c.bf16 %v1334_v50, %v1332_v56  ;;  %v1340_v41 = vrot.slane %v19894_v39, 1  ;;  %v16200_v39 = vld [vmem:[%s15037_s17 + $0x2b4] sm:$0x1] }
  0xbd   : > { %12759 = vmatmul.mubr.msk.bf16.gmra.mrb[76].mxu0 %vm1629_vm2, %v16122_v20  ;;  %v19893_v20 = vunpack.c.h.bf16 %v16145_v53  ;;  %v1335_v22 = vrot.slane %v20333_v18, 1  ;;  %v1338_v27 = vrot.slane %v20334_v14, 1  ;;  %v1343_v14 = vrot.slane %v19895_v42, 1  ;;  %20339 = vst [vmem:[#allocation108_spill] sm:$0xff] %v16200_v39 }
  0xbe   : > { %12762 = vmatprep.mubr.msk.bf16.mxu0 %vm1629_vm2, %v1604_v3  ;;  %20332 = vst [vmem:[#allocation103_spill] sm:$0xff] %v16162_v6  ;;  %20336 = vst [vmem:[#allocation105_spill] sm:$0xff] %v16176_v45  ;;  %v1346_v49 = vrot.slane %v20344_v12, 1  ;;  %v20348_v12 = vunpack.c.l.bf16 %v16200_v39 }
  0xbf   : > { %v1341_v18 = vrot.slane %v19893_v20, 1  ;;  %v1337_v56 = vsel %vm1114_vm1, %v1335_v22, %v1336_v10  ;;  %v1339_v50 = vsel %vm1114_vm1, %v1336_v10, %v1338_v27  ;;  %v16197_v20 = vld [vmem:[%s15037_s17 + $0x2ac] sm:$0xff]   ;;  %v20343_v10 = vunpack.c.l.bf16 %v16172_v19 }
  0xc0   : > { %20338 = vst [vmem:[#allocation107_spill] sm:$0xff] %v16197_v20  ;;  %v16210_v22 = vpack.c.bf16 %v1339_v50, %v1337_v56  ;;  %v19913_v50 = vunpack.c.h.bf16 %v16205_v13  ;;  %v20355_v19 = vunpack.c.h.bf16 %v15098_v29 }
  0xc1   : > { %v1342_v42 = vsel %vm1114_vm1, %v1340_v41, %v1341_v18  ;;  %v1344_v40 = vsel %vm1114_vm1, %v1341_v18, %v1343_v14  ;;  %v1345_v27 = vrot.slane %v20343_v10, 1  ;;  %v19905_v18 = vunpack.c.l.bf16 %v16197_v20 }
  0xc2   : > { %12243 = vmatmul.mubr.msk.bf16.gmra.mrb[80].mxu1 %vm1629_vm2, %v1604_v3  ;;  %v16179_v3 = vld [vmem:[%s15037_s17 + $0x2a8] sm:$0x1]  ;;  %20342 = vst [vmem:[#allocation111_spill] sm:$0xff] %v16210_v22  ;;  %v16225_v56 = vpack.c.bf16 %v1344_v40, %v1342_v42  ;;  %v20347_v40 = vunpack.c.h.bf16 %v16197_v20 }
  0xc3   : > { %12246 = vmatprep.mubr.msk.bf16.mxu1 %vm1629_vm2, %v16162_v6  ;;  %20337 = vst [vmem:[#allocation106_spill] sm:$0xff] %v16179_v3  ;;  %v20345_v53 = vunpack.c.l.bf16 %v16179_v3  ;;  %v1347_v10 = vsel %vm1114_vm1, %v1345_v27, %v1346_v49  ;;  %v1350_v14 = vrot.slane %v19905_v18, 1  ;;  %v20349_v27 = vunpack.c.l.bf16 %v16205_v13  ;;  %v16249_v3 = vld [vmem:[%s15037_s17 + $0x2dc] sm:$0xff]   ;;  %v16252_v18 = vld [vmem:[%s15037_s17 + $0x2e4] sm:$0x1] }
  0xc4   : > { %20346 = vst [vmem:[#allocation112_spill] sm:$0xff] %v16225_v56  ;;  %v1351_v42 = vrot.slane %v20347_v40, 1  ;;  %20351 = vst [vmem:[#allocation113_spill] sm:$0xff] %v16249_v3  ;;  %v16255_v40 = vld [vmem:[%s15037_s17 + $0x2e8] sm:$0xff]   ;;  %v20356_v13 = vunpack.c.l.bf16 %v15104_v33 }
  0xc5   : > { %12763 = vmatmul.mubr.msk.bf16.gmra.mrb[80].mxu0 %vm1629_vm2, %v16162_v6  ;;  %v16208_v6 = vld [vmem:[%s15037_s17 + $0x2d8] sm:$0x1]  ;;  %v1348_v41 = vrot.slane %v20345_v53, 1  ;;  %v1355_v53 = vrot.slane %v20349_v27, 1  ;;  %20352 = vst [vmem:[#allocation114_spill] sm:$0xff] %v16252_v18  ;;  %v3128_v27 = vrot.slane %v20355_v19, 2 }
  0xc6   : > { %12766 = vmatprep.mubr.msk.bf16.mxu0 %vm1629_vm2, %v16176_v45  ;;  %20341 = vst [vmem:[#allocation110_spill] sm:$0xff] %v16208_v6 }
  0xc7   : > { %v1349_v9 = vsel %vm1114_vm1, %v1346_v49, %v1348_v41  ;;  %v20350_v49 = vunpack.c.l.bf16 %v16208_v6  ;;  %v20365_v6 = vunpack.c.h.bf16 %v16255_v40 }
  0xc8   : > { %v16257_v39 = vpack.c.bf16 %v1349_v9, %v1347_v10 }
  0xc9   : > { %v1358_v41 = vrot.slane %v20350_v49, 1  ;;  %v1352_v49 = vsel %vm1114_vm1, %v1350_v14, %v1351_v42  ;;  %v20358_v14 = vunpack.c.l.bf16 %v16249_v3 }
  0xca   : > { %12247 = vmatmul.mubr.msk.bf16.gmra.mrb[84].mxu1 %vm1629_vm2, %v16176_v45  ;;  %v1353_v45 = vrot.slane %v20348_v12, 1  ;;  %20353 = vst [vmem:[#allocation115_spill] sm:$0xff] %v16257_v39  ;;  %v20354_v12 = vunpack.c.l.bf16 %v15098_v29 }
  0xcb   : > { %12250 = vmatprep.mubr.msk.bf16.mxu1 %vm1629_vm2, %v16210_v22  ;;  %v1360_v19 = vrot.slane %v20358_v14, 1  ;;  %v20363_v14 = vunpack.c.l.bf16 %v15115_v38  ;;  %v20368_v38 = vunpack.c.h.bf16 %v15128_v46 }
  0xcc   : > { %v3127_v20 = vrot.slane %v20354_v12, 2  ;;  %v1354_v9 = vsel %vm1114_vm1, %v1351_v42, %v1353_v45  ;;  %v6795_v12 = vsel %vm1822_vm0, %v15502_v44, 0  ;;  %v20360_v45 = vunpack.c.l.bf16 %v15107_v34 }
  0xcd   : > { %12767 = vmatmul.mubr.msk.bf16.gmra.mrb[84].mxu0 %vm1629_vm2, %v16210_v22  ;;  %v1356_v22 = vrot.slane %v19913_v50, 1  ;;  %v3130_v50 = vrot.slane %v20356_v13, 2  ;;  %v16282_v42 = vpack.c.bf16 %v1354_v9, %v1352_v49  ;;  %v20359_v49 = vunpack.c.h.bf16 %v16249_v3  ;;  %v16300_v13 = vld [vmem:[%s15037_s17 + $0x2fc] sm:$0x1] }
  0xce   : > { %12770 = vmatprep.mubr.msk.bf16.mxu0 %vm1629_vm2, %v16225_v56  ;;  %v3132_v44 = vrot.slane %v20360_v45, 2  ;;  %v16316_v45 = vld [vmem:[%s15037_s17 + $0x308] sm:$0x1]  ;;  %v1366_v3 = vrot.slane %v20365_v6, 1  ;;  %v19927_v24 = vunpack.c.l.bf16 %v16300_v13 }
  0xcf   : > { %v1357_v29 = vsel %vm1114_vm1, %v1355_v53, %v1356_v22  ;;  %v1359_v33 = vsel %vm1114_vm1, %v1356_v22, %v1358_v41  ;;  %20357 = vst [vmem:[#allocation116_spill] sm:$0xff] %v16282_v42  ;;  %v3129_v53 = vsel %vm3111_vm3, %v3127_v20, %v3128_v27  ;;  %v3131_v10 = vsel %vm3111_vm3, %v3128_v27, %v3130_v50  ;;  %v16289_v22 = vld [vmem:[%s15037_s17 + $0x2f4] sm:$0xff]   ;;  %v16303_v20 = vld [vmem:[%s15037_s17 + $0x300] sm:$0xff]  }
  0xd0   : > { %v1611_v41 = vpack.c.bf16 %v1359_v33, %v1357_v29  ;;  %v1361_v9 = vrot.slane %v20359_v49, 1  ;;  %v20361_v50 = vunpack.c.l.bf16 %v16252_v18  ;;  %v20362_v29 = vunpack.c.h.bf16 %v15107_v34 }
  0xd1   : > { %v20364_v49 = vunpack.c.l.bf16 %v16255_v40  ;;  %v20367_v34 = vunpack.c.l.bf16 %v15128_v46  ;;  %v16333_v6 = vpack.c.bf16 %v3131_v10, %v3129_v53  ;;  %v20372_v18 = vunpack.c.h.bf16 %v16289_v22 }
  0xd2   : > { %12251 = vmatmul.mubr.msk.bf16.gmra.mrb[88].mxu1 %vm1629_vm2, %v16225_v56  ;;  %v1363_v27 = vrot.slane %v20361_v50, 1  ;;  %v3133_v33 = vrot.slane %v20362_v29, 2  ;;  %v1362_v46 = vsel %vm1114_vm1, %v1360_v19, %v1361_v9 }
  0xd3   : > { %12254 = vmatprep.mubr.msk.bf16.mxu1 %vm1629_vm2, %v16257_v39  ;;  %v1365_v56 = vrot.slane %v20364_v49, 1  ;;  %v3137_v29 = vrot.slane %v20367_v34, 2  ;;  %v20369_v49 = vunpack.c.l.bf16 %v15136_v51  ;;  %20370 = vst [vmem:[#allocation117_spill] sm:$0xff] %v16333_v6 }
  0xd4   : > { %v1364_v51 = vsel %vm1114_vm1, %v1361_v9, %v1363_v27  ;;  %v3134_v34 = vsel %vm3111_vm3, %v3132_v44, %v3133_v33  ;;  %v1373_v9 = vrot.slane %v19927_v24, 1  ;;  %v20376_v44 = vunpack.c.l.bf16 %v16316_v45 }
  0xd5   : > { %12771 = vmatmul.mubr.msk.bf16.gmra.mrb[88].mxu0 %vm1629_vm2, %v16257_v39  ;;  %v3135_v39 = vrot.slane %v20363_v14, 2  ;;  %v3138_v14 = vrot.slane %v20368_v38, 2  ;;  %v3140_v17 = vrot.slane %v20369_v49, 2  ;;  %v1367_v10 = vsel %vm1114_vm1, %v1365_v56, %v1366_v3 }
  0xd6   : > { %12812 = vmatprep.mubr.msk.bf16.mxu0 %vm1629_vm2, %v15872_v5  ;;  %v1368_v5 = vrot.slane %v20366_v8, 1  ;;  %v20371_v49 = vunpack.c.l.bf16 %v16289_v22  ;;  %v20375_v56 = vunpack.c.h.bf16 %v16303_v20  ;;  %v1378_v27 = vrot.slane %v20376_v44, 1 }
  0xd7   : > { %v3136_v38 = vsel %vm3111_vm3, %v3133_v33, %v3135_v39  ;;  %v3139_v19 = vsel %vm3111_vm3, %v3137_v29, %v3138_v14  ;;  %v3141_v8 = vsel %vm3111_vm3, %v3138_v14, %v3140_v17  ;;  %v16355_v39 = vpack.c.bf16 %v1364_v51, %v1362_v46  ;;  %v16364_v17 = vld [vmem:[%s15037_s17 + $0x30c] sm:$0xff]   ;;  %v16375_v51 = vld [vmem:[%s15037_s17 + $0x314] sm:$0x1] }
  0xd8   : > { %v1369_v53 = vsel %vm1114_vm1, %v1366_v3, %v1368_v5  ;;  %v1370_v50 = vrot.slane %v20371_v49, 1  ;;  %v20374_v5 = vunpack.c.l.bf16 %v16303_v20  ;;  %v16368_v33 = vpack.c.bf16 %v3136_v38, %v3134_v34  ;;  %v16388_v34 = vld [vmem:[%s15037_s17 + $0x320] sm:$0x1] }
  0xd9   : > { %20373 = vst [vmem:[#allocation118_spill] sm:$0xff] %v16355_v39  ;;  %v16370_v29 = vpack.c.bf16 %v1369_v53, %v1367_v10  ;;  %v20379_v14 = vunpack.c.l.bf16 %v15139_v52  ;;  %v16377_v49 = vpack.c.bf16 %v3141_v8, %v3139_v19  ;;  %v20383_v10 = vunpack.c.l.bf16 %v15167_v2 }
  0xda   : > { %12255 = vmatmul.mubr.msk.bf16.gmra.mrb[92].mxu1 %vm1629_vm2, %v16282_v42  ;;  %v1375_v3 = vrot.slane %v20374_v5, 1  ;;  %20377 = vst [vmem:[#allocation119_spill] sm:$0xff] %v16368_v33  ;;  %v16385_v42 = vld [vmem:[%s15037_s17 + $0x318] sm:$0xff]   ;;  %v20384_v8 = vunpack.c.h.bf16 %v15167_v2  ;;  %v20385_v2 = vunpack.c.l.bf16 %v15176_v16 }
  0xdb   : > { %12258 = vmatprep.mubr.msk.bf16.mxu1 %vm1629_vm2, %v1611_v41  ;;  %v1371_v41 = vrot.slane %v20372_v18, 1  ;;  %v1376_v18 = vrot.slane %v20375_v56, 1  ;;  %20378 = vst [vmem:[#allocation120_spill] sm:$0xff] %v16370_v29  ;;  %v3142_v46 = vrot.slane %v20379_v14, 2  ;;  %20380 = vst [vmem:[#allocation121_spill] sm:$0xff] %v16377_v49  ;;  %v20381_v56 = vunpack.c.h.bf16 %v15139_v52 }
  0xdc   : > { %v3147_v53 = vrot.slane %v20383_v10, 2  ;;  %v3148_v19 = vrot.slane %v20384_v8, 2  ;;  %v19930_v14 = vunpack.c.h.bf16 %v16364_v17 }
  0xdd   : > { %12813 = vmatmul.mubr.msk.bf16.vlgmr.msra.gmra.mrb[0].mxu0 %vm1629_vm2, %v15905_v11  ;;  %v1372_v5 = vsel %vm1114_vm1, %v1370_v50, %v1371_v41  ;;  %v3143_v44 = vrot.slane %v20381_v56, 2  ;;  %v1374_v38 = vsel %vm1114_vm1, %v1371_v41, %v1373_v9  ;;  %v19932_v50 = vunpack.c.l.bf16 %v16364_v17 }
  0xde   : > { %12941 = vmatpush3.bf16.msra.mxu0 %v6795_v12  ;;  %12816 = vmatprep.mubr.msk.bf16.mxu0 %vm1629_vm2, %v16333_v6  ;;  %v20382_v12 = vunpack.c.l.bf16 %v15163_v0  ;;  %v1377_v52 = vsel %vm1114_vm1, %v1375_v3, %v1376_v18  ;;  %v1379_v0 = vsel %vm1114_vm1, %v1376_v18, %v1378_v27  ;;  %v19931_v41 = vunpack.c.l.bf16 %v16375_v51 }
  0xdf   : > { %v3150_v9 = vrot.slane %v20385_v2, 2  ;;  %v19934_v56 = vunpack.c.l.bf16 %v16385_v42  ;;  %v16409_v3 = vpack.c.bf16 %v1374_v38, %v1372_v5  ;;  %v3144_v18 = vsel %vm3111_vm3, %v3142_v46, %v3143_v44  ;;  %v16425_v5 = vld [vmem:[%s15037_s17 + $0x324] sm:$0xff]  }
  0xe0   : > { %v3145_v24 = vrot.slane %v20382_v12, 2  ;;  %v19937_v12 = vunpack.c.h.bf16 %v16385_v42  ;;  %v16413_v8 = vpack.c.bf16 %v1379_v0, %v1377_v52  ;;  %v3149_v16 = vsel %vm3111_vm3, %v3147_v53, %v3148_v19  ;;  %v16437_v0 = vld [vmem:[%s15037_s17 + $0x32c] sm:$0x1] }
  0xe1   : > { %20386 = vst [vmem:[#allocation122_spill] sm:$0xff] %v16409_v3  ;;  %v1380_v2 = vrot.slane %v19932_v50, 1  ;;  %v1381_v10 = vrot.slane %v19930_v14, 1  ;;  %v1383_v46 = vrot.slane %v19931_v41, 1  ;;  %v20388_v53 = vunpack.c.l.bf16 %v16388_v34 }
  0xe2   : > { %12259 = vmatmul.mubr.msk.bf16.gmra.mrb[96].mxu1 %vm1629_vm2, %v16355_v39  ;;  %v3146_v27 = vsel %vm3111_vm3, %v3143_v44, %v3145_v24  ;;  %20387 = vst [vmem:[#allocation123_spill] sm:$0xff] %v16413_v8  ;;  %v3151_v24 = vsel %vm3111_vm3, %v3148_v19, %v3150_v9  ;;  %v1385_v44 = vrot.slane %v19934_v56, 1  ;;  %v1386_v38 = vrot.slane %v19937_v12, 1  ;;  %v16444_v39 = vld [vmem:[%s15037_s17 + $0x348] sm:$0xff]  }
  0xe3   : > { %12262 = vmatprep.mubr.msk.bf16.mxu1 %vm1629_vm2, %v16370_v29  ;;  %v1388_v52 = vrot.slane %v20388_v53, 1  ;;  %v16439_v14 = vpack.c.bf16 %v3146_v27, %v3144_v18  ;;  %v20390_v41 = vunpack.c.l.bf16 %v15213_v55  ;;  %20391 = vst [vmem:[#allocation125_spill] sm:$0xff] %v16444_v39  ;;  %v20392_v19 = vunpack.c.h.bf16 %v15213_v55  ;;  %v16453_v53 = vld [vmem:[%s15037_s17 + $0x350] sm:$0x1] }
  0xe4   : > { %v20393_v56 = vunpack.c.l.bf16 %v15218_v57  ;;  %20394 = vst [vmem:[#allocation126_spill] sm:$0xff] %v16453_v53  ;;  %v16457_v18 = vpack.c.bf16 %v3151_v24, %v3149_v16  ;;  %v1384_v27 = vsel %vm1114_vm1, %v1381_v10, %v1383_v46  ;;  %v1387_v57 = vsel %vm1114_vm1, %v1385_v44, %v1386_v38 }
  0xe5   : > { %12817 = vmatmul.mubr.msk.bf16.gmra.mrb[4].mxu0 %vm1629_vm2, %v16368_v33  ;;  %20389 = vst [vmem:[#allocation124_spill] sm:$0xff] %v16439_v14  ;;  %v5994_v50 = vrot.slane %v20390_v41, 2  ;;  %v5995_v9 = vrot.slane %v20392_v19, 2  ;;  %v1382_v41 = vsel %vm1114_vm1, %v1380_v2, %v1381_v10  ;;  %v20396_v16 = vunpack.c.l.bf16 %v15225_v62 }
  0xe6   : > { %12820 = vmatprep.mubr.msk.bf16.mxu0 %vm1629_vm2, %v16377_v49  ;;  %v5997_v29 = vrot.slane %v20393_v56, 2  ;;  %20395 = vst [vmem:[#allocation127_spill] sm:$0xff] %v16457_v18  ;;  %v1389_v56 = vsel %vm1114_vm1, %v1386_v38, %v1388_v52  ;;  %v20397_v2 = vunpack.c.h.bf16 %v15225_v62  ;;  %v20398_v46 = vunpack.c.l.bf16 %v15234_v23 }
  0xe7   : > { %v3157_v24 = vrot.slane %v20396_v16, 2  ;;  %v5996_v44 = vsel %vm3111_vm3, %v5994_v50, %v5995_v9  ;;  %v20399_v52 = vunpack.c.l.bf16 %v16425_v5  ;;  %v20400_v49 = vunpack.c.h.bf16 %v16425_v5 }
  0xe8   : > { %v3158_v10 = vrot.slane %v20397_v2, 2  ;;  %v3160_v55 = vrot.slane %v20398_v46, 2  ;;  %v5998_v38 = vsel %vm3111_vm3, %v5995_v9, %v5997_v29  ;;  %v16483_v62 = vpack.c.bf16 %v1384_v27, %v1382_v41  ;;  %v16492_v29 = vld [vmem:[%s15037_s17 + $0x354] sm:$0xff]  }
  0xe9   : > { %v1390_v19 = vrot.slane %v20399_v52, 1  ;;  %v16485_v23 = vpack.c.bf16 %v1389_v56, %v1387_v57  ;;  %v20403_v16 = vunpack.c.l.bf16 %v16437_v0  ;;  %v20404_v50 = vunpack.c.l.bf16 %v15276_v30 }
  0xea   : > { %12263 = vmatmul.mubr.msk.bf16.gmra.mrb[100].mxu1 %vm1629_vm2, %v16409_v3  ;;  %20401 = vst [vmem:[#allocation128_spill] sm:$0xff] %v16483_v62  ;;  %v20406_v41 = vunpack.c.l.bf16 %v15279_v25  ;;  %v20407_v57 = vunpack.c.l.bf16 %v16444_v39  ;;  %v20408_v52 = vunpack.c.h.bf16 %v16444_v39  ;;  %v16507_v12 = vpack.c.bf16 %v5998_v38, %v5996_v44  ;;  %v16521_v44 = vld [vmem:[%s15037_s17 + $0x360] sm:$0xff]   ;;  %v16524_v38 = vld [vmem:[%s15037_s17 + $0x368] sm:$0x1] }
  0xeb   : > { %12266 = vmatprep.mubr.msk.bf16.mxu1 %vm1629_vm2, %v16413_v8  ;;  %v1391_v8 = vrot.slane %v20400_v49, 1  ;;  %20402 = vst [vmem:[#allocation129_spill] sm:$0xff] %v16485_v23  ;;  %v1393_v2 = vrot.slane %v20403_v16, 1  ;;  %v3162_v46 = vrot.slane %v20404_v50, 2  ;;  %v20405_v49 = vunpack.c.h.bf16 %v15276_v30  ;;  %v16505_v50 = vld [vmem:[%s15037_s17 + $0x35c] sm:$0x1] }
  0xec   : > { %v3165_v27 = vrot.slane %v20406_v41, 2  ;;  %v1395_v56 = vrot.slane %v20407_v57, 1  ;;  %v1396_v16 = vrot.slane %v20408_v52, 1  ;;  %20409 = vst [vmem:[#allocation130_spill] sm:$0xff] %v16507_v12  ;;  %v3159_v3 = vsel %vm3111_vm3, %v3157_v24, %v3158_v10 }
  0xed   : > { %12821 = vmatmul.mubr.msk.bf16.gmra.mrb[8].mxu0 %vm1629_vm2, %v16439_v14  ;;  %v3163_v9 = vrot.slane %v20405_v49, 2  ;;  %v20410_v30 = vunpack.c.l.bf16 %v16453_v53  ;;  %v1392_v25 = vsel %vm1114_vm1, %v1390_v19, %v1391_v8  ;;  %v20411_v41 = vunpack.c.l.bf16 %v15288_v26  ;;  %v16647_v53 = vld [vmem:[%s15037_s17 + $0x390] sm:$0xff]  }
  0xee   : > { %12824 = vmatprep.mubr.msk.bf16.mxu0 %vm1629_vm2, %v16457_v18  ;;  %v3161_v18 = vsel %vm3111_vm3, %v3158_v10, %v3160_v55  ;;  %v20412_v57 = vunpack.c.h.bf16 %v15288_v26  ;;  %v20413_v52 = vunpack.c.l.bf16 %v15291_v36  ;;  %v1394_v55 = vsel %vm1114_vm1, %v1391_v8, %v1393_v2 }
  0xef   : > { %v1398_v49 = vrot.slane %v20410_v30, 1  ;;  %v3167_v14 = vrot.slane %v20411_v41, 2  ;;  %v19952_v19 = vunpack.c.l.bf16 %v16492_v29  ;;  %v19953_v24 = vunpack.c.h.bf16 %v16492_v29 }
  0xf0   : > { %v3168_v39 = vrot.slane %v20412_v57, 2  ;;  %v3170_v33 = vrot.slane %v20413_v52, 2  ;;  %v16534_v36 = vpack.c.bf16 %v3161_v18, %v3159_v3  ;;  %v3164_v10 = vsel %vm3111_vm3, %v3162_v46, %v3163_v9 }
  0xf1   : > { %v3166_v30 = vsel %vm3111_vm3, %v3163_v9, %v3165_v27  ;;  %v1397_v41 = vsel %vm1114_vm1, %v1395_v56, %v1396_v16  ;;  %v1399_v8 = vsel %vm1114_vm1, %v1396_v16, %v1398_v49  ;;  %v19958_v2 = vunpack.c.l.bf16 %v16521_v44  ;;  %v16550_v27 = vld [vmem:[%s15037_s17 + $0x36c] sm:$0xff]  }
  0xf2   : > { %12267 = vmatmul.mubr.msk.bf16.gmra.mrb[104].mxu1 %vm1629_vm2, %v16483_v62  ;;  %20414 = vst [vmem:[#allocation131_spill] sm:$0xff] %v16534_v36  ;;  %v19957_v57 = vunpack.c.h.bf16 %v16521_v44  ;;  %v16543_v26 = vpack.c.bf16 %v1394_v55, %v1392_v25  ;;  %v3169_v3 = vsel %vm3111_vm3, %v3167_v14, %v3168_v39  ;;  %v3171_v18 = vsel %vm3111_vm3, %v3168_v39, %v3170_v33  ;;  %v16563_v25 = vld [vmem:[%s15037_s17 + $0x374] sm:$0x1] }
  0xf3   : > { %12270 = vmatprep.mubr.msk.bf16.mxu1 %vm1629_vm2, %v16485_v23  ;;  %v20416_v46 = vunpack.c.l.bf16 %v15318_v15  ;;  %v1400_v56 = vrot.slane %v19952_v19, 1  ;;  %v1401_v16 = vrot.slane %v19953_v24, 1  ;;  %v20417_v49 = vunpack.c.l.bf16 %v16505_v50 }
  0xf4   : > { %20415 = vst [vmem:[#allocation132_spill] sm:$0xff] %v16543_v26  ;;  %v20418_v39 = vunpack.c.h.bf16 %v15318_v15  ;;  %v1619_v55 = vpack.c.bf16 %v1399_v8, %v1397_v41  ;;  %v16569_v19 = vpack.c.bf16 %v3166_v30, %v3164_v10  ;;  %v1405_v24 = vrot.slane %v19958_v2, 1  ;;  %v16586_v30 = vld [vmem:[%s15037_s17 + $0x380] sm:$0x1] }
  0xf5   : > { %v3172_v9 = vrot.slane %v20416_v46, 2  ;;  %12825 = vmatmul.mubr.msk.bf16.gmra.mrb[12].mxu0 %vm1629_vm2, %v16507_v12  ;;  %v1403_v14 = vrot.slane %v20417_v49, 1  ;;  %v20419_v46 = vunpack.c.l.bf16 %v15326_v35  ;;  %v1406_v49 = vrot.slane %v19957_v57, 1  ;;  %v16578_v12 = vld [vmem:[%s15037_s17 + $0x378] sm:$0xff]  }
  0xf6   : > { %v3173_v33 = vrot.slane %v20418_v39, 2  ;;  %12828 = vmatprep.mubr.msk.bf16.mxu0 %vm1629_vm2, %v16534_v36  ;;  %20420 = vst [vmem:[#allocation133_spill] sm:$0xff] %v16569_v19  ;;  %v20421_v15 = vunpack.c.l.bf16 %v16524_v38  ;;  %v16580_v23 = vpack.c.bf16 %v3171_v18, %v3169_v3  ;;  %v1402_v8 = vsel %vm1114_vm1, %v1400_v56, %v1401_v16 }
  0xf7   : > { %v3175_v52 = vrot.slane %v20419_v46, 2  ;;  %v1404_v46 = vsel %vm1114_vm1, %v1401_v16, %v1403_v14  ;;  %v20423_v3 = vunpack.c.l.bf16 %v15332_v1  ;;  %v20424_v2 = vunpack.c.h.bf16 %v15332_v1 }
  0xf8   : > { %v1408_v39 = vrot.slane %v20421_v15, 1  ;;  %20422 = vst [vmem:[#allocation134_spill] sm:$0xff] %v16580_v23  ;;  %v3174_v15 = vsel %vm3111_vm3, %v3172_v9, %v3173_v33  ;;  %v19959_v35 = vunpack.c.l.bf16 %v16578_v12  ;;  %v1407_v56 = vsel %vm1114_vm1, %v1405_v24, %v1406_v49 }
  0xf9   : > { %v3177_v18 = vrot.slane %v20423_v3, 2  ;;  %v3176_v57 = vsel %vm3111_vm3, %v3173_v33, %v3175_v52  ;;  %v3178_v10 = vrot.slane %v20424_v2, 2  ;;  %v20425_v9 = vunpack.c.l.bf16 %v15335_v37 }
  0xfa   : > { %12271 = vmatmul.mubr.msk.bf16.gmra.mrb[108].mxu1 %vm1629_vm2, %v16543_v26  ;;  %v1409_v16 = vsel %vm1114_vm1, %v1406_v49, %v1408_v39  ;;  %v20427_v1 = vunpack.c.h.bf16 %v16550_v27  ;;  %v20428_v33 = vunpack.c.l.bf16 %v16563_v25  ;;  %v16614_v24 = vpack.c.bf16 %v1404_v46, %v1402_v8 }
  0xfb   : > { %12274 = vmatprep.mubr.msk.bf16.mxu1 %vm1629_vm2, %v1619_v55  ;;  %v3180_v14 = vrot.slane %v20425_v9, 2  ;;  %v20426_v55 = vunpack.c.l.bf16 %v16550_v27  ;;  %v16616_v49 = vpack.c.bf16 %v3176_v57, %v3174_v15  ;;  %v16620_v37 = vpack.c.bf16 %v1409_v16, %v1407_v56 }
  0xfc   : > { %v1411_v2 = vrot.slane %v20427_v1, 1  ;;  %v1413_v41 = vrot.slane %v20428_v33, 1  ;;  %20429 = vst [vmem:[#allocation135_spill] sm:$0xff] %v16614_v24  ;;  %v3179_v39 = vsel %vm3111_vm3, %v3177_v18, %v3178_v10  ;;  %v1415_v9 = vrot.slane %v19959_v35, 1  ;;  %v16628_v33 = vld [vmem:[%s15037_s17 + $0x384] sm:$0xff]  }
  0xfd   : > { %v1410_v52 = vrot.slane %v20426_v55, 1  ;;  %12829 = vmatmul.mubr.msk.bf16.gmra.mrb[16].mxu0 %vm1629_vm2, %v16569_v19  ;;  %20430 = vst [vmem:[#allocation136_spill] sm:$0xff] %v16616_v49  ;;  %20431 = vst [vmem:[#allocation137_spill] sm:$0xff] %v16620_v37  ;;  %v20432_v55 = vunpack.c.h.bf16 %v16578_v12  ;;  %v3181_v57 = vsel %vm3111_vm3, %v3178_v10, %v3180_v14  ;;  %v20433_v8 = vunpack.c.l.bf16 %v15359_v54  ;;  %v16638_v18 = vld [vmem:[%s15037_s17 + $0x38c] sm:$0x1] }
  0xfe   : > { %12832 = vmatprep.mubr.msk.bf16.mxu0 %vm1629_vm2, %v16580_v23  ;;  %v20434_v15 = vunpack.c.h.bf16 %v15359_v54  ;;  %v20435_v56 = vunpack.c.l.bf16 %v16586_v30  ;;  %v1414_v26 = vsel %vm1114_vm1, %v1411_v2, %v1413_v41  ;;  %v20437_v10 = vunpack.c.l.bf16 %v15375_v31 }
  0xff   : > { %v1416_v1 = vrot.slane %v20432_v55, 1  ;;  %v3182_v46 = vrot.slane %v20433_v8, 2  ;;  %v1412_v35 = vsel %vm1114_vm1, %v1410_v52, %v1411_v2  ;;  %v20436_v55 = vunpack.c.l.bf16 %v15366_v60  ;;  %v16650_v8 = vld [vmem:[%s15037_s17 + $0x398] sm:$0x1] }
 0x100   : > { %v3183_v3 = vrot.slane %v20434_v15, 2  ;;  %v1418_v16 = vrot.slane %v20435_v56, 1  ;;  %v3187_v14 = vrot.slane %v20437_v10, 2  ;;  %v20438_v54 = vunpack.c.h.bf16 %v15375_v31 }
 0x101   : > { %v3185_v62 = vrot.slane %v20436_v55, 2  ;;  %v20439_v52 = vunpack.c.l.bf16 %v15378_v63  ;;  %v19968_v41 = vunpack.c.l.bf16 %v16628_v33  ;;  %v16662_v2 = vpack.c.bf16 %v3181_v57, %v3179_v39 }
 0x102   : > { %12275 = vmatmul.mubr.msk.bf16.gmra.mrb[112].mxu1 %vm1629_vm2, %v16614_v24  ;;  %v3188_v15 = vrot.slane %v20438_v54, 2  ;;  %v1417_v55 = vsel %vm1114_vm1, %v1415_v9, %v1416_v1  ;;  %v19966_v10 = vunpack.c.l.bf16 %v16638_v18  ;;  %v1419_v24 = vsel %vm1114_vm1, %v1416_v1, %v1418_v16 }
 0x103   : > { %v3190_v56 = vrot.slane %v20439_v52, 2  ;;  %12278 = vmatprep.mubr.msk.bf16.mxu1 %vm1629_vm2, %v16620_v37  ;;  %20440 = vst [vmem:[#allocation138_spill] sm:$0xff] %v16662_v2  ;;  %v19967_v31 = vunpack.c.l.bf16 %v16647_v53  ;;  %v19969_v63 = vunpack.c.h.bf16 %v16647_v53  ;;  %v16670_v52 = vpack.c.bf16 %v1414_v26, %v1412_v35 }
 0x104   : > { %v3184_v60 = vsel %vm3111_vm3, %v3182_v46, %v3183_v3  ;;  %v3186_v39 = vsel %vm3111_vm3, %v3183_v3, %v3185_v62  ;;  %v3189_v9 = vsel %vm3111_vm3, %v3187_v14, %v3188_v15  ;;  %v1420_v57 = vrot.slane %v19968_v41, 1 }
 0x105   : > { %20441 = vst [vmem:[#allocation139_spill] sm:$0xff] %v16670_v52  ;;  %12833 = vmatmul.mubr.msk.bf16.gmra.mrb[20].mxu0 %vm1629_vm2, %v16616_v49  ;;  %v3191_v1 = vsel %vm3111_vm3, %v3188_v15, %v3190_v56  ;;  %v20442_v16 = vunpack.c.h.bf16 %v16628_v33  ;;  %v16684_v26 = vpack.c.bf16 %v1419_v24, %v1417_v55  ;;  %v1423_v62 = vrot.slane %v19966_v10, 1  ;;  %v16697_v56 = vld [vmem:[%s15037_s17 + $0x39c] sm:$0xff]  }
 0x106   : > { %12836 = vmatprep.mubr.msk.bf16.mxu0 %vm1629_vm2, %v16662_v2  ;;  %v16688_v35 = vpack.c.bf16 %v3186_v39, %v3184_v60  ;;  %v1425_v3 = vrot.slane %v19967_v31, 1  ;;  %v1426_v46 = vrot.slane %v19969_v63, 1  ;;  %v20445_v14 = vunpack.c.l.bf16 %v16650_v8 }
 0x107   : > { %v1421_v54 = vrot.slane %v20442_v16, 1  ;;  %20443 = vst [vmem:[#allocation140_spill] sm:$0xff] %v16684_v26  ;;  %v16700_v16 = vld [vmem:[%s15037_s17 + $0x3a4] sm:$0x1]  ;;  %v16702_v24 = vpack.c.bf16 %v3191_v1, %v3189_v9  ;;  %v20447_v55 = vunpack.c.l.bf16 %v15421_v7  ;;  %v20448_v60 = vunpack.c.h.bf16 %v15421_v7 }
 0x108   : > { %20444 = vst [vmem:[#allocation141_spill] sm:$0xff] %v16688_v35  ;;  %v1428_v15 = vrot.slane %v20445_v14, 1  ;;  %v20449_v31 = vunpack.c.l.bf16 %v15424_v43  ;;  %v20450_v63 = vunpack.c.l.bf16 %v15430_v28  ;;  %v20451_v9 = vunpack.c.h.bf16 %v15430_v28 }
 0x109   : > { %20446 = vst [vmem:[#allocation142_spill] sm:$0xff] %v16702_v24  ;;  %v5999_v10 = vrot.slane %v20447_v55, 2  ;;  %v6000_v39 = vrot.slane %v20448_v60, 2  ;;  %v1422_v14 = vsel %vm1114_vm1, %v1420_v57, %v1421_v54  ;;  %v20452_v2 = vunpack.c.l.bf16 %v15434_v4 }
 0x10a   : > { %v6002_v41 = vrot.slane %v20449_v31, 2  ;;  %12279 = vmatmul.mubr.msk.bf16.gmra.mrb[116].mxu1 %vm1629_vm2, %v16670_v52  ;;  %v3197_v37 = vrot.slane %v20450_v63, 2  ;;  %v3198_v1 = vrot.slane %v20451_v9, 2  ;;  %v1424_v43 = vsel %vm1114_vm1, %v1421_v54, %v1423_v62  ;;  %v10822_v9 = vld [vmem:[%s19701_s2 + $0x4] sm:$0x3] }
 0x10b   : > { %v3200_v55 = vrot.slane %v20452_v2, 2  ;;  %12282 = vmatprep.mubr.msk.bf16.mxu1 %vm1629_vm2, %v16684_v26  ;;  %v19976_v7 = vunpack.c.l.bf16 %v16697_v56  ;;  %v19975_v31 = vunpack.c.h.bf16 %v16697_v56  ;;  %v19974_v57 = vunpack.c.l.bf16 %v16700_v16  ;;  %14532 = vmatprep.subr.msk.bf16.mxu1 %vm1822_vm0, %v10822_v9 }
 0x10c   : > { %v1427_v60 = vsel %vm1114_vm1, %v1425_v3, %v1426_v46  ;;  %v1429_v63 = vsel %vm1114_vm1, %v1426_v46, %v1428_v15  ;;  %v6001_v28 = vsel %vm3111_vm3, %v5999_v10, %v6000_v39  ;;  %v16730_v4 = vpack.c.bf16 %v1424_v43, %v1422_v14 }
 0x10d   : > { %12837 = vmatmul.mubr.msk.bf16.gmra.mrb[24].mxu0 %vm1629_vm2, %v16688_v35  ;;  %v6003_v2 = vsel %vm3111_vm3, %v6000_v39, %v6002_v41  ;;  %v3199_v54 = vsel %vm3111_vm3, %v3197_v37, %v3198_v1  ;;  %v3201_v62 = vsel %vm3111_vm3, %v3198_v1, %v3200_v55  ;;  %v16740_v3 = vpack.c.bf16 %v1429_v63, %v1427_v60 }
 0x10e   : > { %20453 = vst [vmem:[#allocation143_spill] sm:$0xff] %v16730_v4  ;;  %12840 = vmatprep.mubr.msk.bf16.mxu0 %vm1629_vm2, %v16702_v24  ;;  %v1430_v10 = vrot.slane %v19976_v7, 1  ;;  %v1431_v46 = vrot.slane %v19975_v31, 1  ;;  %v1433_v37 = vrot.slane %v19974_v57, 1  ;;  %v16751_v41 = vpack.c.bf16 %v6003_v2, %v6001_v28  ;;  %v20460_v2 = vld [vmem:[#allocation23_spill] sm:$0xff] }
 0x10f   : > { %20454 = vst [vmem:[#allocation144_spill] sm:$0xff] %v16740_v3  ;;  %v16753_v15 = vpack.c.bf16 %v3201_v62, %v3199_v54  ;;  %v20457_v39 = vunpack.c.l.bf16 %v15464_v61  ;;  %v20458_v43 = vunpack.c.h.bf16 %v15464_v61  ;;  %v20459_v63 = vunpack.c.l.bf16 %v15477_v21 }
 0x110   : > { %20455 = vst [vmem:[#allocation145_spill] sm:$0xff] %v16751_v41  ;;  %v1432_v1 = vsel %vm1114_vm1, %v1430_v10, %v1431_v46  ;;  %v1434_v55 = vsel %vm1114_vm1, %v1431_v46, %v1433_v37  ;;  %v20461_v57 = vunpack.c.l.bf16 %v20460_v2  ;;  %v20462_v62 = vunpack.c.h.bf16 %v20460_v2 }
 0x111   : > { %20456 = vst [vmem:[#allocation146_spill] sm:$0xff] %v16753_v15  ;;  %v3202_v14 = vrot.slane %v20457_v39, 2  ;;  %v3203_v60 = vrot.slane %v20458_v43, 2  ;;  %v3205_v28 = vrot.slane %v20459_v63, 2  ;;  %v20463_v39 = vld [vmem:[#allocation24_spill] sm:$0xff]  ;;  %v16773_v10 = vpack.c.bf16 %v1434_v55, %v1432_v1  ;;  %v20468_v55 = vld [vmem:[#allocation26_spill] sm:$0xff] }
 0x112   : > { %12283 = vmatmul.mubr.msk.bf16.gmra.mrb[120].mxu1 %vm1629_vm2, %v16730_v4  ;;  %v3207_v54 = vrot.slane %v20461_v57, 2  ;;  %v3208_v31 = vrot.slane %v20462_v62, 2  ;;  %v20464_v7 = vunpack.c.l.bf16 %v20463_v39  ;;  %v14729_v57 = vld [vmem:[%s15037_s17] sm:$0xff]   ;;  %v20469_v43 = vunpack.c.l.bf16 %v20468_v55 }
 0x113   : > { %12286 = vmatprep.mubr.msk.bf16.mxu1 %vm1629_vm2, %v16740_v3  ;;  %20465 = vst [vmem:[#allocation23_spill] sm:$0xff] %v16773_v10  ;;  %v3204_v61 = vsel %vm3111_vm3, %v3202_v14, %v3203_v60  ;;  %v3206_v21 = vsel %vm3111_vm3, %v3203_v60, %v3205_v28  ;;  %v20470_v60 = vunpack.c.h.bf16 %v20468_v55  ;;  %v20471_v28 = vld [vmem:[#allocation27_spill] sm:$0xff] }
 0x114   : > { %v3210_v4 = vrot.slane %v20464_v7, 2  ;;  %v3209_v46 = vsel %vm3111_vm3, %v3207_v54, %v3208_v31  ;;  %v16784_v7 = vpack.c.bf16 %v3206_v21, %v3204_v61  ;;  %v3212_v14 = vrot.slane %v20469_v43, 2  ;;  %v20476_v21 = vld [vmem:[#allocation29_spill] sm:$0xff]  ;;  %v20489_v3 = vld [vmem:[#allocation35_spill] sm:$0xff] }
 0x115   : > { %12841 = vmatmul.mubr.msk.bf16.gmra.mrb[28].mxu0 %vm1629_vm2, %v16751_v41  ;;  %v3213_v63 = vrot.slane %v20470_v60, 2  ;;  %v20472_v2 = vunpack.c.l.bf16 %v20471_v28  ;;  %v20477_v41 = vunpack.c.l.bf16 %v20476_v21  ;;  %v16811_v43 = vld [vmem:[%s15037_s17 + $0x18] sm:$0xff]   ;;  %v20486_v21 = vld [vmem:[#allocation34_spill] sm:$0xff]  ;;  %v20490_v26 = vunpack.c.l.bf16 %v20489_v3 }
 0x116   : > { %12844 = vmatprep.mubr.msk.bf16.mxu0 %vm1629_vm2, %v16753_v15  ;;  %v3211_v37 = vsel %vm3111_vm3, %v3208_v31, %v3210_v4  ;;  %20466 = vst [vmem:[#allocation24_spill] sm:$0xff] %v16784_v7  ;;  %v20473_v31 = vld [vmem:[#allocation28_spill] sm:$0xff] }
 0x117   : > { %v16787_v1 = vpack.c.bf16 %v3211_v37, %v3209_v46  ;;  %v3215_v54 = vrot.slane %v20472_v2, 2  ;;  %v20474_v4 = vunpack.c.l.bf16 %v20473_v31  ;;  %v20475_v39 = vunpack.c.h.bf16 %v20473_v31  ;;  %v16802_v46 = vld [vmem:[%s15037_s17 + $0xc] sm:$0xff]  }
 0x118   : > { %20478 = vst [vmem:[#allocation26_spill] sm:$0xff] %v16802_v46  ;;  %v3214_v37 = vsel %vm3111_vm3, %v3212_v14, %v3213_v63 }
 0x119   : > { %20467 = vst [vmem:[#allocation147_spill] sm:$0xff] %v16787_v1  ;;  %v3217_v62 = vrot.slane %v20474_v4, 2  ;;  %v3218_v61 = vrot.slane %v20475_v39, 2  ;;  %v3216_v55 = vsel %vm3111_vm3, %v3213_v63, %v3215_v54  ;;  %v20481_v63 = vld [vmem:[#allocation31_spill] sm:$0xff]  ;;  %v20484_v39 = vld [vmem:[#allocation33_spill] sm:$0xff] }
 0x11a   : > { %12287 = vmatmul.mubr.msk.bf16.gmra.mrb[124].mxu1 %vm1629_vm2, %v16773_v10  ;;  %v16818_v2 = vpack.c.bf16 %v3216_v55, %v3214_v37  ;;  %v20482_v54 = vunpack.c.l.bf16 %v20481_v63  ;;  %v20483_v4 = vunpack.c.h.bf16 %v20481_v63  ;;  %v20488_v37 = vunpack.c.h.bf16 %v20486_v21 }
 0x11b   : > { %12292 = vmatprep.mubr.msk.bf16.mxu1 %vm1629_vm2, %v14729_v57  ;;  %v3220_v57 = vrot.slane %v20477_v41, 2  ;;  %v3219_v60 = vsel %vm3111_vm3, %v3217_v62, %v3218_v61  ;;  %v3819_v41 = vsel %vm1822_vm0, %v10822_v9, 0 }
 0x11c   : > { %20479 = vst [vmem:[#allocation27_spill] sm:$0xff] %v16818_v2  ;;  %v3222_v31 = vrot.slane %v20482_v54, 2  ;;  %v3223_v62 = vrot.slane %v20483_v4, 2  ;;  %v3228_v55 = vrot.slane %v20488_v37, 2  ;;  %v16846_v54 = vld [vmem:[%s15037_s17 + $0x30] sm:$0xff]  }
 0x11d   : > { %12845 = vmatmul.mubr.msk.bf16.gmra.mrb[32].mxu0 %vm1629_vm2, %v16784_v7  ;;  %v3221_v28 = vsel %vm3111_vm3, %v3218_v61, %v3220_v57  ;;  %v20485_v61 = vunpack.c.l.bf16 %v20484_v39  ;;  %v20487_v57 = vunpack.c.l.bf16 %v20486_v21 }
 0x11e   : > { %12848 = vmatprep.mubr.msk.bf16.mxu0 %vm1629_vm2, %v16787_v1  ;;  %v16822_v14 = vpack.c.bf16 %v3221_v28, %v3219_v60  ;;  %v3230_v60 = vrot.slane %v20490_v26, 2  ;;  %v16839_v28 = vld [vmem:[%s15037_s17 + $0x24] sm:$0xff]   ;;  %v3224_v63 = vsel %vm3111_vm3, %v3222_v31, %v3223_v62  ;;  %v20493_v31 = vld [vmem:[#allocation40_spill] sm:$0xff] }
 0x11f   : > { %v3225_v9 = vrot.slane %v20485_v61, 2  ;;  %v3227_v10 = vrot.slane %v20487_v57, 2  ;;  %v20494_v61 = vunpack.c.l.bf16 %v20493_v31 }
 0x120   : > { %20480 = vst [vmem:[#allocation28_spill] sm:$0xff] %v16822_v14  ;;  %v3231_v3 = vsel %vm3111_vm3, %v3228_v55, %v3230_v60 }
 0x121   : > { %v3229_v4 = vsel %vm3111_vm3, %v3227_v10, %v3228_v55  ;;  %v20496_v10 = vld [vmem:[#allocation41_spill] sm:$0xff]  ;;  %v20498_v55 = vld [vmem:[#allocation42_spill] sm:$0xff] }
 0x122   : > { %12293 = vmatmul.mubr.msk.bf16.vlgmr.msra.gmra.mrb[0].mxu1 %vm1629_vm2, %v16802_v46  ;;  %v16856_v39 = vpack.c.bf16 %v3231_v3, %v3229_v4  ;;  %v20497_v57 = vunpack.c.l.bf16 %v20496_v10  ;;  %v20499_v60 = vunpack.c.l.bf16 %v20498_v55  ;;  %v20501_v46 = vld [vmem:[#allocation43_spill] sm:$0xff]  ;;  %v16873_v4 = vld [vmem:[%s15037_s17 + $0x3c] sm:$0xff]  }
 0x123   : > { %12296 = vmatprep.mubr.msk.bf16.mxu1 %vm1629_vm2, %v16811_v43  ;;  %12421 = vmatpush3.bf16.msra.mxu1 %v3819_v41  ;;  %v3226_v41 = vsel %vm3111_vm3, %v3223_v62, %v3225_v9  ;;  %v6004_v62 = vrot.slane %v20494_v61, 2  ;;  %v20495_v9 = vunpack.c.h.bf16 %v20493_v31  ;;  %v16880_v61 = vld [vmem:[%s15037_s17 + $0x48] sm:$0xff]  }
 0x124   : > { %v16852_v26 = vpack.c.bf16 %v3226_v41, %v3224_v63  ;;  %20492 = vst [vmem:[#allocation31_spill] sm:$0xff] %v16856_v39  ;;  %v6007_v37 = vrot.slane %v20497_v57, 2  ;;  %v3237_v52 = vrot.slane %v20499_v60, 2  ;;  %v20500_v63 = vunpack.c.h.bf16 %v20498_v55 }
 0x125   : > { %12849 = vmatmul.mubr.msk.bf16.gmra.mrb[36].mxu0 %vm1629_vm2, %v16818_v2  ;;  %v6005_v21 = vrot.slane %v20495_v9, 2 }
 0x126   : > { %12852 = vmatprep.mubr.msk.bf16.mxu0 %vm1629_vm2, %v16822_v14  ;;  %20491 = vst [vmem:[#allocation29_spill] sm:$0xff] %v16852_v26  ;;  %v3238_v41 = vrot.slane %v20500_v63, 2  ;;  %v20502_v14 = vunpack.c.l.bf16 %v20501_v46  ;;  %v20510_v63 = vld [vmem:[#allocation48_spill] sm:$0xff] }
 0x127   : > { %v6006_v3 = vsel %vm3111_vm3, %v6004_v62, %v6005_v21  ;;  %v6008_v31 = vsel %vm3111_vm3, %v6005_v21, %v6007_v37  ;;  %v20505_v62 = vld [vmem:[#allocation46_spill] sm:$0xff] }
 0x128   : > { %v3240_v2 = vrot.slane %v20502_v14, 2  ;;  %v3239_v9 = vsel %vm3111_vm3, %v3237_v52, %v3238_v41  ;;  %v16886_v14 = vpack.c.bf16 %v6008_v31, %v6006_v3  ;;  %v20506_v57 = vunpack.c.l.bf16 %v20505_v62  ;;  %v20508_v52 = vld [vmem:[#allocation47_spill] sm:$0xff] }
 0x129   : > { %v20507_v37 = vunpack.c.h.bf16 %v20505_v62  ;;  %v20509_v60 = vunpack.c.l.bf16 %v20508_v52  ;;  %v20512_v3 = vunpack.c.h.bf16 %v20510_v63 }
 0x12a   : > { %12297 = vmatmul.mubr.msk.bf16.gmra.mrb[4].mxu1 %vm1629_vm2, %v16839_v28  ;;  %v3241_v46 = vsel %vm3111_vm3, %v3238_v41, %v3240_v2  ;;  %20503 = vst [vmem:[#allocation33_spill] sm:$0xff] %v16886_v14  ;;  %v3242_v21 = vrot.slane %v20506_v57, 2  ;;  %v20511_v41 = vunpack.c.l.bf16 %v20510_v63  ;;  %v14737_v57 = vld [vmem:[%s15037_s17 + $0x78] sm:$0xff]  }
 0x12b   : > { %12300 = vmatprep.mubr.msk.bf16.mxu1 %vm1629_vm2, %v16846_v54  ;;  %v16890_v10 = vpack.c.bf16 %v3241_v46, %v3239_v9  ;;  %v3243_v55 = vrot.slane %v20507_v37, 2  ;;  %v3245_v2 = vrot.slane %v20509_v60, 2  ;;  %v3248_v31 = vrot.slane %v20512_v3, 2  ;;  %v16907_v9 = vld [vmem:[%s15037_s17 + $0x54] sm:$0xff]   ;;  %v20518_v60 = vld [vmem:[#allocation51_spill] sm:$0xff] }
 0x12c   : > { %20515 = vst [vmem:[#allocation35_spill] sm:$0xff] %v16907_v9 }
 0x12d   : > { %12853 = vmatmul.mubr.msk.bf16.gmra.mrb[40].mxu0 %vm1629_vm2, %v16852_v26  ;;  %20504 = vst [vmem:[#allocation34_spill] sm:$0xff] %v16890_v10  ;;  %v20513_v26 = vld [vmem:[#allocation49_spill] sm:$0xff]  ;;  %v3244_v46 = vsel %vm3111_vm3, %v3242_v21, %v3243_v55  ;;  %v3246_v62 = vsel %vm3111_vm3, %v3243_v55, %v3245_v2  ;;  %v20519_v21 = vunpack.c.l.bf16 %v20518_v60  ;;  %v20520_v55 = vunpack.c.h.bf16 %v20518_v60 }
 0x12e   : > { %12856 = vmatprep.mubr.msk.bf16.mxu0 %vm1629_vm2, %v16856_v39  ;;  %v3247_v39 = vrot.slane %v20511_v41, 2  ;;  %v20514_v1 = vunpack.c.l.bf16 %v20513_v26  ;;  %v20521_v41 = vld [vmem:[#allocation52_spill] sm:$0xff] }
 0x12f   : > { %v3252_v63 = vrot.slane %v20519_v21, 2  ;;  %v3253_v2 = vrot.slane %v20520_v55, 2  ;;  %v16945_v21 = vld [vmem:[%s15037_s17 + $0x90] sm:$0xff]  }
 0x130   : > { %v3250_v7 = vrot.slane %v20514_v1, 2  ;;  %v3249_v37 = vsel %vm3111_vm3, %v3247_v39, %v3248_v31  ;;  %v16918_v1 = vpack.c.bf16 %v3246_v62, %v3244_v46  ;;  %v20522_v39 = vunpack.c.l.bf16 %v20521_v41  ;;  %v20526_v62 = vld [vmem:[#allocation54_spill] sm:$0xff]  ;;  %20529 = vst [vmem:[#allocation43_spill] sm:$0xff] %v16945_v21 }
 0x131   : > { %v20527_v15 = vunpack.c.l.bf16 %v20526_v62  ;;  %v20537_v62 = vld [vmem:[#allocation59_spill] sm:$0xff] }
 0x132   : > { %12301 = vmatmul.mubr.msk.bf16.gmra.mrb[8].mxu1 %vm1629_vm2, %v16873_v4  ;;  %v3251_v52 = vsel %vm3111_vm3, %v3248_v31, %v3250_v7  ;;  %20516 = vst [vmem:[#allocation40_spill] sm:$0xff] %v16918_v1  ;;  %v3255_v3 = vrot.slane %v20522_v39, 2  ;;  %v20523_v7 = vld [vmem:[#allocation53_spill] sm:$0xff] }
 0x133   : > { %12304 = vmatprep.mubr.msk.bf16.mxu1 %vm1629_vm2, %v16880_v61  ;;  %v16921_v26 = vpack.c.bf16 %v3251_v52, %v3249_v37  ;;  %v20524_v31 = vunpack.c.l.bf16 %v20523_v7  ;;  %v16938_v37 = vld [vmem:[%s15037_s17 + $0x84] sm:$0xff]   ;;  %v3254_v52 = vsel %vm3111_vm3, %v3252_v63, %v3253_v2  ;;  %v20532_v63 = vld [vmem:[#allocation56_spill] sm:$0xff] }
 0x134   : > { %20528 = vst [vmem:[#allocation42_spill] sm:$0xff] %v16938_v37  ;;  %v3256_v60 = vsel %vm3111_vm3, %v3253_v2, %v3255_v3  ;;  %v20533_v39 = vunpack.c.l.bf16 %v20532_v63  ;;  %v20534_v3 = vunpack.c.h.bf16 %v20532_v63 }
 0x135   : > { %12857 = vmatmul.mubr.msk.bf16.gmra.mrb[44].mxu0 %vm1629_vm2, %v16886_v14  ;;  %20517 = vst [vmem:[#allocation41_spill] sm:$0xff] %v16921_v26  ;;  %v3257_v14 = vrot.slane %v20524_v31, 2 }
 0x136   : > { %12860 = vmatprep.mubr.msk.bf16.mxu0 %vm1629_vm2, %v16890_v10  ;;  %v20525_v10 = vunpack.c.h.bf16 %v20523_v7  ;;  %v3262_v2 = vrot.slane %v20533_v39, 2  ;;  %v3263_v7 = vrot.slane %v20534_v3, 2  ;;  %v16979_v39 = vld [vmem:[%s15037_s17 + $0xa8] sm:$0xff]  }
 0x137   : > { %20543 = vst [vmem:[#allocation49_spill] sm:$0xff] %v16979_v39 }
 0x138   : > { %v3258_v46 = vrot.slane %v20525_v10, 2 }
 0x13a   : > { %12305 = vmatmul.mubr.msk.bf16.gmra.mrb[12].mxu1 %vm1629_vm2, %v16907_v9  ;;  %v3259_v10 = vsel %vm3111_vm3, %v3257_v14, %v3258_v46  ;;  %v20535_v14 = vld [vmem:[#allocation57_spill] sm:$0xff] }
 0x13b   : > { %12308 = vmatprep.mubr.msk.bf16.mxu1 %vm1629_vm2, %v14737_v57  ;;  %v3260_v57 = vrot.slane %v20527_v15, 2  ;;  %v16951_v15 = vpack.c.bf16 %v3256_v60, %v3254_v52  ;;  %v20536_v31 = vunpack.c.l.bf16 %v20535_v14  ;;  %v20539_v52 = vunpack.c.h.bf16 %v20537_v62 }
 0x13d   : > { %12861 = vmatmul.mubr.msk.bf16.gmra.mrb[48].mxu0 %vm1629_vm2, %v16918_v1  ;;  %v3261_v55 = vsel %vm3111_vm3, %v3258_v46, %v3260_v57  ;;  %20530 = vst [vmem:[#allocation46_spill] sm:$0xff] %v16951_v15  ;;  %v3265_v46 = vrot.slane %v20536_v31, 2  ;;  %v20538_v57 = vunpack.c.l.bf16 %v20537_v62  ;;  %v3268_v60 = vrot.slane %v20539_v52, 2 }
 0x13e   : > { %12864 = vmatprep.mubr.msk.bf16.mxu0 %vm1629_vm2, %v16921_v26  ;;  %v16955_v41 = vpack.c.bf16 %v3261_v55, %v3259_v10  ;;  %v16972_v10 = vld [vmem:[%s15037_s17 + $0x9c] sm:$0xff]   ;;  %v3264_v55 = vsel %vm3111_vm3, %v3262_v2, %v3263_v7  ;;  %v20546_v2 = vunpack.c.l.bf16 %v15822_v58  ;;  %v20547_v31 = vunpack.c.h.bf16 %v15822_v58 }
 0x13f   : > { %v3267_v26 = vrot.slane %v20538_v57, 2  ;;  %20542 = vst [vmem:[#allocation48_spill] sm:$0xff] %v16972_v10  ;;  %v3266_v63 = vsel %vm3111_vm3, %v3263_v7, %v3265_v46  ;;  %v20549_v62 = vunpack.c.l.bf16 %v15835_v47  ;;  %v20550_v52 = vunpack.c.h.bf16 %v15835_v47 }
 0x140   : > { %20531 = vst [vmem:[#allocation47_spill] sm:$0xff] %v16955_v41  ;;  %v6009_v7 = vrot.slane %v20546_v2, 2  ;;  %v6010_v46 = vrot.slane %v20547_v31, 2 }
 0x141   : > { %v3269_v3 = vsel %vm3111_vm3, %v3267_v26, %v3268_v60  ;;  %v20548_v26 = vunpack.c.l.bf16 %v15829_v59  ;;  %v3277_v57 = vrot.slane %v20549_v62, 2 }
 0x142   : > { %12309 = vmatmul.mubr.msk.bf16.gmra.mrb[16].mxu1 %vm1629_vm2, %v16938_v37  ;;  %v20540_v37 = vld [vmem:[#allocation60_spill] sm:$0xff]  ;;  %v6011_v58 = vsel %vm3111_vm3, %v6009_v7, %v6010_v46  ;;  %v20556_v7 = vld [vmem:[#allocation67_spill] sm:$0xff] }
 0x143   : > { %12312 = vmatprep.mubr.msk.bf16.mxu1 %vm1629_vm2, %v16945_v21  ;;  %v20541_v1 = vunpack.c.l.bf16 %v20540_v37 }
 0x145   : > { %v3270_v24 = vrot.slane %v20541_v1, 2  ;;  %12865 = vmatmul.mubr.msk.bf16.gmra.mrb[52].mxu0 %vm1629_vm2, %v16951_v15  ;;  %v16985_v1 = vpack.c.bf16 %v3266_v63, %v3264_v55  ;;  %v20551_v55 = vunpack.c.l.bf16 %v15850_v32 }
 0x146   : > { %12868 = vmatprep.mubr.msk.bf16.mxu0 %vm1629_vm2, %v16955_v41 }
 0x147   : > { %v3271_v37 = vsel %vm3111_vm3, %v3268_v60, %v3270_v24  ;;  %20544 = vst [vmem:[#allocation51_spill] sm:$0xff] %v16985_v1  ;;  %v6012_v24 = vrot.slane %v20548_v26, 2  ;;  %v3278_v60 = vrot.slane %v20550_v52, 2  ;;  %v3280_v63 = vrot.slane %v20551_v55, 2  ;;  %v20561_v55 = vld [vmem:[#allocation70_spill] sm:$0xff] }
 0x148   : > { %v16989_v14 = vpack.c.bf16 %v3271_v37, %v3269_v3  ;;  %v17006_v3 = vld [vmem:[%s15037_s17 + $0xb4] sm:$0xff]   ;;  %v17013_v37 = vld [vmem:[%s15037_s17 + $0xc0] sm:$0xff]   ;;  %v20557_v26 = vunpack.c.l.bf16 %v20556_v7 }
 0x149   : > { %20552 = vst [vmem:[#allocation53_spill] sm:$0xff] %v17006_v3  ;;  %v6013_v59 = vsel %vm3111_vm3, %v6010_v46, %v6012_v24  ;;  %20553 = vst [vmem:[#allocation54_spill] sm:$0xff] %v17013_v37  ;;  %v3279_v47 = vsel %vm3111_vm3, %v3277_v57, %v3278_v60  ;;  %v3281_v32 = vsel %vm3111_vm3, %v3278_v60, %v3280_v63  ;;  %v20558_v24 = vunpack.c.h.bf16 %v20556_v7  ;;  %v20559_v57 = vld [vmem:[#allocation69_spill] sm:$0xff] }
 0x14a   : > { %12313 = vmatmul.mubr.msk.bf16.gmra.mrb[20].mxu1 %vm1629_vm2, %v16972_v10  ;;  %20545 = vst [vmem:[#allocation52_spill] sm:$0xff] %v16989_v14  ;;  %v17019_v2 = vpack.c.bf16 %v6013_v59, %v6011_v58  ;;  %v17023_v31 = vpack.c.bf16 %v3281_v32, %v3279_v47  ;;  %v3282_v46 = vrot.slane %v20557_v26, 2  ;;  %v20560_v52 = vunpack.c.l.bf16 %v20559_v57  ;;  %v17040_v47 = vld [vmem:[%s15037_s17 + $0xcc] sm:$0xff]   ;;  %v20569_v57 = vld [vmem:[#allocation74_spill] sm:$0xff] }
 0x14b   : > { %12316 = vmatprep.mubr.msk.bf16.mxu1 %vm1629_vm2, %v16979_v39  ;;  %v3283_v62 = vrot.slane %v20558_v24, 2  ;;  %v20562_v63 = vunpack.c.l.bf16 %v20561_v55  ;;  %v20563_v58 = vunpack.c.h.bf16 %v20561_v55  ;;  %20566 = vst [vmem:[#allocation59_spill] sm:$0xff] %v17040_v47  ;;  %v14745_v26 = vld [vmem:[%s15037_s17 + $0xf0] sm:$0xff]   ;;  %v17050_v24 = vld [vmem:[%s19701_s2 + $0xe] sm:$0x3] }
 0x14c   : > { %20554 = vst [vmem:[#allocation56_spill] sm:$0xff] %v17019_v2  ;;  %20555 = vst [vmem:[#allocation57_spill] sm:$0xff] %v17023_v31  ;;  %v3285_v60 = vrot.slane %v20560_v52, 2  ;;  %14538 = vmatprep.subr.msk.bf16.mxu0 %vm1822_vm0, %v17050_v24  ;;  %v20570_v52 = vunpack.c.l.bf16 %v20569_v57 }
 0x14d   : > { %12869 = vmatmul.mubr.msk.bf16.gmra.mrb[56].mxu0 %vm1629_vm2, %v16985_v1  ;;  %v3288_v59 = vrot.slane %v20563_v58, 2  ;;  %v20564_v1 = vld [vmem:[#allocation72_spill] sm:$0xff]  ;;  %v3284_v32 = vsel %vm3111_vm3, %v3282_v46, %v3283_v62 }
 0x14e   : > { %12872 = vmatprep.mubr.msk.bf16.mxu0 %vm1629_vm2, %v16989_v14  ;;  %v3287_v14 = vrot.slane %v20562_v63, 2  ;;  %v20565_v41 = vunpack.c.l.bf16 %v20564_v1  ;;  %v3286_v7 = vsel %vm3111_vm3, %v3283_v62, %v3285_v60  ;;  %v3292_v60 = vrot.slane %v20570_v52, 2 }
 0x14f   : > { %v17058_v46 = vpack.c.bf16 %v3286_v7, %v3284_v32  ;;  %v20577_v7 = vld [vmem:[#allocation77_spill] sm:$0xff] }
 0x150   : > { %v3290_v15 = vrot.slane %v20565_v41, 2  ;;  %v3289_v41 = vsel %vm3111_vm3, %v3287_v14, %v3288_v59  ;;  %v20571_v14 = vunpack.c.h.bf16 %v20569_v57  ;;  %v20578_v49 = vunpack.c.l.bf16 %v20577_v7  ;;  %v20588_v7 = vld [vmem:[#allocation82_spill] sm:$0xff] }
 0x151   : > { %20567 = vst [vmem:[#allocation60_spill] sm:$0xff] %v17058_v46 }
 0x152   : > { %12317 = vmatmul.mubr.msk.bf16.gmra.mrb[24].mxu1 %vm1629_vm2, %v17006_v3  ;;  %v3291_v1 = vsel %vm3111_vm3, %v3288_v59, %v3290_v15  ;;  %v3293_v55 = vrot.slane %v20571_v14, 2  ;;  %v20572_v15 = vld [vmem:[#allocation75_spill] sm:$0xff]  ;;  %v20574_v59 = vld [vmem:[#allocation76_spill] sm:$0xff] }
 0x153   : > { %12320 = vmatprep.mubr.msk.bf16.mxu1 %vm1629_vm2, %v17013_v37  ;;  %v17061_v62 = vpack.c.bf16 %v3291_v1, %v3289_v41  ;;  %v20573_v63 = vunpack.c.l.bf16 %v20572_v15  ;;  %v20576_v35 = vunpack.c.h.bf16 %v20574_v59  ;;  %v17078_v41 = vld [vmem:[%s15037_s17 + $0xfc] sm:$0xff]  }
 0x154   : > { %20579 = vst [vmem:[#allocation69_spill] sm:$0xff] %v17078_v41  ;;  %v3294_v1 = vsel %vm3111_vm3, %v3292_v60, %v3293_v55  ;;  %v20583_v60 = vld [vmem:[#allocation79_spill] sm:$0xff] }
 0x155   : > { %12873 = vmatmul.mubr.msk.bf16.gmra.mrb[60].mxu0 %vm1629_vm2, %v17019_v2  ;;  %20568 = vst [vmem:[#allocation67_spill] sm:$0xff] %v17061_v62  ;;  %v3295_v58 = vrot.slane %v20573_v63, 2  ;;  %v20575_v2 = vunpack.c.l.bf16 %v20574_v59  ;;  %v3298_v32 = vrot.slane %v20576_v35, 2  ;;  %v20584_v15 = vunpack.c.l.bf16 %v20583_v60 }
 0x156   : > { %12876 = vmatprep.mubr.msk.bf16.mxu0 %vm1629_vm2, %v17023_v31  ;;  %v20585_v63 = vunpack.c.h.bf16 %v20583_v60 }
 0x157   : > { %v3297_v31 = vrot.slane %v20575_v2, 2  ;;  %v3296_v57 = vsel %vm3111_vm3, %v3293_v55, %v3295_v58  ;;  %v17085_v2 = vld [vmem:[%s15037_s17 + $0x108] sm:$0xff]   ;;  %v3302_v55 = vrot.slane %v20584_v15, 2  ;;  %v17119_v15 = vld [vmem:[%s15037_s17 + $0x120] sm:$0xff]  }
 0x158   : > { %20580 = vst [vmem:[#allocation70_spill] sm:$0xff] %v17085_v2  ;;  %v3303_v58 = vrot.slane %v20585_v63, 2  ;;  %20594 = vst [vmem:[#allocation76_spill] sm:$0xff] %v17119_v15 }
 0x159   : > { %v3299_v35 = vsel %vm3111_vm3, %v3297_v31, %v3298_v32  ;;  %v20586_v31 = vld [vmem:[#allocation81_spill] sm:$0xff] }
 0x15a   : > { %12321 = vmatmul.mubr.msk.bf16.gmra.mrb[28].mxu1 %vm1629_vm2, %v17040_v47  ;;  %v20587_v59 = vunpack.c.l.bf16 %v20586_v31 }
 0x15b   : > { %12324 = vmatprep.mubr.msk.bf16.mxu1 %vm1629_vm2, %v14745_v26  ;;  %v3300_v26 = vrot.slane %v20578_v49, 2  ;;  %v17091_v49 = vpack.c.bf16 %v3296_v57, %v3294_v1  ;;  %v20590_v1 = vunpack.c.h.bf16 %v20588_v7 }
 0x15d   : > { %12877 = vmatmul.mubr.msk.bf16.gmra.mrb[64].mxu0 %vm1629_vm2, %v17058_v46  ;;  %v3301_v52 = vsel %vm3111_vm3, %v3298_v32, %v3300_v26  ;;  %20581 = vst [vmem:[#allocation72_spill] sm:$0xff] %v17091_v49  ;;  %v3305_v32 = vrot.slane %v20587_v59, 2  ;;  %v20589_v26 = vunpack.c.l.bf16 %v20588_v7  ;;  %v3308_v57 = vrot.slane %v20590_v1, 2  ;;  %v20602_v1 = vld [vmem:[#allocation90_spill] sm:$0xff] }
 0x15e   : > { %12880 = vmatprep.mubr.msk.bf16.mxu0 %vm1629_vm2, %v17061_v62  ;;  %v17095_v14 = vpack.c.bf16 %v3301_v52, %v3299_v35  ;;  %v17112_v35 = vld [vmem:[%s15037_s17 + $0x114] sm:$0xff]   ;;  %v3304_v52 = vsel %vm3111_vm3, %v3302_v55, %v3303_v58 }
 0x15f   : > { %v3307_v62 = vrot.slane %v20589_v26, 2  ;;  %20593 = vst [vmem:[#allocation75_spill] sm:$0xff] %v17112_v35  ;;  %v3306_v60 = vsel %vm3111_vm3, %v3303_v58, %v3305_v32  ;;  %v20597_v55 = vld [vmem:[#allocation88_spill] sm:$0xff] }
 0x160   : > { %20582 = vst [vmem:[#allocation74_spill] sm:$0xff] %v17095_v14  ;;  %v20598_v59 = vunpack.c.l.bf16 %v20597_v55  ;;  %v20599_v32 = vunpack.c.h.bf16 %v20597_v55 }
 0x161   : > { %v3309_v63 = vsel %vm3111_vm3, %v3307_v62, %v3308_v57  ;;  %v20600_v62 = vld [vmem:[#allocation89_spill] sm:$0xff] }
 0x162   : > { %12325 = vmatmul.mubr.msk.bf16.gmra.mrb[32].mxu1 %vm1629_vm2, %v17078_v41  ;;  %v20591_v41 = vld [vmem:[#allocation83_spill] sm:$0xff]  ;;  %v6014_v58 = vrot.slane %v20598_v59, 2  ;;  %v6015_v7 = vrot.slane %v20599_v32, 2  ;;  %v20601_v26 = vunpack.c.l.bf16 %v20600_v62  ;;  %v17153_v59 = vld [vmem:[%s15037_s17 + $0x138] sm:$0xff]  }
 0x163   : > { %12328 = vmatprep.mubr.msk.bf16.mxu1 %vm1629_vm2, %v17085_v2  ;;  %v20592_v46 = vunpack.c.l.bf16 %v20591_v41  ;;  %20608 = vst [vmem:[#allocation82_spill] sm:$0xff] %v17153_v59 }
 0x165   : > { %v3310_v23 = vrot.slane %v20592_v46, 2  ;;  %12881 = vmatmul.mubr.msk.bf16.gmra.mrb[68].mxu0 %vm1629_vm2, %v17091_v49  ;;  %v17125_v46 = vpack.c.bf16 %v3306_v60, %v3304_v52  ;;  %v20604_v52 = vunpack.c.h.bf16 %v20602_v1  ;;  %v20605_v49 = vld [vmem:[#allocation91_spill] sm:$0xff] }
 0x166   : > { %12884 = vmatprep.mubr.msk.bf16.mxu0 %vm1629_vm2, %v17095_v14  ;;  %v20606_v19 = vunpack.c.l.bf16 %v20605_v49 }
 0x167   : > { %v3311_v41 = vsel %vm3111_vm3, %v3308_v57, %v3310_v23  ;;  %20595 = vst [vmem:[#allocation77_spill] sm:$0xff] %v17125_v46  ;;  %v6017_v23 = vrot.slane %v20601_v26, 2  ;;  %v20603_v57 = vunpack.c.l.bf16 %v20602_v1  ;;  %v3318_v60 = vrot.slane %v20604_v52, 2  ;;  %v20616_v52 = vld [vmem:[#allocation96_spill] sm:$0xff] }
 0x168   : > { %v17129_v31 = vpack.c.bf16 %v3311_v41, %v3309_v63  ;;  %v3320_v36 = vrot.slane %v20606_v19, 2  ;;  %v17146_v63 = vld [vmem:[%s15037_s17 + $0x12c] sm:$0xff]   ;;  %v6016_v41 = vsel %vm3111_vm3, %v6014_v58, %v6015_v7  ;;  %v20611_v58 = vld [vmem:[#allocation94_spill] sm:$0xff] }
 0x169   : > { %v3317_v14 = vrot.slane %v20603_v57, 2  ;;  %20607 = vst [vmem:[#allocation81_spill] sm:$0xff] %v17146_v63  ;;  %v6018_v55 = vsel %vm3111_vm3, %v6015_v7, %v6017_v23  ;;  %v20612_v26 = vunpack.c.l.bf16 %v20611_v58  ;;  %v20613_v23 = vunpack.c.h.bf16 %v20611_v58 }
 0x16a   : > { %12329 = vmatmul.mubr.msk.bf16.gmra.mrb[36].mxu1 %vm1629_vm2, %v17112_v35  ;;  %20596 = vst [vmem:[#allocation79_spill] sm:$0xff] %v17129_v31  ;;  %v3321_v49 = vsel %vm3111_vm3, %v3318_v60, %v3320_v36  ;;  %v17159_v19 = vpack.c.bf16 %v6018_v55, %v6016_v41  ;;  %v20618_v41 = vunpack.c.h.bf16 %v20616_v52 }
 0x16b   : > { %12332 = vmatprep.mubr.msk.bf16.mxu1 %vm1629_vm2, %v17119_v15  ;;  %v3319_v32 = vsel %vm3111_vm3, %v3317_v14, %v3318_v60  ;;  %v3322_v7 = vrot.slane %v20612_v26, 2  ;;  %v3323_v1 = vrot.slane %v20613_v23, 2  ;;  %v20614_v14 = vld [vmem:[#allocation95_spill] sm:$0xff]  ;;  %v20617_v60 = vunpack.c.l.bf16 %v20616_v52 }
 0x16c   : > { %20609 = vst [vmem:[#allocation83_spill] sm:$0xff] %v17159_v19  ;;  %v17163_v62 = vpack.c.bf16 %v3321_v49, %v3319_v32  ;;  %v20615_v57 = vunpack.c.l.bf16 %v20614_v14  ;;  %v3328_v55 = vrot.slane %v20618_v41, 2  ;;  %v17180_v32 = vld [vmem:[%s15037_s17 + $0x144] sm:$0xff]  }
 0x16d   : > { %12885 = vmatmul.mubr.msk.bf16.gmra.mrb[72].mxu0 %vm1629_vm2, %v17125_v46  ;;  %v20619_v46 = vld [vmem:[#allocation97_spill] sm:$0xff]  ;;  %20621 = vst [vmem:[#allocation89_spill] sm:$0xff] %v17180_v32  ;;  %v3324_v49 = vsel %vm3111_vm3, %v3322_v7, %v3323_v1  ;;  %v14753_v26 = vld [vmem:[%s15037_s17 + $0x168] sm:$0xff]  }
 0x16e   : > { %12888 = vmatprep.mubr.msk.bf16.mxu0 %vm1629_vm2, %v17129_v31  ;;  %20610 = vst [vmem:[#allocation88_spill] sm:$0xff] %v17163_v62  ;;  %v3325_v36 = vrot.slane %v20615_v57, 2  ;;  %v3327_v31 = vrot.slane %v20617_v60, 2  ;;  %v20620_v6 = vunpack.c.l.bf16 %v20619_v46  ;;  %v20624_v57 = vld [vmem:[#allocation99_spill] sm:$0xff]  ;;  %v20627_v60 = vld [vmem:[#allocation100_spill] sm:$0xff] }
 0x16f   : > { %v20625_v7 = vunpack.c.l.bf16 %v20624_v57 }
 0x170   : > { %v3326_v58 = vsel %vm3111_vm3, %v3323_v1, %v3325_v36  ;;  %v3329_v23 = vsel %vm3111_vm3, %v3327_v31, %v3328_v55  ;;  %v20626_v1 = vunpack.c.h.bf16 %v20624_v57  ;;  %v20628_v31 = vunpack.c.l.bf16 %v20627_v60  ;;  %v20636_v60 = vld [vmem:[#allocation104_spill] sm:$0xff] }
 0x171   : > { %v3332_v52 = vrot.slane %v20625_v7, 2  ;;  %v17218_v7 = vld [vmem:[%s15037_s17 + $0x180] sm:$0xff]  }
 0x172   : > { %12333 = vmatmul.mubr.msk.bf16.gmra.mrb[40].mxu1 %vm1629_vm2, %v17146_v63  ;;  %v3333_v36 = vrot.slane %v20626_v1, 2  ;;  %v3335_v41 = vrot.slane %v20628_v31, 2  ;;  %v20637_v31 = vunpack.c.l.bf16 %v20636_v60  ;;  %v17243_v63 = vld [vmem:[%s15037_s17 + $0x2b8] sm:$0xff]  }
 0x173   : > { %12336 = vmatprep.mubr.msk.bf16.mxu1 %vm1629_vm2, %v17153_v59  ;;  %v3330_v59 = vrot.slane %v20620_v6, 2  ;;  %v17191_v6 = vpack.c.bf16 %v3326_v58, %v3324_v49  ;;  %v20632_v58 = vld [vmem:[#allocation102_spill] sm:$0xff] }
 0x174   : > { %v3336_v57 = vsel %vm3111_vm3, %v3333_v36, %v3335_v41 }
 0x175   : > { %12889 = vmatmul.mubr.msk.bf16.gmra.mrb[76].mxu0 %vm1629_vm2, %v17159_v19  ;;  %v3331_v14 = vsel %vm3111_vm3, %v3328_v55, %v3330_v59  ;;  %20622 = vst [vmem:[#allocation90_spill] sm:$0xff] %v17191_v6  ;;  %v20629_v59 = vld [vmem:[#allocation101_spill] sm:$0xff] }
 0x176   : > { %12892 = vmatprep.mubr.msk.bf16.mxu0 %vm1629_vm2, %v17163_v62  ;;  %v17194_v46 = vpack.c.bf16 %v3331_v14, %v3329_v23  ;;  %v20630_v55 = vunpack.c.l.bf16 %v20629_v59  ;;  %v20631_v62 = vunpack.c.h.bf16 %v20629_v59  ;;  %v17211_v23 = vld [vmem:[%s15037_s17 + $0x174] sm:$0xff]   ;;  %v3334_v14 = vsel %vm3111_vm3, %v3332_v52, %v3333_v36  ;;  %v20639_v36 = vld [vmem:[#allocation106_spill] sm:$0xff] }
 0x177   : > { %20634 = vst [vmem:[#allocation94_spill] sm:$0xff] %v17211_v23  ;;  %v17224_v1 = vpack.c.bf16 %v3336_v57, %v3334_v14  ;;  %v3342_v59 = vrot.slane %v20637_v31, 2  ;;  %v20638_v52 = vunpack.c.h.bf16 %v20636_v60  ;;  %v20640_v41 = vunpack.c.l.bf16 %v20639_v36  ;;  %v17246_v60 = vld [vmem:[%s15037_s17 + $0x2c0] sm:$0x1]  ;;  %v17258_v36 = vld [vmem:[%s15037_s17 + $0x198] sm:$0xff]  }
 0x178   : > { %20623 = vst [vmem:[#allocation91_spill] sm:$0xff] %v17194_v46  ;;  %v3337_v19 = vrot.slane %v20630_v55, 2  ;;  %v3338_v49 = vrot.slane %v20631_v62, 2  ;;  %20647 = vst [vmem:[#allocation97_spill] sm:$0xff] %v17246_v60 }
 0x179   : > { %20635 = vst [vmem:[#allocation95_spill] sm:$0xff] %v17224_v1  ;;  %v3343_v55 = vrot.slane %v20638_v52, 2  ;;  %v17251_v52 = vld [vmem:[%s15037_s17 + $0x18c] sm:$0xff]   ;;  %20649 = vst [vmem:[#allocation100_spill] sm:$0xff] %v17258_v36 }
 0x17a   : > { %12337 = vmatmul.mubr.msk.bf16.gmra.mrb[44].mxu1 %vm1629_vm2, %v17180_v32  ;;  %v20633_v32 = vunpack.c.l.bf16 %v20632_v58  ;;  %v3339_v62 = vsel %vm3111_vm3, %v3337_v19, %v3338_v49  ;;  %v3345_v58 = vrot.slane %v20640_v41, 2  ;;  %20648 = vst [vmem:[#allocation99_spill] sm:$0xff] %v17251_v52  ;;  %v20066_v41 = vunpack.c.l.bf16 %v17246_v60 }
 0x17b   : > { %12340 = vmatprep.mubr.msk.bf16.mxu1 %vm1629_vm2, %v14753_v26  ;;  %v20665_v60 = vunpack.c.l.bf16 %v16300_v13  ;;  %v20667_v13 = vld [vmem:[#allocation3_spill] sm:$0xff] }
 0x17c   : > { %v3340_v26 = vrot.slane %v20633_v32, 2 }
 0x17d   : > { %12893 = vmatmul.mubr.msk.bf16.gmra.mrb[80].mxu0 %vm1629_vm2, %v17191_v6 }
 0x17e   : > { %12896 = vmatprep.mubr.msk.bf16.mxu0 %vm1629_vm2, %v17194_v46  ;;  %v3341_v32 = vsel %vm3111_vm3, %v3338_v49, %v3340_v26  ;;  %v20642_v49 = vld [vmem:[#allocation107_spill] sm:$0xff]  ;;  %v20645_v46 = vld [vmem:[#allocation108_spill] sm:$0xff] }
 0x17f   : > { %v17234_v19 = vpack.c.bf16 %v3341_v32, %v3339_v62  ;;  %v20643_v26 = vunpack.c.l.bf16 %v20642_v49  ;;  %v20644_v14 = vunpack.c.h.bf16 %v20642_v49  ;;  %v20646_v6 = vunpack.c.l.bf16 %v20645_v46 }
 0x180   : > { %v3344_v62 = vsel %vm3111_vm3, %v3342_v59, %v3343_v55  ;;  %v3346_v32 = vsel %vm3111_vm3, %v3343_v55, %v3345_v58  ;;  %v20067_v46 = vunpack.c.h.bf16 %v17243_v63 }
 0x181   : > { %20641 = vst [vmem:[#allocation96_spill] sm:$0xff] %v17234_v19  ;;  %v3348_v57 = vrot.slane %v20644_v14, 2  ;;  %v3350_v31 = vrot.slane %v20646_v6, 2  ;;  %v20068_v6 = vunpack.c.l.bf16 %v17243_v63  ;;  %v17267_v59 = vpack.c.bf16 %v3346_v32, %v3344_v62 }
 0x182   : > { %12341 = vmatmul.mubr.msk.bf16.gmra.mrb[48].mxu1 %vm1629_vm2, %v17211_v23  ;;  %v3347_v23 = vrot.slane %v20643_v26, 2  ;;  %v6020_v14 = vrot.slane %v20067_v46, 2 }
 0x183   : > { %12344 = vmatprep.mubr.msk.bf16.mxu1 %vm1629_vm2, %v17218_v7  ;;  %v3351_v26 = vsel %vm3111_vm3, %v3348_v57, %v3350_v31  ;;  %20650 = vst [vmem:[#allocation101_spill] sm:$0xff] %v17267_v59  ;;  %v6019_v58 = vrot.slane %v20068_v6, 2 }
 0x184   : > { %v3349_v49 = vsel %vm3111_vm3, %v3347_v23, %v3348_v57  ;;  %v6022_v23 = vrot.slane %v20066_v41, 2  ;;  %v20652_v57 = vld [vmem:[#allocation113_spill] sm:$0xff] }
 0x185   : > { %12897 = vmatmul.mubr.msk.bf16.gmra.mrb[84].mxu0 %vm1629_vm2, %v17224_v1  ;;  %v17271_v55 = vpack.c.bf16 %v3351_v26, %v3349_v49  ;;  %v20653_v31 = vunpack.c.l.bf16 %v20652_v57  ;;  %v20654_v62 = vunpack.c.h.bf16 %v20652_v57  ;;  %v20655_v1 = vld [vmem:[#allocation114_spill] sm:$0xff]  ;;  %v6021_v26 = vsel %vm3111_vm3, %v6019_v58, %v6020_v14 }
 0x186   : > { %12900 = vmatprep.mubr.msk.bf16.mxu0 %vm1629_vm2, %v17234_v19  ;;  %v17288_v49 = vld [vmem:[%s15037_s17 + $0x1a4] sm:$0xff]   ;;  %v6023_v41 = vsel %vm3111_vm3, %v6020_v14, %v6022_v23  ;;  %v20660_v58 = vunpack.c.l.bf16 %v16255_v40  ;;  %v20661_v23 = vunpack.c.h.bf16 %v16255_v40 }
 0x187   : > { %20651 = vst [vmem:[#allocation102_spill] sm:$0xff] %v17271_v55  ;;  %v3357_v19 = vrot.slane %v20653_v31, 2  ;;  %v3358_v32 = vrot.slane %v20654_v62, 2  ;;  %20657 = vst [vmem:[#allocation104_spill] sm:$0xff] %v17288_v49  ;;  %v17295_v31 = vld [vmem:[%s15037_s17 + $0x1b0] sm:$0xff]  }
 0x188   : > { %20658 = vst [vmem:[#allocation106_spill] sm:$0xff] %v17295_v31  ;;  %v3362_v14 = vrot.slane %v20660_v58, 2  ;;  %v3363_v46 = vrot.slane %v20661_v23, 2 }
 0x189   : > { %v3359_v57 = vsel %vm3111_vm3, %v3357_v19, %v3358_v32  ;;  %v20662_v19 = vunpack.c.l.bf16 %v16266_v48 }
 0x18a   : > { %12345 = vmatmul.mubr.msk.bf16.gmra.mrb[52].mxu1 %vm1629_vm2, %v17251_v52  ;;  %v20656_v52 = vunpack.c.l.bf16 %v20655_v1  ;;  %v3364_v48 = vsel %vm3111_vm3, %v3362_v14, %v3363_v46 }
 0x18b   : > { %12348 = vmatprep.mubr.msk.bf16.mxu1 %vm1629_vm2, %v17258_v36 }
 0x18c   : > { %v3360_v36 = vrot.slane %v20656_v52, 2  ;;  %v17301_v52 = vpack.c.bf16 %v6023_v41, %v6021_v26  ;;  %v20664_v41 = vunpack.c.h.bf16 %v16289_v22 }
 0x18d   : > { %12901 = vmatmul.mubr.msk.bf16.gmra.mrb[88].mxu0 %vm1629_vm2, %v17267_v59 }
 0x18e   : > { %12904 = vmatprep.mubr.msk.bf16.mxu0 %vm1629_vm2, %v17271_v55  ;;  %v3361_v1 = vsel %vm3111_vm3, %v3358_v32, %v3360_v36  ;;  %20659 = vst [vmem:[#allocation107_spill] sm:$0xff] %v17301_v52  ;;  %v3365_v36 = vrot.slane %v20662_v19, 2  ;;  %v20663_v32 = vunpack.c.l.bf16 %v16289_v22  ;;  %v3368_v26 = vrot.slane %v20664_v41, 2  ;;  %v20670_v41 = vld [vmem:[#allocation5_spill] sm:$0xff] }
 0x18f   : > { %v17305_v62 = vpack.c.bf16 %v3361_v1, %v3359_v57  ;;  %v3370_v55 = vrot.slane %v20665_v60, 2  ;;  %v17322_v57 = vld [vmem:[%s15037_s17 + $0x1bc] sm:$0xff]   ;;  %v20668_v60 = vunpack.c.l.bf16 %v20667_v13  ;;  %v20669_v19 = vunpack.c.h.bf16 %v20667_v13 }
 0x190   : > { %v3367_v6 = vrot.slane %v20663_v32, 2  ;;  %20666 = vst [vmem:[#allocation108_spill] sm:$0xff] %v17322_v57  ;;  %v3366_v40 = vsel %vm3111_vm3, %v3363_v46, %v3365_v36  ;;  %v14761_v1 = vld [vmem:[%s15037_s17 + $0x1e0] sm:$0xff]   ;;  %v20674_v46 = vunpack.c.l.bf16 %v16303_v20  ;;  %v20675_v36 = vunpack.c.h.bf16 %v16303_v20 }
 0x191   : > { %v3371_v22 = vsel %vm3111_vm3, %v3368_v26, %v3370_v55  ;;  %v3112_v23 = vrot.slane %v20668_v60, 2  ;;  %v3113_v32 = vrot.slane %v20669_v19, 2  ;;  %v17339_v14 = vpack.c.bf16 %v3366_v40, %v3364_v48 }
 0x192   : > { %12349 = vmatmul.mubr.msk.bf16.gmra.mrb[56].mxu1 %vm1629_vm2, %v17288_v49  ;;  %v3369_v58 = vsel %vm3111_vm3, %v3367_v6, %v3368_v26  ;;  %v3372_v55 = vrot.slane %v20674_v46, 2  ;;  %v3373_v26 = vrot.slane %v20675_v36, 2  ;;  %v20676_v13 = vunpack.c.l.bf16 %v16316_v45 }
 0x193   : > { %12352 = vmatprep.mubr.msk.bf16.mxu1 %vm1629_vm2, %v17295_v31  ;;  %20672 = vst [vmem:[#allocation113_spill] sm:$0xff] %v17339_v14  ;;  %v17342_v6 = vpack.c.bf16 %v3371_v22, %v3369_v58  ;;  %v20678_v48 = vunpack.c.h.bf16 %v16364_v17  ;;  %v17359_v58 = vld [vmem:[%s15037_s17 + $0x1ec] sm:$0xff]   ;;  %v17362_v20 = vsel %vm3111_vm3, %v3112_v23, %v3113_v32  ;;  %v17372_v22 = vld [vmem:[%s15037_s17 + $0x1f8] sm:$0xff]   ;;  %v20692_v46 = vunpack.c.l.bf16 %v16505_v50 }
 0x194   : > { %v3375_v60 = vrot.slane %v20676_v13, 2  ;;  %20680 = vst [vmem:[#allocation3_spill] sm:$0xff] %v17359_v58 }
 0x195   : > { %12905 = vmatmul.mubr.msk.bf16.gmra.mrb[92].mxu0 %vm1629_vm2, %v17301_v52  ;;  %v20671_v52 = vunpack.c.l.bf16 %v20670_v41  ;;  %20673 = vst [vmem:[#allocation114_spill] sm:$0xff] %v17342_v6  ;;  %v3378_v40 = vrot.slane %v20678_v48, 2  ;;  %v20679_v41 = vunpack.c.l.bf16 %v16375_v51  ;;  %v20685_v48 = vunpack.c.l.bf16 %v16425_v5 }
 0x196   : > { %12908 = vmatprep.mubr.msk.bf16.mxu0 %vm1629_vm2, %v17305_v62  ;;  %v3376_v51 = vsel %vm3111_vm3, %v3373_v26, %v3375_v60  ;;  %v20684_v60 = vunpack.c.l.bf16 %v16388_v34  ;;  %v17407_v34 = vld [vmem:[%s15037_s17 + $0x204] sm:$0xff]  }
 0x197   : > { %v3115_v59 = vrot.slane %v20671_v52, 2  ;;  %v20677_v52 = vunpack.c.l.bf16 %v16364_v17  ;;  %v3374_v17 = vsel %vm3111_vm3, %v3372_v55, %v3373_v26  ;;  %v20682_v55 = vunpack.c.l.bf16 %v16385_v42 }
 0x198   : > { %v20683_v26 = vunpack.c.h.bf16 %v16385_v42  ;;  %v17402_v42 = vld [vmem:[%s15037_s17 + $0x338] sm:$0x1] }
 0x199   : > { %v3377_v19 = vrot.slane %v20677_v52, 2  ;;  %v17365_v45 = vsel %vm3111_vm3, %v3113_v32, %v3115_v59  ;;  %v17380_v32 = vpack.c.bf16 %v3376_v51, %v3374_v17  ;;  %v3382_v36 = vrot.slane %v20682_v55, 2  ;;  %v17399_v55 = vld [vmem:[%s15037_s17 + $0x330] sm:$0xff]   ;;  %20688 = vst [vmem:[#allocation148_spill] sm:$0xff] %v17402_v42 }
 0x19a   : > { %12353 = vmatmul.mubr.msk.bf16.gmra.mrb[60].mxu1 %vm1629_vm2, %v17322_v57  ;;  %v3383_v13 = vrot.slane %v20683_v26, 2  ;;  %v3385_v52 = vrot.slane %v20684_v60, 2  ;;  %v20687_v17 = vunpack.c.l.bf16 %v16437_v0  ;;  %v20078_v0 = vunpack.c.l.bf16 %v17399_v55 }
 0x19b   : > { %12356 = vmatprep.mubr.msk.bf16.mxu1 %vm1629_vm2, %v14761_v1  ;;  %v3380_v1 = vrot.slane %v20679_v41, 2  ;;  %v3379_v23 = vsel %vm3111_vm3, %v3377_v19, %v3378_v40  ;;  %20681 = vst [vmem:[#allocation5_spill] sm:$0xff] %v17380_v32  ;;  %v20686_v41 = vunpack.c.h.bf16 %v16425_v5  ;;  %v17414_v5 = vld [vmem:[%s15037_s17 + $0x210] sm:$0xff]   ;;  %v20077_v26 = vunpack.c.h.bf16 %v17399_v55 }
 0x19c   : > { %v3390_v51 = vrot.slane %v20687_v17, 2  ;;  %v20076_v60 = vunpack.c.l.bf16 %v17402_v42  ;;  %v20700_v42 = vunpack.c.l.bf16 %v16563_v25 }
 0x19d   : > { %12909 = vmatmul.mubr.msk.bf16.gmra.mrb[96].mxu0 %vm1629_vm2, %v17339_v14  ;;  %v3381_v59 = vsel %vm3111_vm3, %v3378_v40, %v3380_v1  ;;  %v3387_v40 = vrot.slane %v20685_v48, 2  ;;  %v3388_v1 = vrot.slane %v20686_v41, 2  ;;  %v6025_v17 = vrot.slane %v20077_v26, 2 }
 0x19e   : > { %12912 = vmatprep.mubr.msk.bf16.mxu0 %vm1629_vm2, %v17342_v6  ;;  %v17390_v19 = vpack.c.bf16 %v3381_v59, %v3379_v23  ;;  %v3384_v23 = vsel %vm3111_vm3, %v3382_v36, %v3383_v13  ;;  %v3386_v59 = vsel %vm3111_vm3, %v3383_v13, %v3385_v52  ;;  %v6024_v52 = vrot.slane %v20078_v0, 2 }
 0x19f   : > { %v3389_v48 = vsel %vm3111_vm3, %v3387_v40, %v3388_v1  ;;  %v3391_v41 = vsel %vm3111_vm3, %v3388_v1, %v3390_v51  ;;  %v17423_v36 = vpack.c.bf16 %v3386_v59, %v3384_v23  ;;  %v6027_v40 = vrot.slane %v20076_v60, 2 }
 0x1a0   : > { %v17427_v13 = vpack.c.bf16 %v3391_v41, %v3389_v48  ;;  %v20690_v1 = vunpack.c.l.bf16 %v16492_v29  ;;  %v20691_v23 = vunpack.c.h.bf16 %v16492_v29  ;;  %v17444_v48 = vld [vmem:[%s15037_s17 + $0x21c] sm:$0xff]   ;;  %v6026_v41 = vsel %vm3111_vm3, %v6024_v52, %v6025_v17 }
 0x1a1   : > { %v6028_v60 = vsel %vm3111_vm3, %v6025_v17, %v6027_v40  ;;  %v20695_v52 = vunpack.c.l.bf16 %v16521_v44  ;;  %v20696_v40 = vunpack.c.h.bf16 %v16521_v44 }
 0x1a2   : > { %12357 = vmatmul.mubr.msk.bf16.gmra.mrb[64].mxu1 %vm1629_vm2, %v17359_v58  ;;  %20689 = vst [vmem:[#allocation149_spill] sm:$0xff] %v17427_v13  ;;  %v3397_v51 = vrot.slane %v20690_v1, 2  ;;  %v3398_v59 = vrot.slane %v20691_v23, 2  ;;  %v3400_v58 = vrot.slane %v20692_v46, 2  ;;  %v17451_v1 = vld [vmem:[%s15037_s17 + $0x228] sm:$0xff]   ;;  %v17457_v46 = vpack.c.bf16 %v6028_v60, %v6026_v41 }
 0x1a3   : > { %12360 = vmatprep.mubr.msk.bf16.mxu1 %vm1629_vm2, %v17372_v22  ;;  %20693 = vst [vmem:[#allocation150_spill] sm:$0xff] %v17451_v1  ;;  %v3402_v17 = vrot.slane %v20695_v52, 2  ;;  %v3403_v26 = vrot.slane %v20696_v40, 2  ;;  %v20699_v60 = vunpack.c.h.bf16 %v16550_v27 }
 0x1a4   : > { %v3399_v29 = vsel %vm3111_vm3, %v3397_v51, %v3398_v59  ;;  %v3401_v50 = vsel %vm3111_vm3, %v3398_v59, %v3400_v58  ;;  %20694 = vst [vmem:[#allocation151_spill] sm:$0xff] %v17457_v46  ;;  %v20697_v51 = vunpack.c.l.bf16 %v16524_v38  ;;  %v20698_v59 = vunpack.c.l.bf16 %v16550_v27 }
 0x1a5   : > { %12913 = vmatmul.mubr.msk.bf16.gmra.mrb[100].mxu0 %vm1629_vm2, %v17380_v32  ;;  %v17461_v23 = vpack.c.bf16 %v3401_v50, %v3399_v29  ;;  %v3408_v41 = vrot.slane %v20699_v60, 2  ;;  %v17478_v29 = vld [vmem:[%s15037_s17 + $0x234] sm:$0xff]   ;;  %v3404_v44 = vsel %vm3111_vm3, %v3402_v17, %v3403_v26  ;;  %v20703_v17 = vunpack.c.l.bf16 %v16578_v12 }
 0x1a6   : > { %12916 = vmatprep.mubr.msk.bf16.mxu0 %vm1629_vm2, %v17390_v19  ;;  %v3405_v58 = vrot.slane %v20697_v51, 2  ;;  %v3407_v0 = vrot.slane %v20698_v59, 2  ;;  %20701 = vst [vmem:[#allocation152_spill] sm:$0xff] %v17478_v29  ;;  %v14769_v50 = vld [vmem:[%s15037_s17 + $0x258] sm:$0xff]   ;;  %v20707_v60 = vunpack.c.h.bf16 %v16628_v33 }
 0x1a7   : > { %v3412_v40 = vrot.slane %v20703_v17, 2  ;;  %v20711_v17 = vunpack.c.l.bf16 %v16647_v53 }
 0x1a8   : > { %v3406_v38 = vsel %vm3111_vm3, %v3403_v26, %v3405_v58  ;;  %v3409_v27 = vsel %vm3111_vm3, %v3407_v0, %v3408_v41  ;;  %v20704_v26 = vunpack.c.h.bf16 %v16578_v12  ;;  %v20705_v0 = vunpack.c.l.bf16 %v16586_v30 }
 0x1a9   : > { %v17489_v25 = vpack.c.bf16 %v3406_v38, %v3404_v44  ;;  %v20708_v44 = vunpack.c.l.bf16 %v16638_v18 }
 0x1aa   : > { %12361 = vmatmul.mubr.msk.bf16.gmra.mrb[68].mxu1 %vm1629_vm2, %v17407_v34  ;;  %v3413_v51 = vrot.slane %v20704_v26, 2  ;;  %v3415_v58 = vrot.slane %v20705_v0, 2  ;;  %v3422_v26 = vrot.slane %v20711_v17, 2 }
 0x1ab   : > { %12364 = vmatprep.mubr.msk.bf16.mxu1 %vm1629_vm2, %v17414_v5  ;;  %v3420_v38 = vrot.slane %v20708_v44, 2 }
 0x1ac   : > { %v3414_v12 = vsel %vm3111_vm3, %v3412_v40, %v3413_v51  ;;  %v3416_v30 = vsel %vm3111_vm3, %v3413_v51, %v3415_v58  ;;  %v20712_v40 = vunpack.c.h.bf16 %v16647_v53  ;;  %v20713_v51 = vunpack.c.l.bf16 %v16650_v8  ;;  %v17544_v53 = vld [vmem:[%s15037_s17 + $0x3b0] sm:$0x1]  ;;  %v17549_v8 = vld [vmem:[%s15037_s17 + $0x27c] sm:$0xff]  }
 0x1ad   : > { %12917 = vmatmul.mubr.msk.bf16.gmra.mrb[104].mxu0 %vm1629_vm2, %v17423_v36  ;;  %20718 = vst [vmem:[#allocation157_spill] sm:$0xff] %v17544_v53 }
 0x1ae   : > { %12920 = vmatprep.mubr.msk.bf16.mxu0 %vm1629_vm2, %v17427_v13  ;;  %v3410_v13 = vrot.slane %v20700_v42, 2  ;;  %v3423_v0 = vrot.slane %v20712_v40, 2  ;;  %v3425_v58 = vrot.slane %v20713_v51, 2  ;;  %v20082_v40 = vunpack.c.l.bf16 %v17544_v53  ;;  %v17701_v53 = vld [vmem:[%s15037_s17 + $0x384] sm:$0xff]  }
 0x1b0   : > { %v3411_v52 = vsel %vm3111_vm3, %v3408_v41, %v3410_v13  ;;  %v20706_v13 = vunpack.c.l.bf16 %v16628_v33  ;;  %v3418_v41 = vrot.slane %v20707_v60, 2 }
 0x1b1   : > { %v17492_v42 = vpack.c.bf16 %v3411_v52, %v3409_v27  ;;  %v17516_v27 = vld [vmem:[%s15037_s17 + $0x270] sm:$0xff]   ;;  %v17522_v52 = vpack.c.bf16 %v3416_v30, %v3414_v12  ;;  %v17541_v30 = vld [vmem:[%s15037_s17 + $0x3a8] sm:$0xff]  }
 0x1b2   : > { %12365 = vmatmul.mubr.msk.bf16.gmra.mrb[72].mxu1 %vm1629_vm2, %v17444_v48  ;;  %v3417_v59 = vrot.slane %v20706_v13, 2  ;;  %v3421_v18 = vsel %vm3111_vm3, %v3418_v41, %v3420_v38  ;;  %v20717_v38 = vunpack.c.l.bf16 %v16700_v16  ;;  %v20084_v16 = vunpack.c.l.bf16 %v17541_v30 }
 0x1b3   : > { %12368 = vmatprep.mubr.msk.bf16.mxu1 %vm1629_vm2, %v17451_v1  ;;  %20702 = vst [vmem:[#allocation153_spill] sm:$0xff] %v17492_v42  ;;  %20710 = vst [vmem:[#allocation155_spill] sm:$0xff] %v17522_v52  ;;  %v20083_v17 = vunpack.c.h.bf16 %v17541_v30 }
 0x1b4   : > { %v3419_v33 = vsel %vm3111_vm3, %v3417_v59, %v3418_v41  ;;  %v20715_v59 = vunpack.c.l.bf16 %v16697_v56  ;;  %v20716_v41 = vunpack.c.h.bf16 %v16697_v56  ;;  %v3430_v12 = vrot.slane %v20717_v38, 2  ;;  %v17556_v56 = vld [vmem:[%s15037_s17 + $0x288] sm:$0xff]  }
 0x1b5   : > { %12921 = vmatmul.mubr.msk.bf16.gmra.mrb[108].mxu0 %vm1629_vm2, %v17457_v46  ;;  %v17532_v13 = vpack.c.bf16 %v3421_v18, %v3419_v33  ;;  %v3424_v33 = vsel %vm3111_vm3, %v3422_v26, %v3423_v0  ;;  %v3426_v18 = vsel %vm3111_vm3, %v3423_v0, %v3425_v58  ;;  %v6029_v58 = vrot.slane %v20084_v16, 2  ;;  %v14786_v16 = vld [vmem:[%s15037_s17 + $0x348] sm:$0xff]   ;;  %v17675_v46 = vld [vmem:[%s15037_s17 + $0x360] sm:$0xff]  }
 0x1b6   : > { %12924 = vmatprep.mubr.msk.bf16.mxu0 %vm1629_vm2, %v17461_v23  ;;  %v3427_v60 = vrot.slane %v20715_v59, 2  ;;  %v3428_v44 = vrot.slane %v20716_v41, 2  ;;  %v17565_v26 = vpack.c.bf16 %v3426_v18, %v3424_v33  ;;  %v6032_v41 = vrot.slane %v20082_v40, 2  ;;  %v17587_v33 = vld [vmem:[%s15037_s17 + $0x2a0] sm:$0xff]   ;;  %v17650_v40 = vld [vmem:[%s15037_s17 + $0x318] sm:$0xff]  }
 0x1b7   : > { %20714 = vst [vmem:[#allocation156_spill] sm:$0xff] %v17532_v13 }
 0x1b8   : > { %v3429_v51 = vsel %vm3111_vm3, %v3427_v60, %v3428_v44  ;;  %v3431_v59 = vsel %vm3111_vm3, %v3428_v44, %v3430_v12  ;;  %20719 = vst [vmem:[#allocation158_spill] sm:$0xff] %v17565_v26  ;;  %v6030_v60 = vrot.slane %v20083_v17, 2  ;;  %v17580_v44 = vld [vmem:[%s15037_s17 + $0x294] sm:$0xff]   ;;  %v17659_v17 = vld [vmem:[%s15037_s17 + $0x324] sm:$0xff]  }
 0x1b9   : > { %v17569_v0 = vpack.c.bf16 %v3431_v59, %v3429_v51  ;;  %v17598_v51 = vld [vmem:[%s15037_s17 + $0x2ac] sm:$0xff]   ;;  %20725 = vst [vmem:[#allocation164_spill] sm:$0xff] %v17659_v17 }
 0x1ba   : > { %12369 = vmatmul.mubr.msk.bf16.gmra.mrb[76].mxu1 %vm1629_vm2, %v17478_v29  ;;  %v6031_v38 = vsel %vm3111_vm3, %v6029_v58, %v6030_v60  ;;  %v6033_v12 = vsel %vm3111_vm3, %v6030_v60, %v6032_v41  ;;  %20722 = vst [vmem:[#allocation161_spill] sm:$0xff] %v17598_v51  ;;  %v14777_v59 = vld [vmem:[%s15037_s17 + $0x2d0] sm:$0xff]   ;;  %v7585_v58 = vsel %vm1822_vm0, %v17050_v24, 0  ;;  %v17611_v60 = vld [vmem:[%s15037_s17 + $0x2dc] sm:$0xff]   ;;  %v17616_v41 = vld [vmem:[%s15037_s17 + $0x2e8] sm:$0xff]  }
 0x1bb   : > { %12372 = vmatprep.mubr.msk.bf16.mxu1 %vm1629_vm2, %v14769_v50  ;;  %v17509_v50 = vld [vmem:[%s15037_s17 + $0x264] sm:$0xff]   ;;  %20720 = vst [vmem:[#allocation159_spill] sm:$0xff] %v17569_v0  ;;  %v17591_v18 = vpack.c.bf16 %v6033_v12, %v6031_v38  ;;  %20723 = vst [vmem:[#allocation162_spill] sm:$0xff] %v17611_v60  ;;  %v17625_v24 = vld [vmem:[%s15037_s17 + $0x2f4] sm:$0xff]  }
 0x1bc   : > { %20709 = vst [vmem:[#allocation154_spill] sm:$0xff] %v17509_v50  ;;  %v17630_v38 = vld [vmem:[%s15037_s17 + $0x300] sm:$0xff]  }
 0x1bd   : > { %12925 = vmatmul.mubr.msk.bf16.gmra.mrb[112].mxu0 %vm1629_vm2, %v17489_v25  ;;  %20721 = vst [vmem:[#allocation160_spill] sm:$0xff] %v17591_v18  ;;  %v17637_v12 = vld [vmem:[%s15037_s17 + $0x60] sm:$0xff]  }
 0x1be   : > { %12928 = vmatprep.mubr.msk.bf16.mxu0 %vm1629_vm2, %v17492_v42  ;;  %20724 = vst [vmem:[#allocation163_spill] sm:$0xff] %v17637_v12 }
 0x1c2   : > { %12373 = vmatmul.mubr.msk.bf16.gmra.mrb[80].mxu1 %vm1629_vm2, %v17509_v50  ;;  %v10895_v50 = vld [vmem:[%s19701_s2 + $0x6] sm:$0x3] }
 0x1c3   : > { %12376 = vmatprep.mubr.msk.bf16.mxu1 %vm1629_vm2, %v17516_v27  ;;  %14533 = vmatprep.subr.msk.bf16.mxu1 %vm1822_vm0, %v10895_v50 }
 0x1c5   : > { %12929 = vmatmul.mubr.msk.bf16.gmra.mrb[116].mxu0 %vm1629_vm2, %v17522_v52 }
 0x1c6   : > { %12932 = vmatprep.mubr.msk.bf16.mxu0 %vm1629_vm2, %v17532_v13 }
 0x1ca   : > { %12377 = vmatmul.mubr.msk.bf16.gmra.mrb[84].mxu1 %vm1629_vm2, %v17549_v8 }
 0x1cb   : > { %12380 = vmatprep.mubr.msk.bf16.mxu1 %vm1629_vm2, %v17556_v56 }
 0x1cd   : > { %12933 = vmatmul.mubr.msk.bf16.gmra.mrb[120].mxu0 %vm1629_vm2, %v17565_v26 }
 0x1ce   : > { %12936 = vmatprep.mubr.msk.bf16.mxu0 %vm1629_vm2, %v17569_v0 }
 0x1d2   : > { %12381 = vmatmul.mubr.msk.bf16.gmra.mrb[88].mxu1 %vm1629_vm2, %v17580_v44 }
 0x1d3   : > { %12384 = vmatprep.mubr.msk.bf16.mxu1 %vm1629_vm2, %v17587_v33 }
 0x1d5   : > { %12937 = vmatmul.mubr.msk.bf16.gmra.mrb[124].mxu0 %vm1629_vm2, %v17591_v18  ;;  %v17670_v18 = vld [vmem:[%s15037_s17 + $0x354] sm:$0xff]  }
 0x1d6   : > { %12942 = vmatprep.mubr.msk.bf16.mxu0 %vm1629_vm2, %v16811_v43  ;;  %20726 = vst [vmem:[#allocation165_spill] sm:$0xff] %v17670_v18 }
 0x1da   : > { %12385 = vmatmul.mubr.msk.bf16.gmra.mrb[92].mxu1 %vm1629_vm2, %v17598_v51 }
 0x1db   : > { %12388 = vmatprep.mubr.msk.bf16.mxu1 %vm1629_vm2, %v14777_v59  ;;  %v17642_v59 = vld [vmem:[%s15037_s17 + $0x30c] sm:$0xff]  }
 0x1dd   : > { %12943 = vmatmul.mubr.msk.bf16.vlgmr.msra.gmra.mrb[0].mxu0 %vm1629_vm2, %v16839_v28 }
 0x1de   : > { %13071 = vmatpush3.bf16.msra.mxu0 %v7585_v58  ;;  %12946 = vmatprep.mubr.msk.bf16.mxu0 %vm1629_vm2, %v16846_v54  ;;  %v17647_v58 = vld [vmem:[%s15037_s17 + $0x6c] sm:$0xff]  }
 0x1e2   : > { %12389 = vmatmul.mubr.msk.bf16.gmra.mrb[96].mxu1 %vm1629_vm2, %v17611_v60  ;;  %v17689_v60 = vld [vmem:[%s15037_s17 + $0x378] sm:$0xff]  }
 0x1e3   : > { %12392 = vmatprep.mubr.msk.bf16.mxu1 %vm1629_vm2, %v17616_v41 }
 0x1e5   : > { %12947 = vmatmul.mubr.msk.bf16.gmra.mrb[4].mxu0 %vm1629_vm2, %v16873_v4 }
 0x1e6   : > { %12950 = vmatprep.mubr.msk.bf16.mxu0 %vm1629_vm2, %v16880_v61 }
 0x1ea   : > { %12393 = vmatmul.mubr.msk.bf16.gmra.mrb[100].mxu1 %vm1629_vm2, %v17625_v24 }
 0x1eb   : > { %12396 = vmatprep.mubr.msk.bf16.mxu1 %vm1629_vm2, %v17630_v38 }
 0x1ed   : > { %12951 = vmatmul.mubr.msk.bf16.gmra.mrb[8].mxu0 %vm1629_vm2, %v16907_v9  ;;  %v20743_v9 = vld [vmem:[#allocation124_spill] sm:$0xff] }
 0x1ee   : > { %12954 = vmatprep.mubr.msk.bf16.mxu0 %vm1629_vm2, %v17637_v12 }
 0x1f2   : > { %12397 = vmatmul.mubr.msk.bf16.gmra.mrb[104].mxu1 %vm1629_vm2, %v17642_v59 }
 0x1f3   : > { %12400 = vmatprep.mubr.msk.bf16.mxu1 %vm1629_vm2, %v17650_v40 }
 0x1f5   : > { %12955 = vmatmul.mubr.msk.bf16.gmra.mrb[12].mxu0 %vm1629_vm2, %v17647_v58 }
 0x1f6   : > { %12958 = vmatprep.mubr.msk.bf16.mxu0 %vm1629_vm2, %v16945_v21 }
 0x1fa   : > { %12401 = vmatmul.mubr.msk.bf16.gmra.mrb[108].mxu1 %vm1629_vm2, %v17659_v17 }
 0x1fb   : > { %12404 = vmatprep.mubr.msk.bf16.mxu1 %vm1629_vm2, %v14786_v16  ;;  %v17684_v16 = vld [vmem:[%s15037_s17 + $0x36c] sm:$0xff]  }
 0x1fd   : > { %12959 = vmatmul.mubr.msk.bf16.gmra.mrb[16].mxu0 %vm1629_vm2, %v16972_v10  ;;  %v20730_v10 = vld [vmem:[#allocation66_spill] sm:$0xff] }
 0x1fe   : > { %12962 = vmatprep.mubr.msk.bf16.mxu0 %vm1629_vm2, %v16979_v39  ;;  %v4529_v39 = vsel %vm1822_vm0, %v10895_v50, 0  ;;  %v20733_v50 = vld [vmem:[#allocation117_spill] sm:$0xff] }
 0x202   : > { %12405 = vmatmul.mubr.msk.bf16.gmra.mrb[112].mxu1 %vm1629_vm2, %v17670_v18  ;;  %v17696_v18 = vld [vmem:[%s15037_s17 + $0xd8] sm:$0xff]  }
 0x203   : > { %12408 = vmatprep.mubr.msk.bf16.mxu1 %vm1629_vm2, %v17675_v46  ;;  %20727 = vst [vmem:[#allocation166_spill] sm:$0xff] %v17696_v18 }
 0x205   : > { %12963 = vmatmul.mubr.msk.bf16.gmra.mrb[20].mxu0 %vm1629_vm2, %v17006_v3  ;;  %v17712_v3 = vld [vmem:[%s15037_s17 + $0x390] sm:$0xff]  }
 0x206   : > { %12966 = vmatprep.mubr.msk.bf16.mxu0 %vm1629_vm2, %v17013_v37  ;;  %v17709_v37 = vld [vmem:[%s15037_s17 + $0xe4] sm:$0xff]  }
 0x20a   : > { %12409 = vmatmul.mubr.msk.bf16.gmra.mrb[116].mxu1 %vm1629_vm2, %v17684_v16 }
 0x20b   : > { %12412 = vmatprep.mubr.msk.bf16.mxu1 %vm1629_vm2, %v17689_v60 }
 0x20d   : > { %12967 = vmatmul.mubr.msk.bf16.gmra.mrb[24].mxu0 %vm1629_vm2, %v17040_v47  ;;  %v17722_v47 = vld [vmem:[%s15037_s17 + $0x39c] sm:$0xff]  }
 0x20e   : > { %12970 = vmatprep.mubr.msk.bf16.mxu0 %vm1629_vm2, %v17696_v18  ;;  %20728 = vst [vmem:[#allocation167_spill] sm:$0xff] %v17722_v47  ;;  %v20729_v18 = vpack.c.bf16 %v17365_v45, %v17362_v20  ;;  %v14795_v20 = vld [vmem:[%s19701_s2 + $0x8] sm:$0x3]  ;;  %v20731_v45 = vld [vmem:[#allocation81_spill] sm:$0xff] }
 0x212   : > { %12413 = vmatmul.mubr.msk.bf16.gmra.mrb[120].mxu1 %vm1629_vm2, %v17701_v53 }
 0x213   : > { %12416 = vmatprep.mubr.msk.bf16.mxu1 %vm1629_vm2, %v17712_v3 }
 0x215   : > { %12971 = vmatmul.mubr.msk.bf16.gmra.mrb[28].mxu0 %vm1629_vm2, %v17709_v37 }
 0x216   : > { %12974 = vmatprep.mubr.msk.bf16.mxu0 %vm1629_vm2, %v17085_v2 }
 0x21a   : > { %12417 = vmatmul.mubr.msk.bf16.gmra.mrb[124].mxu1 %vm1629_vm2, %v17722_v47 }
 0x21b   : > { %12422 = vmatprep.mubr.msk.bf16.mxu1 %vm1629_vm2, %v20729_v18  ;;  %v20732_v18 = vld [vmem:[#allocation82_spill] sm:$0xff] }
 0x21d   : > { %12975 = vmatmul.mubr.msk.bf16.gmra.mrb[32].mxu0 %vm1629_vm2, %v17112_v35 }
 0x21e   : > { %12978 = vmatprep.mubr.msk.bf16.mxu0 %vm1629_vm2, %v17119_v15 }
 0x222   : > { %12423 = vmatmul.mubr.msk.bf16.vlgmr.msra.gmra.mrb[0].mxu1 %vm1629_vm2, %v20730_v10  ;;  %v20734_v10 = vld [vmem:[#allocation119_spill] sm:$0xff] }
 0x223   : > { %12426 = vmatprep.mubr.msk.bf16.mxu1 %vm1629_vm2, %v15905_v11  ;;  %12551 = vmatpush3.bf16.msra.mxu1 %v4529_v39  ;;  %v17754_v11 = vld [vmem:[%s15037_s17 + $0x150] sm:$0xff]   ;;  %v20736_v39 = vld [vmem:[#allocation89_spill] sm:$0xff] }
 0x224   : > { %14535 = vmatprep.subr.msk.bf16.mxu1 %vm1822_vm0, %v14795_v20  ;;  %20735 = vst [vmem:[#allocation66_spill] sm:$0xff] %v17754_v11  ;;  %v17761_v20 = vld [vmem:[%s15037_s17 + $0x15c] sm:$0xff]  }
 0x225   : > { %12979 = vmatmul.mubr.msk.bf16.gmra.mrb[36].mxu0 %vm1629_vm2, %v20731_v45  ;;  %v20737_v45 = vld [vmem:[#allocation9_spill] sm:$0xff] }
 0x226   : > { %12982 = vmatprep.mubr.msk.bf16.mxu0 %vm1629_vm2, %v20732_v18  ;;  %v20738_v15 = vunpack.c.l.bf16 %v20737_v45  ;;  %v20739_v18 = vunpack.c.h.bf16 %v20737_v45  ;;  %v20745_v45 = vld [vmem:[#allocation99_spill] sm:$0xff] }
 0x228   : > { %v3152_v35 = vrot.slane %v20738_v15, 2  ;;  %v3153_v2 = vrot.slane %v20739_v18, 2  ;;  %v20746_v18 = vld [vmem:[#allocation100_spill] sm:$0xff] }
 0x22a   : > { %12427 = vmatmul.mubr.msk.bf16.gmra.mrb[4].mxu1 %vm1629_vm2, %v20733_v50  ;;  %v20740_v50 = vld [vmem:[#allocation11_spill] sm:$0xff] }
 0x22b   : > { %12430 = vmatprep.mubr.msk.bf16.mxu1 %vm1629_vm2, %v20734_v10  ;;  %v20741_v21 = vunpack.c.l.bf16 %v20740_v50  ;;  %v20742_v10 = vld [vmem:[#allocation121_spill] sm:$0xff]  ;;  %v17799_v50 = vld [vmem:[%s15037_s17 + $0x1c8] sm:$0xff]  }
 0x22c   : > { %20751 = vst [vmem:[#allocation9_spill] sm:$0xff] %v17799_v50 }
 0x22d   : > { %12983 = vmatmul.mubr.msk.bf16.gmra.mrb[40].mxu0 %vm1629_vm2, %v20736_v39  ;;  %v3155_v12 = vrot.slane %v20741_v21, 2  ;;  %v20744_v21 = vld [vmem:[#allocation127_spill] sm:$0xff] }
 0x22e   : > { %12986 = vmatprep.mubr.msk.bf16.mxu0 %vm1629_vm2, %v17754_v11  ;;  %v3154_v11 = vsel %vm3111_vm3, %v3152_v35, %v3153_v2  ;;  %v20748_v35 = vld [vmem:[#allocation133_spill] sm:$0xff] }
 0x22f   : > { %v3156_v39 = vsel %vm3111_vm3, %v3153_v2, %v3155_v12  ;;  %v20747_v2 = vld [vmem:[#allocation131_spill] sm:$0xff]  ;;  %v20750_v12 = vld [vmem:[#allocation136_spill] sm:$0xff] }
 0x230   : > { %v3568_v15 = vpack.c.bf16 %v3156_v39, %v3154_v11  ;;  %v20749_v11 = vld [vmem:[#allocation134_spill] sm:$0xff]  ;;  %v17806_v39 = vld [vmem:[%s15037_s17 + $0x1d4] sm:$0xff]  }
 0x232   : > { %12431 = vmatmul.mubr.msk.bf16.gmra.mrb[8].mxu1 %vm1629_vm2, %v20742_v10 }
 0x233   : > { %12434 = vmatprep.mubr.msk.bf16.mxu1 %vm1629_vm2, %v20743_v9 }
 0x235   : > { %12987 = vmatmul.mubr.msk.bf16.gmra.mrb[44].mxu0 %vm1629_vm2, %v17761_v20 }
 0x236   : > { %12990 = vmatprep.mubr.msk.bf16.mxu0 %vm1629_vm2, %v17218_v7 }
 0x23a   : > { %12435 = vmatmul.mubr.msk.bf16.gmra.mrb[12].mxu1 %vm1629_vm2, %v20744_v21 }
 0x23b   : > { %12438 = vmatprep.mubr.msk.bf16.mxu1 %vm1629_vm2, %v3568_v15  ;;  %v20752_v15 = vld [vmem:[#allocation18_spill] sm:$0xff] }
 0x23c   : > { %v20754_v21 = vunpack.c.h.bf16 %v20752_v15 }
 0x23d   : > { %12991 = vmatmul.mubr.msk.bf16.gmra.mrb[48].mxu0 %vm1629_vm2, %v20745_v45 }
 0x23e   : > { %12994 = vmatprep.mubr.msk.bf16.mxu0 %vm1629_vm2, %v20746_v18  ;;  %v3193_v9 = vrot.slane %v20754_v21, 2 }
 0x242   : > { %12439 = vmatmul.mubr.msk.bf16.gmra.mrb[16].mxu1 %vm1629_vm2, %v20747_v2  ;;  %v20753_v2 = vunpack.c.l.bf16 %v20752_v15  ;;  %v17858_v15 = vld [vmem:[%s15037_s17 + $0x24c] sm:$0xff]  }
 0x243   : > { %12442 = vmatprep.mubr.msk.bf16.mxu1 %vm1629_vm2, %v20748_v35 }
 0x244   : > { %v3192_v35 = vrot.slane %v20753_v2, 2  ;;  %v20765_v2 = vld [vmem:[#allocation36_spill] sm:$0xff] }
 0x245   : > { %12995 = vmatmul.mubr.msk.bf16.gmra.mrb[52].mxu0 %vm1629_vm2, %v17288_v49  ;;  %v20758_v49 = vld [vmem:[#allocation141_spill] sm:$0xff] }
 0x246   : > { %12998 = vmatprep.mubr.msk.bf16.mxu0 %vm1629_vm2, %v17295_v31 }
 0x24a   : > { %12443 = vmatmul.mubr.msk.bf16.gmra.mrb[20].mxu1 %vm1629_vm2, %v20749_v11  ;;  %v20755_v11 = vld [vmem:[#allocation19_spill] sm:$0xff] }
 0x24b   : > { %12446 = vmatprep.mubr.msk.bf16.mxu1 %vm1629_vm2, %v20750_v12  ;;  %v20756_v10 = vunpack.c.l.bf16 %v20755_v11  ;;  %v20757_v12 = vld [vmem:[#allocation138_spill] sm:$0xff]  ;;  %v20763_v11 = vld [vmem:[#allocation27_spill] sm:$0xff] }
 0x24d   : > { %12999 = vmatmul.mubr.msk.bf16.gmra.mrb[56].mxu0 %vm1629_vm2, %v17322_v57  ;;  %v3195_v31 = vrot.slane %v20756_v10, 2  ;;  %v3194_v57 = vsel %vm3111_vm3, %v3192_v35, %v3193_v9  ;;  %v17827_v10 = vld [vmem:[%s19701_s2 + $0x10] sm:$0x3]  ;;  %v20759_v35 = vld [vmem:[#allocation142_spill] sm:$0xff] }
 0x24e   : > { %13002 = vmatprep.mubr.msk.bf16.mxu0 %vm1629_vm2, %v17799_v50  ;;  %14539 = vmatprep.subr.msk.bf16.mxu0 %vm1822_vm0, %v17827_v10 }
 0x24f   : > { %v3196_v50 = vsel %vm3111_vm3, %v3193_v9, %v3195_v31  ;;  %v20760_v9 = vld [vmem:[#allocation146_spill] sm:$0xff]  ;;  %v20761_v31 = vld [vmem:[#allocation24_spill] sm:$0xff] }
 0x250   : > { %v3576_v21 = vpack.c.bf16 %v3196_v50, %v3194_v57  ;;  %v20762_v57 = vld [vmem:[#allocation147_spill] sm:$0xff]  ;;  %v17851_v50 = vld [vmem:[%s15037_s17 + $0x240] sm:$0xff]  }
 0x251   : > { %20764 = vst [vmem:[#allocation11_spill] sm:$0xff] %v17851_v50 }
 0x252   : > { %12447 = vmatmul.mubr.msk.bf16.gmra.mrb[24].mxu1 %vm1629_vm2, %v20757_v12 }
 0x253   : > { %12450 = vmatprep.mubr.msk.bf16.mxu1 %vm1629_vm2, %v20758_v49 }
 0x255   : > { %13003 = vmatmul.mubr.msk.bf16.gmra.mrb[60].mxu0 %vm1629_vm2, %v17806_v39 }
 0x256   : > { %13006 = vmatprep.mubr.msk.bf16.mxu0 %vm1629_vm2, %v17372_v22 }
 0x25a   : > { %12451 = vmatmul.mubr.msk.bf16.gmra.mrb[28].mxu1 %vm1629_vm2, %v20759_v35 }
 0x25b   : > { %12454 = vmatprep.mubr.msk.bf16.mxu1 %vm1629_vm2, %v3576_v21  ;;  %v20766_v21 = vunpack.c.l.bf16 %v20765_v2 }
 0x25d   : > { %13007 = vmatmul.mubr.msk.bf16.gmra.mrb[64].mxu0 %vm1629_vm2, %v17407_v34 }
 0x25e   : > { %13010 = vmatprep.mubr.msk.bf16.mxu0 %vm1629_vm2, %v17414_v5 }
 0x262   : > { %12455 = vmatmul.mubr.msk.bf16.gmra.mrb[32].mxu1 %vm1629_vm2, %v20760_v9  ;;  %v3232_v9 = vrot.slane %v20766_v21, 2 }
 0x263   : > { %12458 = vmatprep.mubr.msk.bf16.mxu1 %vm1629_vm2, %v20761_v31  ;;  %v20767_v31 = vunpack.c.h.bf16 %v20765_v2  ;;  %v20777_v2 = vld [vmem:[#allocation61_spill] sm:$0xff] }
 0x264   : > { %v20778_v21 = vunpack.c.l.bf16 %v20777_v2 }
 0x265   : > { %13011 = vmatmul.mubr.msk.bf16.gmra.mrb[68].mxu0 %vm1629_vm2, %v17444_v48  ;;  %v3233_v35 = vrot.slane %v20767_v31, 2 }
 0x266   : > { %13014 = vmatprep.mubr.msk.bf16.mxu0 %vm1629_vm2, %v17451_v1  ;;  %v20771_v1 = vld [vmem:[#allocation29_spill] sm:$0xff] }
 0x26a   : > { %12459 = vmatmul.mubr.msk.bf16.gmra.mrb[36].mxu1 %vm1629_vm2, %v20762_v57  ;;  %v20768_v57 = vld [vmem:[#allocation38_spill] sm:$0xff] }
 0x26b   : > { %12462 = vmatprep.mubr.msk.bf16.mxu1 %vm1629_vm2, %v20763_v11  ;;  %v20769_v49 = vunpack.c.l.bf16 %v20768_v57  ;;  %v20770_v11 = vld [vmem:[#allocation28_spill] sm:$0xff]  ;;  %v20772_v57 = vld [vmem:[#allocation31_spill] sm:$0xff] }
 0x26d   : > { %13015 = vmatmul.mubr.msk.bf16.gmra.mrb[72].mxu0 %vm1629_vm2, %v17478_v29  ;;  %v3235_v12 = vrot.slane %v20769_v49, 2  ;;  %v3234_v29 = vsel %vm3111_vm3, %v3232_v9, %v3233_v35  ;;  %v20773_v49 = vld [vmem:[#allocation34_spill] sm:$0xff]  ;;  %v3272_v9 = vrot.slane %v20778_v21, 2 }
 0x26e   : > { %13018 = vmatprep.mubr.msk.bf16.mxu0 %vm1629_vm2, %v17851_v50  ;;  %v17942_v21 = vld [vmem:[%s15037_s17 + $0x33c] sm:$0xff]  }
 0x26f   : > { %v3236_v50 = vsel %vm3111_vm3, %v3233_v35, %v3235_v12  ;;  %v20774_v12 = vld [vmem:[#allocation40_spill] sm:$0xff]  ;;  %v20776_v35 = vld [vmem:[#allocation46_spill] sm:$0xff] }
 0x270   : > { %v3584_v31 = vpack.c.bf16 %v3236_v50, %v3234_v29  ;;  %v20775_v29 = vld [vmem:[#allocation41_spill] sm:$0xff]  ;;  %v17900_v50 = vld [vmem:[%s15037_s17 + $0x2c4] sm:$0xff]  }
 0x272   : > { %12463 = vmatmul.mubr.msk.bf16.gmra.mrb[40].mxu1 %vm1629_vm2, %v20770_v11 }
 0x273   : > { %12466 = vmatprep.mubr.msk.bf16.mxu1 %vm1629_vm2, %v20771_v1  ;;  %v20782_v1 = vld [vmem:[#allocation47_spill] sm:$0xff] }
 0x275   : > { %13019 = vmatmul.mubr.msk.bf16.gmra.mrb[76].mxu0 %vm1629_vm2, %v17858_v15 }
 0x276   : > { %13022 = vmatprep.mubr.msk.bf16.mxu0 %vm1629_vm2, %v17516_v27 }
 0x27a   : > { %12467 = vmatmul.mubr.msk.bf16.gmra.mrb[44].mxu1 %vm1629_vm2, %v20772_v57 }
 0x27b   : > { %12470 = vmatprep.mubr.msk.bf16.mxu1 %vm1629_vm2, %v3584_v31  ;;  %v20779_v31 = vunpack.c.h.bf16 %v20777_v2 }
 0x27d   : > { %13023 = vmatmul.mubr.msk.bf16.gmra.mrb[80].mxu0 %vm1629_vm2, %v17549_v8 }
 0x27e   : > { %13026 = vmatprep.mubr.msk.bf16.mxu0 %vm1629_vm2, %v17556_v56 }
 0x282   : > { %12471 = vmatmul.mubr.msk.bf16.gmra.mrb[48].mxu1 %vm1629_vm2, %v20773_v49  ;;  %v3273_v49 = vrot.slane %v20779_v31, 2 }
 0x283   : > { %12474 = vmatprep.mubr.msk.bf16.mxu1 %vm1629_vm2, %v20774_v12  ;;  %v20780_v12 = vld [vmem:[#allocation62_spill] sm:$0xff] }
 0x284   : > { %v20781_v57 = vunpack.c.l.bf16 %v20780_v12  ;;  %v3274_v11 = vsel %vm3111_vm3, %v3272_v9, %v3273_v49  ;;  %v20784_v12 = vld [vmem:[#allocation52_spill] sm:$0xff] }
 0x285   : > { %13027 = vmatmul.mubr.msk.bf16.gmra.mrb[84].mxu0 %vm1629_vm2, %v17580_v44  ;;  %v20789_v9 = vld [vmem:[#allocation84_spill] sm:$0xff] }
 0x286   : > { %13030 = vmatprep.mubr.msk.bf16.mxu0 %vm1629_vm2, %v17587_v33  ;;  %v20790_v31 = vunpack.c.l.bf16 %v20789_v9 }
 0x28a   : > { %12475 = vmatmul.mubr.msk.bf16.gmra.mrb[52].mxu1 %vm1629_vm2, %v20775_v29  ;;  %v3275_v29 = vrot.slane %v20781_v57, 2  ;;  %v20785_v57 = vld [vmem:[#allocation57_spill] sm:$0xff] }
 0x28b   : > { %12478 = vmatprep.mubr.msk.bf16.mxu1 %vm1629_vm2, %v20776_v35  ;;  %v20783_v35 = vld [vmem:[#allocation51_spill] sm:$0xff] }
 0x28d   : > { %13031 = vmatmul.mubr.msk.bf16.gmra.mrb[88].mxu0 %vm1629_vm2, %v17598_v51  ;;  %v3276_v51 = vsel %vm3111_vm3, %v3273_v49, %v3275_v29  ;;  %v20786_v29 = vld [vmem:[#allocation60_spill] sm:$0xff]  ;;  %v3312_v49 = vrot.slane %v20790_v31, 2 }
 0x28e   : > { %13034 = vmatprep.mubr.msk.bf16.mxu0 %vm1629_vm2, %v17243_v63  ;;  %v3592_v2 = vpack.c.bf16 %v3276_v51, %v3274_v11  ;;  %v20787_v51 = vld [vmem:[#allocation67_spill] sm:$0xff]  ;;  %v20788_v11 = vld [vmem:[#allocation72_spill] sm:$0xff] }
 0x28f   : > { %v17984_v31 = vld [vmem:[%s15037_s17 + $0x3b4] sm:$0xff]  }
 0x292   : > { %12479 = vmatmul.mubr.msk.bf16.gmra.mrb[56].mxu1 %vm1629_vm2, %v20782_v1 }
 0x293   : > { %12482 = vmatprep.mubr.msk.bf16.mxu1 %vm1629_vm2, %v20783_v35  ;;  %v20794_v35 = vld [vmem:[#allocation74_spill] sm:$0xff] }
 0x295   : > { %13035 = vmatmul.mubr.msk.bf16.gmra.mrb[92].mxu0 %vm1629_vm2, %v17900_v50 }
 0x296   : > { %13038 = vmatprep.mubr.msk.bf16.mxu0 %vm1629_vm2, %v17616_v41 }
 0x29a   : > { %12483 = vmatmul.mubr.msk.bf16.gmra.mrb[60].mxu1 %vm1629_vm2, %v20784_v12 }
 0x29b   : > { %12486 = vmatprep.mubr.msk.bf16.mxu1 %vm1629_vm2, %v3592_v2  ;;  %v20791_v2 = vunpack.c.h.bf16 %v20789_v9 }
 0x29d   : > { %13039 = vmatmul.mubr.msk.bf16.gmra.mrb[96].mxu0 %vm1629_vm2, %v17625_v24 }
 0x29e   : > { %13042 = vmatprep.mubr.msk.bf16.mxu0 %vm1629_vm2, %v17630_v38 }
 0x2a2   : > { %12487 = vmatmul.mubr.msk.bf16.gmra.mrb[64].mxu1 %vm1629_vm2, %v20785_v57  ;;  %v3313_v57 = vrot.slane %v20791_v2, 2 }
 0x2a3   : > { %12490 = vmatprep.mubr.msk.bf16.mxu1 %vm1629_vm2, %v20786_v29  ;;  %v20792_v29 = vld [vmem:[#allocation86_spill] sm:$0xff] }
 0x2a4   : > { %v20793_v12 = vunpack.c.l.bf16 %v20792_v29  ;;  %v3314_v1 = vsel %vm3111_vm3, %v3312_v49, %v3313_v57  ;;  %v20796_v29 = vld [vmem:[#allocation79_spill] sm:$0xff]  ;;  %v20801_v49 = vld [vmem:[#allocation109_spill] sm:$0xff] }
 0x2a5   : > { %13043 = vmatmul.mubr.msk.bf16.gmra.mrb[100].mxu0 %vm1629_vm2, %v17642_v59  ;;  %v20802_v2 = vunpack.c.l.bf16 %v20801_v49 }
 0x2a6   : > { %13046 = vmatprep.mubr.msk.bf16.mxu0 %vm1629_vm2, %v17650_v40 }
 0x2aa   : > { %12491 = vmatmul.mubr.msk.bf16.gmra.mrb[68].mxu1 %vm1629_vm2, %v20787_v51  ;;  %v3315_v51 = vrot.slane %v20793_v12, 2  ;;  %v20797_v12 = vld [vmem:[#allocation88_spill] sm:$0xff] }
 0x2ab   : > { %12494 = vmatprep.mubr.msk.bf16.mxu1 %vm1629_vm2, %v20788_v11  ;;  %v20795_v11 = vld [vmem:[#allocation77_spill] sm:$0xff] }
 0x2ad   : > { %13047 = vmatmul.mubr.msk.bf16.gmra.mrb[104].mxu0 %vm1629_vm2, %v17659_v17  ;;  %v3316_v17 = vsel %vm3111_vm3, %v3313_v57, %v3315_v51  ;;  %v20798_v51 = vld [vmem:[#allocation90_spill] sm:$0xff]  ;;  %v3352_v57 = vrot.slane %v20802_v2, 2 }
 0x2ae   : > { %13050 = vmatprep.mubr.msk.bf16.mxu0 %vm1629_vm2, %v17399_v55  ;;  %v3600_v9 = vpack.c.bf16 %v3316_v17, %v3314_v1  ;;  %v20799_v1 = vld [vmem:[#allocation91_spill] sm:$0xff]  ;;  %v20808_v2 = vld [vmem:[#allocation6_spill] sm:$0xff] }
 0x2af   : > { %v20800_v17 = vld [vmem:[#allocation95_spill] sm:$0xff] }
 0x2b2   : > { %12495 = vmatmul.mubr.msk.bf16.gmra.mrb[72].mxu1 %vm1629_vm2, %v20794_v35 }
 0x2b3   : > { %12498 = vmatprep.mubr.msk.bf16.mxu1 %vm1629_vm2, %v20795_v11  ;;  %v20806_v11 = vld [vmem:[#allocation96_spill] sm:$0xff] }
 0x2b5   : > { %13051 = vmatmul.mubr.msk.bf16.gmra.mrb[108].mxu0 %vm1629_vm2, %v17942_v21 }
 0x2b6   : > { %13054 = vmatprep.mubr.msk.bf16.mxu0 %vm1629_vm2, %v17675_v46 }
 0x2ba   : > { %12499 = vmatmul.mubr.msk.bf16.gmra.mrb[76].mxu1 %vm1629_vm2, %v20796_v29 }
 0x2bb   : > { %12502 = vmatprep.mubr.msk.bf16.mxu1 %vm1629_vm2, %v3600_v9  ;;  %v20803_v9 = vunpack.c.h.bf16 %v20801_v49 }
 0x2bd   : > { %13055 = vmatmul.mubr.msk.bf16.gmra.mrb[112].mxu0 %vm1629_vm2, %v17684_v16 }
 0x2be   : > { %13058 = vmatprep.mubr.msk.bf16.mxu0 %vm1629_vm2, %v17689_v60 }
 0x2c2   : > { %12503 = vmatmul.mubr.msk.bf16.gmra.mrb[80].mxu1 %vm1629_vm2, %v20797_v12  ;;  %v3353_v12 = vrot.slane %v20803_v9, 2  ;;  %v20810_v9 = vld [vmem:[#allocation7_spill] sm:$0xff] }
 0x2c3   : > { %12506 = vmatprep.mubr.msk.bf16.mxu1 %vm1629_vm2, %v20798_v51  ;;  %v20804_v51 = vld [vmem:[#allocation110_spill] sm:$0xff] }
 0x2c4   : > { %v20805_v29 = vunpack.c.l.bf16 %v20804_v51  ;;  %v3354_v35 = vsel %vm3111_vm3, %v3352_v57, %v3353_v12  ;;  %v20809_v51 = vld [vmem:[#allocation102_spill] sm:$0xff]  ;;  %v20118_v57 = vunpack.c.h.bf16 %v17647_v58 }
 0x2c5   : > { %13059 = vmatmul.mubr.msk.bf16.gmra.mrb[116].mxu0 %vm1629_vm2, %v17701_v53 }
 0x2c6   : > { %13062 = vmatprep.mubr.msk.bf16.mxu0 %vm1629_vm2, %v17712_v3 }
 0x2ca   : > { %12507 = vmatmul.mubr.msk.bf16.gmra.mrb[84].mxu1 %vm1629_vm2, %v20799_v1  ;;  %v3355_v1 = vrot.slane %v20805_v29, 2  ;;  %v8351_v29 = vsel %vm1822_vm0, %v17827_v10, 0  ;;  %v20115_v10 = vunpack.c.l.bf16 %v17647_v58 }
 0x2cb   : > { %12510 = vmatprep.mubr.msk.bf16.mxu1 %vm1629_vm2, %v20800_v17  ;;  %v20807_v17 = vld [vmem:[#allocation101_spill] sm:$0xff] }
 0x2cd   : > { %13063 = vmatmul.mubr.msk.bf16.gmra.mrb[120].mxu0 %vm1629_vm2, %v17722_v47  ;;  %v3356_v47 = vsel %vm3111_vm3, %v3353_v12, %v3355_v1  ;;  %v20811_v1 = vld [vmem:[#allocation8_spill] sm:$0xff] }
 0x2ce   : > { %13066 = vmatprep.mubr.msk.bf16.mxu0 %vm1629_vm2, %v17541_v30  ;;  %v3608_v49 = vpack.c.bf16 %v3356_v47, %v3354_v35  ;;  %v18016_v47 = vld [vmem:[%s15037_s17 + $0x74] sm:$0x1]  ;;  %v20812_v35 = vld [vmem:[#allocation10_spill] sm:$0xff] }
 0x2cf   : > { %v20813_v12 = vld [vmem:[#allocation12_spill] sm:$0xff] }
 0x2d2   : > { %12511 = vmatmul.mubr.msk.bf16.gmra.mrb[88].mxu1 %vm1629_vm2, %v20806_v11 }
 0x2d3   : > { %12514 = vmatprep.mubr.msk.bf16.mxu1 %vm1629_vm2, %v20807_v17 }
 0x2d5   : > { %13067 = vmatmul.mubr.msk.bf16.gmra.mrb[124].mxu0 %vm1629_vm2, %v17984_v31 }
 0x2d6   : > { %13072 = vmatprep.mubr.msk.bf16.mxu0 %vm1629_vm2, %v20808_v2  ;;  %v20120_v2 = vunpack.c.l.bf16 %v18016_v47 }
 0x2da   : > { %12515 = vmatmul.mubr.msk.bf16.gmra.mrb[92].mxu1 %vm1629_vm2, %v20809_v51 }
 0x2db   : > { %12518 = vmatprep.mubr.msk.bf16.mxu1 %vm1629_vm2, %v3608_v49  ;;  %v7495_v49 = vrot.slane %v20118_v57, 1 }
 0x2dd   : > { %13073 = vmatmul.mubr.msk.bf16.vlgmr.msra.gmra.mrb[0].mxu0 %vm1629_vm2, %v20810_v9  ;;  %v20814_v9 = vld [vmem:[#allocation13_spill] sm:$0xff] }
 0x2de   : > { %13201 = vmatpush3.bf16.msra.mxu0 %v8351_v29  ;;  %13076 = vmatprep.mubr.msk.bf16.mxu0 %vm1629_vm2, %v20811_v1  ;;  %v7497_v29 = vrot.slane %v20120_v2, 1  ;;  %v20815_v1 = vld [vmem:[#allocation14_spill] sm:$0xff] }
 0x2e2   : > { %12519 = vmatmul.mubr.msk.bf16.gmra.mrb[96].mxu1 %vm1629_vm2, %v17305_v62  ;;  %v7494_v62 = vrot.slane %v20115_v10, 1  ;;  %v20816_v10 = vld [vmem:[#allocation125_spill] sm:$0xff] }
 0x2e3   : > { %12522 = vmatprep.mubr.msk.bf16.mxu1 %vm1629_vm2, %v17339_v14  ;;  %v20818_v57 = vunpack.c.h.bf16 %v20816_v10 }
 0x2e5   : > { %13077 = vmatmul.mubr.msk.bf16.gmra.mrb[4].mxu0 %vm1629_vm2, %v20812_v35  ;;  %v7496_v35 = vsel %vm1114_vm1, %v7494_v62, %v7495_v49  ;;  %v3393_v51 = vrot.slane %v20818_v57, 2  ;;  %v20824_v57 = vld [vmem:[#allocation17_spill] sm:$0xff] }
 0x2e6   : > { %13080 = vmatprep.mubr.msk.bf16.mxu0 %vm1629_vm2, %v20813_v12  ;;  %v7498_v12 = vsel %vm1114_vm1, %v7495_v49, %v7497_v29  ;;  %v675_v29 = vunpack.c.h.bf16 %v17709_v37 }
 0x2ea   : > { %12523 = vmatmul.mubr.msk.bf16.gmra.mrb[100].mxu1 %vm1629_vm2, %v17342_v6  ;;  %v20817_v6 = vunpack.c.l.bf16 %v20816_v10 }
 0x2eb   : > { %12526 = vmatprep.mubr.msk.bf16.mxu1 %vm1629_vm2, %v17380_v32  ;;  %v20819_v32 = vld [vmem:[#allocation126_spill] sm:$0xff] }
 0x2ec   : > { %v3392_v14 = vrot.slane %v20817_v6, 2  ;;  %v20820_v17 = vunpack.c.l.bf16 %v20819_v32  ;;  %v20821_v6 = vld [vmem:[#allocation15_spill] sm:$0xff]  ;;  %v20822_v32 = vld [vmem:[#allocation149_spill] sm:$0xff] }
 0x2ed   : > { %13081 = vmatmul.mubr.msk.bf16.gmra.mrb[8].mxu0 %vm1629_vm2, %v20814_v9  ;;  %v7550_v9 = vpack.c.bf16 %v7498_v12, %v7496_v35  ;;  %v7500_v12 = vrot.slane %v675_v29, 1 }
 0x2ee   : > { %13084 = vmatprep.mubr.msk.bf16.mxu0 %vm1629_vm2, %v20815_v1  ;;  %v3395_v2 = vrot.slane %v20820_v17, 2  ;;  %v3394_v62 = vsel %vm3111_vm3, %v3392_v14, %v3393_v51  ;;  %v20823_v17 = vld [vmem:[#allocation16_spill] sm:$0xff]  ;;  %v18068_v14 = vld [vmem:[%s15037_s17 + $0xec] sm:$0x1]  ;;  %v20826_v1 = vld [vmem:[#allocation21_spill] sm:$0xff] }
 0x2ef   : > { %v20129_v35 = vunpack.c.l.bf16 %v18068_v14 }
 0x2f0   : > { %v3396_v49 = vsel %vm3111_vm3, %v3393_v51, %v3395_v2  ;;  %v20825_v51 = vld [vmem:[#allocation20_spill] sm:$0xff]  ;;  %v674_v2 = vunpack.c.l.bf16 %v17709_v37 }
 0x2f1   : > { %v3616_v10 = vpack.c.bf16 %v3396_v49, %v3394_v62  ;;  %v20827_v62 = vld [vmem:[#allocation22_spill] sm:$0xff]  ;;  %v20828_v49 = vld [vmem:[#allocation25_spill] sm:$0xff] }
 0x2f2   : > { %12527 = vmatmul.mubr.msk.bf16.gmra.mrb[104].mxu1 %vm1629_vm2, %v17390_v19 }
 0x2f3   : > { %12530 = vmatprep.mubr.msk.bf16.mxu1 %vm1629_vm2, %v17423_v36 }
 0x2f5   : > { %13085 = vmatmul.mubr.msk.bf16.gmra.mrb[12].mxu0 %vm1629_vm2, %v7550_v9  ;;  %v7502_v9 = vrot.slane %v20129_v35, 1 }
 0x2f6   : > { %13088 = vmatprep.mubr.msk.bf16.mxu0 %vm1629_vm2, %v20821_v6 }
 0x2fa   : > { %12531 = vmatmul.mubr.msk.bf16.gmra.mrb[108].mxu1 %vm1629_vm2, %v20822_v32 }
 0x2fb   : > { %12534 = vmatprep.mubr.msk.bf16.mxu1 %vm1629_vm2, %v3616_v10  ;;  %v7503_v10 = vsel %vm1114_vm1, %v7500_v12, %v7502_v9  ;;  %v18114_v9 = vld [vmem:[%s15037_s17 + $0x164] sm:$0x1] }
 0x2fd   : > { %13089 = vmatmul.mubr.msk.bf16.gmra.mrb[16].mxu0 %vm1629_vm2, %v20823_v17 }
 0x2fe   : > { %13092 = vmatprep.mubr.msk.bf16.mxu0 %vm1629_vm2, %v20824_v57  ;;  %v20829_v57 = vld [vmem:[#allocation30_spill] sm:$0xff] }
 0x302   : > { %12535 = vmatmul.mubr.msk.bf16.gmra.mrb[112].mxu1 %vm1629_vm2, %v17461_v23  ;;  %v7499_v23 = vrot.slane %v674_v2, 1 }
 0x303   : > { %12538 = vmatprep.mubr.msk.bf16.mxu1 %vm1629_vm2, %v17489_v25 }
 0x304   : > { %v7501_v6 = vsel %vm1114_vm1, %v7499_v23, %v7500_v12  ;;  %v20832_v23 = vld [vmem:[#allocation37_spill] sm:$0xff]  ;;  %v20833_v12 = vld [vmem:[#allocation4_spill] sm:$0xff] }
 0x305   : > { %13093 = vmatmul.mubr.msk.bf16.gmra.mrb[20].mxu0 %vm1629_vm2, %v20825_v51  ;;  %v7551_v17 = vpack.c.bf16 %v7503_v10, %v7501_v6  ;;  %v20830_v51 = vld [vmem:[#allocation26_spill] sm:$0xff]  ;;  %v20125_v6 = vunpack.c.h.bf16 %v17761_v20  ;;  %v20835_v10 = vld [vmem:[#allocation44_spill] sm:$0xff] }
 0x306   : > { %13096 = vmatprep.mubr.msk.bf16.mxu0 %vm1629_vm2, %v20826_v1  ;;  %v20831_v1 = vld [vmem:[#allocation32_spill] sm:$0xff] }
 0x30a   : > { %12539 = vmatmul.mubr.msk.bf16.gmra.mrb[116].mxu1 %vm1629_vm2, %v17492_v42  ;;  %v20918_v42 = vld [vmem:[#allocation23_spill] sm:$0xff] }
 0x30b   : > { %12542 = vmatprep.mubr.msk.bf16.mxu1 %vm1629_vm2, %v17522_v52 }
 0x30d   : > { %13097 = vmatmul.mubr.msk.bf16.gmra.mrb[24].mxu0 %vm1629_vm2, %v20827_v62  ;;  %v20834_v62 = vld [vmem:[#allocation39_spill] sm:$0xff] }
 0x30e   : > { %13100 = vmatprep.mubr.msk.bf16.mxu0 %vm1629_vm2, %v20828_v49  ;;  %v20126_v49 = vunpack.c.l.bf16 %v17761_v20 }
 0x312   : > { %12543 = vmatmul.mubr.msk.bf16.gmra.mrb[120].mxu1 %vm1629_vm2, %v17532_v13 }
 0x313   : > { %12546 = vmatprep.mubr.msk.bf16.mxu1 %vm1629_vm2, %v17565_v26  ;;  %v20915_v26 = vld [vmem:[#allocation144_spill] sm:$0xff] }
 0x315   : > { %13101 = vmatmul.mubr.msk.bf16.gmra.mrb[28].mxu0 %vm1629_vm2, %v7551_v17  ;;  %v20123_v17 = vunpack.c.l.bf16 %v18114_v9 }
 0x316   : > { %13104 = vmatprep.mubr.msk.bf16.mxu0 %vm1629_vm2, %v20829_v57 }
 0x317   : > { %v7507_v57 = vrot.slane %v20123_v17, 1  ;;  %v20853_v17 = vld [vmem:[#allocation59_spill] sm:$0xff] }
 0x31a   : > { %12547 = vmatmul.mubr.msk.bf16.gmra.mrb[124].mxu1 %vm1629_vm2, %v17569_v0  ;;  %v20901_v0 = vld [vmem:[#allocation132_spill] sm:$0xff] }
 0x31b   : > { %12552 = vmatprep.mubr.msk.bf16.mxu1 %vm1629_vm2, %v20830_v51  ;;  %v20836_v51 = vld [vmem:[#allocation45_spill] sm:$0xff] }
 0x31d   : > { %13105 = vmatmul.mubr.msk.bf16.gmra.mrb[32].mxu0 %vm1629_vm2, %v20831_v1  ;;  %v20837_v1 = vld [vmem:[#allocation50_spill] sm:$0xff] }
 0x31e   : > { %13108 = vmatprep.mubr.msk.bf16.mxu0 %vm1629_vm2, %v20832_v23 }
 0x322   : > { %12553 = vmatmul.mubr.msk.bf16.vlgmr.msra.gmra.mrb[0].mxu1 %vm1629_vm2, %v16811_v43  ;;  %v7504_v43 = vrot.slane %v20126_v49, 1  ;;  %v20867_v49 = vld [vmem:[#allocation93_spill] sm:$0xff] }
 0x323   : > { %12556 = vmatprep.mubr.msk.bf16.mxu1 %vm1629_vm2, %v16839_v28  ;;  %13499 = vmatpush3.bf16.msra.mxu1 %v20833_v12  ;;  %v7505_v28 = vrot.slane %v20125_v6, 1 }
 0x325   : > { %13109 = vmatmul.mubr.msk.bf16.gmra.mrb[36].mxu0 %vm1629_vm2, %v20834_v62  ;;  %v7508_v23 = vsel %vm1114_vm1, %v7505_v28, %v7507_v57  ;;  %v20838_v62 = vld [vmem:[#allocation35_spill] sm:$0xff]  ;;  %v20845_v57 = vld [vmem:[#allocation48_spill] sm:$0xff] }
 0x326   : > { %13112 = vmatprep.mubr.msk.bf16.mxu0 %vm1629_vm2, %v20835_v10  ;;  %v20840_v10 = vld [vmem:[#allocation163_spill] sm:$0xff] }
 0x32a   : > { %12557 = vmatmul.mubr.msk.bf16.gmra.mrb[4].mxu1 %vm1629_vm2, %v16846_v54  ;;  %v7506_v54 = vsel %vm1114_vm1, %v7504_v43, %v7505_v28  ;;  %v20842_v43 = vld [vmem:[#allocation58_spill] sm:$0xff]  ;;  %v20843_v28 = vld [vmem:[#allocation63_spill] sm:$0xff] }
 0x32b   : > { %12560 = vmatprep.mubr.msk.bf16.mxu1 %vm1629_vm2, %v16873_v4  ;;  %v7552_v12 = vpack.c.bf16 %v7508_v23, %v7506_v54  ;;  %v20839_v4 = vld [vmem:[#allocation55_spill] sm:$0xff]  ;;  %v20846_v54 = vld [vmem:[#allocation64_spill] sm:$0xff]  ;;  %v20121_v23 = vunpack.c.l.bf16 %v17806_v39 }
 0x32d   : > { %13113 = vmatmul.mubr.msk.bf16.gmra.mrb[40].mxu0 %vm1629_vm2, %v20836_v51  ;;  %v20841_v51 = vld [vmem:[#allocation42_spill] sm:$0xff] }
 0x32e   : > { %13116 = vmatprep.mubr.msk.bf16.mxu0 %vm1629_vm2, %v20837_v1  ;;  %v18159_v1 = vld [vmem:[%s15037_s17 + $0x1dc] sm:$0x1] }
 0x332   : > { %12561 = vmatmul.mubr.msk.bf16.gmra.mrb[8].mxu1 %vm1629_vm2, %v16880_v61  ;;  %v20844_v61 = vld [vmem:[#allocation43_spill] sm:$0xff] }
 0x333   : > { %12564 = vmatprep.mubr.msk.bf16.mxu1 %vm1629_vm2, %v20838_v62  ;;  %v20847_v62 = vld [vmem:[#allocation65_spill] sm:$0xff] }
 0x335   : > { %13117 = vmatmul.mubr.msk.bf16.gmra.mrb[44].mxu0 %vm1629_vm2, %v7552_v12  ;;  %v20122_v12 = vunpack.c.h.bf16 %v17806_v39 }
 0x336   : > { %13120 = vmatprep.mubr.msk.bf16.mxu0 %vm1629_vm2, %v20839_v4  ;;  %v20124_v4 = vunpack.c.l.bf16 %v18159_v1 }
 0x33a   : > { %12565 = vmatmul.mubr.msk.bf16.gmra.mrb[12].mxu1 %vm1629_vm2, %v20840_v10  ;;  %v20848_v10 = vld [vmem:[#allocation49_spill] sm:$0xff] }
 0x33b   : > { %12568 = vmatprep.mubr.msk.bf16.mxu1 %vm1629_vm2, %v20841_v51  ;;  %v7509_v51 = vrot.slane %v20121_v23, 1  ;;  %v20852_v23 = vld [vmem:[#allocation54_spill] sm:$0xff] }
 0x33d   : > { %13121 = vmatmul.mubr.msk.bf16.gmra.mrb[48].mxu0 %vm1629_vm2, %v20842_v43  ;;  %v7510_v43 = vrot.slane %v20122_v12, 1 }
 0x33e   : > { %13124 = vmatprep.mubr.msk.bf16.mxu0 %vm1629_vm2, %v20843_v28  ;;  %v20849_v28 = vld [vmem:[#allocation53_spill] sm:$0xff] }
 0x342   : > { %12569 = vmatmul.mubr.msk.bf16.gmra.mrb[16].mxu1 %vm1629_vm2, %v20844_v61  ;;  %v7512_v61 = vrot.slane %v20124_v4, 1  ;;  %v20866_v4 = vunpack.c.h.bf16 %v17647_v58 }
 0x343   : > { %12572 = vmatprep.mubr.msk.bf16.mxu1 %vm1629_vm2, %v20845_v57  ;;  %v20850_v57 = vld [vmem:[#allocation68_spill] sm:$0xff] }
 0x344   : > { %v8261_v6 = vrot.slane %v20866_v4, 2  ;;  %v20871_v4 = vld [vmem:[#allocation89_spill] sm:$0xff] }
 0x345   : > { %13125 = vmatmul.mubr.msk.bf16.gmra.mrb[52].mxu0 %vm1629_vm2, %v20846_v54  ;;  %v20851_v54 = vld [vmem:[#allocation73_spill] sm:$0xff] }
 0x346   : > { %13128 = vmatprep.mubr.msk.bf16.mxu0 %vm1629_vm2, %v20847_v62  ;;  %v7511_v62 = vsel %vm1114_vm1, %v7509_v51, %v7510_v43  ;;  %v20857_v51 = vld [vmem:[#allocation80_spill] sm:$0xff] }
 0x34a   : > { %12573 = vmatmul.mubr.msk.bf16.gmra.mrb[20].mxu1 %vm1629_vm2, %v20848_v10  ;;  %v7513_v10 = vsel %vm1114_vm1, %v7510_v43, %v7512_v61  ;;  %v20858_v43 = vld [vmem:[#allocation85_spill] sm:$0xff]  ;;  %v20861_v61 = vld [vmem:[#allocation87_spill] sm:$0xff] }
 0x34b   : > { %12576 = vmatprep.mubr.msk.bf16.mxu1 %vm1629_vm2, %v20849_v28  ;;  %v7553_v12 = vpack.c.bf16 %v7513_v10, %v7511_v62  ;;  %v20854_v28 = vld [vmem:[#allocation78_spill] sm:$0xff]  ;;  %v20128_v62 = vunpack.c.l.bf16 %v17858_v15  ;;  %v20127_v10 = vunpack.c.h.bf16 %v17858_v15 }
 0x34d   : > { %13129 = vmatmul.mubr.msk.bf16.gmra.mrb[56].mxu0 %vm1629_vm2, %v20850_v57  ;;  %v20855_v57 = vld [vmem:[#allocation166_spill] sm:$0xff] }
 0x34e   : > { %13132 = vmatprep.mubr.msk.bf16.mxu0 %vm1629_vm2, %v20851_v54  ;;  %v20856_v54 = vld [vmem:[#allocation69_spill] sm:$0xff] }
 0x352   : > { %12577 = vmatmul.mubr.msk.bf16.gmra.mrb[24].mxu1 %vm1629_vm2, %v20852_v23  ;;  %v20859_v23 = vld [vmem:[#allocation70_spill] sm:$0xff] }
 0x353   : > { %12580 = vmatprep.mubr.msk.bf16.mxu1 %vm1629_vm2, %v20853_v17  ;;  %v20860_v17 = vld [vmem:[#allocation75_spill] sm:$0xff] }
 0x355   : > { %13133 = vmatmul.mubr.msk.bf16.gmra.mrb[60].mxu0 %vm1629_vm2, %v7553_v12  ;;  %v18204_v12 = vld [vmem:[%s15037_s17 + $0x254] sm:$0x1] }
 0x356   : > { %13136 = vmatprep.mubr.msk.bf16.mxu0 %vm1629_vm2, %v20854_v28  ;;  %v20862_v28 = vld [vmem:[#allocation92_spill] sm:$0xff] }
 0x35a   : > { %12581 = vmatmul.mubr.msk.bf16.gmra.mrb[28].mxu1 %vm1629_vm2, %v20855_v57  ;;  %v20130_v57 = vunpack.c.l.bf16 %v18204_v12 }
 0x35b   : > { %12584 = vmatprep.mubr.msk.bf16.mxu1 %vm1629_vm2, %v20856_v54  ;;  %v20863_v54 = vld [vmem:[#allocation76_spill] sm:$0xff] }
 0x35d   : > { %13137 = vmatmul.mubr.msk.bf16.gmra.mrb[64].mxu0 %vm1629_vm2, %v20857_v51  ;;  %v7514_v51 = vrot.slane %v20128_v62, 1 }
 0x35e   : > { %13140 = vmatprep.mubr.msk.bf16.mxu0 %vm1629_vm2, %v20858_v43  ;;  %v7515_v43 = vrot.slane %v20127_v10, 1 }
 0x360   : > { %v7516_v10 = vsel %vm1114_vm1, %v7514_v51, %v7515_v43 }
 0x362   : > { %12585 = vmatmul.mubr.msk.bf16.gmra.mrb[32].mxu1 %vm1629_vm2, %v20859_v23  ;;  %v20864_v23 = vld [vmem:[#allocation81_spill] sm:$0xff] }
 0x363   : > { %12588 = vmatprep.mubr.msk.bf16.mxu1 %vm1629_vm2, %v20860_v17  ;;  %v7517_v17 = vrot.slane %v20130_v57, 1  ;;  %v20870_v57 = vld [vmem:[#allocation82_spill] sm:$0xff] }
 0x365   : > { %13141 = vmatmul.mubr.msk.bf16.gmra.mrb[68].mxu0 %vm1629_vm2, %v20861_v61  ;;  %v20865_v61 = vunpack.c.l.bf16 %v17647_v58  ;;  %v7518_v62 = vsel %vm1114_vm1, %v7515_v43, %v7517_v17  ;;  %v20876_v43 = vld [vmem:[#allocation111_spill] sm:$0xff]  ;;  %v20878_v17 = vunpack.c.h.bf16 %v17243_v63 }
 0x366   : > { %13144 = vmatprep.mubr.msk.bf16.mxu0 %vm1629_vm2, %v20862_v28 }
 0x367   : > { %v8260_v28 = vrot.slane %v20865_v61, 2  ;;  %v7554_v61 = vpack.c.bf16 %v7518_v62, %v7516_v10  ;;  %v20874_v62 = vld [vmem:[#allocation94_spill] sm:$0xff]  ;;  %v20875_v10 = vld [vmem:[#allocation105_spill] sm:$0xff] }
 0x369   : > { %v18238_v58 = vsel %vm3111_vm3, %v8260_v28, %v8261_v6  ;;  %v5254_v28 = vrot.slane %v20878_v17, 1 }
 0x36a   : > { %12589 = vmatmul.mubr.msk.bf16.gmra.mrb[36].mxu1 %vm1629_vm2, %v20863_v54  ;;  %v20868_v54 = vld [vmem:[#allocation98_spill] sm:$0xff] }
 0x36b   : > { %12592 = vmatprep.mubr.msk.bf16.mxu1 %vm1629_vm2, %v20864_v23  ;;  %v20869_v23 = vunpack.c.l.bf16 %v18016_v47  ;;  %v20872_v47 = vld [vmem:[#allocation103_spill] sm:$0xff] }
 0x36d   : > { %13145 = vmatmul.mubr.msk.bf16.gmra.mrb[72].mxu0 %vm1629_vm2, %v20867_v49  ;;  %v8263_v35 = vrot.slane %v20869_v23, 2 }
 0x36e   : > { %13148 = vmatprep.mubr.msk.bf16.mxu0 %vm1629_vm2, %v20868_v54  ;;  %v20879_v54 = vld [vmem:[#allocation97_spill] sm:$0xff] }
 0x36f   : > { %v18243_v49 = vsel %vm3111_vm3, %v8261_v6, %v8263_v35  ;;  %v20877_v35 = vunpack.c.l.bf16 %v17243_v63  ;;  %v20880_v23 = vunpack.c.l.bf16 %v20879_v54  ;;  %v20883_v54 = vld [vmem:[#allocation104_spill] sm:$0xff] }
 0x371   : > { %v5253_v6 = vrot.slane %v20877_v35, 1 }
 0x372   : > { %12593 = vmatmul.mubr.msk.bf16.gmra.mrb[40].mxu1 %vm1629_vm2, %v20870_v57  ;;  %v20873_v57 = vld [vmem:[#allocation66_spill] sm:$0xff] }
 0x373   : > { %12596 = vmatprep.mubr.msk.bf16.mxu1 %vm1629_vm2, %v20871_v4  ;;  %v18269_v4 = vld [vmem:[%s15037_s17 + $0x2cc] sm:$0x1] }
 0x375   : > { %13149 = vmatmul.mubr.msk.bf16.gmra.mrb[76].mxu0 %vm1629_vm2, %v7554_v61  ;;  %v5256_v61 = vrot.slane %v20880_v23, 1 }
 0x376   : > { %13152 = vmatprep.mubr.msk.bf16.mxu0 %vm1629_vm2, %v20872_v47  ;;  %v20881_v47 = vld [vmem:[#allocation112_spill] sm:$0xff] }
 0x37a   : > { %12597 = vmatmul.mubr.msk.bf16.gmra.mrb[44].mxu1 %vm1629_vm2, %v20873_v57  ;;  %v20133_v57 = vunpack.c.l.bf16 %v17900_v50 }
 0x37b   : > { %12600 = vmatprep.mubr.msk.bf16.mxu1 %vm1629_vm2, %v20874_v62  ;;  %v20882_v62 = vld [vmem:[#allocation115_spill] sm:$0xff] }
 0x37c   : > { %v7519_v35 = vrot.slane %v20133_v57, 1 }
 0x37d   : > { %13153 = vmatmul.mubr.msk.bf16.gmra.mrb[80].mxu0 %vm1629_vm2, %v20875_v10  ;;  %v5255_v10 = vsel %vm1114_vm1, %v5253_v6, %v5254_v28  ;;  %v8265_v6 = vrot.slane %v674_v2, 2 }
 0x37e   : > { %13156 = vmatprep.mubr.msk.bf16.mxu0 %vm1629_vm2, %v20876_v43  ;;  %v5257_v43 = vsel %vm1114_vm1, %v5254_v28, %v5256_v61  ;;  %v20884_v28 = vld [vmem:[#allocation116_spill] sm:$0xff] }
 0x37f   : > { %v18288_v23 = vpack.c.bf16 %v5257_v43, %v5255_v10  ;;  %v20885_v10 = vunpack.c.l.bf16 %v18068_v14  ;;  %v20888_v14 = vld [vmem:[#allocation120_spill] sm:$0xff] }
 0x381   : > { %v8268_v43 = vrot.slane %v20885_v10, 2  ;;  %v20894_v10 = vunpack.c.h.bf16 %v17399_v55 }
 0x382   : > { %12601 = vmatmul.mubr.msk.bf16.gmra.mrb[48].mxu1 %vm1629_vm2, %v17218_v7  ;;  %v20132_v7 = vunpack.c.h.bf16 %v17900_v50 }
 0x383   : > { %12604 = vmatprep.mubr.msk.bf16.mxu1 %vm1629_vm2, %v20745_v45  ;;  %v20131_v45 = vunpack.c.l.bf16 %v18269_v4 }
 0x384   : > { %v7520_v17 = vrot.slane %v20132_v7, 1  ;;  %v20898_v7 = vld [vmem:[#allocation129_spill] sm:$0xff] }
 0x385   : > { %13157 = vmatmul.mubr.msk.bf16.gmra.mrb[84].mxu0 %vm1629_vm2, %v20881_v47  ;;  %v7522_v47 = vrot.slane %v20131_v45, 1 }
 0x386   : > { %13160 = vmatprep.mubr.msk.bf16.mxu0 %vm1629_vm2, %v20882_v62  ;;  %v7521_v61 = vsel %vm1114_vm1, %v7519_v35, %v7520_v17  ;;  %v20137_v35 = vunpack.c.l.bf16 %v17942_v21 }
 0x387   : > { %v7523_v62 = vsel %vm1114_vm1, %v7520_v17, %v7522_v47  ;;  %v20889_v17 = vld [vmem:[#allocation9_spill] sm:$0xff]  ;;  %v20890_v47 = vld [vmem:[#allocation3_spill] sm:$0xff] }
 0x388   : > { %v7555_v2 = vpack.c.bf16 %v7523_v62, %v7521_v61  ;;  %v20892_v61 = vld [vmem:[#allocation123_spill] sm:$0xff] }
 0x38a   : > { %12605 = vmatmul.mubr.msk.bf16.gmra.mrb[52].mxu1 %vm1629_vm2, %v20746_v18  ;;  %v8266_v18 = vrot.slane %v675_v29, 2  ;;  %v20887_v29 = vld [vmem:[#allocation108_spill] sm:$0xff] }
 0x38b   : > { %12608 = vmatprep.mubr.msk.bf16.mxu1 %vm1629_vm2, %v20883_v54  ;;  %v20886_v54 = vld [vmem:[#allocation106_spill] sm:$0xff] }
 0x38c   : > { %v18307_v37 = vsel %vm3111_vm3, %v8265_v6, %v8266_v18  ;;  %v18312_v45 = vsel %vm3111_vm3, %v8266_v18, %v8268_v43  ;;  %v20891_v6 = vld [vmem:[#allocation122_spill] sm:$0xff]  ;;  %v20893_v18 = vunpack.c.l.bf16 %v17399_v55  ;;  %v5259_v43 = vrot.slane %v20894_v10, 1 }
 0x38d   : > { %13161 = vmatmul.mubr.msk.bf16.gmra.mrb[88].mxu0 %vm1629_vm2, %v20884_v28 }
 0x38e   : > { %13164 = vmatprep.mubr.msk.bf16.mxu0 %vm1629_vm2, %v18288_v23  ;;  %v5258_v62 = vrot.slane %v20893_v18, 1 }
 0x390   : > { %v5260_v18 = vsel %vm1114_vm1, %v5258_v62, %v5259_v43  ;;  %v20899_v62 = vunpack.c.l.bf16 %v17761_v20 }
 0x392   : > { %12609 = vmatmul.mubr.msk.bf16.gmra.mrb[56].mxu1 %vm1629_vm2, %v20886_v54  ;;  %v20895_v54 = vld [vmem:[#allocation148_spill] sm:$0xff] }
 0x393   : > { %12612 = vmatprep.mubr.msk.bf16.mxu1 %vm1629_vm2, %v20887_v29 }
 0x395   : > { %13165 = vmatmul.mubr.msk.bf16.gmra.mrb[92].mxu0 %vm1629_vm2, %v7555_v2  ;;  %v20896_v2 = vunpack.c.l.bf16 %v20895_v54  ;;  %v7524_v54 = vrot.slane %v20137_v35, 1 }
 0x396   : > { %13168 = vmatprep.mubr.msk.bf16.mxu0 %vm1629_vm2, %v20888_v14 }
 0x397   : > { %v5261_v29 = vrot.slane %v20896_v2, 1 }
 0x399   : > { %v5262_v10 = vsel %vm1114_vm1, %v5259_v43, %v5261_v29  ;;  %v8270_v43 = vrot.slane %v20899_v62, 2  ;;  %v20900_v29 = vunpack.c.h.bf16 %v17761_v20 }
 0x39a   : > { %12613 = vmatmul.mubr.msk.bf16.gmra.mrb[60].mxu1 %vm1629_vm2, %v20889_v17  ;;  %v18338_v17 = vld [vmem:[%s15037_s17 + $0x344] sm:$0x1]  ;;  %v18357_v57 = vpack.c.bf16 %v5262_v10, %v5260_v18  ;;  %v20902_v18 = vunpack.c.l.bf16 %v18114_v9  ;;  %v20905_v9 = vld [vmem:[#allocation137_spill] sm:$0xff] }
 0x39b   : > { %12616 = vmatprep.mubr.msk.bf16.mxu1 %vm1629_vm2, %v20890_v47  ;;  %v20897_v47 = vld [vmem:[#allocation128_spill] sm:$0xff] }
 0x39c   : > { %v8273_v10 = vrot.slane %v20902_v18, 2 }
 0x39d   : > { %13169 = vmatmul.mubr.msk.bf16.gmra.mrb[96].mxu0 %vm1629_vm2, %v20891_v6 }
 0x39e   : > { %13172 = vmatprep.mubr.msk.bf16.mxu0 %vm1629_vm2, %v20892_v61 }
 0x3a2   : > { %12617 = vmatmul.mubr.msk.bf16.gmra.mrb[64].mxu1 %vm1629_vm2, %v17372_v22  ;;  %v20135_v22 = vunpack.c.h.bf16 %v17942_v21 }
 0x3a3   : > { %12620 = vmatprep.mubr.msk.bf16.mxu1 %vm1629_vm2, %v17407_v34  ;;  %v20136_v34 = vunpack.c.l.bf16 %v18338_v17 }
 0x3a4   : > { %v7525_v2 = vrot.slane %v20135_v22, 1 }
 0x3a5   : > { %13173 = vmatmul.mubr.msk.bf16.gmra.mrb[100].mxu0 %vm1629_vm2, %v20897_v47  ;;  %v7527_v51 = vrot.slane %v20136_v34, 1  ;;  %v20903_v34 = vld [vmem:[#allocation150_spill] sm:$0xff] }
 0x3a6   : > { %13176 = vmatprep.mubr.msk.bf16.mxu0 %vm1629_vm2, %v20898_v7  ;;  %v7526_v22 = vsel %vm1114_vm1, %v7524_v54, %v7525_v2  ;;  %v20908_v54 = vld [vmem:[#allocation139_spill] sm:$0xff] }
 0x3aa   : > { %12621 = vmatmul.mubr.msk.bf16.gmra.mrb[68].mxu1 %vm1629_vm2, %v17414_v5  ;;  %v8271_v5 = vrot.slane %v20900_v29, 2  ;;  %v20904_v29 = vld [vmem:[#allocation152_spill] sm:$0xff] }
 0x3ab   : > { %12624 = vmatprep.mubr.msk.bf16.mxu1 %vm1629_vm2, %v17444_v48  ;;  %v7528_v48 = vsel %vm1114_vm1, %v7525_v2, %v7527_v51  ;;  %v20909_v2 = vld [vmem:[#allocation140_spill] sm:$0xff]  ;;  %v20144_v51 = vunpack.c.l.bf16 %v17984_v31 }
 0x3ac   : > { %v7556_v62 = vpack.c.bf16 %v7528_v48, %v7526_v22  ;;  %v18376_v20 = vsel %vm3111_vm3, %v8270_v43, %v8271_v5  ;;  %v18381_v35 = vsel %vm3111_vm3, %v8271_v5, %v8273_v10  ;;  %v20907_v22 = vld [vmem:[#allocation154_spill] sm:$0xff]  ;;  %v20910_v43 = vunpack.c.l.bf16 %v17541_v30  ;;  %v20912_v10 = vld [vmem:[#allocation157_spill] sm:$0xff] }
 0x3ad   : > { %13177 = vmatmul.mubr.msk.bf16.gmra.mrb[104].mxu0 %vm1629_vm2, %v20901_v0  ;;  %v20911_v48 = vunpack.c.h.bf16 %v17541_v30 }
 0x3ae   : > { %13180 = vmatprep.mubr.msk.bf16.mxu0 %vm1629_vm2, %v18357_v57  ;;  %v5263_v5 = vrot.slane %v20910_v43, 1 }
 0x3af   : > { %v5264_v18 = vrot.slane %v20911_v48, 1 }
 0x3b1   : > { %v5265_v43 = vsel %vm1114_vm1, %v5263_v5, %v5264_v18  ;;  %v20916_v5 = vunpack.c.l.bf16 %v17806_v39 }
 0x3b2   : > { %12625 = vmatmul.mubr.msk.bf16.gmra.mrb[72].mxu1 %vm1629_vm2, %v20903_v34  ;;  %v20906_v34 = vld [vmem:[#allocation11_spill] sm:$0xff] }
 0x3b3   : > { %12628 = vmatprep.mubr.msk.bf16.mxu1 %vm1629_vm2, %v20904_v29 }
 0x3b5   : > { %13181 = vmatmul.mubr.msk.bf16.gmra.mrb[108].mxu0 %vm1629_vm2, %v7556_v62  ;;  %v20913_v62 = vunpack.c.l.bf16 %v20912_v10  ;;  %v7529_v10 = vrot.slane %v20144_v51, 1  ;;  %v20959_v51 = vunpack.c.l.bf16 %v17942_v21 }
 0x3b6   : > { %13184 = vmatprep.mubr.msk.bf16.mxu0 %vm1629_vm2, %v20905_v9 }
 0x3b7   : > { %v5266_v29 = vrot.slane %v20913_v62, 1 }
 0x3b9   : > { %v5267_v48 = vsel %vm1114_vm1, %v5264_v18, %v5266_v29  ;;  %v8275_v18 = vrot.slane %v20916_v5, 2  ;;  %v20917_v29 = vunpack.c.h.bf16 %v17806_v39 }
 0x3ba   : > { %12629 = vmatmul.mubr.msk.bf16.gmra.mrb[76].mxu1 %vm1629_vm2, %v20906_v34  ;;  %v18407_v34 = vld [vmem:[%s15037_s17 + $0x3bc] sm:$0x1]  ;;  %v18426_v13 = vpack.c.bf16 %v5267_v48, %v5265_v43  ;;  %v20919_v43 = vunpack.c.l.bf16 %v18159_v1 }
 0x3bb   : > { %12632 = vmatprep.mubr.msk.bf16.mxu1 %vm1629_vm2, %v20907_v22  ;;  %v20914_v22 = vld [vmem:[#allocation143_spill] sm:$0xff]  ;;  %v20923_v1 = vld [vmem:[#allocation117_spill] sm:$0xff] }
 0x3bc   : > { %v8278_v48 = vrot.slane %v20919_v43, 2  ;;  %v20929_v43 = vld [vmem:[#allocation127_spill] sm:$0xff] }
 0x3bd   : > { %13185 = vmatmul.mubr.msk.bf16.gmra.mrb[112].mxu0 %vm1629_vm2, %v20908_v54 }
 0x3be   : > { %13188 = vmatprep.mubr.msk.bf16.mxu0 %vm1629_vm2, %v20909_v2 }
 0x3c2   : > { %12633 = vmatmul.mubr.msk.bf16.gmra.mrb[80].mxu1 %vm1629_vm2, %v17516_v27  ;;  %v20142_v27 = vunpack.c.h.bf16 %v17984_v31 }
 0x3c3   : > { %12636 = vmatprep.mubr.msk.bf16.mxu1 %vm1629_vm2, %v17549_v8  ;;  %v20143_v8 = vunpack.c.l.bf16 %v18407_v34 }
 0x3c4   : > { %v7530_v62 = vrot.slane %v20142_v27, 1 }
 0x3c5   : > { %13189 = vmatmul.mubr.msk.bf16.gmra.mrb[116].mxu0 %vm1629_vm2, %v20914_v22  ;;  %v7532_v52 = vrot.slane %v20143_v8, 1 }
 0x3c6   : > { %13192 = vmatprep.mubr.msk.bf16.mxu0 %vm1629_vm2, %v20915_v26  ;;  %v7531_v27 = vsel %vm1114_vm1, %v7529_v10, %v7530_v62  ;;  %v20955_v10 = vld [vmem:[#allocation29_spill] sm:$0xff] }
 0x3ca   : > { %12637 = vmatmul.mubr.msk.bf16.gmra.mrb[84].mxu1 %vm1629_vm2, %v17556_v56  ;;  %v8276_v56 = vrot.slane %v20917_v29, 2  ;;  %v20920_v29 = vld [vmem:[#allocation161_spill] sm:$0xff] }
 0x3cb   : > { %12640 = vmatprep.mubr.msk.bf16.mxu1 %vm1629_vm2, %v17580_v44  ;;  %v7533_v44 = vsel %vm1114_vm1, %v7530_v62, %v7532_v52  ;;  %v20921_v52 = vld [vmem:[#allocation71_spill] sm:$0xff]  ;;  %v20925_v62 = vld [vmem:[#allocation121_spill] sm:$0xff] }
 0x3cc   : > { %v7557_v5 = vpack.c.bf16 %v7533_v44, %v7531_v27  ;;  %v18445_v39 = vsel %vm3111_vm3, %v8275_v18, %v8276_v56  ;;  %v18450_v8 = vsel %vm3111_vm3, %v8276_v56, %v8278_v48  ;;  %v20924_v27 = vld [vmem:[#allocation119_spill] sm:$0xff]  ;;  %v20926_v18 = vld [vmem:[#allocation124_spill] sm:$0xff] }
 0x3cd   : > { %13193 = vmatmul.mubr.msk.bf16.gmra.mrb[120].mxu0 %vm1629_vm2, %v20918_v42 }
 0x3ce   : > { %13196 = vmatprep.mubr.msk.bf16.mxu0 %vm1629_vm2, %v18426_v13 }
 0x3d2   : > { %12641 = vmatmul.mubr.msk.bf16.gmra.mrb[88].mxu1 %vm1629_vm2, %v17587_v33  ;;  %v20922_v33 = vld [vmem:[#allocation162_spill] sm:$0xff] }
 0x3d3   : > { %12644 = vmatprep.mubr.msk.bf16.mxu1 %vm1629_vm2, %v20920_v29 }
 0x3d5   : > { %13197 = vmatmul.mubr.msk.bf16.gmra.mrb[124].mxu0 %vm1629_vm2, %v7557_v5 }
 0x3d6   : > { %13202 = vmatprep.mubr.msk.bf16.mxu0 %vm1629_vm2, %v20921_v52 }
 0x3da   : > { %12645 = vmatmul.mubr.msk.bf16.gmra.mrb[92].mxu1 %vm1629_vm2, %v17243_v63  ;;  %v20927_v63 = vunpack.c.l.bf16 %v17858_v15 }
 0x3db   : > { %12648 = vmatprep.mubr.msk.bf16.mxu1 %vm1629_vm2, %v20922_v33  ;;  %v20933_v33 = vpack.c.bf16 %v18243_v49, %v18238_v58  ;;  %v20936_v58 = vld [vmem:[#allocation134_spill] sm:$0xff] }
 0x3dc   : > { %v8280_v56 = vrot.slane %v20927_v63, 2 }
 0x3dd   : > { %13203 = vmatmul.mubr.msk.bf16.vlgmr.msra.gmra.mrb[0].mxu0 %vm1629_vm2, %v20923_v1 }
 0x3de   : > { %13206 = vmatprep.mubr.msk.bf16.mxu0 %vm1629_vm2, %v20924_v27 }
 0x3e2   : > { %12649 = vmatmul.mubr.msk.bf16.gmra.mrb[96].mxu1 %vm1629_vm2, %v17616_v41  ;;  %v20928_v41 = vunpack.c.h.bf16 %v17858_v15  ;;  %v20932_v15 = vld [vmem:[#allocation164_spill] sm:$0xff] }
 0x3e3   : > { %12652 = vmatprep.mubr.msk.bf16.mxu1 %vm1629_vm2, %v17625_v24  ;;  %v20930_v24 = vld [vmem:[#allocation130_spill] sm:$0xff] }
 0x3e4   : > { %v8281_v44 = vrot.slane %v20928_v41, 2 }
 0x3e5   : > { %13207 = vmatmul.mubr.msk.bf16.gmra.mrb[4].mxu0 %vm1629_vm2, %v20925_v62  ;;  %v20935_v62 = vld [vmem:[#allocation165_spill] sm:$0xff] }
 0x3e6   : > { %13210 = vmatprep.mubr.msk.bf16.mxu0 %vm1629_vm2, %v20926_v18  ;;  %v18486_v48 = vsel %vm3111_vm3, %v8280_v56, %v8281_v44  ;;  %v20937_v56 = vld [vmem:[#allocation136_spill] sm:$0xff] }
 0x3ea   : > { %12653 = vmatmul.mubr.msk.bf16.gmra.mrb[100].mxu1 %vm1629_vm2, %v17630_v38  ;;  %v20931_v38 = vunpack.c.l.bf16 %v18204_v12 }
 0x3eb   : > { %12656 = vmatprep.mubr.msk.bf16.mxu1 %vm1629_vm2, %v17642_v59 }
 0x3ec   : > { %v8283_v5 = vrot.slane %v20931_v38, 2  ;;  %v20939_v38 = vld [vmem:[#allocation141_spill] sm:$0xff] }
 0x3ed   : > { %13211 = vmatmul.mubr.msk.bf16.gmra.mrb[8].mxu0 %vm1629_vm2, %v20929_v43 }
 0x3ee   : > { %13214 = vmatprep.mubr.msk.bf16.mxu0 %vm1629_vm2, %v20930_v24  ;;  %v18493_v59 = vsel %vm3111_vm3, %v8281_v44, %v8283_v5  ;;  %v20938_v44 = vld [vmem:[#allocation138_spill] sm:$0xff] }
 0x3f2   : > { %12657 = vmatmul.mubr.msk.bf16.gmra.mrb[104].mxu1 %vm1629_vm2, %v17650_v40  ;;  %v20934_v40 = vld [vmem:[#allocation133_spill] sm:$0xff] }
 0x3f3   : > { %12660 = vmatprep.mubr.msk.bf16.mxu1 %vm1629_vm2, %v20932_v15  ;;  %v20941_v15 = vunpack.c.h.bf16 %v17900_v50 }
 0x3f5   : > { %v18499_v52 = vpop.f32.mrb[0].mxu1  ;;  %13215 = vmatmul.mubr.msk.bf16.gmra.mrb[12].mxu0 %vm1629_vm2, %v20933_v33  ;;  %v8286_v33 = vrot.slane %v20941_v15, 2  ;;  %v20945_v15 = vld [vmem:[#allocation167_spill] sm:$0xff] }
 0x3f6   : > { %v18505_v12 = vpop.f32.mrb[1].mxu1  ;;  %13218 = vmatprep.mubr.msk.bf16.mxu0 %vm1629_vm2, %v20934_v40 }
 0x3f7   : > { %v18507_v1 = vpop.f32.mrb[2].mxu1 }
 0x3f8   : > { %v18511_v27 = vpop.f32.mrb[3].mxu1 }
 0x3fa   : > { %12661 = vmatmul.mubr.msk.bf16.gmra.mrb[108].mxu1 %vm1629_vm2, %v17399_v55 }
 0x3fb   : > { %12664 = vmatprep.mubr.msk.bf16.mxu1 %vm1629_vm2, %v20935_v62  ;;  %v20942_v62 = vld [vmem:[#allocation142_spill] sm:$0xff] }
 0x3fd   : > { %v18517_v18 = vpop.f32.mrb[4].mxu1  ;;  %13219 = vmatmul.mubr.msk.bf16.gmra.mrb[16].mxu0 %vm1629_vm2, %v20936_v58 }
 0x3fe   : > { %v18521_v49 = vpop.f32.mrb[5].mxu1  ;;  %13222 = vmatprep.mubr.msk.bf16.mxu0 %vm1629_vm2, %v20937_v56 }
 0x3ff   : > { %v18523_v63 = vpop.f32.mrb[6].mxu1 }
 0x400   : > { %v18527_v41 = vpop.f32.mrb[7].mxu1 }
 0x402   : > { %12665 = vmatmul.mubr.msk.bf16.gmra.mrb[112].mxu1 %vm1629_vm2, %v17675_v46  ;;  %v20940_v46 = vunpack.c.l.bf16 %v17900_v50  ;;  %v20944_v50 = vunpack.c.l.bf16 %v18269_v4 }
 0x403   : > { %12668 = vmatprep.mubr.msk.bf16.mxu1 %vm1629_vm2, %v17684_v16 }
 0x404   : > { %v8285_v16 = vrot.slane %v20940_v46, 2 }
 0x405   : > { %v18533_v55 = vpop.f32.mrb[8].mxu1  ;;  %13223 = vmatmul.mubr.msk.bf16.gmra.mrb[20].mxu0 %vm1629_vm2, %v20938_v44  ;;  %v20943_v44 = vld [vmem:[#allocation145_spill] sm:$0xff] }
 0x406   : > { %v18537_v43 = vpop.f32.mrb[9].mxu1  ;;  %13226 = vmatprep.mubr.msk.bf16.mxu0 %vm1629_vm2, %v20939_v38  ;;  %v8288_v38 = vrot.slane %v20944_v50, 2 }
 0x407   : > { %v18539_v24 = vpop.f32.mrb[10].mxu1 }
 0x408   : > { %v18543_v5 = vpop.f32.mrb[11].mxu1  ;;  %v18573_v46 = vsel %vm3111_vm3, %v8286_v33, %v8288_v38 }
 0x40a   : > { %12669 = vmatmul.mubr.msk.bf16.gmra.mrb[116].mxu1 %vm1629_vm2, %v17689_v60 }
 0x40b   : > { %12672 = vmatprep.mubr.msk.bf16.mxu1 %vm1629_vm2, %v17701_v53  ;;  %v18566_v53 = vsel %vm3111_vm3, %v8285_v16, %v8286_v33  ;;  %v20946_v16 = vpack.c.bf16 %v18312_v45, %v18307_v37  ;;  %v20948_v45 = vld [vmem:[#allocation147_spill] sm:$0xff] }
 0x40d   : > { %v18553_v40 = vpop.f32.mrb[12].mxu1  ;;  %13227 = vmatmul.mubr.msk.bf16.gmra.mrb[24].mxu0 %vm1629_vm2, %v20942_v62  ;;  %v20952_v62 = vld [vmem:[#allocation28_spill] sm:$0xff] }
 0x40e   : > { %v18557_v58 = vpop.f32.mrb[13].mxu1  ;;  %13230 = vmatprep.mubr.msk.bf16.mxu0 %vm1629_vm2, %v20943_v44 }
 0x40f   : > { %v18559_v56 = vpop.f32.mrb[14].mxu1 }
 0x410   : > { %v18563_v60 = vpop.f32.mrb[15].mxu1 }
 0x412   : > { %12673 = vmatmul.mubr.msk.bf16.gmra.mrb[120].mxu1 %vm1629_vm2, %v17712_v3  ;;  %v20947_v3 = vld [vmem:[#allocation24_spill] sm:$0xff] }
 0x413   : > { %12676 = vmatprep.mubr.msk.bf16.mxu1 %vm1629_vm2, %v20945_v15 }
 0x415   : > { %v18579_v44 = vpop.f32.mrb[16].mxu1  ;;  %13231 = vmatmul.mubr.msk.bf16.gmra.mrb[28].mxu0 %vm1629_vm2, %v20946_v16  ;;  %v20949_v16 = vld [vmem:[#allocation27_spill] sm:$0xff] }
 0x416   : > { %v18585_v4 = vpop.f32.mrb[17].mxu1  ;;  %13234 = vmatprep.mubr.msk.bf16.mxu0 %vm1629_vm2, %v20947_v3 }
 0x417   : > { %v18587_v50 = vpop.f32.mrb[18].mxu1 }
 0x418   : > { %v18591_v33 = vpop.f32.mrb[19].mxu1 }
 0x41a   : > { %12677 = vmatmul.mubr.msk.bf16.gmra.mrb[124].mxu1 %vm1629_vm2, %v17541_v30  ;;  %v20950_v30 = vld [vmem:[#allocation118_spill] sm:$0xff] }
 0x41b   : > { %12774 = vmatprep.mubr.msk.bf16.mxu1 %vm1629_vm2, %v20884_v28 }
 0x41d   : > { %v18597_v38 = vpop.f32.mrb[20].mxu1  ;;  %13235 = vmatmul.mubr.msk.bf16.gmra.mrb[32].mxu0 %vm1629_vm2, %v20948_v45 }
 0x41e   : > { %v18601_v37 = vpop.f32.mrb[21].mxu1  ;;  %13238 = vmatprep.mubr.msk.bf16.mxu0 %vm1629_vm2, %v20949_v16 }
 0x41f   : > { %v18603_v15 = vpop.f32.mrb[22].mxu1 }
 0x420   : > { %v18607_v3 = vpop.f32.mrb[23].mxu1 }
 0x422   : > { %12775 = vmatmul.mubr.msk.bf16.vlgmr.msra.gmra.mrb[92].mxu1 %vm1629_vm2, %v18288_v23 }
 0x423   : > { %12778 = vmatprep.mubr.msk.bf16.mxu1 %vm1629_vm2, %v20950_v30  ;;  %v20958_v30 = vld [vmem:[#allocation31_spill] sm:$0xff] }
 0x425   : > { %v18613_v28 = vpop.f32.mrb[24].mxu1  ;;  %13239 = vmatmul.mubr.msk.bf16.gmra.mrb[36].mxu0 %vm1629_vm2, %v20952_v62 }
 0x426   : > { %20951 = vst [vmem:[#allocation99_spill] sm:$0xff] %v18613_v28  ;;  %v18617_v45 = vpop.f32.mrb[25].mxu1  ;;  %13242 = vmatprep.mubr.msk.bf16.mxu0 %vm1629_vm2, %v20955_v10  ;;  %v20960_v10 = vunpack.c.h.bf16 %v17942_v21  ;;  %v20961_v28 = vld [vmem:[#allocation33_spill] sm:$0xff] }
 0x427   : > { %20953 = vst [vmem:[#allocation100_spill] sm:$0xff] %v18617_v45  ;;  %v18619_v29 = vpop.f32.mrb[26].mxu1 }
 0x428   : > { %20954 = vst [vmem:[#allocation131_spill] sm:$0xff] %v18619_v29  ;;  %v18623_v16 = vpop.f32.mrb[27].mxu1  ;;  %v8290_v29 = vrot.slane %v20959_v51, 2  ;;  %v8291_v45 = vrot.slane %v20960_v10, 2 }
 0x429   : > { %20956 = vst [vmem:[#allocation18_spill] sm:$0xff] %v18623_v16 }
 0x42a   : > { %12779 = vmatmul.mubr.msk.bf16.gmra.mrb[96].mxu1 %vm1629_vm2, %v20888_v14  ;;  %v18652_v51 = vsel %vm3111_vm3, %v8290_v29, %v8291_v45 }
 0x42b   : > { %12782 = vmatprep.mubr.msk.bf16.mxu1 %vm1629_vm2, %v20891_v6  ;;  %v20962_v6 = vunpack.c.l.bf16 %v18338_v17  ;;  %v20963_v17 = vpack.c.bf16 %v18381_v35, %v18376_v20  ;;  %v20965_v35 = vld [vmem:[#allocation41_spill] sm:$0xff] }
 0x42d   : > { %v18629_v23 = vpop.f32.mrb[28].mxu1  ;;  %13243 = vmatmul.mubr.msk.bf16.gmra.mrb[40].mxu0 %vm1629_vm2, %v20958_v30 }
 0x42e   : > { %20957 = vst [vmem:[#allocation19_spill] sm:$0xff] %v18629_v23  ;;  %v18633_v62 = vpop.f32.mrb[29].mxu1  ;;  %13246 = vmatprep.mubr.msk.bf16.mxu0 %vm1629_vm2, %v20961_v28  ;;  %v8293_v23 = vrot.slane %v20962_v6, 2  ;;  %v20967_v6 = vld [vmem:[#allocation46_spill] sm:$0xff] }
 0x42f   : > { %v18639_v16 = vpop.f32.mrb[30].mxu1 }
 0x430   : > { %v18643_v14 = vpop.f32.mrb[31].mxu1  ;;  %v18655_v21 = vsel %vm3111_vm3, %v8291_v45, %v8293_v23 }
 0x432   : > { %12783 = vmatmul.mubr.msk.bf16.gmra.mrb[100].mxu1 %vm1629_vm2, %v20892_v61 }
 0x433   : > { %12786 = vmatprep.mubr.msk.bf16.mxu1 %vm1629_vm2, %v20897_v47  ;;  %v20964_v47 = vld [vmem:[#allocation40_spill] sm:$0xff] }
 0x435   : > { %v18659_v30 = vpop.f32.mrb[32].mxu1  ;;  %13247 = vmatmul.mubr.msk.bf16.gmra.mrb[44].mxu0 %vm1629_vm2, %v20963_v17 }
 0x436   : > { %v18665_v61 = vpop.f32.mrb[33].mxu1  ;;  %13250 = vmatprep.mubr.msk.bf16.mxu0 %vm1629_vm2, %v20964_v47  ;;  %v20971_v47 = vld [vmem:[#allocation47_spill] sm:$0xff] }
 0x437   : > { %v18667_v10 = vpop.f32.mrb[34].mxu1 }
 0x438   : > { %v18671_v29 = vpop.f32.mrb[35].mxu1 }
 0x43a   : > { %12787 = vmatmul.mubr.msk.bf16.gmra.mrb[104].mxu1 %vm1629_vm2, %v20898_v7  ;;  %v20969_v7 = vld [vmem:[#allocation135_spill] sm:$0xff] }
 0x43b   : > { %12790 = vmatprep.mubr.msk.bf16.mxu1 %vm1629_vm2, %v20901_v0 }
 0x43d   : > { %v18677_v45 = vpop.f32.mrb[36].mxu1  ;;  %13251 = vmatmul.mubr.msk.bf16.gmra.mrb[48].mxu0 %vm1629_vm2, %v20965_v35 }
 0x43e   : > { %v18681_v20 = vpop.f32.mrb[37].mxu1  ;;  %13254 = vmatprep.mubr.msk.bf16.mxu0 %vm1629_vm2, %v20967_v6 }
 0x43f   : > { %v18683_v23 = vpop.f32.mrb[38].mxu1 }
 0x440   : > { %20966 = vst [vmem:[#allocation146_spill] sm:$0xff] %v18683_v23  ;;  %v18687_v17 = vpop.f32.mrb[39].mxu1  ;;  %v20974_v23 = vld [vmem:[#allocation51_spill] sm:$0xff] }
 0x441   : > { %20968 = vst [vmem:[#allocation36_spill] sm:$0xff] %v18687_v17  ;;  %v20980_v17 = vld [vmem:[#allocation56_spill] sm:$0xff] }
 0x442   : > { %12791 = vmatmul.mubr.msk.bf16.gmra.mrb[108].mxu1 %vm1629_vm2, %v18357_v57 }
 0x443   : > { %12794 = vmatprep.mubr.msk.bf16.mxu1 %vm1629_vm2, %v20969_v7  ;;  %v20977_v7 = vld [vmem:[#allocation52_spill] sm:$0xff] }
 0x445   : > { %v18693_v0 = vpop.f32.mrb[40].mxu1  ;;  %13255 = vmatmul.mubr.msk.bf16.gmra.mrb[52].mxu0 %vm1629_vm2, %v20971_v47 }
 0x446   : > { %20970 = vst [vmem:[#allocation38_spill] sm:$0xff] %v18693_v0  ;;  %v18697_v35 = vpop.f32.mrb[41].mxu1  ;;  %13258 = vmatprep.mubr.msk.bf16.mxu0 %vm1629_vm2, %v20974_v23  ;;  %v20979_v23 = vunpack.c.h.bf16 %v17984_v31 }
 0x447   : > { %20972 = vst [vmem:[#allocation34_spill] sm:$0xff] %v18697_v35  ;;  %v18699_v28 = vpop.f32.mrb[42].mxu1 }
 0x448   : > { %20973 = vst [vmem:[#allocation61_spill] sm:$0xff] %v18699_v28  ;;  %v18703_v6 = vpop.f32.mrb[43].mxu1  ;;  %v20978_v28 = vunpack.c.l.bf16 %v17984_v31  ;;  %v8296_v0 = vrot.slane %v20979_v23, 2 }
 0x449   : > { %20975 = vst [vmem:[#allocation62_spill] sm:$0xff] %v18703_v6 }
 0x44a   : > { %12795 = vmatmul.mubr.msk.bf16.gmra.mrb[112].mxu1 %vm1629_vm2, %v20905_v9  ;;  %v8295_v35 = vrot.slane %v20978_v28, 2 }
 0x44b   : > { %12798 = vmatprep.mubr.msk.bf16.mxu1 %vm1629_vm2, %v20908_v54  ;;  %v20981_v54 = vunpack.c.l.bf16 %v18407_v34  ;;  %v20982_v34 = vpack.c.bf16 %v18450_v8, %v18445_v39  ;;  %v20984_v8 = vld [vmem:[#allocation67_spill] sm:$0xff] }
 0x44c   : > { %v18732_v28 = vsel %vm3111_vm3, %v8295_v35, %v8296_v0 }
 0x44d   : > { %v18709_v57 = vpop.f32.mrb[44].mxu1  ;;  %13259 = vmatmul.mubr.msk.bf16.gmra.mrb[56].mxu0 %vm1629_vm2, %v20977_v7 }
 0x44e   : > { %20976 = vst [vmem:[#allocation57_spill] sm:$0xff] %v18709_v57  ;;  %v18713_v47 = vpop.f32.mrb[45].mxu1  ;;  %13262 = vmatprep.mubr.msk.bf16.mxu0 %vm1629_vm2, %v20980_v17  ;;  %v8298_v57 = vrot.slane %v20981_v54, 2  ;;  %v20987_v54 = vld [vmem:[#allocation72_spill] sm:$0xff]  ;;  %v20992_v17 = vld [vmem:[#allocation77_spill] sm:$0xff] }
 0x44f   : > { %v18719_v6 = vpop.f32.mrb[46].mxu1 }
 0x450   : > { %v18723_v9 = vpop.f32.mrb[47].mxu1  ;;  %v18735_v31 = vsel %vm3111_vm3, %v8296_v0, %v8298_v57 }
 0x452   : > { %12799 = vmatmul.mubr.msk.bf16.gmra.mrb[116].mxu1 %vm1629_vm2, %v20909_v2 }
 0x453   : > { %12802 = vmatprep.mubr.msk.bf16.mxu1 %vm1629_vm2, %v20914_v22  ;;  %v20983_v22 = vld [vmem:[#allocation60_spill] sm:$0xff] }
 0x455   : > { %v18739_v7 = vpop.f32.mrb[48].mxu1  ;;  %13263 = vmatmul.mubr.msk.bf16.gmra.mrb[60].mxu0 %vm1629_vm2, %v20982_v34 }
 0x456   : > { %v18745_v2 = vpop.f32.mrb[49].mxu1  ;;  %13266 = vmatprep.mubr.msk.bf16.mxu0 %vm1629_vm2, %v20983_v22 }
 0x457   : > { %v18747_v23 = vpop.f32.mrb[50].mxu1 }
 0x458   : > { %v18751_v35 = vpop.f32.mrb[51].mxu1 }
 0x45a   : > { %12803 = vmatmul.mubr.msk.bf16.gmra.mrb[120].mxu1 %vm1629_vm2, %v20915_v26 }
 0x45b   : > { %12806 = vmatprep.mubr.msk.bf16.mxu1 %vm1629_vm2, %v20918_v42  ;;  %v20990_v42 = vld [vmem:[#allocation74_spill] sm:$0xff] }
 0x45d   : > { %v18757_v0 = vpop.f32.mrb[52].mxu1  ;;  %13267 = vmatmul.mubr.msk.bf16.gmra.mrb[64].mxu0 %vm1629_vm2, %v20984_v8 }
 0x45e   : > { %v18761_v39 = vpop.f32.mrb[53].mxu1  ;;  %13270 = vmatprep.mubr.msk.bf16.mxu0 %vm1629_vm2, %v20987_v54 }
 0x45f   : > { %20985 = vst [vmem:[#allocation84_spill] sm:$0xff] %v18761_v39  ;;  %v18763_v57 = vpop.f32.mrb[54].mxu1  ;;  %v20998_v39 = vld [vmem:[#allocation83_spill] sm:$0xff] }
 0x460   : > { %20986 = vst [vmem:[#allocation86_spill] sm:$0xff] %v18763_v57  ;;  %v18767_v34 = vpop.f32.mrb[55].mxu1 }
 0x461   : > { %20988 = vst [vmem:[#allocation88_spill] sm:$0xff] %v18767_v34  ;;  %v20995_v34 = vld [vmem:[#allocation79_spill] sm:$0xff] }
 0x462   : > { %12807 = vmatmul.mubr.msk.bf16.gmra.mrb[124].mxu1 %vm1629_vm2, %v18426_v13 }
 0x465   : > { %v18771_v26 = vpop.f32.mrb[56].mxu1  ;;  %13271 = vmatmul.mubr.msk.bf16.gmra.mrb[68].mxu0 %vm1629_vm2, %v20990_v42 }
 0x466   : > { %20989 = vst [vmem:[#allocation109_spill] sm:$0xff] %v18771_v26  ;;  %v18775_v22 = vpop.f32.mrb[57].mxu1  ;;  %13274 = vmatprep.mubr.msk.bf16.mxu0 %vm1629_vm2, %v20992_v17  ;;  %v21001_v17 = vpack.c.bf16 %v18493_v59, %v18486_v48  ;;  %v21007_v48 = vld [vmem:[#allocation95_spill] sm:$0xff] }
 0x467   : > { %v18777_v8 = vpop.f32.mrb[58].mxu1 }
 0x468   : > { %20991 = vst [vmem:[#allocation110_spill] sm:$0xff] %v18777_v8  ;;  %v18781_v57 = vpop.f32.mrb[59].mxu1 }
 0x469   : > { %20993 = vst [vmem:[#allocation96_spill] sm:$0xff] %v18781_v57 }
 0x46d   : > { %v18783_v54 = vpop.f32.mrb[60].mxu1  ;;  %13275 = vmatmul.mubr.msk.bf16.gmra.mrb[72].mxu0 %vm1629_vm2, %v20995_v34  ;;  %v21002_v34 = vld [vmem:[#allocation90_spill] sm:$0xff] }
 0x46e   : > { %20994 = vst [vmem:[#allocation6_spill] sm:$0xff] %v18783_v54  ;;  %v18787_v13 = vpop.f32.mrb[61].mxu1  ;;  %13278 = vmatprep.mubr.msk.bf16.mxu0 %vm1629_vm2, %v20998_v39  ;;  %v21004_v39 = vld [vmem:[#allocation91_spill] sm:$0xff] }
 0x46f   : > { %20996 = vst [vmem:[#allocation7_spill] sm:$0xff] %v18787_v13  ;;  %v18789_v26 = vpop.f32.mrb[62].mxu1 }
 0x470   : > { %20997 = vst [vmem:[#allocation8_spill] sm:$0xff] %v18789_v26  ;;  %v18793_v42 = vpop.f32.mrb[63].mxu1 }
 0x471   : > { %20999 = vst [vmem:[#allocation10_spill] sm:$0xff] %v18793_v42 }
 0x475   : > { %v18795_v8 = vpop.f32.mrb[64].mxu1  ;;  %13279 = vmatmul.mubr.msk.bf16.gmra.mrb[76].mxu0 %vm1629_vm2, %v21001_v17 }
 0x476   : > { %21000 = vst [vmem:[#allocation12_spill] sm:$0xff] %v18795_v8  ;;  %v18801_v54 = vpop.f32.mrb[65].mxu1  ;;  %13282 = vmatprep.mubr.msk.bf16.mxu0 %vm1629_vm2, %v21002_v34 }
 0x477   : > { %v18803_v57 = vpop.f32.mrb[66].mxu1 }
 0x478   : > { %v18807_v26 = vpop.f32.mrb[67].mxu1 }
 0x47d   : > { %v18809_v13 = vpop.f32.mrb[68].mxu1  ;;  %13283 = vmatmul.mubr.msk.bf16.gmra.mrb[80].mxu0 %vm1629_vm2, %v21004_v39  ;;  %v21012_v39 = vld [vmem:[#allocation101_spill] sm:$0xff] }
 0x47e   : > { %21003 = vst [vmem:[#allocation13_spill] sm:$0xff] %v18809_v13  ;;  %v18813_v8 = vpop.f32.mrb[69].mxu1  ;;  %13286 = vmatprep.mubr.msk.bf16.mxu0 %vm1629_vm2, %v21007_v48  ;;  %v21015_v48 = vld [vmem:[#allocation102_spill] sm:$0xff] }
 0x47f   : > { %21005 = vst [vmem:[#allocation14_spill] sm:$0xff] %v18813_v8  ;;  %v18815_v42 = vpop.f32.mrb[70].mxu1 }
 0x480   : > { %21006 = vst [vmem:[#allocation125_spill] sm:$0xff] %v18815_v42  ;;  %v18819_v59 = vpop.f32.mrb[71].mxu1 }
 0x481   : > { %21008 = vst [vmem:[#allocation126_spill] sm:$0xff] %v18819_v59 }
 0x485   : > { %v18821_v17 = vpop.f32.mrb[72].mxu1  ;;  %13287 = vmatmul.mubr.msk.bf16.gmra.mrb[84].mxu0 %vm1629_vm2, %v20806_v11  ;;  %v21018_v11 = vld [vmem:[#allocation107_spill] sm:$0xff] }
 0x486   : > { %21009 = vst [vmem:[#allocation15_spill] sm:$0xff] %v18821_v17  ;;  %v18825_v34 = vpop.f32.mrb[73].mxu1  ;;  %13290 = vmatprep.mubr.msk.bf16.mxu0 %vm1629_vm2, %v21012_v39  ;;  %v21021_v39 = vpack.c.bf16 %v18573_v46, %v18566_v53  ;;  %v21029_v46 = vld [vmem:[#allocation5_spill] sm:$0xff] }
 0x487   : > { %21010 = vst [vmem:[#allocation149_spill] sm:$0xff] %v18825_v34  ;;  %v18827_v13 = vpop.f32.mrb[74].mxu1 }
 0x488   : > { %21011 = vst [vmem:[#allocation16_spill] sm:$0xff] %v18827_v13  ;;  %v18831_v8 = vpop.f32.mrb[75].mxu1 }
 0x489   : > { %21013 = vst [vmem:[#allocation17_spill] sm:$0xff] %v18831_v8 }
 0x48d   : > { %v18833_v42 = vpop.f32.mrb[76].mxu1  ;;  %13291 = vmatmul.mubr.msk.bf16.gmra.mrb[88].mxu0 %vm1629_vm2, %v21015_v48  ;;  %v21023_v48 = vld [vmem:[#allocation113_spill] sm:$0xff] }
 0x48e   : > { %21014 = vst [vmem:[#allocation20_spill] sm:$0xff] %v18833_v42  ;;  %v18837_v59 = vpop.f32.mrb[77].mxu1  ;;  %13294 = vmatprep.mubr.msk.bf16.mxu0 %vm1629_vm2, %v21018_v11 }
 0x48f   : > { %21016 = vst [vmem:[#allocation21_spill] sm:$0xff] %v18837_v59  ;;  %v18839_v17 = vpop.f32.mrb[78].mxu1  ;;  %v9291_v59 = vld [vmem:[%s15032_s14 + $0x8] sm:$0xff] }
 0x490   : > { %21017 = vst [vmem:[#allocation22_spill] sm:$0xff] %v18839_v17  ;;  %v18843_v34 = vpop.f32.mrb[79].mxu1  ;;  %9362 = vmatprep.mubr.f32.mxu1 %v9291_v59 }
 0x491   : > { %21019 = vst [vmem:[#allocation25_spill] sm:$0xff] %v18843_v34  ;;  %v21026_v34 = vld [vmem:[#allocation114_spill] sm:$0xff] }
 0x495   : > { %v18845_v13 = vpop.f32.mrb[80].mxu1  ;;  %13295 = vmatmul.mubr.msk.bf16.gmra.mrb[92].mxu0 %vm1629_vm2, %v21021_v39 }
 0x496   : > { %21020 = vst [vmem:[#allocation30_spill] sm:$0xff] %v18845_v13  ;;  %v18851_v42 = vpop.f32.mrb[81].mxu1  ;;  %13298 = vmatprep.mubr.msk.bf16.mxu0 %vm1629_vm2, %v21023_v48 }
 0x497   : > { %v18853_v8 = vpop.f32.mrb[82].mxu1 }
 0x498   : > { %21022 = vst [vmem:[#allocation26_spill] sm:$0xff] %v18853_v8  ;;  %v18857_v17 = vpop.f32.mrb[83].mxu1 }
 0x499   : > { %21024 = vst [vmem:[#allocation32_spill] sm:$0xff] %v18857_v17  ;;  %v21036_v17 = vpack.c.bf16 %v18655_v21, %v18652_v51 }
 0x49d   : > { %v18860_v11 = vpop.f32.mrb[84].mxu1  ;;  %13299 = vmatmul.mubr.msk.bf16.gmra.mrb[96].mxu0 %vm1629_vm2, %v21026_v34 }
 0x49e   : > { %21025 = vst [vmem:[#allocation37_spill] sm:$0xff] %v18860_v11  ;;  %v18864_v13 = vpop.f32.mrb[85].mxu1  ;;  %13302 = vmatprep.mubr.msk.bf16.mxu0 %vm1629_vm2, %v21029_v46  ;;  %v21035_v46 = vld [vmem:[#allocation151_spill] sm:$0xff] }
 0x49f   : > { %21027 = vst [vmem:[#allocation4_spill] sm:$0xff] %v18864_v13  ;;  %v18866_v53 = vpop.f32.mrb[86].mxu1 }
 0x4a0   : > { %21028 = vst [vmem:[#allocation39_spill] sm:$0xff] %v18866_v53  ;;  %v18870_v39 = vpop.f32.mrb[87].mxu1 }
 0x4a1   : > { %21030 = vst [vmem:[#allocation44_spill] sm:$0xff] %v18870_v39 }
 0x4a5   : > { %v18872_v8 = vpop.f32.mrb[88].mxu1  ;;  %13303 = vmatmul.mubr.msk.bf16.gmra.mrb[100].mxu0 %vm1629_vm2, %v17390_v19  ;;  %v18891_v19 = vld [vmem:[%s19702_s3] ss:$0 sm:$0xff] }
 0x4a6   : > { %21031 = vst [vmem:[#allocation45_spill] sm:$0xff] %v18872_v8  ;;  %v18876_v48 = vpop.f32.mrb[89].mxu1  ;;  %13306 = vmatprep.mubr.msk.bf16.mxu0 %vm1629_vm2, %v17423_v36 }
 0x4a7   : > { %21032 = vst [vmem:[#allocation50_spill] sm:$0xff] %v18876_v48  ;;  %v18878_v59 = vpop.f32.mrb[90].mxu1 }
 0x4a8   : > { %21033 = vst [vmem:[#allocation35_spill] sm:$0xff] %v18878_v59  ;;  %v18882_v34 = vpop.f32.mrb[91].mxu1 }
 0x4a9   : > { %21034 = vst [vmem:[#allocation55_spill] sm:$0xff] %v18882_v34 }
 0x4ad   : > { %13307 = vmatmul.mubr.msk.bf16.gmra.mrb[104].mxu0 %vm1629_vm2, %v20822_v32 }
 0x4ae   : > { %13310 = vmatprep.mubr.msk.bf16.mxu0 %vm1629_vm2, %v21035_v46 }
 0x4b0   : > { %v13204_v39 = vpop.f32.mrb[0].mxu0 }
 0x4b1   : > { %v13500_v48 = vadd.f32 %v13204_v39, %v18499_v52  ;;  %v8387_v59 = vpop.f32.mrb[1].mxu0 }
 0x4b2   : > { %v13501_v8 = vadd.f32 %v8387_v59, %v18505_v12  ;;  %v13205_v36 = vpop.f32.mrb[2].mxu0 }
 0x4b3   : > { %v9035_v34 = vadd.f32 %v13500_v48, %v18891_v19  ;;  %v13502_v53 = vadd.f32 %v13205_v36, %v18507_v1  ;;  %v8390_v32 = vpop.f32.mrb[3].mxu0 }
 0x4b4   : > { %v9033_v13 = vadd.f32 %v13501_v8, %v18891_v19  ;;  %v13503_v46 = vadd.f32 %v8390_v32, %v18511_v27 }
 0x4b5   : > { %v9036_v11 = vadd.f32 %v13502_v53, %v18891_v19  ;;  %13311 = vmatmul.mubr.msk.bf16.gmra.mrb[108].mxu0 %vm1629_vm2, %v21036_v17  ;;  %v9163_v12 = vmax.f32 %v9035_v34, 0.0 }
 0x4b6   : > { %v9034_v52 = vadd.f32 %v13503_v46, %v18891_v19  ;;  %13314 = vmatprep.mubr.msk.bf16.mxu0 %vm1629_vm2, %v17489_v25  ;;  %v9161_v1 = vmax.f32 %v9033_v13, 0.0  ;;  %v21037_v46 = vld [vmem:[#allocation153_spill] sm:$0xff] }
 0x4b7   : > { %v9164_v39 = vmax.f32 %v9036_v11, 0.0 }
 0x4b8   : > { %v9162_v48 = vmax.f32 %v9034_v52, 0.0  ;;  %v13208_v59 = vpop.f32.mrb[4].mxu0  ;;  %v21038_v52 = vld [vmem:[#allocation155_spill] sm:$0xff] }
 0x4b9   : > { %v18907_v8 = vpack.c.bf16 %v9164_v39, %v9163_v12  ;;  %v13504_v27 = vadd.f32 %v13208_v59, %v18517_v18  ;;  %v8403_v53 = vpop.f32.mrb[5].mxu0 }
 0x4ba   : > { %v18910_v36 = vpack.c.bf16 %v9162_v48, %v9161_v1  ;;  %v13505_v51 = vadd.f32 %v8403_v53, %v18521_v49  ;;  %v13209_v21 = vpop.f32.mrb[6].mxu0 }
 0x4bb   : > { %v9039_v17 = vadd.f32 %v13504_v27, %v18891_v19  ;;  %v13506_v32 = vadd.f32 %v13209_v21, %v18523_v63  ;;  %v8406_v25 = vpop.f32.mrb[7].mxu0 }
 0x4bc   : > { %v9037_v11 = vadd.f32 %v13505_v51, %v18891_v19  ;;  %v13507_v13 = vadd.f32 %v8406_v25, %v18527_v41 }
 0x4bd   : > { %v9040_v34 = vadd.f32 %v13506_v32, %v18891_v19  ;;  %13315 = vmatmul.mubr.msk.bf16.gmra.mrb[112].mxu0 %vm1629_vm2, %v21037_v46  ;;  %v9167_v49 = vmax.f32 %v9039_v17, 0.0  ;;  %v21040_v46 = vld [vmem:[#allocation158_spill] sm:$0xff] }
 0x4be   : > { %v9038_v18 = vadd.f32 %v13507_v13, %v18891_v19  ;;  %13318 = vmatprep.mubr.msk.bf16.mxu0 %vm1629_vm2, %v21038_v52  ;;  %v9165_v39 = vmax.f32 %v9037_v11, 0.0 }
 0x4bf   : > { %v9168_v12 = vmax.f32 %v9040_v34, 0.0  ;;  %v21039_v34 = vld [vmem:[#allocation156_spill] sm:$0xff] }
 0x4c0   : > { %v9166_v1 = vmax.f32 %v9038_v18, 0.0  ;;  %v13212_v63 = vpop.f32.mrb[8].mxu0 }
 0x4c1   : > { %v18923_v48 = vpack.c.bf16 %v9168_v12, %v9167_v49  ;;  %v13508_v59 = vadd.f32 %v13212_v63, %v18533_v55  ;;  %v8419_v41 = vpop.f32.mrb[9].mxu0 }
 0x4c2   : > { %v18926_v27 = vpack.c.bf16 %v9166_v1, %v9165_v39  ;;  %v13509_v53 = vadd.f32 %v8419_v41, %v18537_v43  ;;  %v13213_v51 = vpop.f32.mrb[10].mxu0 }
 0x4c3   : > { %v9043_v21 = vadd.f32 %v13508_v59, %v18891_v19  ;;  %v13510_v32 = vadd.f32 %v13213_v51, %v18539_v24  ;;  %v8422_v25 = vpop.f32.mrb[11].mxu0 }
 0x4c4   : > { %v9041_v17 = vadd.f32 %v13509_v53, %v18891_v19  ;;  %v13511_v11 = vadd.f32 %v8422_v25, %v18543_v5 }
 0x4c5   : > { %v9044_v13 = vadd.f32 %v13510_v32, %v18891_v19  ;;  %13319 = vmatmul.mubr.msk.bf16.gmra.mrb[116].mxu0 %vm1629_vm2, %v21039_v34  ;;  %v9171_v43 = vmax.f32 %v9043_v21, 0.0 }
 0x4c6   : > { %v9042_v55 = vadd.f32 %v13511_v11, %v18891_v19  ;;  %13322 = vmatprep.mubr.msk.bf16.mxu0 %vm1629_vm2, %v21040_v46  ;;  %v9169_v52 = vmax.f32 %v9041_v17, 0.0  ;;  %v21041_v17 = vld [vmem:[#allocation159_spill] sm:$0xff]  ;;  %v21042_v11 = vld [vmem:[#allocation160_spill] sm:$0xff] }
 0x4c7   : > { %v9172_v18 = vmax.f32 %v9044_v13, 0.0 }
 0x4c8   : > { %v9170_v49 = vmax.f32 %v9042_v55, 0.0  ;;  %v13216_v24 = vpop.f32.mrb[12].mxu0 }
 0x4c9   : > { %v18939_v12 = vpack.c.bf16 %v9172_v18, %v9171_v43  ;;  %v13512_v39 = vadd.f32 %v13216_v24, %v18553_v40  ;;  %v8435_v5 = vpop.f32.mrb[13].mxu0 }
 0x4ca   : > { %v18942_v1 = vpack.c.bf16 %v9170_v49, %v9169_v52  ;;  %v13513_v63 = vadd.f32 %v8435_v5, %v18557_v58  ;;  %v13217_v59 = vpop.f32.mrb[14].mxu0 }
 0x4cb   : > { %v9047_v41 = vadd.f32 %v13512_v39, %v18891_v19  ;;  %v13514_v53 = vadd.f32 %v13217_v59, %v18559_v56  ;;  %v8438_v51 = vpop.f32.mrb[15].mxu0 }
 0x4cc   : > { %v9045_v21 = vadd.f32 %v13513_v63, %v18891_v19  ;;  %v13515_v32 = vadd.f32 %v8438_v51, %v18563_v60 }
 0x4cd   : > { %v9048_v25 = vadd.f32 %v13514_v53, %v18891_v19  ;;  %13323 = vmatmul.mubr.msk.bf16.gmra.mrb[120].mxu0 %vm1629_vm2, %v21041_v17  ;;  %v9175_v58 = vmax.f32 %v9047_v41, 0.0 }
 0x4ce   : > { %v9046_v40 = vadd.f32 %v13515_v32, %v18891_v19  ;;  %13326 = vmatprep.mubr.msk.bf16.mxu0 %vm1629_vm2, %v21042_v11  ;;  %v9173_v34 = vmax.f32 %v9045_v21, 0.0 }
 0x4cf   : > { %v9176_v13 = vmax.f32 %v9048_v25, 0.0 }
 0x4d0   : > { %v9174_v55 = vmax.f32 %v9046_v40, 0.0  ;;  %v13220_v56 = vpop.f32.mrb[16].mxu0 }
 0x4d1   : > { %v18955_v46 = vpack.c.bf16 %v9176_v13, %v9175_v58  ;;  %v13516_v43 = vadd.f32 %v13220_v56, %v18579_v44  ;;  %v8451_v60 = vpop.f32.mrb[17].mxu0  ;;  %v21043_v44 = vpack.c.bf16 %v18735_v31, %v18732_v28 }
 0x4d2   : > { %v18958_v18 = vpack.c.bf16 %v9174_v55, %v9173_v34  ;;  %v13517_v52 = vadd.f32 %v8451_v60, %v18585_v4  ;;  %v13221_v49 = vpop.f32.mrb[18].mxu0 }
 0x4d3   : > { %v9051_v24 = vadd.f32 %v13516_v43, %v18891_v19  ;;  %v13518_v39 = vadd.f32 %v13221_v49, %v18587_v50  ;;  %v8454_v5 = vpop.f32.mrb[19].mxu0 }
 0x4d4   : > { %v9049_v63 = vadd.f32 %v13517_v52, %v18891_v19  ;;  %v13519_v59 = vadd.f32 %v8454_v5, %v18591_v33 }
 0x4d5   : > { %v9052_v41 = vadd.f32 %v13518_v39, %v18891_v19  ;;  %13327 = vmatmul.mubr.msk.bf16.gmra.mrb[124].mxu0 %vm1629_vm2, %v21043_v44  ;;  %v9179_v4 = vmax.f32 %v9051_v24, 0.0  ;;  %v21044_v24 = vld [vmem:[#allocation99_spill] sm:$0xff] }
 0x4d6   : > { %v9050_v53 = vadd.f32 %v13519_v59, %v18891_v19  ;;  %v9177_v21 = vmax.f32 %v9049_v63, 0.0  ;;  %v21046_v44 = vld [vmem:[#allocation131_spill] sm:$0xff] }
 0x4d7   : > { %v9180_v51 = vmax.f32 %v9052_v41, 0.0 }
 0x4d8   : > { %v9178_v32 = vmax.f32 %v9050_v53, 0.0  ;;  %v13224_v25 = vpop.f32.mrb[20].mxu0 }
 0x4d9   : > { %v13520_v50 = vadd.f32 %v13224_v25, %v18597_v38  ;;  %v8467_v17 = vpop.f32.mrb[21].mxu0  ;;  %v13374_v40 = vpack.c.bf16 %v9180_v51, %v9179_v4 }
 0x4da   : > { %v13521_v33 = vadd.f32 %v8467_v17, %v18601_v37  ;;  %v13225_v11 = vpop.f32.mrb[22].mxu0  ;;  %v13370_v58 = vpack.c.bf16 %v9178_v32, %v9177_v21  ;;  %v21047_v21 = vld [vmem:[#allocation18_spill] sm:$0xff] }
 0x4db   : > { %v9055_v13 = vadd.f32 %v13520_v50, %v18891_v19  ;;  %v13522_v28 = vadd.f32 %v13225_v11, %v18603_v15  ;;  %v8470_v31 = vpop.f32.mrb[23].mxu0 }
 0x4dc   : > { %v9053_v34 = vadd.f32 %v13521_v33, %v18891_v19  ;;  %v13523_v55 = vadd.f32 %v8470_v31, %v18607_v3  ;;  %13371 = vmatprep.subr.bf16.mxu1 %v13370_v58  ;;  %v21045_v3 = vld [vmem:[#allocation100_spill] sm:$0xff]  ;;  %v21048_v58 = vld [vmem:[#allocation19_spill] sm:$0xff] }
 0x4dd   : > { %v9056_v56 = vadd.f32 %v13522_v28, %v18891_v19  ;;  %13373 = vmatpush3.bf16.msra.mxu1 %v18910_v36  ;;  %v9183_v37 = vmax.f32 %v9055_v13, 0.0 }
 0x4de   : > { %v9054_v38 = vadd.f32 %v13523_v55, %v18891_v19  ;;  %13375 = vmatprep.subr.bf16.mxu1 %v13374_v40  ;;  %v9181_v60 = vmax.f32 %v9053_v34, 0.0 }
 0x4df   : > { %v9184_v43 = vmax.f32 %v9056_v56, 0.0 }
 0x4e0   : > { %v9182_v52 = vmax.f32 %v9054_v38, 0.0  ;;  %v13228_v49 = vpop.f32.mrb[24].mxu0 }
 0x4e1   : > { %v13524_v15 = vadd.f32 %v13228_v49, %v21044_v24  ;;  %v8483_v39 = vpop.f32.mrb[25].mxu0  ;;  %13377 = vmatpush3.bf16.msra.mxu1 %v18907_v8  ;;  %v13382_v5 = vpack.c.bf16 %v9184_v43, %v9183_v37 }
 0x4e2   : > { %v13525_v63 = vadd.f32 %v8483_v39, %v21045_v3  ;;  %v13229_v59 = vpop.f32.mrb[26].mxu0  ;;  %v13378_v41 = vpack.c.bf16 %v9182_v52, %v9181_v60 }
 0x4e3   : > { %v9059_v36 = vadd.f32 %v13524_v15, %v18891_v19  ;;  %v13526_v53 = vadd.f32 %v13229_v59, %v21046_v44  ;;  %v8486_v4 = vpop.f32.mrb[27].mxu0 }
 0x4e4   : > { %v9057_v51 = vadd.f32 %v13525_v63, %v18891_v19  ;;  %v13527_v32 = vadd.f32 %v8486_v4, %v21047_v21  ;;  %13379 = vmatprep.subr.bf16.mxu1 %v13378_v41 }
 0x4e5   : > { %v9060_v25 = vadd.f32 %v13526_v53, %v18891_v19  ;;  %13381 = vmatpush3.bf16.msra.mxu1 %v18926_v27  ;;  %v9187_v50 = vmax.f32 %v9059_v36, 0.0 }
 0x4e6   : > { %v9058_v8 = vadd.f32 %v13527_v32, %v18891_v19  ;;  %13383 = vmatprep.subr.bf16.mxu1 %v13382_v5  ;;  %v9185_v40 = vmax.f32 %v9057_v51, 0.0 }
 0x4e7   : > { %v9188_v17 = vmax.f32 %v9060_v25, 0.0 }
 0x4e8   : > { %v9186_v33 = vmax.f32 %v9058_v8, 0.0  ;;  %v13232_v11 = vpop.f32.mrb[28].mxu0 }
 0x4e9   : > { %v13528_v13 = vadd.f32 %v13232_v11, %v21048_v58  ;;  %v8499_v28 = vpop.f32.mrb[29].mxu0  ;;  %13385 = vmatpush3.bf16.msra.mxu1 %v18923_v48  ;;  %v13390_v31 = vpack.c.bf16 %v9188_v17, %v9187_v50 }
 0x4ea   : > { %v13529_v34 = vadd.f32 %v8499_v28, %v18633_v62  ;;  %v13233_v55 = vpop.f32.mrb[30].mxu0  ;;  %v13386_v56 = vpack.c.bf16 %v9186_v33, %v9185_v40  ;;  %v9290_v40 = vld [vmem:[%s15032_s14] sm:$0xff] }
 0x4eb   : > { %v9063_v27 = vadd.f32 %v13528_v13, %v18891_v19  ;;  %v13530_v38 = vadd.f32 %v13233_v55, %v18639_v16  ;;  %v8502_v37 = vpop.f32.mrb[31].mxu0  ;;  %v9293_v13 = vld [vmem:[%s15032_s14 + $0x18] sm:$0xff] }
 0x4ec   : > { %v9061_v43 = vadd.f32 %v13529_v34, %v18891_v19  ;;  %v13531_v60 = vadd.f32 %v8502_v37, %v18643_v14  ;;  %13387 = vmatprep.subr.bf16.mxu1 %v13386_v56 }
 0x4ed   : > { %v9064_v52 = vadd.f32 %v13530_v38, %v18891_v19  ;;  %13389 = vmatpush3.bf16.msra.mxu1 %v18942_v1  ;;  %v9191_v62 = vmax.f32 %v9063_v27, 0.0  ;;  %v21050_v27 = vld [vmem:[#allocation36_spill] sm:$0xff] }
 0x4ee   : > { %v9062_v48 = vadd.f32 %v13531_v60, %v18891_v19  ;;  %13391 = vmatprep.subr.bf16.mxu1 %v13390_v31  ;;  %v9189_v24 = vmax.f32 %v9061_v43, 0.0  ;;  %v21049_v31 = vld [vmem:[#allocation146_spill] sm:$0xff] }
 0x4ef   : > { %v9192_v49 = vmax.f32 %v9064_v52, 0.0 }
 0x4f0   : > { %v9190_v15 = vmax.f32 %v9062_v48, 0.0  ;;  %v13236_v39 = vpop.f32.mrb[32].mxu0 }
 0x4f1   : > { %v13532_v16 = vadd.f32 %v13236_v39, %v18659_v30  ;;  %v8515_v5 = vpop.f32.mrb[33].mxu0  ;;  %13393 = vmatpush3.bf16.msra.mxu1 %v18939_v12  ;;  %v13398_v3 = vpack.c.bf16 %v9192_v49, %v9191_v62  ;;  %v21051_v39 = vld [vmem:[#allocation38_spill] sm:$0xff] }
 0x4f2   : > { %v13533_v14 = vadd.f32 %v8515_v5, %v18665_v61  ;;  %v13237_v63 = vpop.f32.mrb[34].mxu0  ;;  %v13394_v59 = vpack.c.bf16 %v9190_v15, %v9189_v24 }
 0x4f3   : > { %v9067_v1 = vadd.f32 %v13532_v16, %v18891_v19  ;;  %v13534_v41 = vadd.f32 %v13237_v63, %v18667_v10  ;;  %v8518_v36 = vpop.f32.mrb[35].mxu0 }
 0x4f4   : > { %v9065_v44 = vadd.f32 %v13533_v14, %v18891_v19  ;;  %v13535_v53 = vadd.f32 %v8518_v36, %v18671_v29  ;;  %13395 = vmatprep.subr.bf16.mxu1 %v13394_v59  ;;  %v21052_v14 = vld [vmem:[#allocation34_spill] sm:$0xff] }
 0x4f5   : > { %v19007_v4 = vpop.f32.mrb[92].mxu1  ;;  %v9068_v30 = vadd.f32 %v13534_v41, %v18891_v19  ;;  %13397 = vmatpush3.bf16.msra.mxu1 %v18958_v18  ;;  %v9195_v51 = vmax.f32 %v9067_v1, 0.0  ;;  %v21053_v41 = vld [vmem:[#allocation61_spill] sm:$0xff] }
 0x4f6   : > { %v19011_v61 = vpop.f32.mrb[93].mxu1  ;;  %v9066_v12 = vadd.f32 %v13535_v53, %v18891_v19  ;;  %13399 = vmatprep.subr.bf16.mxu1 %v13398_v3  ;;  %v9193_v29 = vmax.f32 %v9065_v44, 0.0 }
 0x4f7   : > { %v19014_v10 = vpop.f32.mrb[94].mxu1  ;;  %v9196_v21 = vmax.f32 %v9068_v30, 0.0  ;;  %v21054_v30 = vld [vmem:[#allocation62_spill] sm:$0xff] }
 0x4f8   : > { %v19016_v32 = vpop.f32.mrb[95].mxu1  ;;  %v9194_v25 = vmax.f32 %v9066_v12, 0.0  ;;  %v13240_v8 = vpop.f32.mrb[36].mxu0 }
 0x4f9   : > { %v19018_v50 = vpack.c.bf16 %v9196_v21, %v9195_v51  ;;  %v13536_v17 = vadd.f32 %v13240_v8, %v18677_v45  ;;  %v8531_v18 = vpop.f32.mrb[37].mxu0  ;;  %13401 = vmatpush3.bf16.msra.mxu1 %v18955_v46 }
 0x4fa   : > { %v19023_v33 = vpack.c.bf16 %v9194_v25, %v9193_v29  ;;  %v13537_v11 = vadd.f32 %v8531_v18, %v18681_v20  ;;  %v13241_v58 = vpop.f32.mrb[38].mxu0 }
 0x4fb   : > { %v9071_v28 = vadd.f32 %v13536_v17, %v18891_v19  ;;  %v13538_v34 = vadd.f32 %v13241_v58, %v21049_v31  ;;  %v8534_v55 = vpop.f32.mrb[39].mxu0  ;;  %v21055_v31 = vld [vmem:[#allocation57_spill] sm:$0xff] }
 0x4fc   : > { %v9069_v56 = vadd.f32 %v13537_v11, %v18891_v19  ;;  %v13539_v38 = vadd.f32 %v8534_v55, %v21050_v27  ;;  %9363 = vmatmul.mubr.f32.vlgmr.msra.gmra.mrb[128].mxu1 %v9290_v40 }
 0x4fd   : > { %v19031_v45 = vpop.f32.mrb[96].mxu1  ;;  %v9072_v46 = vadd.f32 %v13538_v34, %v18891_v19  ;;  %9432 = vmatprep.mubr.f32.mxu1 %v9293_v13  ;;  %v9199_v60 = vmax.f32 %v9071_v28, 0.0 }
 0x4fe   : > { %v19034_v37 = vpop.f32.mrb[97].mxu1  ;;  %v9070_v20 = vadd.f32 %v13539_v38, %v18891_v19  ;;  %v9197_v62 = vmax.f32 %v9069_v56, 0.0 }
 0x4ff   : > { %v19037_v43 = vpop.f32.mrb[98].mxu1  ;;  %v9200_v52 = vmax.f32 %v9072_v46, 0.0 }
 0x500   : > { %v19039_v48 = vpop.f32.mrb[99].mxu1  ;;  %v9198_v49 = vmax.f32 %v9070_v20, 0.0  ;;  %v13244_v24 = vpop.f32.mrb[40].mxu0 }
 0x501   : > { %v19041_v15 = vpack.c.bf16 %v9200_v52, %v9199_v60  ;;  %v13540_v16 = vadd.f32 %v13244_v24, %v21051_v39  ;;  %v8547_v5 = vpop.f32.mrb[41].mxu0 }
 0x502   : > { %v19044_v3 = vpack.c.bf16 %v9198_v49, %v9197_v62  ;;  %v13541_v63 = vadd.f32 %v8547_v5, %v21052_v14  ;;  %v13245_v59 = vpop.f32.mrb[42].mxu0 }
 0x503   : > { %v9075_v1 = vadd.f32 %v13540_v16, %v18891_v19  ;;  %v13542_v36 = vadd.f32 %v13245_v59, %v21053_v41  ;;  %v8550_v44 = vpop.f32.mrb[43].mxu0 }
 0x504   : > { %v9073_v53 = vadd.f32 %v13541_v63, %v18891_v19  ;;  %v13543_v12 = vadd.f32 %v8550_v44, %v21054_v30 }
 0x505   : > { %v19051_v51 = vpop.f32.mrb[100].mxu1  ;;  %v9076_v21 = vadd.f32 %v13542_v36, %v18891_v19  ;;  %v9203_v17 = vmax.f32 %v9075_v1, 0.0 }
 0x506   : > { %v19054_v29 = vpop.f32.mrb[101].mxu1  ;;  %v9074_v25 = vadd.f32 %v13543_v12, %v18891_v19  ;;  %v9201_v11 = vmax.f32 %v9073_v53, 0.0 }
 0x507   : > { %v19057_v8 = vpop.f32.mrb[102].mxu1  ;;  %v9204_v18 = vmax.f32 %v9076_v21, 0.0 }
 0x508   : > { %v19059_v40 = vpop.f32.mrb[103].mxu1  ;;  %v9202_v58 = vmax.f32 %v9074_v25, 0.0  ;;  %v13248_v13 = vpop.f32.mrb[44].mxu0 }
 0x509   : > { %v19061_v28 = vpack.c.bf16 %v9204_v18, %v9203_v17  ;;  %v13544_v34 = vadd.f32 %v13248_v13, %v21055_v31  ;;  %v8563_v55 = vpop.f32.mrb[45].mxu0 }
 0x50a   : > { %v19064_v56 = vpack.c.bf16 %v9202_v58, %v9201_v11  ;;  %v13545_v27 = vadd.f32 %v8563_v55, %v18713_v47  ;;  %v13249_v38 = vpop.f32.mrb[46].mxu0 }
 0x50b   : > { %v9079_v46 = vadd.f32 %v13544_v34, %v18891_v19  ;;  %v13546_v20 = vadd.f32 %v13249_v38, %v18719_v6  ;;  %v8566_v60 = vpop.f32.mrb[47].mxu0 }
 0x50c   : > { %v9077_v52 = vadd.f32 %v13545_v27, %v18891_v19  ;;  %v13547_v62 = vadd.f32 %v8566_v60, %v18723_v9  ;;  %v21056_v60 = vld [vmem:[#allocation84_spill] sm:$0xff] }
 0x50d   : > { %v19071_v49 = vpop.f32.mrb[104].mxu1  ;;  %v9080_v24 = vadd.f32 %v13546_v20, %v18891_v19  ;;  %v9207_v47 = vmax.f32 %v9079_v46, 0.0 }
 0x50e   : > { %v19074_v39 = vpop.f32.mrb[105].mxu1  ;;  %v9078_v16 = vadd.f32 %v13547_v62, %v18891_v19  ;;  %v9205_v6 = vmax.f32 %v9077_v52, 0.0 }
 0x50f   : > { %v19077_v5 = vpop.f32.mrb[106].mxu1  ;;  %v9208_v14 = vmax.f32 %v9080_v24, 0.0 }
 0x510   : > { %v19079_v63 = vpop.f32.mrb[107].mxu1  ;;  %v9206_v59 = vmax.f32 %v9078_v16, 0.0  ;;  %v13252_v1 = vpop.f32.mrb[48].mxu0 }
 0x511   : > { %v19081_v41 = vpack.c.bf16 %v9208_v14, %v9207_v47  ;;  %v13548_v9 = vadd.f32 %v13252_v1, %v18739_v7  ;;  %v8579_v36 = vpop.f32.mrb[49].mxu0  ;;  %v21057_v47 = vld [vmem:[#allocation86_spill] sm:$0xff]  ;;  %v21058_v1 = vld [vmem:[#allocation88_spill] sm:$0xff] }
 0x512   : > { %v19084_v44 = vpack.c.bf16 %v9206_v59, %v9205_v6  ;;  %v13549_v53 = vadd.f32 %v8579_v36, %v18745_v2  ;;  %v13253_v30 = vpop.f32.mrb[50].mxu0 }
 0x513   : > { %v9083_v12 = vadd.f32 %v13548_v9, %v18891_v19  ;;  %v13550_v21 = vadd.f32 %v13253_v30, %v18747_v23  ;;  %v8582_v25 = vpop.f32.mrb[51].mxu0 }
 0x514   : > { %v9081_v17 = vadd.f32 %v13549_v53, %v18891_v19  ;;  %v13551_v18 = vadd.f32 %v8582_v25, %v18751_v35 }
 0x515   : > { %v19091_v11 = vpop.f32.mrb[108].mxu1  ;;  %v9084_v58 = vadd.f32 %v13550_v21, %v18891_v19  ;;  %v9211_v2 = vmax.f32 %v9083_v12, 0.0 }
 0x516   : > { %v19094_v7 = vpop.f32.mrb[109].mxu1  ;;  %v9082_v13 = vadd.f32 %v13551_v18, %v18891_v19  ;;  %v9209_v23 = vmax.f32 %v9081_v17, 0.0 }
 0x517   : > { %v19097_v31 = vpop.f32.mrb[110].mxu1  ;;  %v9212_v34 = vmax.f32 %v9084_v58, 0.0 }
 0x518   : > { %v19099_v55 = vpop.f32.mrb[111].mxu1  ;;  %v9210_v27 = vmax.f32 %v9082_v13, 0.0  ;;  %v13256_v38 = vpop.f32.mrb[52].mxu0 }
 0x519   : > { %v13552_v46 = vadd.f32 %v13256_v38, %v18757_v0  ;;  %v8595_v35 = vpop.f32.mrb[53].mxu0  ;;  %v13406_v20 = vpack.c.bf16 %v9212_v34, %v9211_v2  ;;  %v21059_v2 = vld [vmem:[#allocation109_spill] sm:$0xff] }
 0x51a   : > { %v13553_v52 = vadd.f32 %v8595_v35, %v21056_v60  ;;  %v13257_v62 = vpop.f32.mrb[54].mxu0  ;;  %v13402_v24 = vpack.c.bf16 %v9210_v27, %v9209_v23 }
 0x51b   : > { %v9087_v16 = vadd.f32 %v13552_v46, %v18891_v19  ;;  %v13554_v14 = vadd.f32 %v13257_v62, %v21057_v47  ;;  %v8598_v6 = vpop.f32.mrb[55].mxu0 }
 0x51c   : > { %v9085_v59 = vadd.f32 %v13553_v52, %v18891_v19  ;;  %v13555_v9 = vadd.f32 %v8598_v6, %v21058_v1  ;;  %13403 = vmatprep.subr.bf16.mxu1 %v13402_v24  ;;  %v21061_v24 = vld [vmem:[#allocation96_spill] sm:$0xff] }
 0x51d   : > { %v19107_v36 = vpop.f32.mrb[112].mxu1  ;;  %v9088_v0 = vadd.f32 %v13554_v14, %v18891_v19  ;;  %13405 = vmatpush3.bf16.msra.mxu1 %v19023_v33  ;;  %v9215_v21 = vmax.f32 %v9087_v16, 0.0 }
 0x51e   : > { %v19111_v53 = vpop.f32.mrb[113].mxu1  ;;  %v9086_v30 = vadd.f32 %v13555_v9, %v18891_v19  ;;  %13407 = vmatprep.subr.bf16.mxu1 %v13406_v20  ;;  %v9213_v18 = vmax.f32 %v9085_v59, 0.0  ;;  %v21060_v20 = vld [vmem:[#allocation110_spill] sm:$0xff] }
 0x51f   : > { %v19114_v12 = vpop.f32.mrb[114].mxu1  ;;  %v9216_v25 = vmax.f32 %v9088_v0, 0.0 }
 0x520   : > { %v19116_v17 = vpop.f32.mrb[115].mxu1  ;;  %v9214_v58 = vmax.f32 %v9086_v30, 0.0  ;;  %v13260_v13 = vpop.f32.mrb[56].mxu0 }
 0x521   : > { %v13556_v34 = vadd.f32 %v13260_v13, %v21059_v2  ;;  %v8611_v23 = vpop.f32.mrb[57].mxu0  ;;  %13409 = vmatpush3.bf16.msra.mxu1 %v19018_v50  ;;  %v13414_v33 = vpack.c.bf16 %v9216_v25, %v9215_v21  ;;  %v21062_v25 = vld [vmem:[#allocation6_spill] sm:$0xff]  ;;  %v21063_v13 = vld [vmem:[#allocation7_spill] sm:$0xff] }
 0x522   : > { %v13557_v27 = vadd.f32 %v8611_v23, %v18775_v22  ;;  %v13261_v38 = vpop.f32.mrb[58].mxu0  ;;  %v13410_v46 = vpack.c.bf16 %v9214_v58, %v9213_v18 }
 0x523   : > { %v9091_v35 = vadd.f32 %v13556_v34, %v18891_v19  ;;  %v13558_v60 = vadd.f32 %v13261_v38, %v21060_v20  ;;  %v8614_v52 = vpop.f32.mrb[59].mxu0  ;;  %v21065_v20 = vld [vmem:[#allocation10_spill] sm:$0xff] }
 0x524   : > { %v9089_v62 = vadd.f32 %v13557_v27, %v18891_v19  ;;  %v13559_v16 = vadd.f32 %v8614_v52, %v21061_v24  ;;  %13411 = vmatprep.subr.bf16.mxu1 %v13410_v46  ;;  %v21064_v27 = vld [vmem:[#allocation8_spill] sm:$0xff] }
 0x525   : > { %v19125_v47 = vpop.f32.mrb[116].mxu1  ;;  %v9092_v14 = vadd.f32 %v13558_v60, %v18891_v19  ;;  %13413 = vmatpush3.bf16.msra.mxu1 %v19044_v3  ;;  %v9219_v59 = vmax.f32 %v9091_v35, 0.0 }
 0x526   : > { %v19129_v50 = vpop.f32.mrb[117].mxu1  ;;  %v9090_v22 = vadd.f32 %v13559_v16, %v18891_v19  ;;  %13415 = vmatprep.subr.bf16.mxu1 %v13414_v33  ;;  %v9217_v0 = vmax.f32 %v9089_v62, 0.0 }
 0x527   : > { %v19132_v6 = vpop.f32.mrb[118].mxu1  ;;  %v9220_v1 = vmax.f32 %v9092_v14, 0.0 }
 0x528   : > { %v19134_v9 = vpop.f32.mrb[119].mxu1  ;;  %v9218_v30 = vmax.f32 %v9090_v22, 0.0  ;;  %v13264_v21 = vpop.f32.mrb[60].mxu0 }
 0x529   : > { %v13560_v18 = vadd.f32 %v13264_v21, %v21062_v25  ;;  %v8627_v58 = vpop.f32.mrb[61].mxu0  ;;  %13417 = vmatpush3.bf16.msra.mxu1 %v19041_v15  ;;  %v13422_v3 = vpack.c.bf16 %v9220_v1, %v9219_v59  ;;  %v21066_v21 = vld [vmem:[#allocation12_spill] sm:$0xff] }
 0x52a   : > { %v13561_v2 = vadd.f32 %v8627_v58, %v21063_v13  ;;  %v13265_v34 = vpop.f32.mrb[62].mxu0  ;;  %v13418_v23 = vpack.c.bf16 %v9218_v30, %v9217_v0 }
 0x52b   : > { %v9095_v33 = vadd.f32 %v13560_v18, %v18891_v19  ;;  %v13562_v38 = vadd.f32 %v13265_v34, %v21064_v27  ;;  %v8630_v46 = vpop.f32.mrb[63].mxu0 }
 0x52c   : > { %v9093_v35 = vadd.f32 %v13561_v2, %v18891_v19  ;;  %v13563_v60 = vadd.f32 %v8630_v46, %v21065_v20  ;;  %13419 = vmatprep.subr.bf16.mxu1 %v13418_v23 }
 0x52d   : > { %v19143_v52 = vpop.f32.mrb[120].mxu1  ;;  %v9096_v62 = vadd.f32 %v13562_v38, %v18891_v19  ;;  %13421 = vmatpush3.bf16.msra.mxu1 %v19064_v56  ;;  %v9223_v14 = vmax.f32 %v9095_v33, 0.0 }
 0x52e   : > { %v19147_v15 = vpop.f32.mrb[121].mxu1  ;;  %v9094_v24 = vadd.f32 %v13563_v60, %v18891_v19  ;;  %13423 = vmatprep.subr.bf16.mxu1 %v13422_v3  ;;  %v9221_v1 = vmax.f32 %v9093_v35, 0.0 }
 0x52f   : > { %v19150_v16 = vpop.f32.mrb[122].mxu1  ;;  %v9224_v22 = vmax.f32 %v9096_v62, 0.0 }
 0x530   : > { %v19152_v59 = vpop.f32.mrb[123].mxu1  ;;  %v9222_v0 = vmax.f32 %v9094_v24, 0.0  ;;  %v13268_v30 = vpop.f32.mrb[64].mxu0 }
 0x531   : > { %v13564_v25 = vadd.f32 %v13268_v30, %v21066_v21  ;;  %v8643_v18 = vpop.f32.mrb[65].mxu0  ;;  %13425 = vmatpush3.bf16.msra.mxu1 %v19061_v28  ;;  %v13430_v56 = vpack.c.bf16 %v9224_v22, %v9223_v14  ;;  %v21070_v22 = vld [vmem:[#allocation13_spill] sm:$0xff]  ;;  %v21071_v21 = vld [vmem:[#allocation14_spill] sm:$0xff] }
 0x532   : > { %v13565_v58 = vadd.f32 %v8643_v18, %v18801_v54  ;;  %v13269_v13 = vpop.f32.mrb[66].mxu0  ;;  %v13426_v2 = vpack.c.bf16 %v9222_v0, %v9221_v1  ;;  %v9292_v0 = vld [vmem:[%s15032_s14 + $0x10] sm:$0xff] }
 0x533   : > { %v9099_v3 = vadd.f32 %v13564_v25, %v18891_v19  ;;  %v13566_v34 = vadd.f32 %v13269_v13, %v18803_v57  ;;  %v8646_v23 = vpop.f32.mrb[67].mxu0  ;;  %v21072_v13 = vld [vmem:[#allocation125_spill] sm:$0xff] }
 0x534   : > { %v9097_v33 = vadd.f32 %v13565_v58, %v18891_v19  ;;  %v13567_v27 = vadd.f32 %v8646_v23, %v18807_v26  ;;  %13427 = vmatprep.subr.bf16.mxu1 %v13426_v2  ;;  %v21073_v23 = vld [vmem:[#allocation126_spill] sm:$0xff] }
 0x535   : > { %v19161_v38 = vpop.f32.mrb[124].mxu1  ;;  %v9100_v46 = vadd.f32 %v13566_v34, %v18891_v19  ;;  %13429 = vmatpush3.bf16.msra.mxu1 %v19084_v44  ;;  %v9227_v35 = vmax.f32 %v9099_v3, 0.0 }
 0x536   : > { %v19165_v54 = vpop.f32.mrb[125].mxu1  ;;  %v9098_v28 = vadd.f32 %v13567_v27, %v18891_v19  ;;  %13431 = vmatprep.subr.bf16.mxu1 %v13430_v56  ;;  %v9225_v26 = vmax.f32 %v9097_v33, 0.0  ;;  %v9295_v56 = vld [vmem:[%s15032_s14 + $0x28] sm:$0xff] }
 0x537   : > { %21067 = vst [vmem:[#allocation163_spill] sm:$0xff] %v19165_v54  ;;  %v19168_v57 = vpop.f32.mrb[126].mxu1  ;;  %v9228_v20 = vmax.f32 %v9100_v46, 0.0 }
 0x538   : > { %21068 = vst [vmem:[#allocation42_spill] sm:$0xff] %v19168_v57  ;;  %v19170_v60 = vpop.f32.mrb[127].mxu1  ;;  %v9226_v62 = vmax.f32 %v9098_v28, 0.0  ;;  %v13272_v24 = vpop.f32.mrb[68].mxu0  ;;  %v21086_v57 = vld [vmem:[#allocation4_spill] sm:$0xff] }
 0x539   : > { %21069 = vst [vmem:[#allocation58_spill] sm:$0xff] %v19170_v60  ;;  %v19172_v14 = vpack.c.bf16 %v9228_v20, %v9227_v35  ;;  %v13568_v1 = vadd.f32 %v13272_v24, %v21070_v22  ;;  %v8659_v44 = vpop.f32.mrb[69].mxu0  ;;  %13433 = vmatpush3.bf16.msra.mxu1 %v19081_v41  ;;  %v21074_v24 = vld [vmem:[#allocation15_spill] sm:$0xff] }
 0x53a   : > { %v19177_v30 = vpack.c.bf16 %v9226_v62, %v9225_v26  ;;  %v13569_v25 = vadd.f32 %v8659_v44, %v21071_v21  ;;  %v13273_v18 = vpop.f32.mrb[70].mxu0  ;;  %v21075_v21 = vld [vmem:[#allocation149_spill] sm:$0xff] }
 0x53b   : > { %v9103_v58 = vadd.f32 %v13568_v1, %v18891_v19  ;;  %v13570_v2 = vadd.f32 %v13273_v18, %v21072_v13  ;;  %v8662_v3 = vpop.f32.mrb[71].mxu0 }
 0x53c   : > { %v9101_v34 = vadd.f32 %v13569_v25, %v18891_v19  ;;  %v13571_v33 = vadd.f32 %v8662_v3, %v21073_v23  ;;  %9433 = vmatmul.mubr.f32.vlgmr.msra.gmra.mrb[130].mxu1 %v9292_v0  ;;  %v21077_v3 = vld [vmem:[#allocation17_spill] sm:$0xff] }
 0x53d   : > { %v9104_v27 = vadd.f32 %v13570_v2, %v18891_v19  ;;  %9502 = vmatprep.mubr.f32.mxu1 %v9295_v56  ;;  %v9231_v46 = vmax.f32 %v9103_v58, 0.0  ;;  %v21076_v56 = vld [vmem:[#allocation16_spill] sm:$0xff] }
 0x53e   : > { %v9102_v41 = vadd.f32 %v13571_v33, %v18891_v19  ;;  %v9229_v35 = vmax.f32 %v9101_v34, 0.0 }
 0x53f   : > { %v9232_v28 = vmax.f32 %v9104_v27, 0.0 }
 0x540   : > { %v9230_v20 = vmax.f32 %v9102_v41, 0.0  ;;  %v13276_v26 = vpop.f32.mrb[72].mxu0 }
 0x541   : > { %v19187_v62 = vpack.c.bf16 %v9232_v28, %v9231_v46  ;;  %v13572_v22 = vadd.f32 %v13276_v26, %v21074_v24  ;;  %v8675_v1 = vpop.f32.mrb[73].mxu0  ;;  %v21078_v26 = vld [vmem:[#allocation20_spill] sm:$0xff] }
 0x542   : > { %v19190_v44 = vpack.c.bf16 %v9230_v20, %v9229_v35  ;;  %v13573_v25 = vadd.f32 %v8675_v1, %v21075_v21  ;;  %v13277_v0 = vpop.f32.mrb[74].mxu0  ;;  %v21079_v21 = vld [vmem:[#allocation21_spill] sm:$0xff] }
 0x543   : > { %v9107_v18 = vadd.f32 %v13572_v22, %v18891_v19  ;;  %v13574_v13 = vadd.f32 %v13277_v0, %v21076_v56  ;;  %v8678_v2 = vpop.f32.mrb[75].mxu0 }
 0x544   : > { %v9105_v58 = vadd.f32 %v13573_v25, %v18891_v19  ;;  %v13575_v34 = vadd.f32 %v8678_v2, %v21077_v3 }
 0x545   : > { %v9108_v23 = vadd.f32 %v13574_v13, %v18891_v19  ;;  %v9235_v27 = vmax.f32 %v9107_v18, 0.0  ;;  %v21080_v13 = vld [vmem:[#allocation22_spill] sm:$0xff] }
 0x546   : > { %v9106_v33 = vadd.f32 %v13575_v34, %v18891_v19  ;;  %v9233_v46 = vmax.f32 %v9105_v58, 0.0  ;;  %v21081_v58 = vld [vmem:[#allocation25_spill] sm:$0xff] }
 0x547   : > { %v9236_v41 = vmax.f32 %v9108_v23, 0.0 }
 0x548   : > { %v9234_v28 = vmax.f32 %v9106_v33, 0.0  ;;  %v13280_v35 = vpop.f32.mrb[76].mxu0 }
 0x549   : > { %v19199_v20 = vpack.c.bf16 %v9236_v41, %v9235_v27  ;;  %v13576_v24 = vadd.f32 %v13280_v35, %v21078_v26  ;;  %v8691_v22 = vpop.f32.mrb[77].mxu0 }
 0x54a   : > { %v19202_v1 = vpack.c.bf16 %v9234_v28, %v9233_v46  ;;  %v13577_v25 = vadd.f32 %v8691_v22, %v21079_v21  ;;  %v13281_v0 = vpop.f32.mrb[78].mxu0  ;;  %v21082_v22 = vld [vmem:[#allocation30_spill] sm:$0xff] }
 0x54b   : > { %v9111_v56 = vadd.f32 %v13576_v24, %v18891_v19  ;;  %v13578_v2 = vadd.f32 %v13281_v0, %v21080_v13  ;;  %v8694_v3 = vpop.f32.mrb[79].mxu0 }
 0x54c   : > { %v9109_v18 = vadd.f32 %v13577_v25, %v18891_v19  ;;  %v13579_v34 = vadd.f32 %v8694_v3, %v21081_v58 }
 0x54d   : > { %v9112_v23 = vadd.f32 %v13578_v2, %v18891_v19  ;;  %v9239_v27 = vmax.f32 %v9111_v56, 0.0  ;;  %v21083_v2 = vld [vmem:[#allocation26_spill] sm:$0xff] }
 0x54e   : > { %v9110_v33 = vadd.f32 %v13579_v34, %v18891_v19  ;;  %v9237_v46 = vmax.f32 %v9109_v18, 0.0  ;;  %v21084_v18 = vld [vmem:[#allocation32_spill] sm:$0xff] }
 0x54f   : > { %v9240_v41 = vmax.f32 %v9112_v23, 0.0 }
 0x550   : > { %v9238_v28 = vmax.f32 %v9110_v33, 0.0  ;;  %v13284_v35 = vpop.f32.mrb[80].mxu0 }
 0x551   : > { %v19211_v26 = vpack.c.bf16 %v9240_v41, %v9239_v27  ;;  %v13580_v24 = vadd.f32 %v13284_v35, %v21082_v22  ;;  %v8707_v21 = vpop.f32.mrb[81].mxu0 }
 0x552   : > { %v19214_v0 = vpack.c.bf16 %v9238_v28, %v9237_v46  ;;  %v13581_v25 = vadd.f32 %v8707_v21, %v18851_v42  ;;  %v13285_v13 = vpop.f32.mrb[82].mxu0  ;;  %v21085_v42 = vld [vmem:[#allocation37_spill] sm:$0xff] }
 0x553   : > { %v9115_v3 = vadd.f32 %v13580_v24, %v18891_v19  ;;  %v13582_v58 = vadd.f32 %v13285_v13, %v21083_v2  ;;  %v8710_v34 = vpop.f32.mrb[83].mxu0 }
 0x554   : > { %v9113_v56 = vadd.f32 %v13581_v25, %v18891_v19  ;;  %v13583_v23 = vadd.f32 %v8710_v34, %v21084_v18  ;;  %v21087_v34 = vld [vmem:[#allocation39_spill] sm:$0xff] }
 0x555   : > { %v9116_v33 = vadd.f32 %v13582_v58, %v18891_v19  ;;  %v9243_v41 = vmax.f32 %v9115_v3, 0.0  ;;  %v21088_v3 = vld [vmem:[#allocation44_spill] sm:$0xff] }
 0x556   : > { %v9114_v27 = vadd.f32 %v13583_v23, %v18891_v19  ;;  %v9241_v46 = vmax.f32 %v9113_v56, 0.0 }
 0x557   : > { %v9244_v35 = vmax.f32 %v9116_v33, 0.0 }
 0x558   : > { %v9242_v28 = vmax.f32 %v9114_v27, 0.0  ;;  %v13288_v22 = vpop.f32.mrb[84].mxu0 }
 0x559   : > { %v13584_v21 = vadd.f32 %v13288_v22, %v21085_v42  ;;  %v8723_v60 = vpop.f32.mrb[85].mxu0  ;;  %v13438_v24 = vpack.c.bf16 %v9244_v35, %v9243_v41 }
 0x55a   : > { %v13585_v13 = vadd.f32 %v8723_v60, %v21086_v57  ;;  %v13289_v2 = vpop.f32.mrb[86].mxu0  ;;  %v13434_v54 = vpack.c.bf16 %v9242_v28, %v9241_v46  ;;  %v21089_v28 = vld [vmem:[#allocation45_spill] sm:$0xff] }
 0x55b   : > { %v9119_v25 = vadd.f32 %v13584_v21, %v18891_v19  ;;  %v13586_v18 = vadd.f32 %v13289_v2, %v21087_v34  ;;  %v8726_v58 = vpop.f32.mrb[87].mxu0 }
 0x55c   : > { %v9117_v23 = vadd.f32 %v13585_v13, %v18891_v19  ;;  %v13587_v33 = vadd.f32 %v8726_v58, %v21088_v3  ;;  %13435 = vmatprep.subr.bf16.mxu1 %v13434_v54  ;;  %v21090_v13 = vld [vmem:[#allocation50_spill] sm:$0xff] }
 0x55d   : > { %v9120_v56 = vadd.f32 %v13586_v18, %v18891_v19  ;;  %13437 = vmatpush3.bf16.msra.mxu1 %v19177_v30  ;;  %v9247_v57 = vmax.f32 %v9119_v25, 0.0  ;;  %v21091_v18 = vld [vmem:[#allocation35_spill] sm:$0xff] }
 0x55e   : > { %v9118_v27 = vadd.f32 %v13587_v33, %v18891_v19  ;;  %13439 = vmatprep.subr.bf16.mxu1 %v13438_v24  ;;  %v9245_v41 = vmax.f32 %v9117_v23, 0.0  ;;  %v21092_v23 = vld [vmem:[#allocation55_spill] sm:$0xff] }
 0x55f   : > { %v9248_v60 = vmax.f32 %v9120_v56, 0.0 }
 0x560   : > { %v9246_v35 = vmax.f32 %v9118_v27, 0.0  ;;  %v13292_v46 = vpop.f32.mrb[88].mxu0 }
 0x561   : > { %v13588_v22 = vadd.f32 %v13292_v46, %v21089_v28  ;;  %v8739_v42 = vpop.f32.mrb[89].mxu0  ;;  %13441 = vmatpush3.bf16.msra.mxu1 %v19172_v14  ;;  %v13446_v21 = vpack.c.bf16 %v9248_v60, %v9247_v57 }
 0x562   : > { %v13589_v54 = vadd.f32 %v8739_v42, %v21090_v13  ;;  %v13293_v2 = vpop.f32.mrb[90].mxu0  ;;  %v13442_v34 = vpack.c.bf16 %v9246_v35, %v9245_v41 }
 0x563   : > { %v9123_v30 = vadd.f32 %v13588_v22, %v18891_v19  ;;  %v13590_v58 = vadd.f32 %v13293_v2, %v21091_v18  ;;  %v8742_v24 = vpop.f32.mrb[91].mxu0 }
 0x564   : > { %v9121_v25 = vadd.f32 %v13589_v54, %v18891_v19  ;;  %v13591_v3 = vadd.f32 %v8742_v24, %v21092_v23  ;;  %13443 = vmatprep.subr.bf16.mxu1 %v13442_v34 }
 0x565   : > { %v9124_v33 = vadd.f32 %v13590_v58, %v18891_v19  ;;  %13445 = vmatpush3.bf16.msra.mxu1 %v19190_v44  ;;  %v9251_v56 = vmax.f32 %v9123_v30, 0.0 }
 0x566   : > { %v9122_v14 = vadd.f32 %v13591_v3, %v18891_v19  ;;  %13447 = vmatprep.subr.bf16.mxu1 %v13446_v21  ;;  %v9249_v57 = vmax.f32 %v9121_v25, 0.0  ;;  %v19248_v19 = vld [vmem:[%s19702_s3] ss:$0 sm:$0xff] }
 0x567   : > { %v9252_v27 = vmax.f32 %v9124_v33, 0.0 }
 0x568   : > { %v9250_v60 = vmax.f32 %v9122_v14, 0.0  ;;  %v13296_v41 = vpop.f32.mrb[92].mxu0 }
 0x569   : > { %v13592_v35 = vadd.f32 %v13296_v41, %v19007_v4  ;;  %v8755_v46 = vpop.f32.mrb[93].mxu0  ;;  %13449 = vmatpush3.bf16.msra.mxu1 %v19187_v62  ;;  %v13454_v28 = vpack.c.bf16 %v9252_v27, %v9251_v56 }
 0x56a   : > { %v13593_v22 = vadd.f32 %v8755_v46, %v19011_v61  ;;  %v13297_v42 = vpop.f32.mrb[94].mxu0  ;;  %v13450_v13 = vpack.c.bf16 %v9250_v60, %v9249_v57 }
 0x56b   : > { %v9127_v44 = vadd.f32 %v19248_v19, %v13592_v35  ;;  %v13594_v21 = vadd.f32 %v13297_v42, %v19014_v10  ;;  %v8758_v54 = vpop.f32.mrb[95].mxu0 }
 0x56c   : > { %v9125_v4 = vadd.f32 %v19248_v19, %v13593_v22  ;;  %v13595_v2 = vadd.f32 %v8758_v54, %v19016_v32  ;;  %13451 = vmatprep.subr.bf16.mxu1 %v13450_v13 }
 0x56d   : > { %v9128_v62 = vadd.f32 %v19248_v19, %v13594_v21  ;;  %13453 = vmatpush3.bf16.msra.mxu1 %v19202_v1  ;;  %v9255_v34 = vmax.f32 %v9127_v44, 0.0  ;;  %v9297_v44 = vld [vmem:[%s15032_s14 + $0x38] sm:$0xff] }
 0x56e   : > { %v9126_v61 = vadd.f32 %v19248_v19, %v13595_v2  ;;  %13455 = vmatprep.subr.bf16.mxu1 %v13454_v28  ;;  %v9253_v18 = vmax.f32 %v9125_v4, 0.0 }
 0x56f   : > { %v9256_v30 = vmax.f32 %v9128_v62, 0.0 }
 0x570   : > { %v9254_v58 = vmax.f32 %v9126_v61, 0.0  ;;  %v13300_v24 = vpop.f32.mrb[96].mxu0 }
 0x571   : > { %v13596_v10 = vadd.f32 %v13300_v24, %v19031_v45  ;;  %v8771_v25 = vpop.f32.mrb[97].mxu0  ;;  %13457 = vmatpush3.bf16.msra.mxu1 %v19199_v20  ;;  %v13462_v23 = vpack.c.bf16 %v9256_v30, %v9255_v34 }
 0x572   : > { %v13597_v32 = vadd.f32 %v8771_v25, %v19034_v37  ;;  %v13301_v3 = vpop.f32.mrb[98].mxu0  ;;  %v13458_v33 = vpack.c.bf16 %v9254_v58, %v9253_v18 }
 0x573   : > { %v9131_v1 = vadd.f32 %v19248_v19, %v13596_v10  ;;  %v13598_v14 = vadd.f32 %v13301_v3, %v19037_v43  ;;  %v8774_v56 = vpop.f32.mrb[99].mxu0 }
 0x574   : > { %v9129_v27 = vadd.f32 %v19248_v19, %v13597_v32  ;;  %v13599_v57 = vadd.f32 %v8774_v56, %v19039_v48  ;;  %13459 = vmatprep.subr.bf16.mxu1 %v13458_v33  ;;  %v9294_v48 = vld [vmem:[%s15032_s14 + $0x20] sm:$0xff] }
 0x575   : > { %v9132_v45 = vadd.f32 %v19248_v19, %v13598_v14  ;;  %13461 = vmatpush3.bf16.msra.mxu1 %v19214_v0  ;;  %v9259_v20 = vmax.f32 %v9131_v1, 0.0 }
 0x576   : > { %v9130_v37 = vadd.f32 %v19248_v19, %v13599_v57  ;;  %13463 = vmatprep.subr.bf16.mxu1 %v13462_v23  ;;  %v9257_v41 = vmax.f32 %v9129_v27, 0.0 }
 0x577   : > { %v9260_v60 = vmax.f32 %v9132_v45, 0.0 }
 0x578   : > { %v9258_v35 = vmax.f32 %v9130_v37, 0.0  ;;  %v13304_v43 = vpop.f32.mrb[100].mxu0 }
 0x579   : > { %v19267_v46 = vpack.c.bf16 %v9260_v60, %v9259_v20  ;;  %v13600_v28 = vadd.f32 %v13304_v43, %v19051_v51  ;;  %v8787_v22 = vpop.f32.mrb[101].mxu0  ;;  %13465 = vmatpush3.bf16.msra.mxu1 %v19211_v26 }
 0x57a   : > { %v19272_v42 = vpack.c.bf16 %v9258_v35, %v9257_v41  ;;  %v13601_v0 = vadd.f32 %v8787_v22, %v19054_v29  ;;  %v13305_v13 = vpop.f32.mrb[102].mxu0 }
 0x57b   : > { %v9135_v21 = vadd.f32 %v19248_v19, %v13600_v28  ;;  %v13602_v54 = vadd.f32 %v13305_v13, %v19057_v8  ;;  %v8790_v4 = vpop.f32.mrb[103].mxu0 }
 0x57c   : > { %v9133_v2 = vadd.f32 %v19248_v19, %v13601_v0  ;;  %v13603_v62 = vadd.f32 %v8790_v4, %v19059_v40  ;;  %9503 = vmatmul.mubr.f32.vlgmr.msra.gmra.mrb[132].mxu1 %v9294_v48 }
 0x57d   : > { %v9136_v51 = vadd.f32 %v19248_v19, %v13602_v54  ;;  %9572 = vmatprep.mubr.f32.mxu1 %v9297_v44  ;;  %v9263_v61 = vmax.f32 %v9135_v21, 0.0 }
 0x57e   : > { %v9134_v26 = vadd.f32 %v19248_v19, %v13603_v62  ;;  %v9261_v29 = vmax.f32 %v9133_v2, 0.0 }
 0x57f   : > { %v9264_v34 = vmax.f32 %v9136_v51, 0.0 }
 0x580   : > { %v9262_v30 = vmax.f32 %v9134_v26, 0.0  ;;  %v13308_v18 = vpop.f32.mrb[104].mxu0 }
 0x581   : > { %v19282_v58 = vpack.c.bf16 %v9264_v34, %v9263_v61  ;;  %v13604_v8 = vadd.f32 %v13308_v18, %v19071_v49  ;;  %v8803_v24 = vpop.f32.mrb[105].mxu0 }
 0x582   : > { %v19285_v10 = vpack.c.bf16 %v9262_v30, %v9261_v29  ;;  %v13605_v40 = vadd.f32 %v8803_v24, %v19074_v39  ;;  %v13309_v25 = vpop.f32.mrb[106].mxu0 }
 0x583   : > { %v9139_v23 = vadd.f32 %v19248_v19, %v13604_v8  ;;  %v13606_v32 = vadd.f32 %v13309_v25, %v19077_v5  ;;  %v8806_v3 = vpop.f32.mrb[107].mxu0 }
 0x584   : > { %v9137_v33 = vadd.f32 %v19248_v19, %v13605_v40  ;;  %v13607_v1 = vadd.f32 %v8806_v3, %v19079_v63 }
 0x585   : > { %v9140_v14 = vadd.f32 %v19248_v19, %v13606_v32  ;;  %v9267_v49 = vmax.f32 %v9139_v23, 0.0 }
 0x586   : > { %v9138_v56 = vadd.f32 %v19248_v19, %v13607_v1  ;;  %v9265_v57 = vmax.f32 %v9137_v33, 0.0 }
 0x587   : > { %v9268_v27 = vmax.f32 %v9140_v14, 0.0 }
 0x588   : > { %v9266_v45 = vmax.f32 %v9138_v56, 0.0  ;;  %v13312_v37 = vpop.f32.mrb[108].mxu0 }
 0x589   : > { %v19294_v39 = vpack.c.bf16 %v9268_v27, %v9267_v49  ;;  %v13608_v20 = vadd.f32 %v13312_v37, %v19091_v11  ;;  %v8819_v60 = vpop.f32.mrb[109].mxu0 }
 0x58a   : > { %v19297_v5 = vpack.c.bf16 %v9266_v45, %v9265_v57  ;;  %v13609_v41 = vadd.f32 %v8819_v60, %v19094_v7  ;;  %v13313_v35 = vpop.f32.mrb[110].mxu0 }
 0x58b   : > { %v9143_v63 = vadd.f32 %v19248_v19, %v13608_v20  ;;  %v13610_v43 = vadd.f32 %v13313_v35, %v19097_v31  ;;  %v8822_v28 = vpop.f32.mrb[111].mxu0 }
 0x58c   : > { %v9141_v22 = vadd.f32 %v19248_v19, %v13609_v41  ;;  %v13611_v48 = vadd.f32 %v8822_v28, %v19099_v55 }
 0x58d   : > { %v9144_v0 = vadd.f32 %v19248_v19, %v13610_v43  ;;  %v9271_v11 = vmax.f32 %v9143_v63, 0.0 }
 0x58e   : > { %v9142_v13 = vadd.f32 %v19248_v19, %v13611_v48  ;;  %v9269_v21 = vmax.f32 %v9141_v22, 0.0 }
 0x58f   : > { %v9272_v44 = vmax.f32 %v9144_v0, 0.0 }
 0x590   : > { %v9270_v54 = vmax.f32 %v9142_v13, 0.0  ;;  %v13316_v4 = vpop.f32.mrb[112].mxu0 }
 0x591   : > { %v19306_v7 = vpack.c.bf16 %v9272_v44, %v9271_v11  ;;  %v13612_v2 = vadd.f32 %v13316_v4, %v19107_v36  ;;  %v8835_v62 = vpop.f32.mrb[113].mxu0 }
 0x592   : > { %v19309_v31 = vpack.c.bf16 %v9270_v54, %v9269_v21  ;;  %v13613_v51 = vadd.f32 %v8835_v62, %v19111_v53  ;;  %v13317_v26 = vpop.f32.mrb[114].mxu0 }
 0x593   : > { %v9147_v55 = vadd.f32 %v19248_v19, %v13612_v2  ;;  %v13614_v61 = vadd.f32 %v13317_v26, %v19114_v12  ;;  %v8838_v34 = vpop.f32.mrb[115].mxu0  ;;  %v21094_v26 = vld [vmem:[#allocation42_spill] sm:$0xff] }
 0x594   : > { %v9145_v29 = vadd.f32 %v19248_v19, %v13613_v51  ;;  %v13615_v30 = vadd.f32 %v8838_v34, %v19116_v17 }
 0x595   : > { %v9148_v18 = vadd.f32 %v19248_v19, %v13614_v61  ;;  %v9275_v36 = vmax.f32 %v9147_v55, 0.0 }
 0x596   : > { %v9146_v8 = vadd.f32 %v19248_v19, %v13615_v30  ;;  %v9273_v40 = vmax.f32 %v9145_v29, 0.0  ;;  %v21095_v29 = vld [vmem:[#allocation58_spill] sm:$0xff] }
 0x597   : > { %v9276_v24 = vmax.f32 %v9148_v18, 0.0 }
 0x598   : > { %v9274_v25 = vmax.f32 %v9146_v8, 0.0  ;;  %v13320_v23 = vpop.f32.mrb[116].mxu0 }
 0x599   : > { %v13616_v53 = vadd.f32 %v13320_v23, %v19125_v47  ;;  %v8851_v32 = vpop.f32.mrb[117].mxu0  ;;  %v13470_v3 = vpack.c.bf16 %v9276_v24, %v9275_v36  ;;  %v9296_v23 = vld [vmem:[%s15032_s14 + $0x30] sm:$0xff] }
 0x59a   : > { %v13617_v12 = vadd.f32 %v8851_v32, %v19129_v50  ;;  %v13321_v33 = vpop.f32.mrb[118].mxu0  ;;  %v13466_v1 = vpack.c.bf16 %v9274_v25, %v9273_v40 }
 0x59b   : > { %v9151_v14 = vadd.f32 %v19248_v19, %v13616_v53  ;;  %v13618_v17 = vadd.f32 %v13321_v33, %v19132_v6  ;;  %v8854_v56 = vpop.f32.mrb[119].mxu0 }
 0x59c   : > { %v9149_v49 = vadd.f32 %v19248_v19, %v13617_v12  ;;  %v13619_v27 = vadd.f32 %v8854_v56, %v19134_v9  ;;  %13467 = vmatprep.subr.bf16.mxu1 %v13466_v1 }
 0x59d   : > { %v9152_v57 = vadd.f32 %v19248_v19, %v13618_v17  ;;  %13469 = vmatpush3.bf16.msra.mxu1 %v19272_v42  ;;  %v9279_v50 = vmax.f32 %v9151_v14, 0.0 }
 0x59e   : > { %v9150_v47 = vadd.f32 %v19248_v19, %v13619_v27  ;;  %13471 = vmatprep.subr.bf16.mxu1 %v13470_v3  ;;  %v9277_v37 = vmax.f32 %v9149_v49, 0.0 }
 0x59f   : > { %v9280_v45 = vmax.f32 %v9152_v57, 0.0 }
 0x5a0   : > { %v9278_v20 = vmax.f32 %v9150_v47, 0.0  ;;  %v13324_v60 = vpop.f32.mrb[120].mxu0 }
 0x5a1   : > { %v13620_v6 = vadd.f32 %v13324_v60, %v19143_v52  ;;  %v8867_v41 = vpop.f32.mrb[121].mxu0  ;;  %13473 = vmatpush3.bf16.msra.mxu1 %v19267_v46  ;;  %v13478_v35 = vpack.c.bf16 %v9280_v45, %v9279_v50  ;;  %v14802_v50 = vld [vmem:[%s19703_s4] ss:$12 sps:$4 sm:$0xff] (!%p11294_p6)   ;;  %v14959_v45 = vmov (!%p11294_p6), 0.0   ;;  %v14805_v60 = vld [vmem:[%s19703_s4 + $0x18] ss:$12 sps:$4 sm:$0xff] (!%p11294_p6)  }
 0x5a2   : > { %v13621_v9 = vadd.f32 %v8867_v41, %v19147_v15  ;;  %v13325_v63 = vpop.f32.mrb[122].mxu0  ;;  %v13474_v43 = vpack.c.bf16 %v9278_v20, %v9277_v37  ;;  %v14960_v37 = vmov (!%p11294_p6), 0   ;;  %v14803_v20 = vld [vmem:[%s19703_s4 + $0x1c] ss:$12 sps:$4 sm:$0xff] (!%p11294_p6)  }
 0x5a3   : > { %v9155_v42 = vadd.f32 %v19248_v19, %v13620_v6  ;;  %v13622_v28 = vadd.f32 %v13325_v63, %v19150_v16  ;;  %v8870_v22 = vpop.f32.mrb[123].mxu0  ;;  %9795 = vmatprep.mubr.bf16.mxu0 (!%p11294_p6), %v14960_v37  ;;  %v14806_v6 = vld [vmem:[%s19703_s4 + $0x34] ss:$12 sps:$4 sm:$0xff] (!%p11294_p6)   ;;  %v14808_v41 = vld [vmem:[%s19703_s4 + $0x30] ss:$12 sps:$4 sm:$0xff] (!%p11294_p6)  }
 0x5a4   : > { %v9153_v48 = vadd.f32 %v19248_v19, %v13621_v9  ;;  %v13623_v0 = vadd.f32 %v8870_v22, %v19152_v59  ;;  %13475 = vmatprep.subr.bf16.mxu1 %v13474_v43  ;;  %v21093_v59 = vld [vmem:[#allocation163_spill] sm:$0xff]  ;;  %v14812_v43 = vld [vmem:[%s19703_s4 + $0x64] ss:$12 sps:$4 sm:$0xff] (!%p11294_p6)  }
 0x5a5   : > { %v9156_v52 = vadd.f32 %v19248_v19, %v13622_v28  ;;  %13477 = vmatpush3.bf16.msra.mxu1 %v19285_v10  ;;  %v9283_v15 = vmax.f32 %v9155_v42, 0.0  ;;  %v14811_v9 = vld [vmem:[%s19703_s4 + $0x48] ss:$12 sps:$4 sm:$0xff] (!%p11294_p6)   ;;  %v14825_v42 = vld [vmem:[%s19703_s4 + $0x20] ss:$12 sps:$4 sm:$0xff] (!%p11294_p6)  }
 0x5a6   : > { %v9154_v46 = vadd.f32 %v19248_v19, %v13623_v0  ;;  %13479 = vmatprep.subr.bf16.mxu1 %v13478_v35  ;;  %v9281_v11 = vmax.f32 %v9153_v48, 0.0  ;;  %v14809_v35 = vld [vmem:[%s19703_s4 + $0x4c] ss:$12 sps:$4 sm:$0xff] (!%p11294_p6)   ;;  %v14824_v63 = vld [vmem:[%s19703_s4 + $0x8] ss:$12 sps:$4 sm:$0xff] (!%p11294_p6)  }
 0x5a7   : > { %v9284_v13 = vmax.f32 %v9156_v52, 0.0  ;;  %v14814_v28 = vld [vmem:[%s19703_s4 + $0x60] ss:$12 sps:$4 sm:$0xff] (!%p11294_p6)   ;;  %v14815_v22 = vld [vmem:[%s19703_s4 + $0x7c] ss:$12 sps:$4 sm:$0xff] (!%p11294_p6)  }
 0x5a8   : > { %v9282_v44 = vmax.f32 %v9154_v46, 0.0  ;;  %v13328_v21 = vpop.f32.mrb[124].mxu0  ;;  %v14826_v48 = vld [vmem:[%s19703_s4 + $0x38] ss:$12 sps:$4 sm:$0xff] (!%p11294_p6)   ;;  %v14818_v52 = vld [vmem:[%s19703_s4 + $0x94] ss:$12 sps:$4 sm:$0xff] (!%p11294_p6)  }
 0x5a9   : > { %v13624_v16 = vadd.f32 %v13328_v21, %v19161_v38  ;;  %v8883_v54 = vpop.f32.mrb[125].mxu0  ;;  %13481 = vmatpush3.bf16.msra.mxu1 %v19282_v58  ;;  %v13486_v4 = vpack.c.bf16 %v9284_v13, %v9283_v15  ;;  %v14817_v0 = vld [vmem:[%s19703_s4 + $0x78] ss:$12 sps:$4 sm:$0xff] (!%p11294_p6)   ;;  %v14827_v46 = vld [vmem:[%s19703_s4 + $0x50] ss:$12 sps:$4 sm:$0xff] (!%p11294_p6)  }
 0x5aa   : > { %v13625_v2 = vadd.f32 %v8883_v54, %v21093_v59  ;;  %v13329_v62 = vpop.f32.mrb[126].mxu0  ;;  %v13482_v51 = vpack.c.bf16 %v9282_v44, %v9281_v11  ;;  %v14820_v15 = vld [vmem:[%s19703_s4 + $0x90] ss:$12 sps:$4 sm:$0xff] (!%p11294_p6)   ;;  %v14821_v13 = vld [vmem:[%s19703_s4 + $0xac] ss:$12 sps:$4 sm:$0xff] (!%p11294_p6)  }
 0x5ab   : > { %v9159_v10 = vadd.f32 %v19248_v19, %v13624_v16  ;;  %v13626_v55 = vadd.f32 %v13329_v62, %v21094_v26  ;;  %v8886_v61 = vpop.f32.mrb[127].mxu0  ;;  %v14828_v11 = vld [vmem:[%s19703_s4 + $0x68] ss:$12 sps:$4 sm:$0xff] (!%p11294_p6)   ;;  %v14834_v16 = vld [vmem:[%s19705_s6 + $0x4] ss:$12 sps:$4 sm:$0xff] (!%p11294_p6)  }
 0x5ac   : > { %v9157_v34 = vadd.f32 %v19248_v19, %v13625_v2  ;;  %v13627_v30 = vadd.f32 %v8886_v61, %v21095_v29  ;;  %13483 = vmatprep.subr.bf16.mxu1 %v13482_v51  ;;  %v14823_v44 = vld [vmem:[%s19703_s4 + $0xa8] ss:$12 sps:$4 sm:$0xff] (!%p11294_p6)   ;;  %v14829_v54 = vld [vmem:[%s19703_s4 + $0x80] ss:$12 sps:$4 sm:$0xff] (!%p11294_p6)   ;;  %v14830_v62 = vld [vmem:[%s19703_s4 + $0x98] ss:$12 sps:$4 sm:$0xff] (!%p11294_p6)  }
 0x5ad   : > { %v9160_v38 = vadd.f32 %v19248_v19, %v13626_v55  ;;  %13485 = vmatpush3.bf16.msra.mxu1 %v19297_v5  ;;  %v9287_v18 = vmax.f32 %v9159_v10, 0.0  ;;  %v14832_v59 = vld [vmem:[%s19705_s6] ss:$12 sps:$4 sm:$0xff] (!%p11294_p6)   ;;  %v14837_v2 = vld [vmem:[%s19705_s6 + $0x1c] ss:$12 sps:$4 sm:$0xff] (!%p11294_p6)  }
 0x5ae   : > { %v9158_v58 = vadd.f32 %v19248_v19, %v13627_v30  ;;  %13487 = vmatprep.subr.bf16.mxu1 %v13486_v4  ;;  %v9285_v36 = vmax.f32 %v9157_v34, 0.0  ;;  %v14835_v51 = vld [vmem:[%s19705_s6 + $0x18] ss:$12 sps:$4 sm:$0xff] (!%p11294_p6)   ;;  %v14840_v10 = vld [vmem:[%s19705_s6 + $0x34] ss:$12 sps:$4 sm:$0xff] (!%p11294_p6)  }
 0x5af   : > { %v9288_v8 = vmax.f32 %v9160_v38, 0.0  ;;  %v14831_v26 = vld [vmem:[%s19703_s4 + $0xb0] ss:$12 sps:$4 sm:$0xff] (!%p11294_p6)   ;;  %v14859_v55 = vld [vmem:[%s19705_s6 + $0xc8] ss:$12 sps:$4 sm:$0xff] (!%p11294_p6)  }
 0x5b0   : > { %v9286_v24 = vmax.f32 %v9158_v58, 0.0  ;;  %v14838_v61 = vld [vmem:[%s19705_s6 + $0x30] ss:$12 sps:$4 sm:$0xff] (!%p11294_p6)   ;;  %v14843_v34 = vld [vmem:[%s19705_s6 + $0x4c] ss:$12 sps:$4 sm:$0xff] (!%p11294_p6)  }
 0x5b1   : > { %13489 = vmatpush3.bf16.msra.mxu1 %v19294_v39  ;;  %v13494_v40 = vpack.c.bf16 %v9288_v8, %v9287_v18  ;;  %v14860_v29 = vld [vmem:[%s19705_s6 + $0x8] ss:$12 sps:$4 sm:$0xff] (!%p11294_p6)   ;;  %v14864_v30 = vld [vmem:[%s19705_s6 + $0xe0] ss:$12 sps:$4 sm:$0xff] (!%p11294_p6)   ;;  %v14846_v58 = vld [vmem:[%s19705_s6 + $0x64] ss:$12 sps:$4 sm:$0xff] (!%p11294_p6)  }
 0x5b2   : > { %v13490_v25 = vpack.c.bf16 %v9286_v24, %v9285_v36  ;;  %v14841_v38 = vld [vmem:[%s19705_s6 + $0x48] ss:$12 sps:$4 sm:$0xff] (!%p11294_p6)   ;;  %v14865_v18 = vld [vmem:[%s19705_s6 + $0x20] ss:$12 sps:$4 sm:$0xff] (!%p11294_p6)   ;;  %v14869_v8 = vld [vmem:[%s19705_s6 + $0xf8] ss:$12 sps:$4 sm:$0xff] (!%p11294_p6)  }
 0x5b3   : > { %v14844_v36 = vld [vmem:[%s19705_s6 + $0x60] ss:$12 sps:$4 sm:$0xff] (!%p11294_p6)   ;;  %v14849_v24 = vld [vmem:[%s19705_s6 + $0x7c] ss:$12 sps:$4 sm:$0xff] (!%p11294_p6)  }
 0x5b4   : > { %13491 = vmatprep.subr.bf16.mxu1 %v13490_v25  ;;  %v14870_v25 = vld [vmem:[%s19705_s6 + $0x38] ss:$12 sps:$4 sm:$0xff] (!%p11294_p6)  }
 0x5b5   : > { %13493 = vmatpush3.bf16.msra.mxu1 %v19309_v31  ;;  %v9289_v31 = vld [vmem:[#allocation2] sm:$0xff] }
 0x5b6   : > { %13495 = vmatprep.subr.bf16.mxu1 %v13494_v40  ;;  %v14847_v40 = vld [vmem:[%s19705_s6 + $0x78] ss:$12 sps:$4 sm:$0xff] (!%p11294_p6)  }
 0x5b9   : > { %13497 = vmatpush3.bf16.msra.mxu1 %v19306_v7  ;;  %v14800_v7 = vld [vmem:[%s19703_s4 + $0x4] ss:$12 sps:$4 sm:$0xff] (!%p11294_p6)  }
 0x5ba   : > { %13330 = vmatprep.subr.bf16.mxu1 (!%p11294_p6), %v14959_v45  ;;  %9763 = vmatprep.subr.bf16.mxu0 (!%p11294_p6), %v14800_v7  ;;  %v14878_v7 = vld [vmem:[%s19705_s6 + $0x124] ss:$12 sps:$4 sm:$0xff] (!%p11294_p6)  }
 0x5bb   : > { %9764 = vmatpush1.bf16.msra.mxu0 (!%p11294_p6), %v14802_v50  ;;  %v14876_v50 = vld [vmem:[%s19705_s6 + $0x120] ss:$12 sps:$4 sm:$0xff] (!%p11294_p6)  }
 0x5bc   : > { %9573 = vmatmul.mubr.f32.vlgmr.msra.gmra.mrb[134].mxu1 %v9296_v23  ;;  %9765 = vmatprep.subr.bf16.mxu0 (!%p11294_p6), %v14803_v20  ;;  %v14874_v23 = vld [vmem:[%s19705_s6 + $0x110] ss:$12 sps:$4 sm:$0xff] (!%p11294_p6)  }
 0x5bd   : > { %13346 = vmatprep.mubr.msk.bf16.mxu1 (!%p11294_p6), %vm14961_vm4, %v14959_v45  ;;  %13331 = vmatpush3.bf16.msra.mxu1 (!%p11294_p6), %v14824_v63  ;;  %v14883_v20 = vld [vmem:[%s19705_s6 + $0x13c] ss:$12 sps:$4 sm:$0xff] (!%p11294_p6)   ;;  %v14893_v63 = vld [vmem:[%s19705_s6 + $0x16c] ss:$12 sps:$4 sm:$0xff] (!%p11294_p6)  }
 0x5be   : > { %13332 = vmatprep.subr.bf16.mxu1 (!%p11294_p6), %v14959_v45 }
 0x5bf   : > { %9766 = vmatpush1.bf16.msra.mxu0 (!%p11294_p6), %v14805_v60  ;;  %v14881_v60 = vld [vmem:[%s19705_s6 + $0x138] ss:$12 sps:$4 sm:$0xff] (!%p11294_p6)  }
 0x5c0   : > { %9767 = vmatprep.subr.bf16.mxu0 (!%p11294_p6), %v14806_v6  ;;  %v14888_v6 = vld [vmem:[%s19705_s6 + $0x154] ss:$12 sps:$4 sm:$0xff] (!%p11294_p6)  }
 0x5c1   : > { %13333 = vmatpush3.bf16.msra.mxu1 (!%p11294_p6), %v14825_v42  ;;  %v14891_v42 = vld [vmem:[%s19705_s6 + $0x168] ss:$12 sps:$4 sm:$0xff] (!%p11294_p6)  }
 0x5c2   : > { %13334 = vmatprep.subr.bf16.mxu1 (!%p11294_p6), %v14959_v45 }
 0x5c3   : > { %9768 = vmatpush1.bf16.msra.mxu0 (!%p11294_p6), %v14808_v41  ;;  %v14889_v41 = vld [vmem:[%s19705_s6 + $0x158] ss:$12 sps:$4 sm:$0xff] (!%p11294_p6)  }
 0x5c4   : > { %9769 = vmatprep.subr.bf16.mxu0 (!%p11294_p6), %v14809_v35  ;;  %v14886_v35 = vld [vmem:[%s19705_s6 + $0x150] ss:$12 sps:$4 sm:$0xff] (!%p11294_p6)  }
 0x5c5   : > { %13335 = vmatpush3.bf16.msra.mxu1 (!%p11294_p6), %v14826_v48  ;;  %v9620_v48 = vlaneseq (!%p11294_p6) }
 0x5c6   : > { %13336 = vmatprep.subr.bf16.mxu1 (!%p11294_p6), %v14959_v45 }
 0x5c7   : > { %9770 = vmatpush1.bf16.msra.mxu0 (!%p11294_p6), %v14811_v9  ;;  %v14890_v9 = vld [vmem:[%s19705_s6 + $0x98] ss:$12 sps:$4 sm:$0xff] (!%p11294_p6)  }
 0x5c8   : > { %9771 = vmatprep.subr.bf16.mxu0 (!%p11294_p6), %v14812_v43  ;;  %v14894_v43 = vld [vmem:[%s19705_s6 + $0x170] ss:$12 sps:$4 sm:$0xff] (!%p11294_p6)  }
 0x5c9   : > { %13337 = vmatpush3.bf16.msra.mxu1 (!%p11294_p6), %v14827_v46  ;;  %v9618_v46 = vld [vmem:[%s19704_s5] sm:$0x7] (!%p11294_p6) }
 0x5ca   : > { %13338 = vmatprep.subr.bf16.mxu1 (!%p11294_p6), %v14959_v45 }
 0x5cb   : > { %9772 = vmatpush1.bf16.msra.mxu0 (!%p11294_p6), %v14814_v28  ;;  %v14895_v28 = vld [vmem:[%s19705_s6 + $0xb0] ss:$12 sps:$4 sm:$0xff] (!%p11294_p6)  }
 0x5cc   : > { %9773 = vmatprep.subr.bf16.mxu0 (!%p11294_p6), %v14815_v22  ;;  %v14898_v22 = vld [vmem:[%s19705_s6 + $0x184] ss:$12 sps:$4 sm:$0xff] (!%p11294_p6)  }
 0x5cd   : > { %13339 = vmatpush3.bf16.msra.mxu1 (!%p11294_p6), %v14828_v11 }
 0x5ce   : > { %13340 = vmatprep.subr.bf16.mxu1 (!%p11294_p6), %v14959_v45 }
 0x5cf   : > { %v12012_v5 = vpop.f32.mrb[128].mxu1  ;;  %9774 = vmatpush1.bf16.msra.mxu0 (!%p11294_p6), %v14817_v0  ;;  %v19583_v0 = vshrl.u32 (!%p11294_p6), %v9620_v48, 7 }
 0x5d0   : > { %v12013_v53 = vpop.f32.mrb[129].mxu1  ;;  %9775 = vmatprep.subr.bf16.mxu0 (!%p11294_p6), %v14818_v52 }
 0x5d1   : > { %v12014_v19 = vadd.f32 %v12013_v53, %v12012_v5  ;;  %13341 = vmatpush3.bf16.msra.mxu1 (!%p11294_p6), %v14829_v54  ;;  %v14852_v5 = vld [vmem:[%s19705_s6 + $0x94] ss:$12 sps:$4 sm:$0xff] (!%p11294_p6)   ;;  %v14875_v53 = vld [vmem:[%s19705_s6 + $0x50] ss:$12 sps:$4 sm:$0xff] (!%p11294_p6)   ;;  %v9622_v52 = vsub.s32 (!%p11294_p6), 0, %v19583_v0 }
 0x5d2   : > { %13342 = vmatprep.subr.bf16.mxu1 (!%p11294_p6), %v14959_v45 }
 0x5d3   : > { %9776 = vmatpush1.bf16.msra.mxu0 (!%p11294_p6), %v14820_v15  ;;  %v9626_v15 = vsub.s32 (!%p11294_p6), 1, %v19583_v0 }
 0x5d4   : > { %9777 = vmatprep.subr.bf16.mxu0 (!%p11294_p6), %v14821_v13  ;;  %v9623_v13 = vrot.slane (!%p11294_p6), %v9618_v46, %v9622_v52 }
 0x5d5   : > { %13343 = vmatpush3.bf16.msra.mxu1 (!%p11294_p6), %v14830_v62  ;;  %v9627_v11 = vrot.slane (!%p11294_p6), %v9618_v46, %v9626_v15 }
 0x5d6   : > { %13344 = vmatprep.subr.bf16.mxu1 (!%p11294_p6), %v14959_v45 }
 0x5d7   : > { %9778 = vmatpush1.bf16.msra.mxu0 (!%p11294_p6), %v14823_v44 }
 0x5d8   : > { %10347 = vmatprep.subr.bf16.mxu0 (!%p11294_p6), %v14834_v16 }
 0x5d9   : > { %13345 = vmatpush3.bf16.msra.mxu1 (!%p11294_p6), %v14831_v26  ;;  %v14899_v26 = vld [vmem:[%s19705_s6 + $0x188] ss:$12 sps:$4 sm:$0xff] (!%p11294_p6)  }
 0x5da   : > { %12129 = vmatprep.subr.bf16.mxu1 (!%p11294_p6), %v14859_v55 }
 0x60f   : > { %v12047_v32 = vpop.f32.mrb[130].mxu1 }
 0x610   : > { %v12048_v3 = vpop.f32.mrb[131].mxu1 }
 0x611   : > { %v12049_v12 = vadd.f32 %v12048_v3, %v12047_v32  ;;  %v14850_v32 = vld [vmem:[%s19705_s6 + $0x90] ss:$12 sps:$4 sm:$0xff] (!%p11294_p6)   ;;  %v14855_v3 = vld [vmem:[%s19705_s6 + $0xac] ss:$12 sps:$4 sm:$0xff] (!%p11294_p6)  }
 0x613   : > { %v9435_v33 = vadd.f32 %v12049_v12, %v12014_v19  ;;  %v14879_v19 = vld [vmem:[%s19705_s6 + $0x128] ss:$12 sps:$4 sm:$0xff] (!%p11294_p6)  }
 0x614   : > { %v14880_v12 = vld [vmem:[%s19705_s6 + $0x68] ss:$12 sps:$4 sm:$0xff] (!%p11294_p6)  }
 0x64f   : > { %v12082_v1 = vpop.f32.mrb[132].mxu1 }
 0x650   : > { %v12083_v14 = vpop.f32.mrb[133].mxu1 }
 0x651   : > { %v12084_v39 = vadd.f32 %v12083_v14, %v12082_v1  ;;  %v14853_v1 = vld [vmem:[%s19705_s6 + $0xa8] ss:$12 sps:$4 sm:$0xff] (!%p11294_p6)   ;;  %v14858_v14 = vld [vmem:[%s19705_s6 + $0xc4] ss:$12 sps:$4 sm:$0xff] (!%p11294_p6)  }
 0x653   : > { %v9505_v17 = vadd.f32 %v12084_v39, %v9435_v33  ;;  %v14884_v33 = vld [vmem:[%s19705_s6 + $0x140] ss:$12 sps:$4 sm:$0xff] (!%p11294_p6)  }
 0x654   : > { %v14885_v39 = vld [vmem:[%s19705_s6 + $0x80] ss:$12 sps:$4 sm:$0xff] (!%p11294_p6)  }
 0x68f   : > { %v12117_v56 = vpop.f32.mrb[134].mxu1 }
 0x690   : > { %v12118_v49 = vpop.f32.mrb[135].mxu1 }
 0x691   : > { %v12119_v27 = vadd.f32 %v12118_v49, %v12117_v56  ;;  %9583 = sbr.rel (%p11294_p6) target bundleno = 2327 (0x917), region = 60  ;;  %v14863_v56 = vld [vmem:[%s19705_s6 + $0xdc] ss:$12 sps:$4 sm:$0xff] (!%p11294_p6)   ;;  %v14861_v49 = vld [vmem:[%s19705_s6 + $0xd8] ss:$12 sps:$4 sm:$0xff] (!%p11294_p6)  }
 0x693   : > { %v9575_v57 = vadd.f32 %v12119_v27, %v9505_v17  ;;  %v14856_v17 = vld [vmem:[%s19705_s6 + $0xc0] ss:$12 sps:$4 sm:$0xff] (!%p11294_p6)  }
 0x694   : > { %v14868_v27 = vld [vmem:[%s19705_s6 + $0xf4] ss:$12 sps:$4 sm:$0xff] (!%p11294_p6)  }
 0x695   : > { %v9578_v47 = vadd.f32 %v9575_v57, %v9289_v31  ;;  %v14866_v31 = vld [vmem:[%s19705_s6 + $0xf0] ss:$12 sps:$4 sm:$0xff] (!%p11294_p6)   ;;  %v14873_v57 = vld [vmem:[%s19705_s6 + $0x10c] ss:$12 sps:$4 sm:$0xff] (!%p11294_p6)  }
 0x697   : > { %9579 = vst [vmem:[#allocation2] sm:$0xff] %v9578_v47  ;;  %v14871_v47 = vld [vmem:[%s19705_s6 + $0x108] ss:$12 sps:$4 sm:$0xff] (!%p11294_p6)  }
 0x69e   : > { %v9584_v21 = vld [vmem:[#allocation2] sm:$0xff] }
 0x69f   : > { %v9585_v4 = vpack.c.bf16 %v9584_v21, %v9584_v21 }
 0x6a1   : > { %9796 = vmatmul.mubr.bf16.vlgmr.msra.gmra.mrb[0].mxu0 %v9585_v4  ;;  %13347 = vmatmul.mubr.bf16.vlgmr.msra.gmra.mrb[0].mxu1 %v9585_v4 }
 0x6a2   : > { %10348 = vmatpush1.bf16.msra.mxu0 %v14832_v59  ;;  %12130 = vmatpush3.bf16.msra.mxu1 %v14860_v29  ;;  %v14903_v29 = vld [vmem:[%s19705_s6 + $0x1a0] ss:$12 sps:$4 sm:$0xff]  }
 0x6a3   : > { %10349 = vmatprep.subr.bf16.mxu0 %v14837_v2  ;;  %12131 = vmatprep.subr.bf16.mxu1 %v14864_v30 }
 0x6a6   : > { %10350 = vmatpush1.bf16.msra.mxu0 %v14835_v51  ;;  %12132 = vmatpush3.bf16.msra.mxu1 %v14865_v18 }
 0x6a7   : > { %10351 = vmatprep.subr.bf16.mxu0 %v14840_v10  ;;  %12133 = vmatprep.subr.bf16.mxu1 %v14869_v8  ;;  %v14896_v10 = vld [vmem:[%s19705_s6 + $0x180] ss:$12 sps:$4 sm:$0xff]  }
 0x6aa   : > { %10352 = vmatpush1.bf16.msra.mxu0 %v14838_v61  ;;  %12134 = vmatpush3.bf16.msra.mxu1 %v14870_v25  ;;  %v14902_v61 = vld [vmem:[%s19705_s6 + $0x19c] ss:$12 sps:$4 sm:$0xff]  }
 0x6ab   : > { %10353 = vmatprep.subr.bf16.mxu0 %v14843_v34  ;;  %12135 = vmatprep.subr.bf16.mxu1 %v14874_v23  ;;  %v14900_v34 = vld [vmem:[%s19705_s6 + $0x198] ss:$12 sps:$4 sm:$0xff]   ;;  %v14911_v25 = vld [vmem:[%s19705_s6 + $0x1d0] ss:$12 sps:$4 sm:$0xff]  }
 0x6ac   : > { %v14914_v23 = vld [vmem:[%s19705_s6 + $0x1e4] ss:$12 sps:$4 sm:$0xff]  }
 0x6ae   : > { %10354 = vmatpush1.bf16.msra.mxu0 %v14841_v38  ;;  %12136 = vmatpush3.bf16.msra.mxu1 %v14875_v53  ;;  %v14906_v38 = vld [vmem:[%s19705_s6 + $0x1b4] ss:$12 sps:$4 sm:$0xff]  }
 0x6af   : > { %10355 = vmatprep.subr.bf16.mxu0 %v14846_v58  ;;  %12137 = vmatprep.subr.bf16.mxu1 %v14879_v19  ;;  %v14912_v53 = vld [vmem:[%s19705_s6 + $0x1e0] ss:$12 sps:$4 sm:$0xff]   ;;  %v14915_v19 = vld [vmem:[%s19705_s6 + $0x1e8] ss:$12 sps:$4 sm:$0xff]  }
 0x6b2   : > { %10356 = vmatpush1.bf16.msra.mxu0 %v14844_v36  ;;  %12138 = vmatpush3.bf16.msra.mxu1 %v14880_v12  ;;  %v14904_v36 = vld [vmem:[%s19705_s6 + $0x1b0] ss:$12 sps:$4 sm:$0xff]   ;;  %v14916_v12 = vld [vmem:[%s19705_s6 + $0x1f8] ss:$12 sps:$4 sm:$0xff]  }
 0x6b3   : > { %10357 = vmatprep.subr.bf16.mxu0 %v14849_v24  ;;  %12139 = vmatprep.subr.bf16.mxu1 %v14884_v33  ;;  %v14907_v24 = vld [vmem:[%s19705_s6 + $0x1b8] ss:$12 sps:$4 sm:$0xff]   ;;  %v14919_v33 = vld [vmem:[%s19705_s6 + $0x200] ss:$12 sps:$4 sm:$0xff]  }
 0x6b6   : > { %10358 = vmatpush1.bf16.msra.mxu0 %v14847_v40  ;;  %12140 = vmatpush3.bf16.msra.mxu1 %v14885_v39  ;;  %v14908_v40 = vld [vmem:[%s19705_s6 + $0x1c8] ss:$12 sps:$4 sm:$0xff]   ;;  %v14920_v39 = vld [vmem:[%s19705_s6 + $0x210] ss:$12 sps:$4 sm:$0xff]  }
 0x6b7   : > { %10359 = vmatprep.subr.bf16.mxu0 %v14852_v5  ;;  %12141 = vmatprep.subr.bf16.mxu1 %v14889_v41  ;;  %v9630_v5 = vsub.s32 2, %v19583_v0 }
 0x6ba   : > { %10360 = vmatpush1.bf16.msra.mxu0 %v14850_v32  ;;  %12142 = vmatpush3.bf16.msra.mxu1 %v14890_v9  ;;  %v14918_v32 = vld [vmem:[%s19705_s6 + $0x1fc] ss:$12 sps:$4 sm:$0xff]  }
 0x6bb   : > { %10361 = vmatprep.subr.bf16.mxu0 %v14855_v3  ;;  %12143 = vmatprep.subr.bf16.mxu1 %v14894_v43  ;;  %v9631_v3 = vrot.slane %v9618_v46, %v9630_v5 }
 0x6be   : > { %10362 = vmatpush1.bf16.msra.mxu0 %v14853_v1  ;;  %12144 = vmatpush3.bf16.msra.mxu1 %v14895_v28  ;;  %v14922_v1 = vld [vmem:[%s19705_s6 + $0x214] ss:$12 sps:$4 sm:$0xff]  }
 0x6bf   : > { %10363 = vmatprep.subr.bf16.mxu0 %v14858_v14  ;;  %13350 = vmatprep.subr.bf16.mxu1 %v14959_v45 }
 0x6c2   : > { %10364 = vmatpush1.bf16.msra.mxu0 %v14856_v17  ;;  %v14923_v17 = vld [vmem:[%s19705_s6 + $0x218] ss:$12 sps:$4 sm:$0xff]  }
 0x6c3   : > { %10365 = vmatprep.subr.bf16.mxu0 %v14863_v56  ;;  %v14926_v56 = vld [vmem:[%s19705_s6 + $0x22c] ss:$12 sps:$4 sm:$0xff]  }
 0x6c6   : > { %10366 = vmatpush1.bf16.msra.mxu0 %v14861_v49 }
 0x6c7   : > { %10367 = vmatprep.subr.bf16.mxu0 %v14868_v27  ;;  %v14924_v27 = vld [vmem:[%s19705_s6 + $0x228] ss:$12 sps:$4 sm:$0xff]  }
 0x6ca   : > { %10368 = vmatpush1.bf16.msra.mxu0 %v14866_v31  ;;  %v14927_v31 = vld [vmem:[%s19705_s6 + $0x230] ss:$12 sps:$4 sm:$0xff]  }
 0x6cb   : > { %10369 = vmatprep.subr.bf16.mxu0 %v14873_v57 }
 0x6ce   : > { %10370 = vmatpush1.bf16.msra.mxu0 %v14871_v47 }
 0x6cf   : > { %10371 = vmatprep.subr.bf16.mxu0 %v14878_v7 }
 0x6d2   : > { %10372 = vmatpush1.bf16.msra.mxu0 %v14876_v50 }
 0x6d3   : > { %10373 = vmatprep.subr.bf16.mxu0 %v14883_v20 }
 0x6d6   : > { %10374 = vmatpush1.bf16.msra.mxu0 %v14881_v60 }
 0x6d7   : > { %10375 = vmatprep.subr.bf16.mxu0 %v14888_v6  ;;  %v9946_v6 = vld [vmem:[%s19706_s7] sm:$0x7] }
 0x6d8   : > { %v9959_v41 = vrot.slane %v9946_v6, %v9630_v5 }
 0x6da   : > { %10376 = vmatpush1.bf16.msra.mxu0 %v14886_v35  ;;  %v9951_v35 = vrot.slane %v9946_v6, %v9622_v52 }
 0x6db   : > { %10377 = vmatprep.subr.bf16.mxu0 %v14893_v63 }
 0x6de   : > { %10378 = vmatpush1.bf16.msra.mxu0 %v14891_v42 }
 0x6df   : > { %10388 = vmatprep.subr.bf16.mxu0 %v14898_v22 }
 0x774   : > { %v9797_v44 = vpop.f32.mrb[0].mxu0  ;;  %v9838_v30 = vpop.f32.mrb[0].mxu1 }
 0x775   : > { %v9798_v21 = vadd.f32 %v9797_v44, %v9623_v13  ;;  %v9799_v16 = vpop.f32.mrb[1].mxu0  ;;  %v13348_v58 = vpop.f32.mrb[1].mxu1  ;;  %v9839_v14 = vadd.f32 %v9838_v30, %v9631_v3 }
 0x776   : > { %v9800_v54 = vadd.f32 %v9799_v16, %v9627_v11  ;;  %v9801_v4 = vpop.f32.mrb[2].mxu0  ;;  %v9841_v18 = vpop.f32.mrb[2].mxu1 }
 0x777   : > { %v9844_v59 = vmax.f32 %v9798_v21, 0.0  ;;  %v9802_v2 = vpop.f32.mrb[3].mxu0  ;;  %v13349_v8 = vpop.f32.mrb[3].mxu1  ;;  %v9846_v49 = vmax.f32 %v9839_v14, 0.0 }
 0x778   : > { %v9845_v62 = vmax.f32 %v9800_v54, 0.0 }
 0x779   : > { %v9847_v55 = vpack.c.bf16 %v9844_v59, %v9844_v59  ;;  %v9849_v57 = vpack.c.bf16 %v9846_v49, %v9846_v49 }
 0x77a   : > { %v9848_v51 = vpack.c.bf16 %v9845_v62, %v9845_v62 }
 0x77c   : > { %10379 = vmatprep.mubr.bf16.mxu0 %v9848_v51  ;;  %10461 = vmatprep.mubr.bf16.mxu1 %v9848_v51 }
 0x77d   : > { %10380 = vmatmul.mubr.bf16.vlgmr.msra.gmra.mrb[4].mxu0 %v9847_v55  ;;  %10462 = vmatmul.mubr.bf16.vlgmr.msra.gmra.mrb[4].mxu1 %v9847_v55 }
 0x77e   : > { %10389 = vmatpush1.bf16.msra.mxu0 %v14896_v10  ;;  %13351 = vmatpush3.bf16.msra.mxu1 %v14899_v26 }
 0x77f   : > { %10390 = vmatprep.subr.bf16.mxu0 %v14902_v61  ;;  %13352 = vmatprep.subr.bf16.mxu1 %v14959_v45 }
 0x780   : > { %10420 = vmatprep.mubr.bf16.mxu0 %v14960_v37  ;;  %13366 = vmatprep.mubr.msk.bf16.mxu1 %vm14961_vm4, %v14959_v45  ;;  %v14910_v37 = vld [vmem:[%s19705_s6 + $0x1cc] ss:$12 sps:$4 sm:$0xff]  }
 0x782   : > { %10391 = vmatpush1.bf16.msra.mxu0 %v14900_v34  ;;  %13353 = vmatpush3.bf16.msra.mxu1 %v14903_v29 }
 0x783   : > { %10392 = vmatprep.subr.bf16.mxu0 %v14906_v38  ;;  %13354 = vmatprep.subr.bf16.mxu1 %v14959_v45 }
 0x786   : > { %10393 = vmatpush1.bf16.msra.mxu0 %v14904_v36  ;;  %13355 = vmatpush3.bf16.msra.mxu1 %v14907_v24 }
 0x787   : > { %10394 = vmatprep.subr.bf16.mxu0 %v14910_v37  ;;  %13356 = vmatprep.subr.bf16.mxu1 %v14959_v45 }
 0x78a   : > { %10395 = vmatpush1.bf16.msra.mxu0 %v14908_v40  ;;  %13357 = vmatpush3.bf16.msra.mxu1 %v14911_v25 }
 0x78b   : > { %10396 = vmatprep.subr.bf16.mxu0 %v14914_v23  ;;  %13358 = vmatprep.subr.bf16.mxu1 %v14959_v45 }
 0x78e   : > { %10397 = vmatpush1.bf16.msra.mxu0 %v14912_v53  ;;  %13359 = vmatpush3.bf16.msra.mxu1 %v14915_v19 }
 0x78f   : > { %10398 = vmatprep.subr.bf16.mxu0 %v14918_v32  ;;  %13360 = vmatprep.subr.bf16.mxu1 %v14959_v45 }
 0x792   : > { %10399 = vmatpush1.bf16.msra.mxu0 %v14916_v12  ;;  %13361 = vmatpush3.bf16.msra.mxu1 %v14919_v33 }
 0x793   : > { %10400 = vmatprep.subr.bf16.mxu0 %v14922_v1  ;;  %13362 = vmatprep.subr.bf16.mxu1 %v14959_v45 }
 0x796   : > { %10401 = vmatpush1.bf16.msra.mxu0 %v14920_v39  ;;  %13363 = vmatpush3.bf16.msra.mxu1 %v14923_v17 }
 0x797   : > { %10402 = vmatprep.subr.bf16.mxu0 %v14926_v56  ;;  %13364 = vmatprep.subr.bf16.mxu1 %v14959_v45  ;;  %v9955_v45 = vrot.slane %v9946_v6, %v9626_v15 }
 0x79a   : > { %10403 = vmatpush1.bf16.msra.mxu0 %v14924_v27  ;;  %13365 = vmatpush3.bf16.msra.mxu1 %v14927_v31 }
 0x79d   : > { %10421 = vmatmul.mubr.bf16.vlgmr.msra.gmra.mrb[4].mxu0 %v9849_v57  ;;  %13367 = vmatmul.mubr.bf16.vlgmr.msra.gmra.mrb[8].mxu1 %v9849_v57 }
 0x850   : > { %v12145_v47 = vpop.f32.mrb[4].mxu1 }
 0x851   : > { %v12146_v7 = vpop.f32.mrb[5].mxu1 }
 0x852   : > { %v12147_v50 = vadd.f32 %v12146_v7, %v12145_v47  ;;  %v12148_v20 = vpop.f32.mrb[6].mxu1 }
 0x853   : > { %v12149_v60 = vpop.f32.mrb[7].mxu1 }
 0x854   : > { %v10464_v9 = vadd.f32 %v12147_v50, %v9959_v41 }
 0x870   : > { %v10422_v63 = vpop.f32.mrb[4].mxu0  ;;  %v10503_v43 = vpop.f32.mrb[8].mxu1 }
 0x871   : > { %v14524_v42 = vadd.f32 %v10422_v63, %v9951_v35  ;;  %v10504_v28 = vadd.f32 %v10503_v43, %v10464_v9  ;;  %v10424_v22 = vpop.f32.mrb[5].mxu0  ;;  %v13368_v48 = vpop.f32.mrb[9].mxu1 }
 0x872   : > { %v10426_v46 = vpop.f32.mrb[6].mxu0  ;;  %v10506_v13 = vpop.f32.mrb[10].mxu1  ;;  %v14525_v11 = vadd.f32 %v10424_v22, %v9955_v45 }
 0x873   : > { %v10427_v44 = vpop.f32.mrb[7].mxu0  ;;  %v13369_v21 = vpop.f32.mrb[11].mxu1  ;;  %v10523_v16 = vmul.f32 %v10504_v28, %v10504_v28  ;;  %v10509_v54 = vmul.f32 %v14524_v42, %v14524_v42 }
 0x874   : > { %v10516_v52 = vmul.f32 %v14525_v11, %v14525_v11 }
 0x875   : > { %10524 = vadd.xlane.f32.xlu1 %v10523_v16  ;;  %10510 = vadd.xlane.f32.xlu0 %v10509_v54 }
 0x879   : > { %10517 = vadd.xlane.f32.xlu0 %v10516_v52 }
 0x902   : > { %v10525_v4 = vpop.xlane.xlu1 %10524  ;;  %v10511_v0 = vpop.xlane.xlu0 %10510 }
 0x903   : > { %v10526_v15 = vmax.f32 %v10525_v4, 1e-24  ;;  %v10512_v59 = vmax.f32 %v10511_v0, 1e-24 }
 0x905   : > { %14928 = vrsqrt.f32 %v10526_v15 }
 0x906   : > { %14930 = vrsqrt.f32 %v10512_v59  ;;  %v10518_v2 = vpop.xlane.xlu0 %10517 }
 0x907   : > { %v10519_v62 = vmax.f32 %v10518_v2, 1e-24 }
 0x909   : > { %14932 = vrsqrt.f32 %v10519_v62 }
 0x90f   : > { %v14929_v51 = vpop.eup %14928 }
 0x910   : > { %v14931_v10 = vpop.eup %14930  ;;  %v10528_v26 = vmul.f32 %v14929_v51, %v10504_v28 }
 0x911   : > { %v10514_v55 = vmul.f32 %v14931_v10, %v14524_v42 }
 0x912   : > { %10529 = vst [vmem:[%s19707_s8 + $0x10] sm:$0xff] %v10528_v26 }
 0x913   : > { %v14933_v61 = vpop.eup %14932  ;;  %10515 = vst [vmem:[%s19707_s8] sm:$0xff] %v10514_v55 }
 0x914   : > { %v10521_v34 = vmul.f32 %v14933_v61, %v14525_v11 }
 0x916   : > { %10522 = vst [vmem:[%s19707_s8 + $0x8] sm:$0xff] %v10521_v34 }
 0x917 PF: > { %s18_s29 = sadd.s32 1, %s14956_s29   ;;  %s21096_s27 = smov %s14952_s28 }
 0x918   : > { %p15_p7 = scmp.ge.s32.totalorder %s18_s29, 4   ;;  %s21097_s28 = smov %s21099_s30 }
 0x91a   :  { %17 = sbr.rel (!%p15_p7) target bundleno = 2 (0x2), region = 101 }

</bundles_post_ra>
